<compile_context>
chip_gen: v6e
topology: v6e:2x2x1
jax: 0.10.0
libtpu: 0.0.40
codegen_flags: <defaults>
</compile_context>

<pallas_src>
import math

import jax
import jax.numpy as jnp
from jax import lax
from jax.experimental import pallas as pl
from jax.experimental.pallas import tpu as pltpu

_INV_SQRT2 = 1.0 / math.sqrt(2.0)
_LN_EPS = 1e-5


# ----------------------------- helpers -----------------------------

def _full_spec(shape):
    nd = len(shape)
    return pl.BlockSpec(shape, lambda i, _nd=nd: (0,) * _nd)


def _single_block_call(kernel, out_shape, *args):
    """One grid step, every operand is a full-array VMEM block (tiny demo tensors)."""
    return pl.pallas_call(
        kernel,
        out_shape=out_shape,
        grid=(1,),
        in_specs=[_full_spec(a.shape) for a in args],
        out_specs=_full_spec(out_shape.shape),
    )(*args)


def _row_block(m, cap=512):
    """Largest multiple-of-8 divisor of m that is <= cap (full block if m is small)."""
    if m <= cap:
        return m
    for b in range(cap, 7, -8):
        if m % b == 0:
            return b
    return m


def _layer_norm(z, g, b):
    mu = jnp.mean(z, axis=-1, keepdims=True)
    var = jnp.mean((z - mu) ** 2, axis=-1, keepdims=True)
    return (z - mu) * lax.rsqrt(var + _LN_EPS) * g + b


# ----------------------------- kernels -----------------------------

def mlp_ln_kernel(x_ref, w1_ref, b1_ref, w2_ref, b2_ref, g_ref, beta_ref, o_ref):
    """Linear -> exact GELU -> Linear -> LayerNorm on a (rows, D_in) tile."""
    x = x_ref[...]
    h = jnp.dot(x, w1_ref[...], preferred_element_type=jnp.float32) + b1_ref[...]
    h = 0.5 * h * (1.0 + lax.erf(h * _INV_SQRT2))          # PyTorch nn.GELU default (exact)
    y = jnp.dot(h, w2_ref[...], preferred_element_type=jnp.float32) + b2_ref[...]
    o_ref[...] = _layer_norm(y, g_ref[...], beta_ref[...])


def make_self_attn_block_kernel(num_heads, N, L, E):
    """Fused nn.MultiheadAttention self-attn block + residual + LayerNorm.

    Input is batch-first (N, L, E). QKV projection is one (E, 3E) matmul; the head
    loop is unrolled; the output projection is accumulated per head from row-slices
    of W_o (avoids a lane-domain concat)."""
    dh = E // num_heads
    scale = dh ** -0.5

    def kernel(x_ref, wqkv_ref, bqkv_ref, wo_ref, bo_ref, g_ref, beta_ref, o_ref):
        x2d = x_ref[...].reshape(N * L, E)
        qkv = jnp.dot(x2d, wqkv_ref[...], preferred_element_type=jnp.float32) + bqkv_ref[...]
        q = qkv[:, :E].reshape(N, L, E)
        k = qkv[:, E:2 * E].reshape(N, L, E)
        v = qkv[:, 2 * E:].reshape(N, L, E)
        wo = wo_ref[...]

        acc = jnp.zeros((N * L, E), jnp.float32)
        for hh in range(num_heads):                    # unrolled, all in VMEM/vregs
            sl = slice(hh * dh, (hh + 1) * dh)
            qh = q[:, :, sl] * scale
            s = jnp.einsum('nqd,nkd->nqk', qh, k[:, :, sl],
                           preferred_element_type=jnp.float32)
            s = s - jnp.max(s, axis=-1, keepdims=True)
            p = jnp.exp(s)
            p = p * pl.reciprocal(jnp.sum(p, axis=-1, keepdims=True), approx=True)
            oh = jnp.einsum('nqk,nkd->nqd', p, v[:, :, sl],
                            preferred_element_type=jnp.float32)
            acc = acc + jnp.dot(oh.reshape(N * L, dh), wo[sl, :],
                                preferred_element_type=jnp.float32)

        z = x2d + acc + bo_ref[...]                     # residual (dropout = identity)
        o_ref[...] = _layer_norm(z, g_ref[...], beta_ref[...]).reshape(N, L, E)

    return kernel


def make_fusion_kernel(num_heads, S, B, H):
    """MultiHeadFeatureFusion: Q from video, K/V from [video;audio] (weights split in-kernel,
    no HBM concat). Attention batches over (head, seq) and attends over the batch axis B,
    exactly as the reference computes."""
    dh = H // num_heads
    scale = dh ** -0.5

    def kernel(vf_ref, af_ref, wq_ref, bq_ref, wk_ref, bk_ref, wv_ref, bv_ref, o_ref):
        v2 = vf_ref[...].reshape(S * B, H)
        a2 = af_ref[...].reshape(S * B, H)
        wk = wk_ref[...]                                # (2H, H)
        wv = wv_ref[...]
        q = (jnp.dot(v2, wq_ref[...], preferred_element_type=jnp.float32)
             + bq_ref[...]).reshape(S, B, H)
        k = (jnp.dot(v2, wk[:H, :], preferred_element_type=jnp.float32)
             + jnp.dot(a2, wk[H:, :], preferred_element_type=jnp.float32)
             + bk_ref[...]).reshape(S, B, H)
        v = (jnp.dot(v2, wv[:H, :], preferred_element_type=jnp.float32)
             + jnp.dot(a2, wv[H:, :], preferred_element_type=jnp.float32)
             + bv_ref[...]).reshape(S, B, H)

        heads = []
        for hh in range(num_heads):
            sl = slice(hh * dh, (hh + 1) * dh)
            qh = q[:, :, sl] * scale
            s = jnp.einsum('nqd,nkd->nqk', qh, k[:, :, sl],
                           preferred_element_type=jnp.float32)
            s = s - jnp.max(s, axis=-1, keepdims=True)
            p = jnp.exp(s)
            p = p * pl.reciprocal(jnp.sum(p, axis=-1, keepdims=True), approx=True)
            heads.append(jnp.einsum('nqk,nkd->nqd', p, v[:, :, sl],
                                    preferred_element_type=jnp.float32))
        o_ref[...] = jnp.concatenate(heads, axis=-1)    # no out-proj in the reference

    return kernel


def make_cross_attn_block_kernel(num_heads, B, S, H):
    """Cross attention (query=fused, key=value=[vf;af] along seq) + residual + final LayerNorm.
    vf/af arrive as two refs; the softmax over the 2S keys uses a joint max / denominator,
    so the key concat is never materialized."""
    dh = H // num_heads
    scale = dh ** -0.5

    def kernel(fq_ref, kvv_ref, kva_ref, wq_ref, bq_ref, wkv_ref, bkv_ref,
               wo_ref, bo_ref, g_ref, beta_ref, o_ref):
        f2 = fq_ref[...].reshape(B * S, H)
        v2 = kvv_ref[...].reshape(B * S, H)
        a2 = kva_ref[...].reshape(B * S, H)
        wkv = wkv_ref[...]                              # (H, 2H) packed [Wk | Wv]
        bkv = bkv_ref[...]

        q = (jnp.dot(f2, wq_ref[...], preferred_element_type=jnp.float32)
             + bq_ref[...]).reshape(B, S, H)
        kv_v = jnp.dot(v2, wkv, preferred_element_type=jnp.float32) + bkv
        kv_a = jnp.dot(a2, wkv, preferred_element_type=jnp.float32) + bkv
        k_v = kv_v[:, :H].reshape(B, S, H)
        v_v = kv_v[:, H:].reshape(B, S, H)
        k_a = kv_a[:, :H].reshape(B, S, H)
        v_a = kv_a[:, H:].reshape(B, S, H)
        wo = wo_ref[...]

        acc = jnp.zeros((B * S, H), jnp.float32)
        for hh in range(num_heads):
            sl = slice(hh * dh, (hh + 1) * dh)
            qh = q[:, :, sl] * scale
            s1 = jnp.einsum('nqd,nkd->nqk', qh, k_v[:, :, sl],
                            preferred_element_type=jnp.float32)
            s2 = jnp.einsum('nqd,nkd->nqk', qh, k_a[:, :, sl],
                            preferred_element_type=jnp.float32)
            m = jnp.maximum(jnp.max(s1, axis=-1, keepdims=True),
                            jnp.max(s2, axis=-1, keepdims=True))
            p1 = jnp.exp(s1 - m)
            p2 = jnp.exp(s2 - m)
            denom = jnp.sum(p1, axis=-1, keepdims=True) + jnp.sum(p2, axis=-1, keepdims=True)
            oh = (jnp.einsum('nqk,nkd->nqd', p1, v_v[:, :, sl],
                             preferred_element_type=jnp.float32)
                  + jnp.einsum('nqk,nkd->nqd', p2, v_a[:, :, sl],
                               preferred_element_type=jnp.float32))
            oh = oh * pl.reciprocal(denom, approx=True)
            acc = acc + jnp.dot(oh.reshape(B * S, dh), wo[sl, :],
                                preferred_element_type=jnp.float32)

        z = f2 + acc + bo_ref[...]                      # residual (dropout = identity)
        o_ref[...] = _layer_norm(z, g_ref[...], beta_ref[...]).reshape(B, S, H)

    return kernel


# ----------------------------- kernel wrappers -----------------------------

def _mlp_ln(x2d, p):
    M, Din = x2d.shape
    Dh = p['w1'].shape[1]
    Dout = p['w2'].shape[1]
    bm = _row_block(M)
    return pl.pallas_call(
        mlp_ln_kernel,
        out_shape=jax.ShapeDtypeStruct((M, Dout), jnp.float32),
        grid=(M // bm,),
        in_specs=[
            pl.BlockSpec((bm, Din), lambda i: (i, 0)),
            pl.BlockSpec((Din, Dh), lambda i: (0, 0)),
            pl.BlockSpec((1, Dh), lambda i: (0, 0)),
            pl.BlockSpec((Dh, Dout), lambda i: (0, 0)),
            pl.BlockSpec((1, Dout), lambda i: (0, 0)),
            pl.BlockSpec((1, Dout), lambda i: (0, 0)),
            pl.BlockSpec((1, Dout), lambda i: (0, 0)),
        ],
        out_specs=pl.BlockSpec((bm, Dout), lambda i: (i, 0)),
        compiler_params=pltpu.CompilerParams(dimension_semantics=("parallel",)),
    )(x2d, p['w1'], p['b1'], p['w2'], p['b2'], p['g'], p['b'])


def _self_attn_block(xb, p, num_heads):
    # TODO(synk): at production sizes, tile the batch axis N on the grid and pad E to a
    # lane-dense multiple of 128; the demo tensors fit in a single VMEM block.
    N, L, E = xb.shape
    kernel = make_self_attn_block_kernel(num_heads, N, L, E)
    out_shape = jax.ShapeDtypeStruct((N, L, E), jnp.float32)
    return _single_block_call(kernel, out_shape,
                              xb, p['wqkv'], p['bqkv'], p['wo'], p['bo'], p['g'], p['b'])


def _fusion(vf, af, p, num_heads):
    S, B, H = vf.shape
    kernel = make_fusion_kernel(num_heads, S, B, H)
    out_shape = jax.ShapeDtypeStruct((S, B, H), jnp.float32)
    return _single_block_call(kernel, out_shape,
                              vf, af, p['wq'], p['bq'], p['wk'], p['bk'], p['wv'], p['bv'])


def _cross_attn_block(fq_bf, vf_bf, af_bf, cp, norm_p, num_heads):
    B, S, H = fq_bf.shape
    kernel = make_cross_attn_block_kernel(num_heads, B, S, H)
    out_shape = jax.ShapeDtypeStruct((B, S, H), jnp.float32)
    return _single_block_call(kernel, out_shape,
                              fq_bf, vf_bf, af_bf,
                              cp['wq'], cp['bq'], cp['wkv'], cp['bkv'],
                              cp['wo'], cp['bo'], norm_p['g'], norm_p['b'])


def _timesformer_layer(x_sbd, p, num_heads):
    """TimeSformerLayer with t=8 temporal chunking (matches the reference's unmasked pad)."""
    t = 8
    orig_s, b, d = x_sbd.shape
    S = orig_s
    if S % t != 0:
        pad = t - S % t
        x_sbd = jnp.concatenate([x_sbd, jnp.zeros((pad, b, d), x_sbd.dtype)], axis=0)
        S = S + pad
    s = S // t
    # '(t s) b d -> t (s b) d', then batch-first for the fused kernel: (s*b, t, d)
    xb = x_sbd.reshape(t, s, b, d).transpose(1, 2, 0, 3).reshape(s * b, t, d)
    yb = _self_attn_block(xb, p, num_heads)
    y = yb.reshape(s, b, t, d).transpose(2, 0, 1, 3).reshape(S, b, d)
    return y[:orig_s]


# ----------------------------- model -----------------------------

def init_params(seed, video_dim, audio_dim, hidden_dim):
    H = hidden_dim
    keys = iter(jax.random.split(jax.random.PRNGKey(seed), 64))

    def lin(din, dout):
        w = 0.02 * jax.random.normal(next(keys), (din, dout), jnp.float32)
        b = jnp.zeros((1, dout), jnp.float32)
        return w, b

    def ln(d):
        return jnp.ones((1, d), jnp.float32), jnp.zeros((1, d), jnp.float32)

    def proj_params(din):
        w1, b1 = lin(din, 2 * H)
        w2, b2 = lin(2 * H, H)
        g, b = ln(H)
        return dict(w1=w1, b1=b1, w2=w2, b2=b2, g=g, b=b)

    temporal = []
    for _ in range(2):
        wqkv, bqkv = lin(H, 3 * H)          # packed Q|K|V in_proj
        wo, bo = lin(H, H)
        g, b = ln(H)
        temporal.append(dict(wqkv=wqkv, bqkv=bqkv, wo=wo, bo=bo, g=g, b=b))

    f_wq, f_bq = lin(H, H)
    f_wk, f_bk = lin(2 * H, H)
    f_wv, f_bv = lin(2 * H, H)

    c_wq, c_bq = lin(H, H)
    c_wkv, c_bkv = lin(H, 2 * H)            # packed K|V in_proj for cross attention
    c_wo, c_bo = lin(H, H)

    ng, nb = ln(H)

    return dict(
        video_proj=proj_params(video_dim),
        audio_proj=proj_params(audio_dim),
        temporal=temporal,
        fusion=dict(wq=f_wq, bq=f_bq, wk=f_wk, bk=f_bk, wv=f_wv, bv=f_bv),
        cross=dict(wq=c_wq, bq=c_bq, wkv=c_wkv, bkv=c_bkv, wo=c_wo, bo=c_bo),
        norm=dict(g=ng, b=nb),
    )


def multimodal_encoder(params, video_feat, audio_feat, num_heads=4):
    """video_feat: (S, B, video_dim), audio_feat: (S, B, audio_dim) -> (S, B, hidden_dim)."""
    S, B, _ = video_feat.shape
    H = params['video_proj']['w2'].shape[1]

    # modality projections: Linear -> GELU -> Linear -> LayerNorm (one fused kernel each)
    vf = _mlp_ln(video_feat.reshape(S * B, -1), params['video_proj']).reshape(S, B, H)
    af = _mlp_ln(audio_feat.reshape(S * B, -1), params['audio_proj']).reshape(S, B, H)

    # shared temporal layers: batch both modalities through each layer in ONE fused call
    x = jnp.concatenate([vf, af], axis=1)               # (S, 2B, H)
    for layer_p in params['temporal']:
        x = _timesformer_layer(x, layer_p, num_heads)
    vf = x[:, :B]
    af = x[:, B:]

    # attention-weighted feature fusion (single fused kernel, no [vf;af] HBM concat)
    fused = _fusion(vf, af, params['fusion'], num_heads)  # (S, B, H)

    # cross attention (query=fused, key=value=[vf;af] along seq) + final residual LayerNorm,
    # fused into one kernel operating batch-first.
    out_bf = _cross_attn_block(
        jnp.transpose(fused, (1, 0, 2)),
        jnp.transpose(vf, (1, 0, 2)),
        jnp.transpose(af, (1, 0, 2)),
        params['cross'], params['norm'], num_heads)       # (B, S, H)

    # TODO(synk): dropout layers are identity (eval-mode / deterministic inference).
    return jnp.transpose(out_bf, (1, 0, 2))


# ----------------------------- demo -----------------------------

if __name__ == "__main__":
    S, B = 16, 2
    video_dim, audio_dim, hidden_dim = 24, 16, 32
    num_heads = 4

    key = jax.random.PRNGKey(0)
    kv_key, ka_key = jax.random.split(key)
    video_feat = jax.random.normal(kv_key, (S, B, video_dim), jnp.float32)
    audio_feat = jax.random.normal(ka_key, (S, B, audio_dim), jnp.float32)

    params = init_params(0, video_dim, audio_dim, hidden_dim)

    fwd = jax.jit(multimodal_encoder, static_argnames=("num_heads",))
    out = fwd(params, video_feat, audio_feat, num_heads=num_heads)
    out = jax.block_until_ready(out)

    assert out.shape == (S, B, hidden_dim), out.shape
    assert bool(jnp.all(jnp.isfinite(out)))
    print("KERNEL_OK")
</pallas_src>

<mosaic_0001>
module attributes {stable_mosaic.version = 11 : i64} {
  func.func @mlp_ln_kernel(%arg0: i32, %arg1: memref<32x24xf32, #tpu.memory_space<vmem>>, %arg2: memref<24x64xf32, #tpu.memory_space<vmem>>, %arg3: memref<1x64xf32, #tpu.memory_space<vmem>>, %arg4: memref<64x32xf32, #tpu.memory_space<vmem>>, %arg5: memref<1x32xf32, #tpu.memory_space<vmem>>, %arg6: memref<1x32xf32, #tpu.memory_space<vmem>>, %arg7: memref<1x32xf32, #tpu.memory_space<vmem>>, %arg8: memref<32x32xf32, #tpu.memory_space<vmem>>) attributes {dimension_semantics = [#tpu.dimension_semantics<parallel>], iteration_bounds = array<i64: 1>, scalar_prefetch = 0 : i64, scratch_operands = 0 : i64, tpu.core_type = #tpu.core_type<tc>, window_params = [{transform_indices = @transform_0, window_bounds = array<i64: 32, 24>}, {pipeline_mode = #tpu.pipeline_mode<synchronous>, transform_indices = @transform_1, window_bounds = array<i64: 24, 64>}, {pipeline_mode = #tpu.pipeline_mode<synchronous>, transform_indices = @transform_2, window_bounds = array<i64: 1, 64>}, {pipeline_mode = #tpu.pipeline_mode<synchronous>, transform_indices = @transform_3, window_bounds = array<i64: 64, 32>}, {pipeline_mode = #tpu.pipeline_mode<synchronous>, transform_indices = @transform_4, window_bounds = array<i64: 1, 32>}, {pipeline_mode = #tpu.pipeline_mode<synchronous>, transform_indices = @transform_5, window_bounds = array<i64: 1, 32>}, {pipeline_mode = #tpu.pipeline_mode<synchronous>, transform_indices = @transform_6, window_bounds = array<i64: 1, 32>}, {transform_indices = @transform_7, window_bounds = array<i64: 32, 32>}]} {
    %c0 = arith.constant 0 : index
    %c0_0 = arith.constant 0 : index
    %0 = vector.load %arg1[%c0, %c0_0] : memref<32x24xf32, #tpu.memory_space<vmem>>, vector<32x24xf32>
    %c0_1 = arith.constant 0 : index
    %c0_2 = arith.constant 0 : index
    %1 = vector.load %arg2[%c0_1, %c0_2] : memref<24x64xf32, #tpu.memory_space<vmem>>, vector<24x64xf32>
    %cst = arith.constant dense<0.000000e+00> : vector<32x64xf32>
    %2 = tpu.matmul %0, %1, %cst {dimension_numbers = #tpu.dot_dimension_numbers<[1], [0], [0], [1], [0, 0, 1, 1], [], []>} : vector<32x24xf32>, vector<24x64xf32>, vector<32x64xf32> -> vector<32x64xf32>
    %c0_3 = arith.constant 0 : index
    %c0_4 = arith.constant 0 : index
    %3 = vector.load %arg3[%c0_3, %c0_4] : memref<1x64xf32, #tpu.memory_space<vmem>>, vector<1x64xf32>
    %4 = vector.broadcast %3 : vector<1x64xf32> to vector<32x64xf32>
    %5 = arith.addf %2, %4 : vector<32x64xf32>
    %cst_5 = arith.constant 5.000000e-01 : f32
    %6 = vector.broadcast %cst_5 : f32 to vector<32x64xf32>
    %7 = arith.mulf %6, %5 : vector<32x64xf32>
    %cst_6 = arith.constant 0.707106769 : f32
    %8 = vector.broadcast %cst_6 : f32 to vector<32x64xf32>
    %9 = arith.mulf %5, %8 : vector<32x64xf32>
    %10 = math.erf %9 : vector<32x64xf32>
    %cst_7 = arith.constant 1.000000e+00 : f32
    %11 = vector.broadcast %cst_7 : f32 to vector<32x64xf32>
    %12 = arith.addf %11, %10 : vector<32x64xf32>
    %13 = arith.mulf %7, %12 : vector<32x64xf32>
    %c0_8 = arith.constant 0 : index
    %c0_9 = arith.constant 0 : index
    %14 = vector.load %arg4[%c0_8, %c0_9] : memref<64x32xf32, #tpu.memory_space<vmem>>, vector<64x32xf32>
    %cst_10 = arith.constant dense<0.000000e+00> : vector<32x32xf32>
    %15 = tpu.matmul %13, %14, %cst_10 {dimension_numbers = #tpu.dot_dimension_numbers<[1], [0], [0], [1], [0, 0, 1, 1], [], []>} : vector<32x64xf32>, vector<64x32xf32>, vector<32x32xf32> -> vector<32x32xf32>
    %c0_11 = arith.constant 0 : index
    %c0_12 = arith.constant 0 : index
    %16 = vector.load %arg5[%c0_11, %c0_12] : memref<1x32xf32, #tpu.memory_space<vmem>>, vector<1x32xf32>
    %17 = vector.broadcast %16 : vector<1x32xf32> to vector<32x32xf32>
    %18 = arith.addf %15, %17 : vector<32x32xf32>
    %c0_13 = arith.constant 0 : index
    %c0_14 = arith.constant 0 : index
    %19 = vector.load %arg6[%c0_13, %c0_14] : memref<1x32xf32, #tpu.memory_space<vmem>>, vector<1x32xf32>
    %c0_15 = arith.constant 0 : index
    %c0_16 = arith.constant 0 : index
    %20 = vector.load %arg7[%c0_15, %c0_16] : memref<1x32xf32, #tpu.memory_space<vmem>>, vector<1x32xf32>
    %cst_17 = arith.constant dense<0.000000e+00> : vector<32xf32>
    %21 = vector.multi_reduction <add>, %18, %cst_17 [1] : vector<32x32xf32> to vector<32xf32>
    %22 = vector.shape_cast %21 : vector<32xf32> to vector<32x1xf32>
    %cst_18 = arith.constant 3.200000e+01 : f32
    %23 = vector.broadcast %cst_18 : f32 to vector<32x1xf32>
    %24 = arith.divf %22, %23 : vector<32x1xf32>
    %25 = vector.broadcast %24 : vector<32x1xf32> to vector<32x32xf32>
    %26 = arith.subf %18, %25 : vector<32x32xf32>
    %27 = arith.mulf %26, %26 : vector<32x32xf32>
    %cst_19 = arith.constant dense<0.000000e+00> : vector<32xf32>
    %28 = vector.multi_reduction <add>, %27, %cst_19 [1] : vector<32x32xf32> to vector<32xf32>
    %29 = vector.shape_cast %28 : vector<32xf32> to vector<32x1xf32>
    %cst_20 = arith.constant 3.200000e+01 : f32
    %30 = vector.broadcast %cst_20 : f32 to vector<32x1xf32>
    %31 = arith.divf %29, %30 : vector<32x1xf32>
    %32 = vector.broadcast %24 : vector<32x1xf32> to vector<32x32xf32>
    %33 = arith.subf %18, %32 : vector<32x32xf32>
    %cst_21 = arith.constant 9.99999974E-6 : f32
    %34 = vector.broadcast %cst_21 : f32 to vector<32x1xf32>
    %35 = arith.addf %31, %34 : vector<32x1xf32>
    %36 = math.rsqrt %35 : vector<32x1xf32>
    %37 = vector.broadcast %36 : vector<32x1xf32> to vector<32x32xf32>
    %38 = arith.mulf %33, %37 : vector<32x32xf32>
    %39 = vector.broadcast %19 : vector<1x32xf32> to vector<32x32xf32>
    %40 = arith.mulf %38, %39 : vector<32x32xf32>
    %41 = vector.broadcast %20 : vector<1x32xf32> to vector<32x32xf32>
    %42 = arith.addf %40, %41 : vector<32x32xf32>
    %c0_22 = arith.constant 0 : index
    %c0_23 = arith.constant 0 : index
    %43 = vector.load %arg8[%c0_22, %c0_23] : memref<32x32xf32, #tpu.memory_space<vmem>>, vector<32x32xf32>
    tpu.vector_store %arg8[%c0_22, %c0_23], %42 {strides = array<i32>} : memref<32x32xf32, #tpu.memory_space<vmem>>, vector<32x32xf32>,
    return
  }
  func.func @transform_0(%arg0: i32) -> (i32, i32) {
    %c0_i32 = arith.constant 0 : i32
    %c0_i32_0 = arith.constant 0 : i32
    return %arg0, %c0_i32 : i32, i32
  }
  func.func @transform_1(%arg0: i32) -> (i32, i32) {
    %c0_i32 = arith.constant 0 : i32
    %c0_i32_0 = arith.constant 0 : i32
    %c0_i32_1 = arith.constant 0 : i32
    return %c0_i32, %c0_i32_0 : i32, i32
  }
  func.func @transform_2(%arg0: i32) -> (i32, i32) {
    %c0_i32 = arith.constant 0 : i32
    %c0_i32_0 = arith.constant 0 : i32
    %c0_i32_1 = arith.constant 0 : i32
    return %c0_i32, %c0_i32_0 : i32, i32
  }
  func.func @transform_3(%arg0: i32) -> (i32, i32) {
    %c0_i32 = arith.constant 0 : i32
    %c0_i32_0 = arith.constant 0 : i32
    %c0_i32_1 = arith.constant 0 : i32
    return %c0_i32, %c0_i32_0 : i32, i32
  }
  func.func @transform_4(%arg0: i32) -> (i32, i32) {
    %c0_i32 = arith.constant 0 : i32
    %c0_i32_0 = arith.constant 0 : i32
    %c0_i32_1 = arith.constant 0 : i32
    return %c0_i32, %c0_i32_0 : i32, i32
  }
  func.func @transform_5(%arg0: i32) -> (i32, i32) {
    %c0_i32 = arith.constant 0 : i32
    %c0_i32_0 = arith.constant 0 : i32
    %c0_i32_1 = arith.constant 0 : i32
    return %c0_i32, %c0_i32_0 : i32, i32
  }
  func.func @transform_6(%arg0: i32) -> (i32, i32) {
    %c0_i32 = arith.constant 0 : i32
    %c0_i32_0 = arith.constant 0 : i32
    %c0_i32_1 = arith.constant 0 : i32
    return %c0_i32, %c0_i32_0 : i32, i32
  }
  func.func @transform_7(%arg0: i32) -> (i32, i32) {
    %c0_i32 = arith.constant 0 : i32
    %c0_i32_0 = arith.constant 0 : i32
    return %arg0, %c0_i32 : i32, i32
  }
}

module attributes {stable_mosaic.version = 11 : i64} {
  func.func @mlp_ln_kernel(%arg0: i32, %arg1: memref<32x16xf32, #tpu.memory_space<vmem>>, %arg2: memref<16x64xf32, #tpu.memory_space<vmem>>, %arg3: memref<1x64xf32, #tpu.memory_space<vmem>>, %arg4: memref<64x32xf32, #tpu.memory_space<vmem>>, %arg5: memref<1x32xf32, #tpu.memory_space<vmem>>, %arg6: memref<1x32xf32, #tpu.memory_space<vmem>>, %arg7: memref<1x32xf32, #tpu.memory_space<vmem>>, %arg8: memref<32x32xf32, #tpu.memory_space<vmem>>) attributes {dimension_semantics = [#tpu.dimension_semantics<parallel>], iteration_bounds = array<i64: 1>, scalar_prefetch = 0 : i64, scratch_operands = 0 : i64, tpu.core_type = #tpu.core_type<tc>, window_params = [{transform_indices = @transform_0, window_bounds = array<i64: 32, 16>}, {pipeline_mode = #tpu.pipeline_mode<synchronous>, transform_indices = @transform_1, window_bounds = array<i64: 16, 64>}, {pipeline_mode = #tpu.pipeline_mode<synchronous>, transform_indices = @transform_2, window_bounds = array<i64: 1, 64>}, {pipeline_mode = #tpu.pipeline_mode<synchronous>, transform_indices = @transform_3, window_bounds = array<i64: 64, 32>}, {pipeline_mode = #tpu.pipeline_mode<synchronous>, transform_indices = @transform_4, window_bounds = array<i64: 1, 32>}, {pipeline_mode = #tpu.pipeline_mode<synchronous>, transform_indices = @transform_5, window_bounds = array<i64: 1, 32>}, {pipeline_mode = #tpu.pipeline_mode<synchronous>, transform_indices = @transform_6, window_bounds = array<i64: 1, 32>}, {transform_indices = @transform_7, window_bounds = array<i64: 32, 32>}]} {
    %c0 = arith.constant 0 : index
    %c0_0 = arith.constant 0 : index
    %0 = vector.load %arg1[%c0, %c0_0] : memref<32x16xf32, #tpu.memory_space<vmem>>, vector<32x16xf32>
    %c0_1 = arith.constant 0 : index
    %c0_2 = arith.constant 0 : index
    %1 = vector.load %arg2[%c0_1, %c0_2] : memref<16x64xf32, #tpu.memory_space<vmem>>, vector<16x64xf32>
    %cst = arith.constant dense<0.000000e+00> : vector<32x64xf32>
    %2 = tpu.matmul %0, %1, %cst {dimension_numbers = #tpu.dot_dimension_numbers<[1], [0], [0], [1], [0, 0, 1, 1], [], []>} : vector<32x16xf32>, vector<16x64xf32>, vector<32x64xf32> -> vector<32x64xf32>
    %c0_3 = arith.constant 0 : index
    %c0_4 = arith.constant 0 : index
    %3 = vector.load %arg3[%c0_3, %c0_4] : memref<1x64xf32, #tpu.memory_space<vmem>>, vector<1x64xf32>
    %4 = vector.broadcast %3 : vector<1x64xf32> to vector<32x64xf32>
    %5 = arith.addf %2, %4 : vector<32x64xf32>
    %cst_5 = arith.constant 5.000000e-01 : f32
    %6 = vector.broadcast %cst_5 : f32 to vector<32x64xf32>
    %7 = arith.mulf %6, %5 : vector<32x64xf32>
    %cst_6 = arith.constant 0.707106769 : f32
    %8 = vector.broadcast %cst_6 : f32 to vector<32x64xf32>
    %9 = arith.mulf %5, %8 : vector<32x64xf32>
    %10 = math.erf %9 : vector<32x64xf32>
    %cst_7 = arith.constant 1.000000e+00 : f32
    %11 = vector.broadcast %cst_7 : f32 to vector<32x64xf32>
    %12 = arith.addf %11, %10 : vector<32x64xf32>
    %13 = arith.mulf %7, %12 : vector<32x64xf32>
    %c0_8 = arith.constant 0 : index
    %c0_9 = arith.constant 0 : index
    %14 = vector.load %arg4[%c0_8, %c0_9] : memref<64x32xf32, #tpu.memory_space<vmem>>, vector<64x32xf32>
    %cst_10 = arith.constant dense<0.000000e+00> : vector<32x32xf32>
    %15 = tpu.matmul %13, %14, %cst_10 {dimension_numbers = #tpu.dot_dimension_numbers<[1], [0], [0], [1], [0, 0, 1, 1], [], []>} : vector<32x64xf32>, vector<64x32xf32>, vector<32x32xf32> -> vector<32x32xf32>
    %c0_11 = arith.constant 0 : index
    %c0_12 = arith.constant 0 : index
    %16 = vector.load %arg5[%c0_11, %c0_12] : memref<1x32xf32, #tpu.memory_space<vmem>>, vector<1x32xf32>
    %17 = vector.broadcast %16 : vector<1x32xf32> to vector<32x32xf32>
    %18 = arith.addf %15, %17 : vector<32x32xf32>
    %c0_13 = arith.constant 0 : index
    %c0_14 = arith.constant 0 : index
    %19 = vector.load %arg6[%c0_13, %c0_14] : memref<1x32xf32, #tpu.memory_space<vmem>>, vector<1x32xf32>
    %c0_15 = arith.constant 0 : index
    %c0_16 = arith.constant 0 : index
    %20 = vector.load %arg7[%c0_15, %c0_16] : memref<1x32xf32, #tpu.memory_space<vmem>>, vector<1x32xf32>
    %cst_17 = arith.constant dense<0.000000e+00> : vector<32xf32>
    %21 = vector.multi_reduction <add>, %18, %cst_17 [1] : vector<32x32xf32> to vector<32xf32>
    %22 = vector.shape_cast %21 : vector<32xf32> to vector<32x1xf32>
    %cst_18 = arith.constant 3.200000e+01 : f32
    %23 = vector.broadcast %cst_18 : f32 to vector<32x1xf32>
    %24 = arith.divf %22, %23 : vector<32x1xf32>
    %25 = vector.broadcast %24 : vector<32x1xf32> to vector<32x32xf32>
    %26 = arith.subf %18, %25 : vector<32x32xf32>
    %27 = arith.mulf %26, %26 : vector<32x32xf32>
    %cst_19 = arith.constant dense<0.000000e+00> : vector<32xf32>
    %28 = vector.multi_reduction <add>, %27, %cst_19 [1] : vector<32x32xf32> to vector<32xf32>
    %29 = vector.shape_cast %28 : vector<32xf32> to vector<32x1xf32>
    %cst_20 = arith.constant 3.200000e+01 : f32
    %30 = vector.broadcast %cst_20 : f32 to vector<32x1xf32>
    %31 = arith.divf %29, %30 : vector<32x1xf32>
    %32 = vector.broadcast %24 : vector<32x1xf32> to vector<32x32xf32>
    %33 = arith.subf %18, %32 : vector<32x32xf32>
    %cst_21 = arith.constant 9.99999974E-6 : f32
    %34 = vector.broadcast %cst_21 : f32 to vector<32x1xf32>
    %35 = arith.addf %31, %34 : vector<32x1xf32>
    %36 = math.rsqrt %35 : vector<32x1xf32>
    %37 = vector.broadcast %36 : vector<32x1xf32> to vector<32x32xf32>
    %38 = arith.mulf %33, %37 : vector<32x32xf32>
    %39 = vector.broadcast %19 : vector<1x32xf32> to vector<32x32xf32>
    %40 = arith.mulf %38, %39 : vector<32x32xf32>
    %41 = vector.broadcast %20 : vector<1x32xf32> to vector<32x32xf32>
    %42 = arith.addf %40, %41 : vector<32x32xf32>
    %c0_22 = arith.constant 0 : index
    %c0_23 = arith.constant 0 : index
    %43 = vector.load %arg8[%c0_22, %c0_23] : memref<32x32xf32, #tpu.memory_space<vmem>>, vector<32x32xf32>
    tpu.vector_store %arg8[%c0_22, %c0_23], %42 {strides = array<i32>} : memref<32x32xf32, #tpu.memory_space<vmem>>, vector<32x32xf32>,
    return
  }
  func.func @transform_0(%arg0: i32) -> (i32, i32) {
    %c0_i32 = arith.constant 0 : i32
    %c0_i32_0 = arith.constant 0 : i32
    return %arg0, %c0_i32 : i32, i32
  }
  func.func @transform_1(%arg0: i32) -> (i32, i32) {
    %c0_i32 = arith.constant 0 : i32
    %c0_i32_0 = arith.constant 0 : i32
    %c0_i32_1 = arith.constant 0 : i32
    return %c0_i32, %c0_i32_0 : i32, i32
  }
  func.func @transform_2(%arg0: i32) -> (i32, i32) {
    %c0_i32 = arith.constant 0 : i32
    %c0_i32_0 = arith.constant 0 : i32
    %c0_i32_1 = arith.constant 0 : i32
    return %c0_i32, %c0_i32_0 : i32, i32
  }
  func.func @transform_3(%arg0: i32) -> (i32, i32) {
    %c0_i32 = arith.constant 0 : i32
    %c0_i32_0 = arith.constant 0 : i32
    %c0_i32_1 = arith.constant 0 : i32
    return %c0_i32, %c0_i32_0 : i32, i32
  }
  func.func @transform_4(%arg0: i32) -> (i32, i32) {
    %c0_i32 = arith.constant 0 : i32
    %c0_i32_0 = arith.constant 0 : i32
    %c0_i32_1 = arith.constant 0 : i32
    return %c0_i32, %c0_i32_0 : i32, i32
  }
  func.func @transform_5(%arg0: i32) -> (i32, i32) {
    %c0_i32 = arith.constant 0 : i32
    %c0_i32_0 = arith.constant 0 : i32
    %c0_i32_1 = arith.constant 0 : i32
    return %c0_i32, %c0_i32_0 : i32, i32
  }
  func.func @transform_6(%arg0: i32) -> (i32, i32) {
    %c0_i32 = arith.constant 0 : i32
    %c0_i32_0 = arith.constant 0 : i32
    %c0_i32_1 = arith.constant 0 : i32
    return %c0_i32, %c0_i32_0 : i32, i32
  }
  func.func @transform_7(%arg0: i32) -> (i32, i32) {
    %c0_i32 = arith.constant 0 : i32
    %c0_i32_0 = arith.constant 0 : i32
    return %arg0, %c0_i32 : i32, i32
  }
}

module attributes {stable_mosaic.version = 11 : i64} {
  func.func @kernel(%arg0: i32, %arg1: memref<8x8x32xf32, #tpu.memory_space<vmem>>, %arg2: memref<32x96xf32, #tpu.memory_space<vmem>>, %arg3: memref<1x96xf32, #tpu.memory_space<vmem>>, %arg4: memref<32x32xf32, #tpu.memory_space<vmem>>, %arg5: memref<1x32xf32, #tpu.memory_space<vmem>>, %arg6: memref<1x32xf32, #tpu.memory_space<vmem>>, %arg7: memref<1x32xf32, #tpu.memory_space<vmem>>, %arg8: memref<8x8x32xf32, #tpu.memory_space<vmem>>) attributes {dimension_semantics = [#tpu.dimension_semantics<arbitrary>], iteration_bounds = array<i64: 1>, scalar_prefetch = 0 : i64, scratch_operands = 0 : i64, tpu.core_type = #tpu.core_type<tc>, window_params = [{pipeline_mode = #tpu.pipeline_mode<synchronous>, transform_indices = @transform_0, window_bounds = array<i64: 8, 8, 32>}, {pipeline_mode = #tpu.pipeline_mode<synchronous>, transform_indices = @transform_1, window_bounds = array<i64: 32, 96>}, {pipeline_mode = #tpu.pipeline_mode<synchronous>, transform_indices = @transform_2, window_bounds = array<i64: 1, 96>}, {pipeline_mode = #tpu.pipeline_mode<synchronous>, transform_indices = @transform_3, window_bounds = array<i64: 32, 32>}, {pipeline_mode = #tpu.pipeline_mode<synchronous>, transform_indices = @transform_4, window_bounds = array<i64: 1, 32>}, {pipeline_mode = #tpu.pipeline_mode<synchronous>, transform_indices = @transform_5, window_bounds = array<i64: 1, 32>}, {pipeline_mode = #tpu.pipeline_mode<synchronous>, transform_indices = @transform_6, window_bounds = array<i64: 1, 32>}, {pipeline_mode = #tpu.pipeline_mode<synchronous>, transform_indices = @transform_7, window_bounds = array<i64: 8, 8, 32>}]} {
    %c0 = arith.constant 0 : index
    %c0_0 = arith.constant 0 : index
    %c0_1 = arith.constant 0 : index
    %0 = vector.load %arg1[%c0, %c0_0, %c0_1] : memref<8x8x32xf32, #tpu.memory_space<vmem>>, vector<8x8x32xf32>
    %1 = vector.shape_cast %0 : vector<8x8x32xf32> to vector<64x32xf32>
    %c0_2 = arith.constant 0 : index
    %c0_3 = arith.constant 0 : index
    %2 = vector.load %arg2[%c0_2, %c0_3] : memref<32x96xf32, #tpu.memory_space<vmem>>, vector<32x96xf32>
    %cst = arith.constant dense<0.000000e+00> : vector<64x96xf32>
    %3 = tpu.matmul %1, %2, %cst {dimension_numbers = #tpu.dot_dimension_numbers<[1], [0], [0], [1], [0, 0, 1, 1], [], []>} : vector<64x32xf32>, vector<32x96xf32>, vector<64x96xf32> -> vector<64x96xf32>
    %c0_4 = arith.constant 0 : index
    %c0_5 = arith.constant 0 : index
    %4 = vector.load %arg3[%c0_4, %c0_5] : memref<1x96xf32, #tpu.memory_space<vmem>>, vector<1x96xf32>
    %5 = vector.broadcast %4 : vector<1x96xf32> to vector<64x96xf32>
    %6 = arith.addf %3, %5 : vector<64x96xf32>
    %7 = vector.extract_strided_slice %6 {offsets = [0, 0], sizes = [64, 32], strides = [1, 1]} : vector<64x96xf32> to vector<64x32xf32>
    %8 = vector.shape_cast %7 : vector<64x32xf32> to vector<8x8x32xf32>
    %9 = vector.extract_strided_slice %6 {offsets = [0, 32], sizes = [64, 32], strides = [1, 1]} : vector<64x96xf32> to vector<64x32xf32>
    %10 = vector.shape_cast %9 : vector<64x32xf32> to vector<8x8x32xf32>
    %11 = vector.extract_strided_slice %6 {offsets = [0, 64], sizes = [64, 32], strides = [1, 1]} : vector<64x96xf32> to vector<64x32xf32>
    %12 = vector.shape_cast %11 : vector<64x32xf32> to vector<8x8x32xf32>
    %c0_6 = arith.constant 0 : index
    %c0_7 = arith.constant 0 : index
    %13 = vector.load %arg4[%c0_6, %c0_7] : memref<32x32xf32, #tpu.memory_space<vmem>>, vector<32x32xf32>
    %cst_8 = arith.constant 0.000000e+00 : f32
    %14 = vector.broadcast %cst_8 : f32 to vector<64x32xf32>
    %15 = vector.extract_strided_slice %8 {offsets = [0, 0, 0], sizes = [8, 8, 8], strides = [1, 1, 1]} : vector<8x8x32xf32> to vector<8x8x8xf32>
    %cst_9 = arith.constant 0.353553385 : f32
    %16 = vector.broadcast %cst_9 : f32 to vector<8x8x8xf32>
    %17 = arith.mulf %15, %16 : vector<8x8x8xf32>
    %18 = vector.extract_strided_slice %10 {offsets = [0, 0, 0], sizes = [8, 8, 8], strides = [1, 1, 1]} : vector<8x8x32xf32> to vector<8x8x8xf32>
    "tpu.trace_start"() <{level = 10 : i32, message = "nqd,nkd->nqk"}> : () -> ()
    %cst_10 = arith.constant dense<0.000000e+00> : vector<8x8x8xf32>
    %19 = tpu.matmul %17, %18, %cst_10 {dimension_numbers = #tpu.dot_dimension_numbers<[2], [2], [1], [1], [0, 0, 0, 1, 1, 1], [0], [0]>} : vector<8x8x8xf32>, vector<8x8x8xf32>, vector<8x8x8xf32> -> vector<8x8x8xf32>
    "tpu.trace_stop"() : () -> ()
    %cst_11 = arith.constant dense<0xFF800000> : vector<8x8xf32>
    %20 = vector.multi_reduction <maximumf>, %19, %cst_11 [2] : vector<8x8x8xf32> to vector<8x8xf32>
    %21 = vector.shape_cast %20 : vector<8x8xf32> to vector<8x8x1xf32>
    %22 = vector.broadcast %21 : vector<8x8x1xf32> to vector<8x8x8xf32>
    %23 = arith.subf %19, %22 : vector<8x8x8xf32>
    %24 = math.exp %23 : vector<8x8x8xf32>
    %cst_12 = arith.constant dense<0.000000e+00> : vector<8x8xf32>
    %25 = vector.multi_reduction <add>, %24, %cst_12 [2] : vector<8x8x8xf32> to vector<8x8xf32>
    %26 = vector.shape_cast %25 : vector<8x8xf32> to vector<8x8x1xf32>
    %27 = tpu.reciprocal %26 {approx = true} : vector<8x8x1xf32> -> vector<8x8x1xf32>
    %28 = vector.broadcast %27 : vector<8x8x1xf32> to vector<8x8x8xf32>
    %29 = arith.mulf %24, %28 : vector<8x8x8xf32>
    %30 = vector.extract_strided_slice %12 {offsets = [0, 0, 0], sizes = [8, 8, 8], strides = [1, 1, 1]} : vector<8x8x32xf32> to vector<8x8x8xf32>
    "tpu.trace_start"() <{level = 10 : i32, message = "nqk,nkd->nqd"}> : () -> ()
    %cst_13 = arith.constant dense<0.000000e+00> : vector<8x8x8xf32>
    %31 = tpu.matmul %29, %30, %cst_13 {dimension_numbers = #tpu.dot_dimension_numbers<[2], [1], [1], [2], [0, 0, 0, 1, 1, 2], [0], [0]>} : vector<8x8x8xf32>, vector<8x8x8xf32>, vector<8x8x8xf32> -> vector<8x8x8xf32>
    "tpu.trace_stop"() : () -> ()
    %32 = vector.shape_cast %31 : vector<8x8x8xf32> to vector<64x8xf32>
    %33 = vector.extract_strided_slice %13 {offsets = [0, 0], sizes = [8, 32], strides = [1, 1]} : vector<32x32xf32> to vector<8x32xf32>
    %cst_14 = arith.constant dense<0.000000e+00> : vector<64x32xf32>
    %34 = tpu.matmul %32, %33, %cst_14 {dimension_numbers = #tpu.dot_dimension_numbers<[1], [0], [0], [1], [0, 0, 1, 1], [], []>} : vector<64x8xf32>, vector<8x32xf32>, vector<64x32xf32> -> vector<64x32xf32>
    %35 = arith.addf %14, %34 : vector<64x32xf32>
    %36 = vector.extract_strided_slice %8 {offsets = [0, 0, 8], sizes = [8, 8, 8], strides = [1, 1, 1]} : vector<8x8x32xf32> to vector<8x8x8xf32>
    %cst_15 = arith.constant 0.353553385 : f32
    %37 = vector.broadcast %cst_15 : f32 to vector<8x8x8xf32>
    %38 = arith.mulf %36, %37 : vector<8x8x8xf32>
    %39 = vector.extract_strided_slice %10 {offsets = [0, 0, 8], sizes = [8, 8, 8], strides = [1, 1, 1]} : vector<8x8x32xf32> to vector<8x8x8xf32>
    "tpu.trace_start"() <{level = 10 : i32, message = "nqd,nkd->nqk"}> : () -> ()
    %cst_16 = arith.constant dense<0.000000e+00> : vector<8x8x8xf32>
    %40 = tpu.matmul %38, %39, %cst_16 {dimension_numbers = #tpu.dot_dimension_numbers<[2], [2], [1], [1], [0, 0, 0, 1, 1, 1], [0], [0]>} : vector<8x8x8xf32>, vector<8x8x8xf32>, vector<8x8x8xf32> -> vector<8x8x8xf32>
    "tpu.trace_stop"() : () -> ()
    %cst_17 = arith.constant dense<0xFF800000> : vector<8x8xf32>
    %41 = vector.multi_reduction <maximumf>, %40, %cst_17 [2] : vector<8x8x8xf32> to vector<8x8xf32>
    %42 = vector.shape_cast %41 : vector<8x8xf32> to vector<8x8x1xf32>
    %43 = vector.broadcast %42 : vector<8x8x1xf32> to vector<8x8x8xf32>
    %44 = arith.subf %40, %43 : vector<8x8x8xf32>
    %45 = math.exp %44 : vector<8x8x8xf32>
    %cst_18 = arith.constant dense<0.000000e+00> : vector<8x8xf32>
    %46 = vector.multi_reduction <add>, %45, %cst_18 [2] : vector<8x8x8xf32> to vector<8x8xf32>
    %47 = vector.shape_cast %46 : vector<8x8xf32> to vector<8x8x1xf32>
    %48 = tpu.reciprocal %47 {approx = true} : vector<8x8x1xf32> -> vector<8x8x1xf32>
    %49 = vector.broadcast %48 : vector<8x8x1xf32> to vector<8x8x8xf32>
    %50 = arith.mulf %45, %49 : vector<8x8x8xf32>
    %51 = vector.extract_strided_slice %12 {offsets = [0, 0, 8], sizes = [8, 8, 8], strides = [1, 1, 1]} : vector<8x8x32xf32> to vector<8x8x8xf32>
    "tpu.trace_start"() <{level = 10 : i32, message = "nqk,nkd->nqd"}> : () -> ()
    %cst_19 = arith.constant dense<0.000000e+00> : vector<8x8x8xf32>
    %52 = tpu.matmul %50, %51, %cst_19 {dimension_numbers = #tpu.dot_dimension_numbers<[2], [1], [1], [2], [0, 0, 0, 1, 1, 2], [0], [0]>} : vector<8x8x8xf32>, vector<8x8x8xf32>, vector<8x8x8xf32> -> vector<8x8x8xf32>
    "tpu.trace_stop"() : () -> ()
    %53 = vector.shape_cast %52 : vector<8x8x8xf32> to vector<64x8xf32>
    %54 = vector.extract_strided_slice %13 {offsets = [8, 0], sizes = [8, 32], strides = [1, 1]} : vector<32x32xf32> to vector<8x32xf32>
    %cst_20 = arith.constant dense<0.000000e+00> : vector<64x32xf32>
    %55 = tpu.matmul %53, %54, %cst_20 {dimension_numbers = #tpu.dot_dimension_numbers<[1], [0], [0], [1], [0, 0, 1, 1], [], []>} : vector<64x8xf32>, vector<8x32xf32>, vector<64x32xf32> -> vector<64x32xf32>
    %56 = arith.addf %35, %55 : vector<64x32xf32>
    %57 = vector.extract_strided_slice %8 {offsets = [0, 0, 16], sizes = [8, 8, 8], strides = [1, 1, 1]} : vector<8x8x32xf32> to vector<8x8x8xf32>
    %cst_21 = arith.constant 0.353553385 : f32
    %58 = vector.broadcast %cst_21 : f32 to vector<8x8x8xf32>
    %59 = arith.mulf %57, %58 : vector<8x8x8xf32>
    %60 = vector.extract_strided_slice %10 {offsets = [0, 0, 16], sizes = [8, 8, 8], strides = [1, 1, 1]} : vector<8x8x32xf32> to vector<8x8x8xf32>
    "tpu.trace_start"() <{level = 10 : i32, message = "nqd,nkd->nqk"}> : () -> ()
    %cst_22 = arith.constant dense<0.000000e+00> : vector<8x8x8xf32>
    %61 = tpu.matmul %59, %60, %cst_22 {dimension_numbers = #tpu.dot_dimension_numbers<[2], [2], [1], [1], [0, 0, 0, 1, 1, 1], [0], [0]>} : vector<8x8x8xf32>, vector<8x8x8xf32>, vector<8x8x8xf32> -> vector<8x8x8xf32>
    "tpu.trace_stop"() : () -> ()
    %cst_23 = arith.constant dense<0xFF800000> : vector<8x8xf32>
    %62 = vector.multi_reduction <maximumf>, %61, %cst_23 [2] : vector<8x8x8xf32> to vector<8x8xf32>
    %63 = vector.shape_cast %62 : vector<8x8xf32> to vector<8x8x1xf32>
    %64 = vector.broadcast %63 : vector<8x8x1xf32> to vector<8x8x8xf32>
    %65 = arith.subf %61, %64 : vector<8x8x8xf32>
    %66 = math.exp %65 : vector<8x8x8xf32>
    %cst_24 = arith.constant dense<0.000000e+00> : vector<8x8xf32>
    %67 = vector.multi_reduction <add>, %66, %cst_24 [2] : vector<8x8x8xf32> to vector<8x8xf32>
    %68 = vector.shape_cast %67 : vector<8x8xf32> to vector<8x8x1xf32>
    %69 = tpu.reciprocal %68 {approx = true} : vector<8x8x1xf32> -> vector<8x8x1xf32>
    %70 = vector.broadcast %69 : vector<8x8x1xf32> to vector<8x8x8xf32>
    %71 = arith.mulf %66, %70 : vector<8x8x8xf32>
    %72 = vector.extract_strided_slice %12 {offsets = [0, 0, 16], sizes = [8, 8, 8], strides = [1, 1, 1]} : vector<8x8x32xf32> to vector<8x8x8xf32>
    "tpu.trace_start"() <{level = 10 : i32, message = "nqk,nkd->nqd"}> : () -> ()
    %cst_25 = arith.constant dense<0.000000e+00> : vector<8x8x8xf32>
    %73 = tpu.matmul %71, %72, %cst_25 {dimension_numbers = #tpu.dot_dimension_numbers<[2], [1], [1], [2], [0, 0, 0, 1, 1, 2], [0], [0]>} : vector<8x8x8xf32>, vector<8x8x8xf32>, vector<8x8x8xf32> -> vector<8x8x8xf32>
    "tpu.trace_stop"() : () -> ()
    %74 = vector.shape_cast %73 : vector<8x8x8xf32> to vector<64x8xf32>
    %75 = vector.extract_strided_slice %13 {offsets = [16, 0], sizes = [8, 32], strides = [1, 1]} : vector<32x32xf32> to vector<8x32xf32>
    %cst_26 = arith.constant dense<0.000000e+00> : vector<64x32xf32>
    %76 = tpu.matmul %74, %75, %cst_26 {dimension_numbers = #tpu.dot_dimension_numbers<[1], [0], [0], [1], [0, 0, 1, 1], [], []>} : vector<64x8xf32>, vector<8x32xf32>, vector<64x32xf32> -> vector<64x32xf32>
    %77 = arith.addf %56, %76 : vector<64x32xf32>
    %78 = vector.extract_strided_slice %8 {offsets = [0, 0, 24], sizes = [8, 8, 8], strides = [1, 1, 1]} : vector<8x8x32xf32> to vector<8x8x8xf32>
    %cst_27 = arith.constant 0.353553385 : f32
    %79 = vector.broadcast %cst_27 : f32 to vector<8x8x8xf32>
    %80 = arith.mulf %78, %79 : vector<8x8x8xf32>
    %81 = vector.extract_strided_slice %10 {offsets = [0, 0, 24], sizes = [8, 8, 8], strides = [1, 1, 1]} : vector<8x8x32xf32> to vector<8x8x8xf32>
    "tpu.trace_start"() <{level = 10 : i32, message = "nqd,nkd->nqk"}> : () -> ()
    %cst_28 = arith.constant dense<0.000000e+00> : vector<8x8x8xf32>
    %82 = tpu.matmul %80, %81, %cst_28 {dimension_numbers = #tpu.dot_dimension_numbers<[2], [2], [1], [1], [0, 0, 0, 1, 1, 1], [0], [0]>} : vector<8x8x8xf32>, vector<8x8x8xf32>, vector<8x8x8xf32> -> vector<8x8x8xf32>
    "tpu.trace_stop"() : () -> ()
    %cst_29 = arith.constant dense<0xFF800000> : vector<8x8xf32>
    %83 = vector.multi_reduction <maximumf>, %82, %cst_29 [2] : vector<8x8x8xf32> to vector<8x8xf32>
    %84 = vector.shape_cast %83 : vector<8x8xf32> to vector<8x8x1xf32>
    %85 = vector.broadcast %84 : vector<8x8x1xf32> to vector<8x8x8xf32>
    %86 = arith.subf %82, %85 : vector<8x8x8xf32>
    %87 = math.exp %86 : vector<8x8x8xf32>
    %cst_30 = arith.constant dense<0.000000e+00> : vector<8x8xf32>
    %88 = vector.multi_reduction <add>, %87, %cst_30 [2] : vector<8x8x8xf32> to vector<8x8xf32>
    %89 = vector.shape_cast %88 : vector<8x8xf32> to vector<8x8x1xf32>
    %90 = tpu.reciprocal %89 {approx = true} : vector<8x8x1xf32> -> vector<8x8x1xf32>
    %91 = vector.broadcast %90 : vector<8x8x1xf32> to vector<8x8x8xf32>
    %92 = arith.mulf %87, %91 : vector<8x8x8xf32>
    %93 = vector.extract_strided_slice %12 {offsets = [0, 0, 24], sizes = [8, 8, 8], strides = [1, 1, 1]} : vector<8x8x32xf32> to vector<8x8x8xf32>
    "tpu.trace_start"() <{level = 10 : i32, message = "nqk,nkd->nqd"}> : () -> ()
    %cst_31 = arith.constant dense<0.000000e+00> : vector<8x8x8xf32>
    %94 = tpu.matmul %92, %93, %cst_31 {dimension_numbers = #tpu.dot_dimension_numbers<[2], [1], [1], [2], [0, 0, 0, 1, 1, 2], [0], [0]>} : vector<8x8x8xf32>, vector<8x8x8xf32>, vector<8x8x8xf32> -> vector<8x8x8xf32>
    "tpu.trace_stop"() : () -> ()
    %95 = vector.shape_cast %94 : vector<8x8x8xf32> to vector<64x8xf32>
    %96 = vector.extract_strided_slice %13 {offsets = [24, 0], sizes = [8, 32], strides = [1, 1]} : vector<32x32xf32> to vector<8x32xf32>
    %cst_32 = arith.constant dense<0.000000e+00> : vector<64x32xf32>
    %97 = tpu.matmul %95, %96, %cst_32 {dimension_numbers = #tpu.dot_dimension_numbers<[1], [0], [0], [1], [0, 0, 1, 1], [], []>} : vector<64x8xf32>, vector<8x32xf32>, vector<64x32xf32> -> vector<64x32xf32>
    %98 = arith.addf %77, %97 : vector<64x32xf32>
    %99 = arith.addf %1, %98 : vector<64x32xf32>
    %c0_33 = arith.constant 0 : index
    %c0_34 = arith.constant 0 : index
    %100 = vector.load %arg5[%c0_33, %c0_34] : memref<1x32xf32, #tpu.memory_space<vmem>>, vector<1x32xf32>
    %101 = vector.broadcast %100 : vector<1x32xf32> to vector<64x32xf32>
    %102 = arith.addf %99, %101 : vector<64x32xf32>
    %c0_35 = arith.constant 0 : index
    %c0_36 = arith.constant 0 : index
    %103 = vector.load %arg6[%c0_35, %c0_36] : memref<1x32xf32, #tpu.memory_space<vmem>>, vector<1x32xf32>
    %c0_37 = arith.constant 0 : index
    %c0_38 = arith.constant 0 : index
    %104 = vector.load %arg7[%c0_37, %c0_38] : memref<1x32xf32, #tpu.memory_space<vmem>>, vector<1x32xf32>
    %cst_39 = arith.constant dense<0.000000e+00> : vector<64xf32>
    %105 = vector.multi_reduction <add>, %102, %cst_39 [1] : vector<64x32xf32> to vector<64xf32>
    %106 = vector.shape_cast %105 : vector<64xf32> to vector<64x1xf32>
    %cst_40 = arith.constant 3.200000e+01 : f32
    %107 = vector.broadcast %cst_40 : f32 to vector<64x1xf32>
    %108 = arith.divf %106, %107 : vector<64x1xf32>
    %109 = vector.broadcast %108 : vector<64x1xf32> to vector<64x32xf32>
    %110 = arith.subf %102, %109 : vector<64x32xf32>
    %111 = arith.mulf %110, %110 : vector<64x32xf32>
    %cst_41 = arith.constant dense<0.000000e+00> : vector<64xf32>
    %112 = vector.multi_reduction <add>, %111, %cst_41 [1] : vector<64x32xf32> to vector<64xf32>
    %113 = vector.shape_cast %112 : vector<64xf32> to vector<64x1xf32>
    %cst_42 = arith.constant 3.200000e+01 : f32
    %114 = vector.broadcast %cst_42 : f32 to vector<64x1xf32>
    %115 = arith.divf %113, %114 : vector<64x1xf32>
    %116 = vector.broadcast %108 : vector<64x1xf32> to vector<64x32xf32>
    %117 = arith.subf %102, %116 : vector<64x32xf32>
    %cst_43 = arith.constant 9.99999974E-6 : f32
    %118 = vector.broadcast %cst_43 : f32 to vector<64x1xf32>
    %119 = arith.addf %115, %118 : vector<64x1xf32>
    %120 = math.rsqrt %119 : vector<64x1xf32>
    %121 = vector.broadcast %120 : vector<64x1xf32> to vector<64x32xf32>
    %122 = arith.mulf %117, %121 : vector<64x32xf32>
    %123 = vector.broadcast %103 : vector<1x32xf32> to vector<64x32xf32>
    %124 = arith.mulf %122, %123 : vector<64x32xf32>
    %125 = vector.broadcast %104 : vector<1x32xf32> to vector<64x32xf32>
    %126 = arith.addf %124, %125 : vector<64x32xf32>
    %127 = vector.shape_cast %126 : vector<64x32xf32> to vector<8x8x32xf32>
    %c0_44 = arith.constant 0 : index
    %c0_45 = arith.constant 0 : index
    %c0_46 = arith.constant 0 : index
    %128 = vector.load %arg8[%c0_44, %c0_45, %c0_46] : memref<8x8x32xf32, #tpu.memory_space<vmem>>, vector<8x8x32xf32>
    tpu.vector_store %arg8[%c0_44, %c0_45, %c0_46], %127 {strides = array<i32>} : memref<8x8x32xf32, #tpu.memory_space<vmem>>, vector<8x8x32xf32>,
    return
  }
  func.func @transform_0(%arg0: i32) -> (i32, i32, i32) {
    %c0_i32 = arith.constant 0 : i32
    %c0_i32_0 = arith.constant 0 : i32
    %c0_i32_1 = arith.constant 0 : i32
    %c0_i32_2 = arith.constant 0 : i32
    return %c0_i32, %c0_i32_0, %c0_i32_1 : i32, i32, i32
  }
  func.func @transform_1(%arg0: i32) -> (i32, i32) {
    %c0_i32 = arith.constant 0 : i32
    %c0_i32_0 = arith.constant 0 : i32
    %c0_i32_1 = arith.constant 0 : i32
    return %c0_i32, %c0_i32_0 : i32, i32
  }
  func.func @transform_2(%arg0: i32) -> (i32, i32) {
    %c0_i32 = arith.constant 0 : i32
    %c0_i32_0 = arith.constant 0 : i32
    %c0_i32_1 = arith.constant 0 : i32
    return %c0_i32, %c0_i32_0 : i32, i32
  }
  func.func @transform_3(%arg0: i32) -> (i32, i32) {
    %c0_i32 = arith.constant 0 : i32
    %c0_i32_0 = arith.constant 0 : i32
    %c0_i32_1 = arith.constant 0 : i32
    return %c0_i32, %c0_i32_0 : i32, i32
  }
  func.func @transform_4(%arg0: i32) -> (i32, i32) {
    %c0_i32 = arith.constant 0 : i32
    %c0_i32_0 = arith.constant 0 : i32
    %c0_i32_1 = arith.constant 0 : i32
    return %c0_i32, %c0_i32_0 : i32, i32
  }
  func.func @transform_5(%arg0: i32) -> (i32, i32) {
    %c0_i32 = arith.constant 0 : i32
    %c0_i32_0 = arith.constant 0 : i32
    %c0_i32_1 = arith.constant 0 : i32
    return %c0_i32, %c0_i32_0 : i32, i32
  }
  func.func @transform_6(%arg0: i32) -> (i32, i32) {
    %c0_i32 = arith.constant 0 : i32
    %c0_i32_0 = arith.constant 0 : i32
    %c0_i32_1 = arith.constant 0 : i32
    return %c0_i32, %c0_i32_0 : i32, i32
  }
  func.func @transform_7(%arg0: i32) -> (i32, i32, i32) {
    %c0_i32 = arith.constant 0 : i32
    %c0_i32_0 = arith.constant 0 : i32
    %c0_i32_1 = arith.constant 0 : i32
    %c0_i32_2 = arith.constant 0 : i32
    return %c0_i32, %c0_i32_0, %c0_i32_1 : i32, i32, i32
  }
}

module attributes {stable_mosaic.version = 11 : i64} {
  func.func @kernel(%arg0: i32, %arg1: memref<16x2x32xf32, #tpu.memory_space<vmem>>, %arg2: memref<16x2x32xf32, #tpu.memory_space<vmem>>, %arg3: memref<32x32xf32, #tpu.memory_space<vmem>>, %arg4: memref<1x32xf32, #tpu.memory_space<vmem>>, %arg5: memref<64x32xf32, #tpu.memory_space<vmem>>, %arg6: memref<1x32xf32, #tpu.memory_space<vmem>>, %arg7: memref<64x32xf32, #tpu.memory_space<vmem>>, %arg8: memref<1x32xf32, #tpu.memory_space<vmem>>, %arg9: memref<16x2x32xf32, #tpu.memory_space<vmem>>) attributes {dimension_semantics = [#tpu.dimension_semantics<arbitrary>], iteration_bounds = array<i64: 1>, scalar_prefetch = 0 : i64, scratch_operands = 0 : i64, tpu.core_type = #tpu.core_type<tc>, window_params = [{pipeline_mode = #tpu.pipeline_mode<synchronous>, transform_indices = @transform_0, window_bounds = array<i64: 16, 2, 32>}, {pipeline_mode = #tpu.pipeline_mode<synchronous>, transform_indices = @transform_1, window_bounds = array<i64: 16, 2, 32>}, {pipeline_mode = #tpu.pipeline_mode<synchronous>, transform_indices = @transform_2, window_bounds = array<i64: 32, 32>}, {pipeline_mode = #tpu.pipeline_mode<synchronous>, transform_indices = @transform_3, window_bounds = array<i64: 1, 32>}, {pipeline_mode = #tpu.pipeline_mode<synchronous>, transform_indices = @transform_4, window_bounds = array<i64: 64, 32>}, {pipeline_mode = #tpu.pipeline_mode<synchronous>, transform_indices = @transform_5, window_bounds = array<i64: 1, 32>}, {pipeline_mode = #tpu.pipeline_mode<synchronous>, transform_indices = @transform_6, window_bounds = array<i64: 64, 32>}, {pipeline_mode = #tpu.pipeline_mode<synchronous>, transform_indices = @transform_7, window_bounds = array<i64: 1, 32>}, {pipeline_mode = #tpu.pipeline_mode<synchronous>, transform_indices = @transform_8, window_bounds = array<i64: 16, 2, 32>}]} {
    %c0 = arith.constant 0 : index
    %c0_0 = arith.constant 0 : index
    %c0_1 = arith.constant 0 : index
    %0 = vector.load %arg1[%c0, %c0_0, %c0_1] : memref<16x2x32xf32, #tpu.memory_space<vmem>>, vector<16x2x32xf32>
    %1 = vector.shape_cast %0 : vector<16x2x32xf32> to vector<32x32xf32>
    %c0_2 = arith.constant 0 : index
    %c0_3 = arith.constant 0 : index
    %c0_4 = arith.constant 0 : index
    %2 = vector.load %arg2[%c0_2, %c0_3, %c0_4] : memref<16x2x32xf32, #tpu.memory_space<vmem>>, vector<16x2x32xf32>
    %3 = vector.shape_cast %2 : vector<16x2x32xf32> to vector<32x32xf32>
    %c0_5 = arith.constant 0 : index
    %c0_6 = arith.constant 0 : index
    %4 = vector.load %arg5[%c0_5, %c0_6] : memref<64x32xf32, #tpu.memory_space<vmem>>, vector<64x32xf32>
    %c0_7 = arith.constant 0 : index
    %c0_8 = arith.constant 0 : index
    %5 = vector.load %arg7[%c0_7, %c0_8] : memref<64x32xf32, #tpu.memory_space<vmem>>, vector<64x32xf32>
    %c0_9 = arith.constant 0 : index
    %c0_10 = arith.constant 0 : index
    %6 = vector.load %arg3[%c0_9, %c0_10] : memref<32x32xf32, #tpu.memory_space<vmem>>, vector<32x32xf32>
    %cst = arith.constant dense<0.000000e+00> : vector<32x32xf32>
    %7 = tpu.matmul %1, %6, %cst {dimension_numbers = #tpu.dot_dimension_numbers<[1], [0], [0], [1], [0, 0, 1, 1], [], []>} : vector<32x32xf32>, vector<32x32xf32>, vector<32x32xf32> -> vector<32x32xf32>
    %c0_11 = arith.constant 0 : index
    %c0_12 = arith.constant 0 : index
    %8 = vector.load %arg4[%c0_11, %c0_12] : memref<1x32xf32, #tpu.memory_space<vmem>>, vector<1x32xf32>
    %9 = vector.broadcast %8 : vector<1x32xf32> to vector<32x32xf32>
    %10 = arith.addf %7, %9 : vector<32x32xf32>
    %11 = vector.shape_cast %10 : vector<32x32xf32> to vector<16x2x32xf32>
    %12 = vector.extract_strided_slice %4 {offsets = [0, 0], sizes = [32, 32], strides = [1, 1]} : vector<64x32xf32> to vector<32x32xf32>
    %cst_13 = arith.constant dense<0.000000e+00> : vector<32x32xf32>
    %13 = tpu.matmul %1, %12, %cst_13 {dimension_numbers = #tpu.dot_dimension_numbers<[1], [0], [0], [1], [0, 0, 1, 1], [], []>} : vector<32x32xf32>, vector<32x32xf32>, vector<32x32xf32> -> vector<32x32xf32>
    %14 = vector.extract_strided_slice %4 {offsets = [32, 0], sizes = [32, 32], strides = [1, 1]} : vector<64x32xf32> to vector<32x32xf32>
    %cst_14 = arith.constant dense<0.000000e+00> : vector<32x32xf32>
    %15 = tpu.matmul %3, %14, %cst_14 {dimension_numbers = #tpu.dot_dimension_numbers<[1], [0], [0], [1], [0, 0, 1, 1], [], []>} : vector<32x32xf32>, vector<32x32xf32>, vector<32x32xf32> -> vector<32x32xf32>
    %16 = arith.addf %13, %15 : vector<32x32xf32>
    %c0_15 = arith.constant 0 : index
    %c0_16 = arith.constant 0 : index
    %17 = vector.load %arg6[%c0_15, %c0_16] : memref<1x32xf32, #tpu.memory_space<vmem>>, vector<1x32xf32>
    %18 = vector.broadcast %17 : vector<1x32xf32> to vector<32x32xf32>
    %19 = arith.addf %16, %18 : vector<32x32xf32>
    %20 = vector.shape_cast %19 : vector<32x32xf32> to vector<16x2x32xf32>
    %21 = vector.extract_strided_slice %5 {offsets = [0, 0], sizes = [32, 32], strides = [1, 1]} : vector<64x32xf32> to vector<32x32xf32>
    %cst_17 = arith.constant dense<0.000000e+00> : vector<32x32xf32>
    %22 = tpu.matmul %1, %21, %cst_17 {dimension_numbers = #tpu.dot_dimension_numbers<[1], [0], [0], [1], [0, 0, 1, 1], [], []>} : vector<32x32xf32>, vector<32x32xf32>, vector<32x32xf32> -> vector<32x32xf32>
    %23 = vector.extract_strided_slice %5 {offsets = [32, 0], sizes = [32, 32], strides = [1, 1]} : vector<64x32xf32> to vector<32x32xf32>
    %cst_18 = arith.constant dense<0.000000e+00> : vector<32x32xf32>
    %24 = tpu.matmul %3, %23, %cst_18 {dimension_numbers = #tpu.dot_dimension_numbers<[1], [0], [0], [1], [0, 0, 1, 1], [], []>} : vector<32x32xf32>, vector<32x32xf32>, vector<32x32xf32> -> vector<32x32xf32>
    %25 = arith.addf %22, %24 : vector<32x32xf32>
    %c0_19 = arith.constant 0 : index
    %c0_20 = arith.constant 0 : index
    %26 = vector.load %arg8[%c0_19, %c0_20] : memref<1x32xf32, #tpu.memory_space<vmem>>, vector<1x32xf32>
    %27 = vector.broadcast %26 : vector<1x32xf32> to vector<32x32xf32>
    %28 = arith.addf %25, %27 : vector<32x32xf32>
    %29 = vector.shape_cast %28 : vector<32x32xf32> to vector<16x2x32xf32>
    %30 = vector.extract_strided_slice %11 {offsets = [0, 0, 0], sizes = [16, 2, 8], strides = [1, 1, 1]} : vector<16x2x32xf32> to vector<16x2x8xf32>
    %cst_21 = arith.constant 0.353553385 : f32
    %31 = vector.broadcast %cst_21 : f32 to vector<16x2x8xf32>
    %32 = arith.mulf %30, %31 : vector<16x2x8xf32>
    %33 = vector.extract_strided_slice %20 {offsets = [0, 0, 0], sizes = [16, 2, 8], strides = [1, 1, 1]} : vector<16x2x32xf32> to vector<16x2x8xf32>
    "tpu.trace_start"() <{level = 10 : i32, message = "nqd,nkd->nqk"}> : () -> ()
    %cst_22 = arith.constant dense<0.000000e+00> : vector<16x2x2xf32>
    %34 = tpu.matmul %32, %33, %cst_22 {dimension_numbers = #tpu.dot_dimension_numbers<[2], [2], [1], [1], [0, 0, 0, 1, 1, 1], [0], [0]>} : vector<16x2x8xf32>, vector<16x2x8xf32>, vector<16x2x2xf32> -> vector<16x2x2xf32>
    "tpu.trace_stop"() : () -> ()
    %cst_23 = arith.constant dense<0xFF800000> : vector<16x2xf32>
    %35 = vector.multi_reduction <maximumf>, %34, %cst_23 [2] : vector<16x2x2xf32> to vector<16x2xf32>
    %36 = vector.shape_cast %35 : vector<16x2xf32> to vector<16x2x1xf32>
    %37 = vector.broadcast %36 : vector<16x2x1xf32> to vector<16x2x2xf32>
    %38 = arith.subf %34, %37 : vector<16x2x2xf32>
    %39 = math.exp %38 : vector<16x2x2xf32>
    %cst_24 = arith.constant dense<0.000000e+00> : vector<16x2xf32>
    %40 = vector.multi_reduction <add>, %39, %cst_24 [2] : vector<16x2x2xf32> to vector<16x2xf32>
    %41 = vector.shape_cast %40 : vector<16x2xf32> to vector<16x2x1xf32>
    %42 = tpu.reciprocal %41 {approx = true} : vector<16x2x1xf32> -> vector<16x2x1xf32>
    %43 = vector.broadcast %42 : vector<16x2x1xf32> to vector<16x2x2xf32>
    %44 = arith.mulf %39, %43 : vector<16x2x2xf32>
    %45 = vector.extract_strided_slice %29 {offsets = [0, 0, 0], sizes = [16, 2, 8], strides = [1, 1, 1]} : vector<16x2x32xf32> to vector<16x2x8xf32>
    "tpu.trace_start"() <{level = 10 : i32, message = "nqk,nkd->nqd"}> : () -> ()
    %cst_25 = arith.constant dense<0.000000e+00> : vector<16x2x8xf32>
    %46 = tpu.matmul %44, %45, %cst_25 {dimension_numbers = #tpu.dot_dimension_numbers<[2], [1], [1], [2], [0, 0, 0, 1, 1, 2], [0], [0]>} : vector<16x2x2xf32>, vector<16x2x8xf32>, vector<16x2x8xf32> -> vector<16x2x8xf32>
    "tpu.trace_stop"() : () -> ()
    %47 = vector.extract_strided_slice %11 {offsets = [0, 0, 8], sizes = [16, 2, 8], strides = [1, 1, 1]} : vector<16x2x32xf32> to vector<16x2x8xf32>
    %cst_26 = arith.constant 0.353553385 : f32
    %48 = vector.broadcast %cst_26 : f32 to vector<16x2x8xf32>
    %49 = arith.mulf %47, %48 : vector<16x2x8xf32>
    %50 = vector.extract_strided_slice %20 {offsets = [0, 0, 8], sizes = [16, 2, 8], strides = [1, 1, 1]} : vector<16x2x32xf32> to vector<16x2x8xf32>
    "tpu.trace_start"() <{level = 10 : i32, message = "nqd,nkd->nqk"}> : () -> ()
    %cst_27 = arith.constant dense<0.000000e+00> : vector<16x2x2xf32>
    %51 = tpu.matmul %49, %50, %cst_27 {dimension_numbers = #tpu.dot_dimension_numbers<[2], [2], [1], [1], [0, 0, 0, 1, 1, 1], [0], [0]>} : vector<16x2x8xf32>, vector<16x2x8xf32>, vector<16x2x2xf32> -> vector<16x2x2xf32>
    "tpu.trace_stop"() : () -> ()
    %cst_28 = arith.constant dense<0xFF800000> : vector<16x2xf32>
    %52 = vector.multi_reduction <maximumf>, %51, %cst_28 [2] : vector<16x2x2xf32> to vector<16x2xf32>
    %53 = vector.shape_cast %52 : vector<16x2xf32> to vector<16x2x1xf32>
    %54 = vector.broadcast %53 : vector<16x2x1xf32> to vector<16x2x2xf32>
    %55 = arith.subf %51, %54 : vector<16x2x2xf32>
    %56 = math.exp %55 : vector<16x2x2xf32>
    %cst_29 = arith.constant dense<0.000000e+00> : vector<16x2xf32>
    %57 = vector.multi_reduction <add>, %56, %cst_29 [2] : vector<16x2x2xf32> to vector<16x2xf32>
    %58 = vector.shape_cast %57 : vector<16x2xf32> to vector<16x2x1xf32>
    %59 = tpu.reciprocal %58 {approx = true} : vector<16x2x1xf32> -> vector<16x2x1xf32>
    %60 = vector.broadcast %59 : vector<16x2x1xf32> to vector<16x2x2xf32>
    %61 = arith.mulf %56, %60 : vector<16x2x2xf32>
    %62 = vector.extract_strided_slice %29 {offsets = [0, 0, 8], sizes = [16, 2, 8], strides = [1, 1, 1]} : vector<16x2x32xf32> to vector<16x2x8xf32>
    "tpu.trace_start"() <{level = 10 : i32, message = "nqk,nkd->nqd"}> : () -> ()
    %cst_30 = arith.constant dense<0.000000e+00> : vector<16x2x8xf32>
    %63 = tpu.matmul %61, %62, %cst_30 {dimension_numbers = #tpu.dot_dimension_numbers<[2], [1], [1], [2], [0, 0, 0, 1, 1, 2], [0], [0]>} : vector<16x2x2xf32>, vector<16x2x8xf32>, vector<16x2x8xf32> -> vector<16x2x8xf32>
    "tpu.trace_stop"() : () -> ()
    %64 = vector.extract_strided_slice %11 {offsets = [0, 0, 16], sizes = [16, 2, 8], strides = [1, 1, 1]} : vector<16x2x32xf32> to vector<16x2x8xf32>
    %cst_31 = arith.constant 0.353553385 : f32
    %65 = vector.broadcast %cst_31 : f32 to vector<16x2x8xf32>
    %66 = arith.mulf %64, %65 : vector<16x2x8xf32>
    %67 = vector.extract_strided_slice %20 {offsets = [0, 0, 16], sizes = [16, 2, 8], strides = [1, 1, 1]} : vector<16x2x32xf32> to vector<16x2x8xf32>
    "tpu.trace_start"() <{level = 10 : i32, message = "nqd,nkd->nqk"}> : () -> ()
    %cst_32 = arith.constant dense<0.000000e+00> : vector<16x2x2xf32>
    %68 = tpu.matmul %66, %67, %cst_32 {dimension_numbers = #tpu.dot_dimension_numbers<[2], [2], [1], [1], [0, 0, 0, 1, 1, 1], [0], [0]>} : vector<16x2x8xf32>, vector<16x2x8xf32>, vector<16x2x2xf32> -> vector<16x2x2xf32>
    "tpu.trace_stop"() : () -> ()
    %cst_33 = arith.constant dense<0xFF800000> : vector<16x2xf32>
    %69 = vector.multi_reduction <maximumf>, %68, %cst_33 [2] : vector<16x2x2xf32> to vector<16x2xf32>
    %70 = vector.shape_cast %69 : vector<16x2xf32> to vector<16x2x1xf32>
    %71 = vector.broadcast %70 : vector<16x2x1xf32> to vector<16x2x2xf32>
    %72 = arith.subf %68, %71 : vector<16x2x2xf32>
    %73 = math.exp %72 : vector<16x2x2xf32>
    %cst_34 = arith.constant dense<0.000000e+00> : vector<16x2xf32>
    %74 = vector.multi_reduction <add>, %73, %cst_34 [2] : vector<16x2x2xf32> to vector<16x2xf32>
    %75 = vector.shape_cast %74 : vector<16x2xf32> to vector<16x2x1xf32>
    %76 = tpu.reciprocal %75 {approx = true} : vector<16x2x1xf32> -> vector<16x2x1xf32>
    %77 = vector.broadcast %76 : vector<16x2x1xf32> to vector<16x2x2xf32>
    %78 = arith.mulf %73, %77 : vector<16x2x2xf32>
    %79 = vector.extract_strided_slice %29 {offsets = [0, 0, 16], sizes = [16, 2, 8], strides = [1, 1, 1]} : vector<16x2x32xf32> to vector<16x2x8xf32>
    "tpu.trace_start"() <{level = 10 : i32, message = "nqk,nkd->nqd"}> : () -> ()
    %cst_35 = arith.constant dense<0.000000e+00> : vector<16x2x8xf32>
    %80 = tpu.matmul %78, %79, %cst_35 {dimension_numbers = #tpu.dot_dimension_numbers<[2], [1], [1], [2], [0, 0, 0, 1, 1, 2], [0], [0]>} : vector<16x2x2xf32>, vector<16x2x8xf32>, vector<16x2x8xf32> -> vector<16x2x8xf32>
    "tpu.trace_stop"() : () -> ()
    %81 = vector.extract_strided_slice %11 {offsets = [0, 0, 24], sizes = [16, 2, 8], strides = [1, 1, 1]} : vector<16x2x32xf32> to vector<16x2x8xf32>
    %cst_36 = arith.constant 0.353553385 : f32
    %82 = vector.broadcast %cst_36 : f32 to vector<16x2x8xf32>
    %83 = arith.mulf %81, %82 : vector<16x2x8xf32>
    %84 = vector.extract_strided_slice %20 {offsets = [0, 0, 24], sizes = [16, 2, 8], strides = [1, 1, 1]} : vector<16x2x32xf32> to vector<16x2x8xf32>
    "tpu.trace_start"() <{level = 10 : i32, message = "nqd,nkd->nqk"}> : () -> ()
    %cst_37 = arith.constant dense<0.000000e+00> : vector<16x2x2xf32>
    %85 = tpu.matmul %83, %84, %cst_37 {dimension_numbers = #tpu.dot_dimension_numbers<[2], [2], [1], [1], [0, 0, 0, 1, 1, 1], [0], [0]>} : vector<16x2x8xf32>, vector<16x2x8xf32>, vector<16x2x2xf32> -> vector<16x2x2xf32>
    "tpu.trace_stop"() : () -> ()
    %cst_38 = arith.constant dense<0xFF800000> : vector<16x2xf32>
    %86 = vector.multi_reduction <maximumf>, %85, %cst_38 [2] : vector<16x2x2xf32> to vector<16x2xf32>
    %87 = vector.shape_cast %86 : vector<16x2xf32> to vector<16x2x1xf32>
    %88 = vector.broadcast %87 : vector<16x2x1xf32> to vector<16x2x2xf32>
    %89 = arith.subf %85, %88 : vector<16x2x2xf32>
    %90 = math.exp %89 : vector<16x2x2xf32>
    %cst_39 = arith.constant dense<0.000000e+00> : vector<16x2xf32>
    %91 = vector.multi_reduction <add>, %90, %cst_39 [2] : vector<16x2x2xf32> to vector<16x2xf32>
    %92 = vector.shape_cast %91 : vector<16x2xf32> to vector<16x2x1xf32>
    %93 = tpu.reciprocal %92 {approx = true} : vector<16x2x1xf32> -> vector<16x2x1xf32>
    %94 = vector.broadcast %93 : vector<16x2x1xf32> to vector<16x2x2xf32>
    %95 = arith.mulf %90, %94 : vector<16x2x2xf32>
    %96 = vector.extract_strided_slice %29 {offsets = [0, 0, 24], sizes = [16, 2, 8], strides = [1, 1, 1]} : vector<16x2x32xf32> to vector<16x2x8xf32>
    "tpu.trace_start"() <{level = 10 : i32, message = "nqk,nkd->nqd"}> : () -> ()
    %cst_40 = arith.constant dense<0.000000e+00> : vector<16x2x8xf32>
    %97 = tpu.matmul %95, %96, %cst_40 {dimension_numbers = #tpu.dot_dimension_numbers<[2], [1], [1], [2], [0, 0, 0, 1, 1, 2], [0], [0]>} : vector<16x2x2xf32>, vector<16x2x8xf32>, vector<16x2x8xf32> -> vector<16x2x8xf32>
    "tpu.trace_stop"() : () -> ()
    %98 = tpu.concatenate %46, %63, %80, %97 in 2 : vector<16x2x8xf32>, vector<16x2x8xf32>, vector<16x2x8xf32>, vector<16x2x8xf32> -> vector<16x2x32xf32>
    %c0_41 = arith.constant 0 : index
    %c0_42 = arith.constant 0 : index
    %c0_43 = arith.constant 0 : index
    %99 = vector.load %arg9[%c0_41, %c0_42, %c0_43] : memref<16x2x32xf32, #tpu.memory_space<vmem>>, vector<16x2x32xf32>
    tpu.vector_store %arg9[%c0_41, %c0_42, %c0_43], %98 {strides = array<i32>} : memref<16x2x32xf32, #tpu.memory_space<vmem>>, vector<16x2x32xf32>,
    return
  }
  func.func @transform_0(%arg0: i32) -> (i32, i32, i32) {
    %c0_i32 = arith.constant 0 : i32
    %c0_i32_0 = arith.constant 0 : i32
    %c0_i32_1 = arith.constant 0 : i32
    %c0_i32_2 = arith.constant 0 : i32
    return %c0_i32, %c0_i32_0, %c0_i32_1 : i32, i32, i32
  }
  func.func @transform_1(%arg0: i32) -> (i32, i32, i32) {
    %c0_i32 = arith.constant 0 : i32
    %c0_i32_0 = arith.constant 0 : i32
    %c0_i32_1 = arith.constant 0 : i32
    %c0_i32_2 = arith.constant 0 : i32
    return %c0_i32, %c0_i32_0, %c0_i32_1 : i32, i32, i32
  }
  func.func @transform_2(%arg0: i32) -> (i32, i32) {
    %c0_i32 = arith.constant 0 : i32
    %c0_i32_0 = arith.constant 0 : i32
    %c0_i32_1 = arith.constant 0 : i32
    return %c0_i32, %c0_i32_0 : i32, i32
  }
  func.func @transform_3(%arg0: i32) -> (i32, i32) {
    %c0_i32 = arith.constant 0 : i32
    %c0_i32_0 = arith.constant 0 : i32
    %c0_i32_1 = arith.constant 0 : i32
    return %c0_i32, %c0_i32_0 : i32, i32
  }
  func.func @transform_4(%arg0: i32) -> (i32, i32) {
    %c0_i32 = arith.constant 0 : i32
    %c0_i32_0 = arith.constant 0 : i32
    %c0_i32_1 = arith.constant 0 : i32
    return %c0_i32, %c0_i32_0 : i32, i32
  }
  func.func @transform_5(%arg0: i32) -> (i32, i32) {
    %c0_i32 = arith.constant 0 : i32
    %c0_i32_0 = arith.constant 0 : i32
    %c0_i32_1 = arith.constant 0 : i32
    return %c0_i32, %c0_i32_0 : i32, i32
  }
  func.func @transform_6(%arg0: i32) -> (i32, i32) {
    %c0_i32 = arith.constant 0 : i32
    %c0_i32_0 = arith.constant 0 : i32
    %c0_i32_1 = arith.constant 0 : i32
    return %c0_i32, %c0_i32_0 : i32, i32
  }
  func.func @transform_7(%arg0: i32) -> (i32, i32) {
    %c0_i32 = arith.constant 0 : i32
    %c0_i32_0 = arith.constant 0 : i32
    %c0_i32_1 = arith.constant 0 : i32
    return %c0_i32, %c0_i32_0 : i32, i32
  }
  func.func @transform_8(%arg0: i32) -> (i32, i32, i32) {
    %c0_i32 = arith.constant 0 : i32
    %c0_i32_0 = arith.constant 0 : i32
    %c0_i32_1 = arith.constant 0 : i32
    %c0_i32_2 = arith.constant 0 : i32
    return %c0_i32, %c0_i32_0, %c0_i32_1 : i32, i32, i32
  }
}

module attributes {stable_mosaic.version = 11 : i64} {
  func.func @kernel(%arg0: i32, %arg1: memref<2x16x32xf32, #tpu.memory_space<vmem>>, %arg2: memref<2x16x32xf32, #tpu.memory_space<vmem>>, %arg3: memref<2x16x32xf32, #tpu.memory_space<vmem>>, %arg4: memref<32x32xf32, #tpu.memory_space<vmem>>, %arg5: memref<1x32xf32, #tpu.memory_space<vmem>>, %arg6: memref<32x64xf32, #tpu.memory_space<vmem>>, %arg7: memref<1x64xf32, #tpu.memory_space<vmem>>, %arg8: memref<32x32xf32, #tpu.memory_space<vmem>>, %arg9: memref<1x32xf32, #tpu.memory_space<vmem>>, %arg10: memref<1x32xf32, #tpu.memory_space<vmem>>, %arg11: memref<1x32xf32, #tpu.memory_space<vmem>>, %arg12: memref<2x16x32xf32, #tpu.memory_space<vmem>>) attributes {dimension_semantics = [#tpu.dimension_semantics<arbitrary>], iteration_bounds = array<i64: 1>, scalar_prefetch = 0 : i64, scratch_operands = 0 : i64, tpu.core_type = #tpu.core_type<tc>, window_params = [{pipeline_mode = #tpu.pipeline_mode<synchronous>, transform_indices = @transform_0, window_bounds = array<i64: 2, 16, 32>}, {pipeline_mode = #tpu.pipeline_mode<synchronous>, transform_indices = @transform_1, window_bounds = array<i64: 2, 16, 32>}, {pipeline_mode = #tpu.pipeline_mode<synchronous>, transform_indices = @transform_2, window_bounds = array<i64: 2, 16, 32>}, {pipeline_mode = #tpu.pipeline_mode<synchronous>, transform_indices = @transform_3, window_bounds = array<i64: 32, 32>}, {pipeline_mode = #tpu.pipeline_mode<synchronous>, transform_indices = @transform_4, window_bounds = array<i64: 1, 32>}, {pipeline_mode = #tpu.pipeline_mode<synchronous>, transform_indices = @transform_5, window_bounds = array<i64: 32, 64>}, {pipeline_mode = #tpu.pipeline_mode<synchronous>, transform_indices = @transform_6, window_bounds = array<i64: 1, 64>}, {pipeline_mode = #tpu.pipeline_mode<synchronous>, transform_indices = @transform_7, window_bounds = array<i64: 32, 32>}, {pipeline_mode = #tpu.pipeline_mode<synchronous>, transform_indices = @transform_8, window_bounds = array<i64: 1, 32>}, {pipeline_mode = #tpu.pipeline_mode<synchronous>, transform_indices = @transform_9, window_bounds = array<i64: 1, 32>}, {pipeline_mode = #tpu.pipeline_mode<synchronous>, transform_indices = @transform_10, window_bounds = array<i64: 1, 32>}, {pipeline_mode = #tpu.pipeline_mode<synchronous>, transform_indices = @transform_11, window_bounds = array<i64: 2, 16, 32>}]} {
    %c0 = arith.constant 0 : index
    %c0_0 = arith.constant 0 : index
    %c0_1 = arith.constant 0 : index
    %0 = vector.load %arg1[%c0, %c0_0, %c0_1] : memref<2x16x32xf32, #tpu.memory_space<vmem>>, vector<2x16x32xf32>
    %1 = vector.shape_cast %0 : vector<2x16x32xf32> to vector<32x32xf32>
    %c0_2 = arith.constant 0 : index
    %c0_3 = arith.constant 0 : index
    %c0_4 = arith.constant 0 : index
    %2 = vector.load %arg2[%c0_2, %c0_3, %c0_4] : memref<2x16x32xf32, #tpu.memory_space<vmem>>, vector<2x16x32xf32>
    %3 = vector.shape_cast %2 : vector<2x16x32xf32> to vector<32x32xf32>
    %c0_5 = arith.constant 0 : index
    %c0_6 = arith.constant 0 : index
    %c0_7 = arith.constant 0 : index
    %4 = vector.load %arg3[%c0_5, %c0_6, %c0_7] : memref<2x16x32xf32, #tpu.memory_space<vmem>>, vector<2x16x32xf32>
    %5 = vector.shape_cast %4 : vector<2x16x32xf32> to vector<32x32xf32>
    %c0_8 = arith.constant 0 : index
    %c0_9 = arith.constant 0 : index
    %6 = vector.load %arg6[%c0_8, %c0_9] : memref<32x64xf32, #tpu.memory_space<vmem>>, vector<32x64xf32>
    %c0_10 = arith.constant 0 : index
    %c0_11 = arith.constant 0 : index
    %7 = vector.load %arg7[%c0_10, %c0_11] : memref<1x64xf32, #tpu.memory_space<vmem>>, vector<1x64xf32>
    %c0_12 = arith.constant 0 : index
    %c0_13 = arith.constant 0 : index
    %8 = vector.load %arg4[%c0_12, %c0_13] : memref<32x32xf32, #tpu.memory_space<vmem>>, vector<32x32xf32>
    %cst = arith.constant dense<0.000000e+00> : vector<32x32xf32>
    %9 = tpu.matmul %1, %8, %cst {dimension_numbers = #tpu.dot_dimension_numbers<[1], [0], [0], [1], [0, 0, 1, 1], [], []>} : vector<32x32xf32>, vector<32x32xf32>, vector<32x32xf32> -> vector<32x32xf32>
    %c0_14 = arith.constant 0 : index
    %c0_15 = arith.constant 0 : index
    %10 = vector.load %arg5[%c0_14, %c0_15] : memref<1x32xf32, #tpu.memory_space<vmem>>, vector<1x32xf32>
    %11 = vector.broadcast %10 : vector<1x32xf32> to vector<32x32xf32>
    %12 = arith.addf %9, %11 : vector<32x32xf32>
    %13 = vector.shape_cast %12 : vector<32x32xf32> to vector<2x16x32xf32>
    %cst_16 = arith.constant dense<0.000000e+00> : vector<32x64xf32>
    %14 = tpu.matmul %3, %6, %cst_16 {dimension_numbers = #tpu.dot_dimension_numbers<[1], [0], [0], [1], [0, 0, 1, 1], [], []>} : vector<32x32xf32>, vector<32x64xf32>, vector<32x64xf32> -> vector<32x64xf32>
    %15 = vector.broadcast %7 : vector<1x64xf32> to vector<32x64xf32>
    %16 = arith.addf %14, %15 : vector<32x64xf32>
    %cst_17 = arith.constant dense<0.000000e+00> : vector<32x64xf32>
    %17 = tpu.matmul %5, %6, %cst_17 {dimension_numbers = #tpu.dot_dimension_numbers<[1], [0], [0], [1], [0, 0, 1, 1], [], []>} : vector<32x32xf32>, vector<32x64xf32>, vector<32x64xf32> -> vector<32x64xf32>
    %18 = vector.broadcast %7 : vector<1x64xf32> to vector<32x64xf32>
    %19 = arith.addf %17, %18 : vector<32x64xf32>
    %20 = vector.extract_strided_slice %16 {offsets = [0, 0], sizes = [32, 32], strides = [1, 1]} : vector<32x64xf32> to vector<32x32xf32>
    %21 = vector.shape_cast %20 : vector<32x32xf32> to vector<2x16x32xf32>
    %22 = vector.extract_strided_slice %16 {offsets = [0, 32], sizes = [32, 32], strides = [1, 1]} : vector<32x64xf32> to vector<32x32xf32>
    %23 = vector.shape_cast %22 : vector<32x32xf32> to vector<2x16x32xf32>
    %24 = vector.extract_strided_slice %19 {offsets = [0, 0], sizes = [32, 32], strides = [1, 1]} : vector<32x64xf32> to vector<32x32xf32>
    %25 = vector.shape_cast %24 : vector<32x32xf32> to vector<2x16x32xf32>
    %26 = vector.extract_strided_slice %19 {offsets = [0, 32], sizes = [32, 32], strides = [1, 1]} : vector<32x64xf32> to vector<32x32xf32>
    %27 = vector.shape_cast %26 : vector<32x32xf32> to vector<2x16x32xf32>
    %c0_18 = arith.constant 0 : index
    %c0_19 = arith.constant 0 : index
    %28 = vector.load %arg8[%c0_18, %c0_19] : memref<32x32xf32, #tpu.memory_space<vmem>>, vector<32x32xf32>
    %cst_20 = arith.constant 0.000000e+00 : f32
    %29 = vector.broadcast %cst_20 : f32 to vector<32x32xf32>
    %30 = vector.extract_strided_slice %13 {offsets = [0, 0, 0], sizes = [2, 16, 8], strides = [1, 1, 1]} : vector<2x16x32xf32> to vector<2x16x8xf32>
    %cst_21 = arith.constant 0.353553385 : f32
    %31 = vector.broadcast %cst_21 : f32 to vector<2x16x8xf32>
    %32 = arith.mulf %30, %31 : vector<2x16x8xf32>
    %33 = vector.extract_strided_slice %21 {offsets = [0, 0, 0], sizes = [2, 16, 8], strides = [1, 1, 1]} : vector<2x16x32xf32> to vector<2x16x8xf32>
    "tpu.trace_start"() <{level = 10 : i32, message = "nqd,nkd->nqk"}> : () -> ()
    %cst_22 = arith.constant dense<0.000000e+00> : vector<2x16x16xf32>
    %34 = tpu.matmul %32, %33, %cst_22 {dimension_numbers = #tpu.dot_dimension_numbers<[2], [2], [1], [1], [0, 0, 0, 1, 1, 1], [0], [0]>} : vector<2x16x8xf32>, vector<2x16x8xf32>, vector<2x16x16xf32> -> vector<2x16x16xf32>
    "tpu.trace_stop"() : () -> ()
    %35 = vector.extract_strided_slice %25 {offsets = [0, 0, 0], sizes = [2, 16, 8], strides = [1, 1, 1]} : vector<2x16x32xf32> to vector<2x16x8xf32>
    "tpu.trace_start"() <{level = 10 : i32, message = "nqd,nkd->nqk"}> : () -> ()
    %cst_23 = arith.constant dense<0.000000e+00> : vector<2x16x16xf32>
    %36 = tpu.matmul %32, %35, %cst_23 {dimension_numbers = #tpu.dot_dimension_numbers<[2], [2], [1], [1], [0, 0, 0, 1, 1, 1], [0], [0]>} : vector<2x16x8xf32>, vector<2x16x8xf32>, vector<2x16x16xf32> -> vector<2x16x16xf32>
    "tpu.trace_stop"() : () -> ()
    %cst_24 = arith.constant dense<0xFF800000> : vector<2x16xf32>
    %37 = vector.multi_reduction <maximumf>, %34, %cst_24 [2] : vector<2x16x16xf32> to vector<2x16xf32>
    %38 = vector.shape_cast %37 : vector<2x16xf32> to vector<2x16x1xf32>
    %cst_25 = arith.constant dense<0xFF800000> : vector<2x16xf32>
    %39 = vector.multi_reduction <maximumf>, %36, %cst_25 [2] : vector<2x16x16xf32> to vector<2x16xf32>
    %40 = vector.shape_cast %39 : vector<2x16xf32> to vector<2x16x1xf32>
    %41 = arith.maximumf %38, %40 : vector<2x16x1xf32>
    %42 = vector.broadcast %41 : vector<2x16x1xf32> to vector<2x16x16xf32>
    %43 = arith.subf %34, %42 : vector<2x16x16xf32>
    %44 = math.exp %43 : vector<2x16x16xf32>
    %45 = vector.broadcast %41 : vector<2x16x1xf32> to vector<2x16x16xf32>
    %46 = arith.subf %36, %45 : vector<2x16x16xf32>
    %47 = math.exp %46 : vector<2x16x16xf32>
    %cst_26 = arith.constant dense<0.000000e+00> : vector<2x16xf32>
    %48 = vector.multi_reduction <add>, %44, %cst_26 [2] : vector<2x16x16xf32> to vector<2x16xf32>
    %49 = vector.shape_cast %48 : vector<2x16xf32> to vector<2x16x1xf32>
    %cst_27 = arith.constant dense<0.000000e+00> : vector<2x16xf32>
    %50 = vector.multi_reduction <add>, %47, %cst_27 [2] : vector<2x16x16xf32> to vector<2x16xf32>
    %51 = vector.shape_cast %50 : vector<2x16xf32> to vector<2x16x1xf32>
    %52 = arith.addf %49, %51 : vector<2x16x1xf32>
    %53 = vector.extract_strided_slice %23 {offsets = [0, 0, 0], sizes = [2, 16, 8], strides = [1, 1, 1]} : vector<2x16x32xf32> to vector<2x16x8xf32>
    "tpu.trace_start"() <{level = 10 : i32, message = "nqk,nkd->nqd"}> : () -> ()
    %cst_28 = arith.constant dense<0.000000e+00> : vector<2x16x8xf32>
    %54 = tpu.matmul %44, %53, %cst_28 {dimension_numbers = #tpu.dot_dimension_numbers<[2], [1], [1], [2], [0, 0, 0, 1, 1, 2], [0], [0]>} : vector<2x16x16xf32>, vector<2x16x8xf32>, vector<2x16x8xf32> -> vector<2x16x8xf32>
    "tpu.trace_stop"() : () -> ()
    %55 = vector.extract_strided_slice %27 {offsets = [0, 0, 0], sizes = [2, 16, 8], strides = [1, 1, 1]} : vector<2x16x32xf32> to vector<2x16x8xf32>
    "tpu.trace_start"() <{level = 10 : i32, message = "nqk,nkd->nqd"}> : () -> ()
    %cst_29 = arith.constant dense<0.000000e+00> : vector<2x16x8xf32>
    %56 = tpu.matmul %47, %55, %cst_29 {dimension_numbers = #tpu.dot_dimension_numbers<[2], [1], [1], [2], [0, 0, 0, 1, 1, 2], [0], [0]>} : vector<2x16x16xf32>, vector<2x16x8xf32>, vector<2x16x8xf32> -> vector<2x16x8xf32>
    "tpu.trace_stop"() : () -> ()
    %57 = arith.addf %54, %56 : vector<2x16x8xf32>
    %58 = tpu.reciprocal %52 {approx = true} : vector<2x16x1xf32> -> vector<2x16x1xf32>
    %59 = vector.broadcast %58 : vector<2x16x1xf32> to vector<2x16x8xf32>
    %60 = arith.mulf %57, %59 : vector<2x16x8xf32>
    %61 = vector.shape_cast %60 : vector<2x16x8xf32> to vector<32x8xf32>
    %62 = vector.extract_strided_slice %28 {offsets = [0, 0], sizes = [8, 32], strides = [1, 1]} : vector<32x32xf32> to vector<8x32xf32>
    %cst_30 = arith.constant dense<0.000000e+00> : vector<32x32xf32>
    %63 = tpu.matmul %61, %62, %cst_30 {dimension_numbers = #tpu.dot_dimension_numbers<[1], [0], [0], [1], [0, 0, 1, 1], [], []>} : vector<32x8xf32>, vector<8x32xf32>, vector<32x32xf32> -> vector<32x32xf32>
    %64 = arith.addf %29, %63 : vector<32x32xf32>
    %65 = vector.extract_strided_slice %13 {offsets = [0, 0, 8], sizes = [2, 16, 8], strides = [1, 1, 1]} : vector<2x16x32xf32> to vector<2x16x8xf32>
    %cst_31 = arith.constant 0.353553385 : f32
    %66 = vector.broadcast %cst_31 : f32 to vector<2x16x8xf32>
    %67 = arith.mulf %65, %66 : vector<2x16x8xf32>
    %68 = vector.extract_strided_slice %21 {offsets = [0, 0, 8], sizes = [2, 16, 8], strides = [1, 1, 1]} : vector<2x16x32xf32> to vector<2x16x8xf32>
    "tpu.trace_start"() <{level = 10 : i32, message = "nqd,nkd->nqk"}> : () -> ()
    %cst_32 = arith.constant dense<0.000000e+00> : vector<2x16x16xf32>
    %69 = tpu.matmul %67, %68, %cst_32 {dimension_numbers = #tpu.dot_dimension_numbers<[2], [2], [1], [1], [0, 0, 0, 1, 1, 1], [0], [0]>} : vector<2x16x8xf32>, vector<2x16x8xf32>, vector<2x16x16xf32> -> vector<2x16x16xf32>
    "tpu.trace_stop"() : () -> ()
    %70 = vector.extract_strided_slice %25 {offsets = [0, 0, 8], sizes = [2, 16, 8], strides = [1, 1, 1]} : vector<2x16x32xf32> to vector<2x16x8xf32>
    "tpu.trace_start"() <{level = 10 : i32, message = "nqd,nkd->nqk"}> : () -> ()
    %cst_33 = arith.constant dense<0.000000e+00> : vector<2x16x16xf32>
    %71 = tpu.matmul %67, %70, %cst_33 {dimension_numbers = #tpu.dot_dimension_numbers<[2], [2], [1], [1], [0, 0, 0, 1, 1, 1], [0], [0]>} : vector<2x16x8xf32>, vector<2x16x8xf32>, vector<2x16x16xf32> -> vector<2x16x16xf32>
    "tpu.trace_stop"() : () -> ()
    %cst_34 = arith.constant dense<0xFF800000> : vector<2x16xf32>
    %72 = vector.multi_reduction <maximumf>, %69, %cst_34 [2] : vector<2x16x16xf32> to vector<2x16xf32>
    %73 = vector.shape_cast %72 : vector<2x16xf32> to vector<2x16x1xf32>
    %cst_35 = arith.constant dense<0xFF800000> : vector<2x16xf32>
    %74 = vector.multi_reduction <maximumf>, %71, %cst_35 [2] : vector<2x16x16xf32> to vector<2x16xf32>
    %75 = vector.shape_cast %74 : vector<2x16xf32> to vector<2x16x1xf32>
    %76 = arith.maximumf %73, %75 : vector<2x16x1xf32>
    %77 = vector.broadcast %76 : vector<2x16x1xf32> to vector<2x16x16xf32>
    %78 = arith.subf %69, %77 : vector<2x16x16xf32>
    %79 = math.exp %78 : vector<2x16x16xf32>
    %80 = vector.broadcast %76 : vector<2x16x1xf32> to vector<2x16x16xf32>
    %81 = arith.subf %71, %80 : vector<2x16x16xf32>
    %82 = math.exp %81 : vector<2x16x16xf32>
    %cst_36 = arith.constant dense<0.000000e+00> : vector<2x16xf32>
    %83 = vector.multi_reduction <add>, %79, %cst_36 [2] : vector<2x16x16xf32> to vector<2x16xf32>
    %84 = vector.shape_cast %83 : vector<2x16xf32> to vector<2x16x1xf32>
    %cst_37 = arith.constant dense<0.000000e+00> : vector<2x16xf32>
    %85 = vector.multi_reduction <add>, %82, %cst_37 [2] : vector<2x16x16xf32> to vector<2x16xf32>
    %86 = vector.shape_cast %85 : vector<2x16xf32> to vector<2x16x1xf32>
    %87 = arith.addf %84, %86 : vector<2x16x1xf32>
    %88 = vector.extract_strided_slice %23 {offsets = [0, 0, 8], sizes = [2, 16, 8], strides = [1, 1, 1]} : vector<2x16x32xf32> to vector<2x16x8xf32>
    "tpu.trace_start"() <{level = 10 : i32, message = "nqk,nkd->nqd"}> : () -> ()
    %cst_38 = arith.constant dense<0.000000e+00> : vector<2x16x8xf32>
    %89 = tpu.matmul %79, %88, %cst_38 {dimension_numbers = #tpu.dot_dimension_numbers<[2], [1], [1], [2], [0, 0, 0, 1, 1, 2], [0], [0]>} : vector<2x16x16xf32>, vector<2x16x8xf32>, vector<2x16x8xf32> -> vector<2x16x8xf32>
    "tpu.trace_stop"() : () -> ()
    %90 = vector.extract_strided_slice %27 {offsets = [0, 0, 8], sizes = [2, 16, 8], strides = [1, 1, 1]} : vector<2x16x32xf32> to vector<2x16x8xf32>
    "tpu.trace_start"() <{level = 10 : i32, message = "nqk,nkd->nqd"}> : () -> ()
    %cst_39 = arith.constant dense<0.000000e+00> : vector<2x16x8xf32>
    %91 = tpu.matmul %82, %90, %cst_39 {dimension_numbers = #tpu.dot_dimension_numbers<[2], [1], [1], [2], [0, 0, 0, 1, 1, 2], [0], [0]>} : vector<2x16x16xf32>, vector<2x16x8xf32>, vector<2x16x8xf32> -> vector<2x16x8xf32>
    "tpu.trace_stop"() : () -> ()
    %92 = arith.addf %89, %91 : vector<2x16x8xf32>
    %93 = tpu.reciprocal %87 {approx = true} : vector<2x16x1xf32> -> vector<2x16x1xf32>
    %94 = vector.broadcast %93 : vector<2x16x1xf32> to vector<2x16x8xf32>
    %95 = arith.mulf %92, %94 : vector<2x16x8xf32>
    %96 = vector.shape_cast %95 : vector<2x16x8xf32> to vector<32x8xf32>
    %97 = vector.extract_strided_slice %28 {offsets = [8, 0], sizes = [8, 32], strides = [1, 1]} : vector<32x32xf32> to vector<8x32xf32>
    %cst_40 = arith.constant dense<0.000000e+00> : vector<32x32xf32>
    %98 = tpu.matmul %96, %97, %cst_40 {dimension_numbers = #tpu.dot_dimension_numbers<[1], [0], [0], [1], [0, 0, 1, 1], [], []>} : vector<32x8xf32>, vector<8x32xf32>, vector<32x32xf32> -> vector<32x32xf32>
    %99 = arith.addf %64, %98 : vector<32x32xf32>
    %100 = vector.extract_strided_slice %13 {offsets = [0, 0, 16], sizes = [2, 16, 8], strides = [1, 1, 1]} : vector<2x16x32xf32> to vector<2x16x8xf32>
    %cst_41 = arith.constant 0.353553385 : f32
    %101 = vector.broadcast %cst_41 : f32 to vector<2x16x8xf32>
    %102 = arith.mulf %100, %101 : vector<2x16x8xf32>
    %103 = vector.extract_strided_slice %21 {offsets = [0, 0, 16], sizes = [2, 16, 8], strides = [1, 1, 1]} : vector<2x16x32xf32> to vector<2x16x8xf32>
    "tpu.trace_start"() <{level = 10 : i32, message = "nqd,nkd->nqk"}> : () -> ()
    %cst_42 = arith.constant dense<0.000000e+00> : vector<2x16x16xf32>
    %104 = tpu.matmul %102, %103, %cst_42 {dimension_numbers = #tpu.dot_dimension_numbers<[2], [2], [1], [1], [0, 0, 0, 1, 1, 1], [0], [0]>} : vector<2x16x8xf32>, vector<2x16x8xf32>, vector<2x16x16xf32> -> vector<2x16x16xf32>
    "tpu.trace_stop"() : () -> ()
    %105 = vector.extract_strided_slice %25 {offsets = [0, 0, 16], sizes = [2, 16, 8], strides = [1, 1, 1]} : vector<2x16x32xf32> to vector<2x16x8xf32>
    "tpu.trace_start"() <{level = 10 : i32, message = "nqd,nkd->nqk"}> : () -> ()
    %cst_43 = arith.constant dense<0.000000e+00> : vector<2x16x16xf32>
    %106 = tpu.matmul %102, %105, %cst_43 {dimension_numbers = #tpu.dot_dimension_numbers<[2], [2], [1], [1], [0, 0, 0, 1, 1, 1], [0], [0]>} : vector<2x16x8xf32>, vector<2x16x8xf32>, vector<2x16x16xf32> -> vector<2x16x16xf32>
    "tpu.trace_stop"() : () -> ()
    %cst_44 = arith.constant dense<0xFF800000> : vector<2x16xf32>
    %107 = vector.multi_reduction <maximumf>, %104, %cst_44 [2] : vector<2x16x16xf32> to vector<2x16xf32>
    %108 = vector.shape_cast %107 : vector<2x16xf32> to vector<2x16x1xf32>
    %cst_45 = arith.constant dense<0xFF800000> : vector<2x16xf32>
    %109 = vector.multi_reduction <maximumf>, %106, %cst_45 [2] : vector<2x16x16xf32> to vector<2x16xf32>
    %110 = vector.shape_cast %109 : vector<2x16xf32> to vector<2x16x1xf32>
    %111 = arith.maximumf %108, %110 : vector<2x16x1xf32>
    %112 = vector.broadcast %111 : vector<2x16x1xf32> to vector<2x16x16xf32>
    %113 = arith.subf %104, %112 : vector<2x16x16xf32>
    %114 = math.exp %113 : vector<2x16x16xf32>
    %115 = vector.broadcast %111 : vector<2x16x1xf32> to vector<2x16x16xf32>
    %116 = arith.subf %106, %115 : vector<2x16x16xf32>
    %117 = math.exp %116 : vector<2x16x16xf32>
    %cst_46 = arith.constant dense<0.000000e+00> : vector<2x16xf32>
    %118 = vector.multi_reduction <add>, %114, %cst_46 [2] : vector<2x16x16xf32> to vector<2x16xf32>
    %119 = vector.shape_cast %118 : vector<2x16xf32> to vector<2x16x1xf32>
    %cst_47 = arith.constant dense<0.000000e+00> : vector<2x16xf32>
    %120 = vector.multi_reduction <add>, %117, %cst_47 [2] : vector<2x16x16xf32> to vector<2x16xf32>
    %121 = vector.shape_cast %120 : vector<2x16xf32> to vector<2x16x1xf32>
    %122 = arith.addf %119, %121 : vector<2x16x1xf32>
    %123 = vector.extract_strided_slice %23 {offsets = [0, 0, 16], sizes = [2, 16, 8], strides = [1, 1, 1]} : vector<2x16x32xf32> to vector<2x16x8xf32>
    "tpu.trace_start"() <{level = 10 : i32, message = "nqk,nkd->nqd"}> : () -> ()
    %cst_48 = arith.constant dense<0.000000e+00> : vector<2x16x8xf32>
    %124 = tpu.matmul %114, %123, %cst_48 {dimension_numbers = #tpu.dot_dimension_numbers<[2], [1], [1], [2], [0, 0, 0, 1, 1, 2], [0], [0]>} : vector<2x16x16xf32>, vector<2x16x8xf32>, vector<2x16x8xf32> -> vector<2x16x8xf32>
    "tpu.trace_stop"() : () -> ()
    %125 = vector.extract_strided_slice %27 {offsets = [0, 0, 16], sizes = [2, 16, 8], strides = [1, 1, 1]} : vector<2x16x32xf32> to vector<2x16x8xf32>
    "tpu.trace_start"() <{level = 10 : i32, message = "nqk,nkd->nqd"}> : () -> ()
    %cst_49 = arith.constant dense<0.000000e+00> : vector<2x16x8xf32>
    %126 = tpu.matmul %117, %125, %cst_49 {dimension_numbers = #tpu.dot_dimension_numbers<[2], [1], [1], [2], [0, 0, 0, 1, 1, 2], [0], [0]>} : vector<2x16x16xf32>, vector<2x16x8xf32>, vector<2x16x8xf32> -> vector<2x16x8xf32>
    "tpu.trace_stop"() : () -> ()
    %127 = arith.addf %124, %126 : vector<2x16x8xf32>
    %128 = tpu.reciprocal %122 {approx = true} : vector<2x16x1xf32> -> vector<2x16x1xf32>
    %129 = vector.broadcast %128 : vector<2x16x1xf32> to vector<2x16x8xf32>
    %130 = arith.mulf %127, %129 : vector<2x16x8xf32>
    %131 = vector.shape_cast %130 : vector<2x16x8xf32> to vector<32x8xf32>
    %132 = vector.extract_strided_slice %28 {offsets = [16, 0], sizes = [8, 32], strides = [1, 1]} : vector<32x32xf32> to vector<8x32xf32>
    %cst_50 = arith.constant dense<0.000000e+00> : vector<32x32xf32>
    %133 = tpu.matmul %131, %132, %cst_50 {dimension_numbers = #tpu.dot_dimension_numbers<[1], [0], [0], [1], [0, 0, 1, 1], [], []>} : vector<32x8xf32>, vector<8x32xf32>, vector<32x32xf32> -> vector<32x32xf32>
    %134 = arith.addf %99, %133 : vector<32x32xf32>
    %135 = vector.extract_strided_slice %13 {offsets = [0, 0, 24], sizes = [2, 16, 8], strides = [1, 1, 1]} : vector<2x16x32xf32> to vector<2x16x8xf32>
    %cst_51 = arith.constant 0.353553385 : f32
    %136 = vector.broadcast %cst_51 : f32 to vector<2x16x8xf32>
    %137 = arith.mulf %135, %136 : vector<2x16x8xf32>
    %138 = vector.extract_strided_slice %21 {offsets = [0, 0, 24], sizes = [2, 16, 8], strides = [1, 1, 1]} : vector<2x16x32xf32> to vector<2x16x8xf32>
    "tpu.trace_start"() <{level = 10 : i32, message = "nqd,nkd->nqk"}> : () -> ()
    %cst_52 = arith.constant dense<0.000000e+00> : vector<2x16x16xf32>
    %139 = tpu.matmul %137, %138, %cst_52 {dimension_numbers = #tpu.dot_dimension_numbers<[2], [2], [1], [1], [0, 0, 0, 1, 1, 1], [0], [0]>} : vector<2x16x8xf32>, vector<2x16x8xf32>, vector<2x16x16xf32> -> vector<2x16x16xf32>
    "tpu.trace_stop"() : () -> ()
    %140 = vector.extract_strided_slice %25 {offsets = [0, 0, 24], sizes = [2, 16, 8], strides = [1, 1, 1]} : vector<2x16x32xf32> to vector<2x16x8xf32>
    "tpu.trace_start"() <{level = 10 : i32, message = "nqd,nkd->nqk"}> : () -> ()
    %cst_53 = arith.constant dense<0.000000e+00> : vector<2x16x16xf32>
    %141 = tpu.matmul %137, %140, %cst_53 {dimension_numbers = #tpu.dot_dimension_numbers<[2], [2], [1], [1], [0, 0, 0, 1, 1, 1], [0], [0]>} : vector<2x16x8xf32>, vector<2x16x8xf32>, vector<2x16x16xf32> -> vector<2x16x16xf32>
    "tpu.trace_stop"() : () -> ()
    %cst_54 = arith.constant dense<0xFF800000> : vector<2x16xf32>
    %142 = vector.multi_reduction <maximumf>, %139, %cst_54 [2] : vector<2x16x16xf32> to vector<2x16xf32>
    %143 = vector.shape_cast %142 : vector<2x16xf32> to vector<2x16x1xf32>
    %cst_55 = arith.constant dense<0xFF800000> : vector<2x16xf32>
    %144 = vector.multi_reduction <maximumf>, %141, %cst_55 [2] : vector<2x16x16xf32> to vector<2x16xf32>
    %145 = vector.shape_cast %144 : vector<2x16xf32> to vector<2x16x1xf32>
    %146 = arith.maximumf %143, %145 : vector<2x16x1xf32>
    %147 = vector.broadcast %146 : vector<2x16x1xf32> to vector<2x16x16xf32>
    %148 = arith.subf %139, %147 : vector<2x16x16xf32>
    %149 = math.exp %148 : vector<2x16x16xf32>
    %150 = vector.broadcast %146 : vector<2x16x1xf32> to vector<2x16x16xf32>
    %151 = arith.subf %141, %150 : vector<2x16x16xf32>
    %152 = math.exp %151 : vector<2x16x16xf32>
    %cst_56 = arith.constant dense<0.000000e+00> : vector<2x16xf32>
    %153 = vector.multi_reduction <add>, %149, %cst_56 [2] : vector<2x16x16xf32> to vector<2x16xf32>
    %154 = vector.shape_cast %153 : vector<2x16xf32> to vector<2x16x1xf32>
    %cst_57 = arith.constant dense<0.000000e+00> : vector<2x16xf32>
    %155 = vector.multi_reduction <add>, %152, %cst_57 [2] : vector<2x16x16xf32> to vector<2x16xf32>
    %156 = vector.shape_cast %155 : vector<2x16xf32> to vector<2x16x1xf32>
    %157 = arith.addf %154, %156 : vector<2x16x1xf32>
    %158 = vector.extract_strided_slice %23 {offsets = [0, 0, 24], sizes = [2, 16, 8], strides = [1, 1, 1]} : vector<2x16x32xf32> to vector<2x16x8xf32>
    "tpu.trace_start"() <{level = 10 : i32, message = "nqk,nkd->nqd"}> : () -> ()
    %cst_58 = arith.constant dense<0.000000e+00> : vector<2x16x8xf32>
    %159 = tpu.matmul %149, %158, %cst_58 {dimension_numbers = #tpu.dot_dimension_numbers<[2], [1], [1], [2], [0, 0, 0, 1, 1, 2], [0], [0]>} : vector<2x16x16xf32>, vector<2x16x8xf32>, vector<2x16x8xf32> -> vector<2x16x8xf32>
    "tpu.trace_stop"() : () -> ()
    %160 = vector.extract_strided_slice %27 {offsets = [0, 0, 24], sizes = [2, 16, 8], strides = [1, 1, 1]} : vector<2x16x32xf32> to vector<2x16x8xf32>
    "tpu.trace_start"() <{level = 10 : i32, message = "nqk,nkd->nqd"}> : () -> ()
    %cst_59 = arith.constant dense<0.000000e+00> : vector<2x16x8xf32>
    %161 = tpu.matmul %152, %160, %cst_59 {dimension_numbers = #tpu.dot_dimension_numbers<[2], [1], [1], [2], [0, 0, 0, 1, 1, 2], [0], [0]>} : vector<2x16x16xf32>, vector<2x16x8xf32>, vector<2x16x8xf32> -> vector<2x16x8xf32>
    "tpu.trace_stop"() : () -> ()
    %162 = arith.addf %159, %161 : vector<2x16x8xf32>
    %163 = tpu.reciprocal %157 {approx = true} : vector<2x16x1xf32> -> vector<2x16x1xf32>
    %164 = vector.broadcast %163 : vector<2x16x1xf32> to vector<2x16x8xf32>
    %165 = arith.mulf %162, %164 : vector<2x16x8xf32>
    %166 = vector.shape_cast %165 : vector<2x16x8xf32> to vector<32x8xf32>
    %167 = vector.extract_strided_slice %28 {offsets = [24, 0], sizes = [8, 32], strides = [1, 1]} : vector<32x32xf32> to vector<8x32xf32>
    %cst_60 = arith.constant dense<0.000000e+00> : vector<32x32xf32>
    %168 = tpu.matmul %166, %167, %cst_60 {dimension_numbers = #tpu.dot_dimension_numbers<[1], [0], [0], [1], [0, 0, 1, 1], [], []>} : vector<32x8xf32>, vector<8x32xf32>, vector<32x32xf32> -> vector<32x32xf32>
    %169 = arith.addf %134, %168 : vector<32x32xf32>
    %170 = arith.addf %1, %169 : vector<32x32xf32>
    %c0_61 = arith.constant 0 : index
    %c0_62 = arith.constant 0 : index
    %171 = vector.load %arg9[%c0_61, %c0_62] : memref<1x32xf32, #tpu.memory_space<vmem>>, vector<1x32xf32>
    %172 = vector.broadcast %171 : vector<1x32xf32> to vector<32x32xf32>
    %173 = arith.addf %170, %172 : vector<32x32xf32>
    %c0_63 = arith.constant 0 : index
    %c0_64 = arith.constant 0 : index
    %174 = vector.load %arg10[%c0_63, %c0_64] : memref<1x32xf32, #tpu.memory_space<vmem>>, vector<1x32xf32>
    %c0_65 = arith.constant 0 : index
    %c0_66 = arith.constant 0 : index
    %175 = vector.load %arg11[%c0_65, %c0_66] : memref<1x32xf32, #tpu.memory_space<vmem>>, vector<1x32xf32>
    %cst_67 = arith.constant dense<0.000000e+00> : vector<32xf32>
    %176 = vector.multi_reduction <add>, %173, %cst_67 [1] : vector<32x32xf32> to vector<32xf32>
    %177 = vector.shape_cast %176 : vector<32xf32> to vector<32x1xf32>
    %cst_68 = arith.constant 3.200000e+01 : f32
    %178 = vector.broadcast %cst_68 : f32 to vector<32x1xf32>
    %179 = arith.divf %177, %178 : vector<32x1xf32>
    %180 = vector.broadcast %179 : vector<32x1xf32> to vector<32x32xf32>
    %181 = arith.subf %173, %180 : vector<32x32xf32>
    %182 = arith.mulf %181, %181 : vector<32x32xf32>
    %cst_69 = arith.constant dense<0.000000e+00> : vector<32xf32>
    %183 = vector.multi_reduction <add>, %182, %cst_69 [1] : vector<32x32xf32> to vector<32xf32>
    %184 = vector.shape_cast %183 : vector<32xf32> to vector<32x1xf32>
    %cst_70 = arith.constant 3.200000e+01 : f32
    %185 = vector.broadcast %cst_70 : f32 to vector<32x1xf32>
    %186 = arith.divf %184, %185 : vector<32x1xf32>
    %187 = vector.broadcast %179 : vector<32x1xf32> to vector<32x32xf32>
    %188 = arith.subf %173, %187 : vector<32x32xf32>
    %cst_71 = arith.constant 9.99999974E-6 : f32
    %189 = vector.broadcast %cst_71 : f32 to vector<32x1xf32>
    %190 = arith.addf %186, %189 : vector<32x1xf32>
    %191 = math.rsqrt %190 : vector<32x1xf32>
    %192 = vector.broadcast %191 : vector<32x1xf32> to vector<32x32xf32>
    %193 = arith.mulf %188, %192 : vector<32x32xf32>
    %194 = vector.broadcast %174 : vector<1x32xf32> to vector<32x32xf32>
    %195 = arith.mulf %193, %194 : vector<32x32xf32>
    %196 = vector.broadcast %175 : vector<1x32xf32> to vector<32x32xf32>
    %197 = arith.addf %195, %196 : vector<32x32xf32>
    %198 = vector.shape_cast %197 : vector<32x32xf32> to vector<2x16x32xf32>
    %c0_72 = arith.constant 0 : index
    %c0_73 = arith.constant 0 : index
    %c0_74 = arith.constant 0 : index
    %199 = vector.load %arg12[%c0_72, %c0_73, %c0_74] : memref<2x16x32xf32, #tpu.memory_space<vmem>>, vector<2x16x32xf32>
    tpu.vector_store %arg12[%c0_72, %c0_73, %c0_74], %198 {strides = array<i32>} : memref<2x16x32xf32, #tpu.memory_space<vmem>>, vector<2x16x32xf32>,
    return
  }
  func.func @transform_0(%arg0: i32) -> (i32, i32, i32) {
    %c0_i32 = arith.constant 0 : i32
    %c0_i32_0 = arith.constant 0 : i32
    %c0_i32_1 = arith.constant 0 : i32
    %c0_i32_2 = arith.constant 0 : i32
    return %c0_i32, %c0_i32_0, %c0_i32_1 : i32, i32, i32
  }
  func.func @transform_1(%arg0: i32) -> (i32, i32, i32) {
    %c0_i32 = arith.constant 0 : i32
    %c0_i32_0 = arith.constant 0 : i32
    %c0_i32_1 = arith.constant 0 : i32
    %c0_i32_2 = arith.constant 0 : i32
    return %c0_i32, %c0_i32_0, %c0_i32_1 : i32, i32, i32
  }
  func.func @transform_2(%arg0: i32) -> (i32, i32, i32) {
    %c0_i32 = arith.constant 0 : i32
    %c0_i32_0 = arith.constant 0 : i32
    %c0_i32_1 = arith.constant 0 : i32
    %c0_i32_2 = arith.constant 0 : i32
    return %c0_i32, %c0_i32_0, %c0_i32_1 : i32, i32, i32
  }
  func.func @transform_3(%arg0: i32) -> (i32, i32) {
    %c0_i32 = arith.constant 0 : i32
    %c0_i32_0 = arith.constant 0 : i32
    %c0_i32_1 = arith.constant 0 : i32
    return %c0_i32, %c0_i32_0 : i32, i32
  }
  func.func @transform_4(%arg0: i32) -> (i32, i32) {
    %c0_i32 = arith.constant 0 : i32
    %c0_i32_0 = arith.constant 0 : i32
    %c0_i32_1 = arith.constant 0 : i32
    return %c0_i32, %c0_i32_0 : i32, i32
  }
  func.func @transform_5(%arg0: i32) -> (i32, i32) {
    %c0_i32 = arith.constant 0 : i32
    %c0_i32_0 = arith.constant 0 : i32
    %c0_i32_1 = arith.constant 0 : i32
    return %c0_i32, %c0_i32_0 : i32, i32
  }
  func.func @transform_6(%arg0: i32) -> (i32, i32) {
    %c0_i32 = arith.constant 0 : i32
    %c0_i32_0 = arith.constant 0 : i32
    %c0_i32_1 = arith.constant 0 : i32
    return %c0_i32, %c0_i32_0 : i32, i32
  }
  func.func @transform_7(%arg0: i32) -> (i32, i32) {
    %c0_i32 = arith.constant 0 : i32
    %c0_i32_0 = arith.constant 0 : i32
    %c0_i32_1 = arith.constant 0 : i32
    return %c0_i32, %c0_i32_0 : i32, i32
  }
  func.func @transform_8(%arg0: i32) -> (i32, i32) {
    %c0_i32 = arith.constant 0 : i32
    %c0_i32_0 = arith.constant 0 : i32
    %c0_i32_1 = arith.constant 0 : i32
    return %c0_i32, %c0_i32_0 : i32, i32
  }
  func.func @transform_9(%arg0: i32) -> (i32, i32) {
    %c0_i32 = arith.constant 0 : i32
    %c0_i32_0 = arith.constant 0 : i32
    %c0_i32_1 = arith.constant 0 : i32
    return %c0_i32, %c0_i32_0 : i32, i32
  }
  func.func @transform_10(%arg0: i32) -> (i32, i32) {
    %c0_i32 = arith.constant 0 : i32
    %c0_i32_0 = arith.constant 0 : i32
    %c0_i32_1 = arith.constant 0 : i32
    return %c0_i32, %c0_i32_0 : i32, i32
  }
  func.func @transform_11(%arg0: i32) -> (i32, i32, i32) {
    %c0_i32 = arith.constant 0 : i32
    %c0_i32_0 = arith.constant 0 : i32
    %c0_i32_1 = arith.constant 0 : i32
    %c0_i32_2 = arith.constant 0 : i32
    return %c0_i32, %c0_i32_0, %c0_i32_1 : i32, i32, i32
  }
}

</mosaic_0001>

<bundles_post_ra>
// kernel: multimodal_encoder.6
= control target key start
LH: loop header
LB: loop body
LE: loop exit
PB: predicated region body
PF: predicated region fallthrough
CT: control target
= control target key end

     0   :  { %vm40_vm0 = vcmask 195584   ;;  %vm173_vm1 = vcmask 523264   ;;  %vm273_vm2 = vcmask 261120   ;;  %s561_s1 = inlined_call_operand.vmem [shape: f32[24,64], index: 1, kind: input, shape index: {}]   ;;  %s562_s0 = inlined_call_operand.vmem [shape: f32[32,24], index: 0, kind: input, shape index: {}]   ;;  %s563_s3 = inlined_call_operand.vmem [shape: f32[64,32], index: 3, kind: input, shape index: {}]   ;;  %s564_s2 = inlined_call_operand.vmem [shape: f32[1,64], index: 2, kind: input, shape index: {}]   ;;  %s565_s4 = inlined_call_operand.vmem [shape: f32[1,32], index: 4, kind: input, shape index: {}]   ;;  %s566_s5 = inlined_call_operand.vmem [shape: f32[1,32], index: 5, kind: input, shape index: {}]   ;;  %s567_s6 = inlined_call_operand.vmem [shape: f32[1,32], index: 6, kind: input, shape index: {}]   ;;  %s568_s7 = inlined_call_operand.vmem [shape: f32[32,32], index: 7, kind: output, shape index: {}]  }
   0x1   :  { %v32_v0 = vld [vmem:[%s561_s1 + $0x10] sm:$0xff]  ;;  %v31_v1 = vld [vmem:[%s561_s1 + $0x8] sm:$0xff]  ;;  %v26_v2 = vld [vmem:[%s562_s0] sm:$0xff] }
   0x2   :  { %386 = vmatprep.subr.mxu0 %v32_v0  ;;  %v30_v3 = vld [vmem:[%s561_s1] sm:$0xff]  ;;  %392 = vmatprep.mubr.msk.f32.mxu0 %vm40_vm0, %v26_v2  ;;  %v27_v4 = vld [vmem:[%s562_s0 + $0x8] sm:$0xff]  ;;  %v28_v5 = vld [vmem:[%s562_s0 + $0x10] sm:$0xff] }
   0x3   :  { %387 = vmatpush3.msra.mxu0 %v32_v0  ;;  %v29_v6 = vld [vmem:[%s562_s0 + $0x18] sm:$0xff]  ;;  %v164_v8 = vld [vmem:[%s563_s3 + $0x30] sm:$0xff]  ;;  %v163_v9 = vld [vmem:[%s563_s3 + $0x28] sm:$0xff] }
   0x4   :  { %388 = vmatprep.subr.mxu0 %v31_v1  ;;  %v165_v7 = vld [vmem:[%s563_s3 + $0x38] sm:$0xff]  ;;  %v162_v10 = vld [vmem:[%s563_s3 + $0x20] sm:$0xff]  ;;  %v160_v12 = vld [vmem:[%s563_s3 + $0x10] sm:$0xff] }
   0x5   :  { %389 = vmatpush3.msra.mxu0 %v31_v1  ;;  %398 = vmatprep.subr.mxu1 %v165_v7  ;;  %v161_v11 = vld [vmem:[%s563_s3 + $0x18] sm:$0xff]  ;;  %v159_v13 = vld [vmem:[%s563_s3 + $0x8] sm:$0xff]  ;;  %v158_v14 = vld [vmem:[%s563_s3] sm:$0xff] }
   0x6   :  { %390 = vmatprep.subr.mxu0 %v30_v3  ;;  %399 = vmatpush3.msra.mxu1 %v165_v7  ;;  %v355_v15 = vld [vmem:[%s564_s2] ss:$0 sm:$0xff] }
   0x7   :  { %391 = vmatpush3.msra.mxu0 %v30_v3  ;;  %400 = vmatprep.subr.mxu1 %v164_v8  ;;  %v360_v45 = vld [vmem:[%s565_s4] ss:$0 sm:$0xff] }
   0x8   :  { %393 = vmatmul.mubr.msk.f32.vlgmr.msra.gmra.mxu0 %vm40_vm0, %v27_v4  ;;  %401 = vmatpush3.msra.mxu1 %v164_v8 }
   0x9   :  { %395 = vmatprep.mubr.msk.f32.mxu0 %vm40_vm0, %v28_v5  ;;  %402 = vmatprep.subr.mxu1 %v163_v9 }
   0xa   :  { %403 = vmatpush3.msra.mxu1 %v163_v9 }
   0xb   :  { %404 = vmatprep.subr.mxu1 %v162_v10 }
   0xc   :  { %396 = vmatmul.mubr.msk.f32.gmra.mxu0 %vm40_vm0, %v29_v6  ;;  %405 = vmatpush3.msra.mxu1 %v162_v10 }
   0xd   :  { %406 = vmatprep.subr.mxu1 %v161_v11 }
   0xe   :  { %407 = vmatpush3.msra.mxu1 %v161_v11 }
   0xf   :  { %408 = vmatprep.subr.mxu1 %v160_v12 }
  0x10   :  { %409 = vmatpush3.msra.mxu1 %v160_v12 }
  0x11   :  { %410 = vmatprep.subr.mxu1 %v159_v13 }
  0x12   :  { %411 = vmatpush3.msra.mxu1 %v159_v13 }
  0x13   :  { %412 = vmatprep.subr.mxu1 %v158_v14 }
  0x14   :  { %413 = vmatpush3.msra.mxu1 %v158_v14 }
  0xc8   :  { %v394_v16 = vpop.f32.mrf.mxu0 }
  0xc9   :  { %v125_v17 = vadd.f32 %v394_v16, %v355_v15 }
  0xca   :  { %v119_v18 = vpop.f32.mrf.mxu0 }
  0xcb   :  { %v143_v19 = vmul.f32 0.70710677, %v125_v17  ;;  %v120_v20 = vadd.f32 %v355_v15, %v119_v18  ;;  %v139_v34 = vmul.f32 0.5, %v125_v17 }
  0xcc   :  { %v397_v21 = vpop.f32.mrf.mxu0 }
  0xcd   :  { %420 = verf.f32 %v143_v19  ;;  %v142_v22 = vmul.f32 0.70710677, %v120_v20  ;;  %v135_v23 = vadd.f32 %v397_v21, %v355_v15  ;;  %v138_v31 = vmul.f32 0.5, %v120_v20 }
  0xce   :  { %v129_v24 = vpop.f32.mrf.mxu0 }
  0xcf   :  { %422 = verf.f32 %v142_v22  ;;  %v145_v25 = vmul.f32 0.70710677, %v135_v23  ;;  %v130_v26 = vadd.f32 %v355_v15, %v129_v24  ;;  %v141_v41 = vmul.f32 0.5, %v135_v23 }
  0xd1   :  { %424 = verf.f32 %v145_v25  ;;  %v144_v27 = vmul.f32 0.70710677, %v130_v26  ;;  %v140_v39 = vmul.f32 0.5, %v130_v26  ;;  %v365_v26 = vld [vmem:[%s566_s5] ss:$0 sm:$0xff] }
  0xd3   :  { %426 = verf.f32 %v144_v27 }
  0xda   :  { %v421_v28 = vpop.eup %420 }
  0xdb   :  { %v151_v30 = vadd.f32 1.0, %v421_v28  ;;  %v366_v28 = vld [vmem:[%s567_s6] ss:$0 sm:$0xff] }
  0xdc   :  { %v423_v29 = vpop.eup %422 }
  0xdd   :  { %v150_v32 = vadd.f32 1.0, %v423_v29  ;;  %v155_v37 = vmul.f32 %v151_v30, %v139_v34 }
  0xde   :  { %v425_v33 = vpop.eup %424 }
  0xdf   :  { %v154_v35 = vmul.f32 %v150_v32, %v138_v31  ;;  %v153_v38 = vadd.f32 1.0, %v425_v33 }
  0xe0   :  { %v427_v36 = vpop.eup %426 }
  0xe1   :  { %v152_v40 = vadd.f32 1.0, %v427_v36  ;;  %414 = vmatprep.mubr.msk.f32.mxu1 %vm173_vm1, %v154_v35  ;;  %v157_v43 = vmul.f32 %v153_v38, %v141_v41 }
  0xe2   :  { %415 = vmatmul.mubr.msk.f32.vlgmr.msra.gmra.mxu1 %vm173_vm1, %v155_v37 }
  0xe3   :  { %v156_v42 = vmul.f32 %v152_v40, %v140_v39 }
  0xe5   :  { %417 = vmatprep.mubr.msk.f32.mxu1 %vm173_vm1, %v156_v42 }
  0xe6   :  { %418 = vmatmul.mubr.msk.f32.gmra.mxu1 %vm173_vm1, %v157_v43 }
 0x1a2   :  { %v416_v44 = vpop.f32.mrf.mxu1 }
 0x1a3   :  { %v258_v49 = vadd.f32 %v416_v44, %v360_v45 }
 0x1a4   :  { %v252_v46 = vpop.f32.mrf.mxu1 }
 0x1a5   :  { %v253_v47 = vadd.f32 %v360_v45, %v252_v46  ;;  %v277_v55 = vsel %vm273_vm2, %v258_v49, 0.0 }
 0x1a6   :  { %v419_v48 = vpop.f32.mrf.mxu1 }
 0x1a7   :  { %v274_v50 = vsel %vm273_vm2, %v253_v47, 0.0  ;;  %v268_v53 = vadd.f32 %v419_v48, %v360_v45 }
 0x1a8   :  { %v262_v51 = vpop.f32.mrf.mxu1  ;;  %275 = vadd.xlane.f32.xlu0 %v274_v50 }
 0x1a9   :  { %v263_v52 = vadd.f32 %v360_v45, %v262_v51  ;;  %v283_v56 = vsel %vm273_vm2, %v268_v53, 0.0 }
 0x1ab   :  { %v280_v54 = vsel %vm273_vm2, %v263_v52, 0.0 }
 0x1ac   :  { %281 = vadd.xlane.f32.xlu1 %v280_v54  ;;  %278 = vadd.xlane.f32.xlu0 %v277_v55 }
 0x1b0   :  { %284 = vadd.xlane.f32.xlu1 %v283_v56 }
 0x231   :  { %v276_v57 = vpop.xlane.xlu0 %275 }
 0x232   :  { %v287_v58 = vmul.f32 0.03125, %v276_v57 }
 0x234   :  { %v291_v59 = vsub.f32 %v253_v47, %v287_v58 }
 0x235   :  { %v282_v60 = vpop.xlane.xlu1 %281  ;;  %v279_v61 = vpop.xlane.xlu0 %278 }
 0x236   :  { %v289_v62 = vmul.f32 0.03125, %v282_v60  ;;  %v288_v63 = vmul.f32 0.03125, %v279_v61  ;;  %v295_v0 = vmul.f32 %v291_v59, %v291_v59 }
 0x238   :  { %v293_v1 = vsub.f32 %v263_v52, %v289_v62  ;;  %v292_v2 = vsub.f32 %v258_v49, %v288_v63  ;;  %v299_v3 = vsel %vm273_vm2, %v295_v0, 0.0 }
 0x239   :  { %v285_v4 = vpop.xlane.xlu1 %284  ;;  %300 = vadd.xlane.f32.xlu0 %v299_v3 }
 0x23a   :  { %v290_v5 = vmul.f32 0.03125, %v285_v4  ;;  %v297_v6 = vmul.f32 %v293_v1, %v293_v1  ;;  %v296_v7 = vmul.f32 %v292_v2, %v292_v2 }
 0x23c   :  { %v294_v8 = vsub.f32 %v268_v53, %v290_v5  ;;  %v305_v9 = vsel %vm273_vm2, %v297_v6, 0.0  ;;  %v302_v10 = vsel %vm273_vm2, %v296_v7, 0.0 }
 0x23d   :  { %306 = vadd.xlane.f32.xlu0 %v305_v9  ;;  %303 = vadd.xlane.f32.xlu1 %v302_v10 }
 0x23e   :  { %v298_v11 = vmul.f32 %v294_v8, %v294_v8 }
 0x240   :  { %v308_v12 = vsel %vm273_vm2, %v298_v11, 0.0 }
 0x241   :  { %309 = vadd.xlane.f32.xlu1 %v308_v12 }
 0x2c2   :  { %v301_v13 = vpop.xlane.xlu0 %300 }
 0x2c3   :  { %v311_v14 = vmul.f32 0.03125, %v301_v13 }
 0x2c5   :  { %v315_v15 = vadd.f32 1e-05, %v311_v14 }
 0x2c6   :  { %v304_v16 = vpop.xlane.xlu1 %303  ;;  %v307_v17 = vpop.xlane.xlu0 %306 }
 0x2c7   :  { %428 = vrsqrt.f32 %v315_v15  ;;  %v312_v18 = vmul.f32 0.03125, %v304_v16  ;;  %v313_v19 = vmul.f32 0.03125, %v307_v17 }
 0x2c9   :  { %v316_v20 = vadd.f32 1e-05, %v312_v18  ;;  %v317_v21 = vadd.f32 1e-05, %v313_v19 }
 0x2ca   :  { %v310_v22 = vpop.xlane.xlu1 %309 }
 0x2cb   :  { %430 = vrsqrt.f32 %v316_v20  ;;  %v314_v23 = vmul.f32 0.03125, %v310_v22 }
 0x2cc   :  { %432 = vrsqrt.f32 %v317_v21 }
 0x2cd   :  { %v318_v24 = vadd.f32 1e-05, %v314_v23 }
 0x2cf   :  { %434 = vrsqrt.f32 %v318_v24 }
 0x2d4   :  { %v429_v25 = vpop.eup %428 }
 0x2d5   :  { %v323_v27 = vmul.f32 %v429_v25, %v291_v59 }
 0x2d7   :  { %v333_v29 = vmul.f32 %v365_v26, %v323_v27 }
 0x2d8   :  { %v431_v30 = vpop.eup %430 }
 0x2d9   :  { %v433_v31 = vpop.eup %432  ;;  %v343_v32 = vadd.f32 %v366_v28, %v333_v29  ;;  %v324_v33 = vmul.f32 %v431_v30, %v292_v2 }
 0x2da   :  { %v325_v34 = vmul.f32 %v433_v31, %v293_v1 }
 0x2db   :  { %347 = vst.msk [vmem:[%s568_s7] sm:$0xff] %vm273_vm2, %v343_v32  ;;  %v334_v35 = vmul.f32 %v365_v26, %v324_v33 }
 0x2dc   :  { %v435_v36 = vpop.eup %434  ;;  %v335_v37 = vmul.f32 %v365_v26, %v325_v34 }
 0x2dd   :  { %v344_v38 = vadd.f32 %v366_v28, %v334_v35  ;;  %v326_v39 = vmul.f32 %v435_v36, %v294_v8 }
 0x2de   :  { %v345_v40 = vadd.f32 %v366_v28, %v335_v37 }
 0x2df   :  { %348 = vst.msk [vmem:[%s568_s7 + $0x8] sm:$0xff] %vm273_vm2, %v344_v38  ;;  %v336_v41 = vmul.f32 %v365_v26, %v326_v39 }
 0x2e0   :  { %349 = vst.msk [vmem:[%s568_s7 + $0x10] sm:$0xff] %vm273_vm2, %v345_v40 }
 0x2e1   :  { %v346_v42 = vadd.f32 %v366_v28, %v336_v41 }
 0x2e3   :  { %350 = vst.msk [vmem:[%s568_s7 + $0x18] sm:$0xff] %vm273_vm2, %v346_v42 }

// kernel: multimodal_encoder.7
= control target key start
LH: loop header
LB: loop body
LE: loop exit
PB: predicated region body
PF: predicated region fallthrough
CT: control target
= control target key end

     0   :  { %vm39_vm0 = vcmask 130048   ;;  %vm172_vm1 = vcmask 523264   ;;  %vm272_vm2 = vcmask 261120   ;;  %s550_s1 = inlined_call_operand.vmem [shape: f32[16,64], index: 1, kind: input, shape index: {}]   ;;  %s551_s0 = inlined_call_operand.vmem [shape: f32[32,16], index: 0, kind: input, shape index: {}]   ;;  %s552_s3 = inlined_call_operand.vmem [shape: f32[64,32], index: 3, kind: input, shape index: {}]   ;;  %s553_s2 = inlined_call_operand.vmem [shape: f32[1,64], index: 2, kind: input, shape index: {}]   ;;  %s554_s4 = inlined_call_operand.vmem [shape: f32[1,32], index: 4, kind: input, shape index: {}]   ;;  %s555_s5 = inlined_call_operand.vmem [shape: f32[1,32], index: 5, kind: input, shape index: {}]   ;;  %s556_s6 = inlined_call_operand.vmem [shape: f32[1,32], index: 6, kind: input, shape index: {}]   ;;  %s557_s7 = inlined_call_operand.vmem [shape: f32[32,32], index: 7, kind: output, shape index: {}]  }
   0x1   :  { %v31_v0 = vld [vmem:[%s550_s1 + $0x8] sm:$0xff]  ;;  %v30_v1 = vld [vmem:[%s550_s1] sm:$0xff]  ;;  %v28_v4 = vld [vmem:[%s551_s0 + $0x10] sm:$0xff] }
   0x2   :  { %v26_v2 = vld [vmem:[%s551_s0] sm:$0xff]  ;;  %384 = vmatprep.subr.mxu0 %v31_v0  ;;  %v27_v3 = vld [vmem:[%s551_s0 + $0x8] sm:$0xff]  ;;  %v29_v5 = vld [vmem:[%s551_s0 + $0x18] sm:$0xff] }
   0x3   :  { %388 = vmatprep.mubr.msk.f32.mxu0 %vm39_vm0, %v26_v2  ;;  %385 = vmatpush3.msra.mxu0 %v31_v0  ;;  %v164_v6 = vld [vmem:[%s552_s3 + $0x38] sm:$0xff]  ;;  %v163_v7 = vld [vmem:[%s552_s3 + $0x30] sm:$0xff]  ;;  %v162_v8 = vld [vmem:[%s552_s3 + $0x28] sm:$0xff] }
   0x4   :  { %386 = vmatprep.subr.mxu0 %v30_v1  ;;  %394 = vmatprep.subr.mxu1 %v164_v6  ;;  %v161_v9 = vld [vmem:[%s552_s3 + $0x20] sm:$0xff]  ;;  %v160_v10 = vld [vmem:[%s552_s3 + $0x18] sm:$0xff]  ;;  %v159_v11 = vld [vmem:[%s552_s3 + $0x10] sm:$0xff] }
   0x5   :  { %387 = vmatpush3.msra.mxu0 %v30_v1  ;;  %395 = vmatpush3.msra.mxu1 %v164_v6  ;;  %v158_v12 = vld [vmem:[%s552_s3 + $0x8] sm:$0xff]  ;;  %v157_v13 = vld [vmem:[%s552_s3] sm:$0xff] }
   0x6   :  { %389 = vmatmul.mubr.msk.f32.vlgmr.msra.gmra.mxu0 %vm39_vm0, %v27_v3  ;;  %396 = vmatprep.subr.mxu1 %v163_v7  ;;  %v354_v14 = vld [vmem:[%s553_s2] ss:$0 sm:$0xff] }
   0x7   :  { %391 = vmatprep.mubr.msk.f32.mxu0 %vm39_vm0, %v28_v4  ;;  %397 = vmatpush3.msra.mxu1 %v163_v7  ;;  %v359_v44 = vld [vmem:[%s554_s4] ss:$0 sm:$0xff] }
   0x8   :  { %398 = vmatprep.subr.mxu1 %v162_v8 }
   0x9   :  { %399 = vmatpush3.msra.mxu1 %v162_v8 }
   0xa   :  { %392 = vmatmul.mubr.msk.f32.gmra.mxu0 %vm39_vm0, %v29_v5  ;;  %400 = vmatprep.subr.mxu1 %v161_v9 }
   0xb   :  { %401 = vmatpush3.msra.mxu1 %v161_v9 }
   0xc   :  { %402 = vmatprep.subr.mxu1 %v160_v10 }
   0xd   :  { %403 = vmatpush3.msra.mxu1 %v160_v10 }
   0xe   :  { %404 = vmatprep.subr.mxu1 %v159_v11 }
   0xf   :  { %405 = vmatpush3.msra.mxu1 %v159_v11 }
  0x10   :  { %406 = vmatprep.subr.mxu1 %v158_v12 }
  0x11   :  { %407 = vmatpush3.msra.mxu1 %v158_v12 }
  0x12   :  { %408 = vmatprep.subr.mxu1 %v157_v13 }
  0x13   :  { %409 = vmatpush3.msra.mxu1 %v157_v13 }
  0xc6   :  { %v390_v15 = vpop.f32.mrf.mxu0 }
  0xc7   :  { %v124_v16 = vadd.f32 %v390_v15, %v354_v14 }
  0xc8   :  { %v118_v17 = vpop.f32.mrf.mxu0 }
  0xc9   :  { %v142_v18 = vmul.f32 0.70710677, %v124_v16  ;;  %v119_v19 = vadd.f32 %v354_v14, %v118_v17  ;;  %v138_v33 = vmul.f32 0.5, %v124_v16 }
  0xca   :  { %v393_v20 = vpop.f32.mrf.mxu0 }
  0xcb   :  { %416 = verf.f32 %v142_v18  ;;  %v141_v21 = vmul.f32 0.70710677, %v119_v19  ;;  %v134_v22 = vadd.f32 %v393_v20, %v354_v14  ;;  %v137_v30 = vmul.f32 0.5, %v119_v19 }
  0xcc   :  { %v128_v23 = vpop.f32.mrf.mxu0 }
  0xcd   :  { %418 = verf.f32 %v141_v21  ;;  %v144_v24 = vmul.f32 0.70710677, %v134_v22  ;;  %v129_v25 = vadd.f32 %v354_v14, %v128_v23  ;;  %v140_v40 = vmul.f32 0.5, %v134_v22 }
  0xcf   :  { %420 = verf.f32 %v144_v24  ;;  %v143_v26 = vmul.f32 0.70710677, %v129_v25  ;;  %v139_v38 = vmul.f32 0.5, %v129_v25  ;;  %v364_v25 = vld [vmem:[%s555_s5] ss:$0 sm:$0xff] }
  0xd1   :  { %422 = verf.f32 %v143_v26 }
  0xd8   :  { %v417_v27 = vpop.eup %416 }
  0xd9   :  { %v150_v29 = vadd.f32 1.0, %v417_v27  ;;  %v365_v27 = vld [vmem:[%s556_s6] ss:$0 sm:$0xff] }
  0xda   :  { %v419_v28 = vpop.eup %418 }
  0xdb   :  { %v149_v31 = vadd.f32 1.0, %v419_v28  ;;  %v154_v36 = vmul.f32 %v150_v29, %v138_v33 }
  0xdc   :  { %v421_v32 = vpop.eup %420 }
  0xdd   :  { %v153_v34 = vmul.f32 %v149_v31, %v137_v30  ;;  %v152_v37 = vadd.f32 1.0, %v421_v32 }
  0xde   :  { %v423_v35 = vpop.eup %422 }
  0xdf   :  { %v151_v39 = vadd.f32 1.0, %v423_v35  ;;  %410 = vmatprep.mubr.msk.f32.mxu1 %vm172_vm1, %v153_v34  ;;  %v156_v42 = vmul.f32 %v152_v37, %v140_v40 }
  0xe0   :  { %411 = vmatmul.mubr.msk.f32.vlgmr.msra.gmra.mxu1 %vm172_vm1, %v154_v36 }
  0xe1   :  { %v155_v41 = vmul.f32 %v151_v39, %v139_v38 }
  0xe3   :  { %413 = vmatprep.mubr.msk.f32.mxu1 %vm172_vm1, %v155_v41 }
  0xe4   :  { %414 = vmatmul.mubr.msk.f32.gmra.mxu1 %vm172_vm1, %v156_v42 }
 0x1a0   :  { %v412_v43 = vpop.f32.mrf.mxu1 }
 0x1a1   :  { %v257_v48 = vadd.f32 %v412_v43, %v359_v44 }
 0x1a2   :  { %v251_v45 = vpop.f32.mrf.mxu1 }
 0x1a3   :  { %v252_v46 = vadd.f32 %v359_v44, %v251_v45  ;;  %v276_v54 = vsel %vm272_vm2, %v257_v48, 0.0 }
 0x1a4   :  { %v415_v47 = vpop.f32.mrf.mxu1 }
 0x1a5   :  { %v273_v49 = vsel %vm272_vm2, %v252_v46, 0.0  ;;  %v267_v52 = vadd.f32 %v415_v47, %v359_v44 }
 0x1a6   :  { %v261_v50 = vpop.f32.mrf.mxu1  ;;  %274 = vadd.xlane.f32.xlu0 %v273_v49 }
 0x1a7   :  { %v262_v51 = vadd.f32 %v359_v44, %v261_v50  ;;  %v282_v55 = vsel %vm272_vm2, %v267_v52, 0.0 }
 0x1a9   :  { %v279_v53 = vsel %vm272_vm2, %v262_v51, 0.0 }
 0x1aa   :  { %280 = vadd.xlane.f32.xlu1 %v279_v53  ;;  %277 = vadd.xlane.f32.xlu0 %v276_v54 }
 0x1ae   :  { %283 = vadd.xlane.f32.xlu1 %v282_v55 }
 0x22f   :  { %v275_v56 = vpop.xlane.xlu0 %274 }
 0x230   :  { %v286_v57 = vmul.f32 0.03125, %v275_v56 }
 0x232   :  { %v290_v58 = vsub.f32 %v252_v46, %v286_v57 }
 0x233   :  { %v281_v59 = vpop.xlane.xlu1 %280  ;;  %v278_v60 = vpop.xlane.xlu0 %277 }
 0x234   :  { %v288_v61 = vmul.f32 0.03125, %v281_v59  ;;  %v287_v62 = vmul.f32 0.03125, %v278_v60  ;;  %v294_v63 = vmul.f32 %v290_v58, %v290_v58 }
 0x236   :  { %v292_v0 = vsub.f32 %v262_v51, %v288_v61  ;;  %v291_v1 = vsub.f32 %v257_v48, %v287_v62  ;;  %v298_v2 = vsel %vm272_vm2, %v294_v63, 0.0 }
 0x237   :  { %v284_v3 = vpop.xlane.xlu1 %283  ;;  %299 = vadd.xlane.f32.xlu0 %v298_v2 }
 0x238   :  { %v289_v4 = vmul.f32 0.03125, %v284_v3  ;;  %v296_v5 = vmul.f32 %v292_v0, %v292_v0  ;;  %v295_v6 = vmul.f32 %v291_v1, %v291_v1 }
 0x23a   :  { %v293_v7 = vsub.f32 %v267_v52, %v289_v4  ;;  %v304_v8 = vsel %vm272_vm2, %v296_v5, 0.0  ;;  %v301_v9 = vsel %vm272_vm2, %v295_v6, 0.0 }
 0x23b   :  { %305 = vadd.xlane.f32.xlu0 %v304_v8  ;;  %302 = vadd.xlane.f32.xlu1 %v301_v9 }
 0x23c   :  { %v297_v10 = vmul.f32 %v293_v7, %v293_v7 }
 0x23e   :  { %v307_v11 = vsel %vm272_vm2, %v297_v10, 0.0 }
 0x23f   :  { %308 = vadd.xlane.f32.xlu1 %v307_v11 }
 0x2c0   :  { %v300_v12 = vpop.xlane.xlu0 %299 }
 0x2c1   :  { %v310_v13 = vmul.f32 0.03125, %v300_v12 }
 0x2c3   :  { %v314_v14 = vadd.f32 1e-05, %v310_v13 }
 0x2c4   :  { %v303_v15 = vpop.xlane.xlu1 %302  ;;  %v306_v16 = vpop.xlane.xlu0 %305 }
 0x2c5   :  { %424 = vrsqrt.f32 %v314_v14  ;;  %v311_v17 = vmul.f32 0.03125, %v303_v15  ;;  %v312_v18 = vmul.f32 0.03125, %v306_v16 }
 0x2c7   :  { %v315_v19 = vadd.f32 1e-05, %v311_v17  ;;  %v316_v20 = vadd.f32 1e-05, %v312_v18 }
 0x2c8   :  { %v309_v21 = vpop.xlane.xlu1 %308 }
 0x2c9   :  { %426 = vrsqrt.f32 %v315_v19  ;;  %v313_v22 = vmul.f32 0.03125, %v309_v21 }
 0x2ca   :  { %428 = vrsqrt.f32 %v316_v20 }
 0x2cb   :  { %v317_v23 = vadd.f32 1e-05, %v313_v22 }
 0x2cd   :  { %430 = vrsqrt.f32 %v317_v23 }
 0x2d2   :  { %v425_v24 = vpop.eup %424 }
 0x2d3   :  { %v322_v26 = vmul.f32 %v425_v24, %v290_v58 }
 0x2d5   :  { %v332_v28 = vmul.f32 %v364_v25, %v322_v26 }
 0x2d6   :  { %v427_v29 = vpop.eup %426 }
 0x2d7   :  { %v429_v30 = vpop.eup %428  ;;  %v342_v31 = vadd.f32 %v365_v27, %v332_v28  ;;  %v323_v32 = vmul.f32 %v427_v29, %v291_v1 }
 0x2d8   :  { %v324_v33 = vmul.f32 %v429_v30, %v292_v0 }
 0x2d9   :  { %346 = vst.msk [vmem:[%s557_s7] sm:$0xff] %vm272_vm2, %v342_v31  ;;  %v333_v34 = vmul.f32 %v364_v25, %v323_v32 }
 0x2da   :  { %v431_v35 = vpop.eup %430  ;;  %v334_v36 = vmul.f32 %v364_v25, %v324_v33 }
 0x2db   :  { %v343_v37 = vadd.f32 %v365_v27, %v333_v34  ;;  %v325_v38 = vmul.f32 %v431_v35, %v293_v7 }
 0x2dc   :  { %v344_v39 = vadd.f32 %v365_v27, %v334_v36 }
 0x2dd   :  { %347 = vst.msk [vmem:[%s557_s7 + $0x8] sm:$0xff] %vm272_vm2, %v343_v37  ;;  %v335_v40 = vmul.f32 %v364_v25, %v325_v38 }
 0x2de   :  { %348 = vst.msk [vmem:[%s557_s7 + $0x10] sm:$0xff] %vm272_vm2, %v344_v39 }
 0x2df   :  { %v345_v41 = vadd.f32 %v365_v27, %v335_v40 }
 0x2e1   :  { %349 = vst.msk [vmem:[%s557_s7 + $0x18] sm:$0xff] %vm272_vm2, %v345_v41 }

// kernel: multimodal_encoder.11
= control target key start
LH: loop header
LB: loop body
LE: loop exit
PB: predicated region body
PF: predicated region fallthrough
CT: control target
= control target key end

     0   :  { %vm66_vm0 = vcmask 261120   ;;  %vm372_vm1 = vcmask 64512   ;;  %vm709_vm2 = vcmask 130048   ;;  %s4710_s23 = smov 80   ;;  %s4711_s24 = smov 104   ;;  %s5473_s3 = inlined_call_operand.vmem [shape: f32[32,32], index: 3, kind: input, shape index: {}]   ;;  %s5474_s5 = inlined_call_operand.vmem [shape: f32[32,64], index: 5, kind: input, shape index: {}]   ;;  %s5475_s0 = inlined_call_operand.vmem [shape: f32[2,16,32], index: 0, kind: input, shape index: {}]   ;;  %s5476_s1 = inlined_call_operand.vmem [shape: f32[2,16,32], index: 1, kind: input, shape index: {}]   ;;  %s5477_s2 = inlined_call_operand.vmem [shape: f32[2,16,32], index: 2, kind: input, shape index: {}]   ;;  %s5478_s6 = inlined_call_operand.vmem [shape: f32[1,64], index: 6, kind: input, shape index: {}]   ;;  %s5479_s4 = inlined_call_operand.vmem [shape: f32[1,32], index: 4, kind: input, shape index: {}]   ;;  %s5480_s7 = inlined_call_operand.vmem [shape: f32[32,32], index: 7, kind: input, shape index: {}]   ;;  %s5481_s8 = inlined_call_operand.vmem [shape: f32[1,32], index: 8, kind: input, shape index: {}]   ;;  %s5482_s9 = inlined_call_operand.vmem [shape: f32[1,32], index: 9, kind: input, shape index: {}]   ;;  %s5483_s10 = inlined_call_operand.vmem [shape: f32[1,32], index: 10, kind: input, shape index: {}]   ;;  %s5484_s11 = inlined_call_operand.vmem [shape: f32[2,16,32], index: 11, kind: output, shape index: {}]  }
   0x1   :  { %v58_v0 = vld [vmem:[%s5473_s3 + $0x18] sm:$0xff]  ;;  %v57_v2 = vld [vmem:[%s5473_s3 + $0x10] sm:$0xff]  ;;  %v56_v4 = vld [vmem:[%s5473_s3 + $0x8] sm:$0xff]  ;;  %s4712_s27 = smov 72  }
   0x2   :  { %v53_v1 = vld [vmem:[%s5474_s5 + $0x18] sm:$0xff]  ;;  %4293 = vmatprep.subr.mxu0 %v58_v0  ;;  %v52_v3 = vld [vmem:[%s5474_s5 + $0x10] sm:$0xff]  ;;  %v51_v5 = vld [vmem:[%s5474_s5 + $0x8] sm:$0xff] }
   0x3   :  { %4307 = vmatprep.subr.mxu1 %v53_v1  ;;  %4294 = vmatpush3.msra.mxu0 %v58_v0  ;;  %v55_v6 = vld [vmem:[%s5473_s3] sm:$0xff]  ;;  %v39_v10 = vld [vmem:[%s5475_s0 + $0x8] sm:$0xff]  ;;  %v40_v12 = vld [vmem:[%s5475_s0 + $0x10] sm:$0xff] }
   0x4   :  { %4308 = vmatpush3.msra.mxu1 %v53_v1  ;;  %4295 = vmatprep.subr.mxu0 %v57_v2  ;;  %v50_v7 = vld [vmem:[%s5474_s5] sm:$0xff]  ;;  %v43_v11 = vld [vmem:[%s5476_s1 + $0x8] sm:$0xff]  ;;  %v44_v13 = vld [vmem:[%s5476_s1 + $0x10] sm:$0xff]  ;;  %s4709_s5 = smov 112  }
   0x5   :  { %4309 = vmatprep.subr.mxu1 %v52_v3  ;;  %4296 = vmatpush3.msra.mxu0 %v57_v2  ;;  %v38_v8 = vld [vmem:[%s5475_s0] sm:$0xff]  ;;  %v45_v14 = vld [vmem:[%s5476_s1 + $0x18] sm:$0xff]  ;;  %v47_v17 = vld [vmem:[%s5477_s2 + $0x8] sm:$0xff] }
   0x6   :  { %4310 = vmatpush3.msra.mxu1 %v52_v3  ;;  %4297 = vmatprep.subr.mxu0 %v56_v4  ;;  %v42_v9 = vld [vmem:[%s5476_s1] sm:$0xff]  ;;  %v41_v15 = vld [vmem:[%s5475_s0 + $0x18] sm:$0xff]  ;;  %v48_v18 = vld [vmem:[%s5477_s2 + $0x10] sm:$0xff] }
   0x7   :  { %4311 = vmatprep.subr.mxu1 %v51_v5  ;;  %4298 = vmatpush3.msra.mxu0 %v56_v4  ;;  %v46_v16 = vld [vmem:[%s5477_s2] sm:$0xff]  ;;  %v49_v19 = vld [vmem:[%s5477_s2 + $0x18] sm:$0xff]  ;;  %s4706_s2 = smov 96  }
   0x8   :  { %4312 = vmatpush3.msra.mxu1 %v51_v5  ;;  %4299 = vmatprep.subr.mxu0 %v55_v6  ;;  %v3997_v20 = vld [vmem:[%s5478_s6] ss:$0 sm:$0xff]  ;;  %s4708_s6 = smov 88  }
   0x9   :  { %4313 = vmatprep.subr.mxu1 %v50_v7  ;;  %4300 = vmatpush3.msra.mxu0 %v55_v6  ;;  %v3992_v24 = vld [vmem:[%s5479_s4] ss:$0 sm:$0xff]  ;;  %s4707_s4 = smov 120  }
   0xa   :  { %4301 = vmatprep.mubr.msk.f32.mxu0 %vm66_vm0, %v38_v8  ;;  %4314 = vmatpush3.msra.mxu1 %v50_v7 }
   0xb   :  { %4315 = vmatprep.mubr.msk.f32.mxu1 %vm66_vm0, %v42_v9  ;;  %4302 = vmatmul.mubr.msk.f32.vlgmr.msra.gmra.mxu0 %vm66_vm0, %v39_v10 }
   0xc   :  { %4316 = vmatmul.mubr.msk.f32.vlgmr.msra.gmra.mxu1 %vm66_vm0, %v43_v11  ;;  %4321 = vmatprep.subr.mxu0 %v53_v1 }
   0xd   :  { %4304 = vmatprep.mubr.msk.f32.mxu0 %vm66_vm0, %v40_v12  ;;  %4322 = vmatpush3.msra.mxu0 %v53_v1 }
   0xe   :  { %4318 = vmatprep.mubr.msk.f32.mxu1 %vm66_vm0, %v44_v13  ;;  %4323 = vmatprep.subr.mxu0 %v52_v3 }
   0xf   :  { %4324 = vmatpush3.msra.mxu0 %v52_v3 }
  0x10   :  { %4319 = vmatmul.mubr.msk.f32.gmra.mxu1 %vm66_vm0, %v45_v14  ;;  %4305 = vmatmul.mubr.msk.f32.gmra.mxu0 %vm66_vm0, %v41_v15 }
  0x11   :  { %4325 = vmatprep.subr.mxu0 %v51_v5  ;;  %4329 = vmatprep.mubr.msk.f32.mxu0 %vm66_vm0, %v46_v16 }
  0x12   :  { %4326 = vmatpush3.msra.mxu0 %v51_v5 }
  0x13   :  { %4327 = vmatprep.subr.mxu0 %v50_v7 }
  0x14   :  { %4328 = vmatpush3.msra.mxu0 %v50_v7 }
  0x15   :  { %4330 = vmatmul.mubr.msk.f32.vlgmr.msra.gmra.mxu0 %vm66_vm0, %v47_v17 }
  0x16   :  { %4332 = vmatprep.mubr.msk.f32.mxu0 %vm66_vm0, %v48_v18 }
  0x19   :  { %4333 = vmatmul.mubr.msk.f32.gmra.mxu0 %vm66_vm0, %v49_v19 }
  0xcb   :  { %v4303_v21 = vpop.f32.mrf.mxu0 }
  0xcc   :  { %v4317_v22 = vpop.f32.mrf.mxu1  ;;  %v151_v33 = vadd.f32 %v4303_v21, %v3992_v24 }
  0xcd   :  { %v4848_v23 = vadd.f32 %v4317_v22, %v3997_v20  ;;  %v145_v25 = vpop.f32.mrf.mxu0 }
  0xce   :  { %v248_v26 = vpop.f32.mrf.mxu1  ;;  %v146_v27 = vadd.f32 %v3992_v24, %v145_v25  ;;  %v4881_v39 = vmul.f32 0.35355338, %v151_v33 }
  0xcf   :  { %v4853_v28 = vadd.f32 %v3997_v20, %v248_v26  ;;  %966 = vrot.lane.b32.xlu1 %v4848_v23, %s4706_s2  ;;  %4335 = vmatprep.subr.msk.mxu1 %vm372_vm1, %v4848_v23 }
  0xd0   :  { %v4320_v29 = vpop.f32.mrf.mxu1  ;;  %4336 = vmatpush3.xpose.msk.msra.mxu1 %vm372_vm1, %v4848_v23  ;;  %v4861_v30 = vmul.f32 0.35355338, %v146_v27  ;;  %v4306_v31 = vpop.f32.mrf.mxu0 }
  0xd1   :  { %v4863_v32 = vadd.f32 %v4320_v29, %v3997_v20  ;;  %4337 = vmatprep.subr.msk.mxu1 %vm372_vm1, %v4853_v28  ;;  %v161_v42 = vadd.f32 %v4306_v31, %v3992_v24 }
  0xd2   :  { %v258_v34 = vpop.f32.mrf.mxu1  ;;  %v155_v35 = vpop.f32.mrf.mxu0  ;;  %4339 = vmatprep.mubr.msk.f32.mxu1 %vm372_vm1, %v4861_v30 }
  0xd3   :  { %1152 = vrot.lane.b32.xlu1 %v4848_v23, %s4707_s4  ;;  %1053 = vrot.lane.b32.xlu0 %v4863_v32, %s4706_s2  ;;  %v4871_v36 = vadd.f32 %v3997_v20, %v258_v34  ;;  %v156_v37 = vadd.f32 %v3992_v24, %v155_v35  ;;  %v4907_v47 = vmul.f32 0.35355338, %v161_v42 }
  0xd4   :  { %4342 = vmatprep.subr.msk.mxu0 %vm372_vm1, %v4863_v32  ;;  %4338 = vmatpush3.xpose.msk.msra.mxu1 %vm372_vm1, %v4853_v28 }
  0xd5   :  { %v4331_v38 = vpop.f32.mrf.mxu0  ;;  %4343 = vmatpush3.xpose.msk.msra.mxu0 %vm372_vm1, %v4863_v32  ;;  %v4883_v40 = vmul.f32 0.35355338, %v156_v37 }
  0xd6   :  { %v4885_v41 = vadd.f32 %v4331_v38, %v3997_v20  ;;  %4344 = vmatprep.subr.msk.mxu0 %vm372_vm1, %v4871_v36 }
  0xd7   :  { %v345_v43 = vpop.f32.mrf.mxu0  ;;  %964 = vrot.lane.b32.xlu1 %v4853_v28, %s4706_s2  ;;  %4340 = vmatmul.mubr.msk.f32.vlgmr.msra.gmra.mxu1 %vm372_vm1, %v4881_v39 }
  0xd8   :  { %v4891_v44 = vadd.f32 %v3997_v20, %v345_v43  ;;  %792 = vrot.lane.b32.xlu0 %v4885_v41, %s4706_s2  ;;  %4346 = vmatprep.mubr.msk.f32.mxu0 %vm372_vm1, %v4883_v40 }
  0xd9   :  { %4349 = vmatprep.subr.msk.mxu1 %vm372_vm1, %v4885_v41  ;;  %v4334_v45 = vpop.f32.mrf.mxu0  ;;  %4345 = vmatpush3.xpose.msk.msra.mxu0 %vm372_vm1, %v4871_v36 }
  0xda   :  { %v4901_v46 = vadd.f32 %v4334_v45, %v3997_v20  ;;  %4350 = vmatpush3.xpose.msk.msra.mxu1 %vm372_vm1, %v4885_v41  ;;  %4353 = vmatprep.mubr.msk.f32.mxu1 %vm372_vm1, %v4861_v30 }
  0xdb   :  { %4351 = vmatprep.subr.msk.mxu1 %vm372_vm1, %v4891_v44  ;;  %v355_v48 = vpop.f32.mrf.mxu0  ;;  %790 = vrot.lane.b32.xlu1 %v4891_v44, %s4706_s2 }
  0xdc   :  { %4356 = vmatprep.subr.msk.mxu0 %vm372_vm1, %v4901_v46  ;;  %v4917_v49 = vadd.f32 %v3997_v20, %v355_v48  ;;  %4347 = vmatmul.mubr.msk.f32.vlgmr.msra.gmra.mxu0 %vm372_vm1, %v4907_v47 }
  0xdd   :  { %4357 = vmatpush3.xpose.msk.msra.mxu0 %vm372_vm1, %v4901_v46  ;;  %4360 = vmatprep.mubr.msk.f32.mxu0 %vm372_vm1, %v4883_v40 }
  0xde   :  { %4352 = vmatpush3.xpose.msk.msra.mxu1 %vm372_vm1, %v4891_v44  ;;  %4358 = vmatprep.subr.msk.mxu0 %vm372_vm1, %v4917_v49 }
  0xdf   :  { %877 = vrot.lane.b32.xlu0 %v4917_v49, %s4706_s2  ;;  %879 = vrot.lane.b32.xlu1 %v4901_v46, %s4706_s2 }
  0xe1   :  { %4354 = vmatmul.mubr.msk.f32.vlgmr.msra.gmra.mxu1 %vm372_vm1, %v4881_v39  ;;  %4359 = vmatpush3.xpose.msk.msra.mxu0 %vm372_vm1, %v4917_v49 }
  0xe4   :  { %4361 = vmatmul.mubr.msk.f32.vlgmr.msra.gmra.mxu0 %vm372_vm1, %v4907_v47 }
 0x141   :  { %v967_v50 = vpop.permute.xlu1 %966 }
 0x142   :  { %4377 = vmatprep.subr.mxu0 %v967_v50 }
 0x143   :  { %4378 = vmatpush3.msra.mxu0 %v967_v50 }
 0x145   :  { %v4939_v51 = vpop.permute.xlu1 %1152  ;;  %v4941_v52 = vpop.permute.xlu0 %1053 }
 0x149   :  { %v965_v53 = vpop.permute.xlu1 %964 }
 0x14a   :  { %v793_v54 = vpop.permute.xlu0 %792  ;;  %4379 = vmatprep.subr.mxu0 %v965_v53 }
 0x14b   :  { %4363 = vmatprep.subr.mxu1 %v793_v54  ;;  %4380 = vmatpush3.msra.mxu0 %v965_v53 }
 0x14c   :  { %4364 = vmatpush3.msra.mxu1 %v793_v54  ;;  %4391 = vmatprep.subr.msk.mxu0 %vm372_vm1, %v4939_v51 }
 0x14d   :  { %v791_v55 = vpop.permute.xlu1 %790 }
 0x14e   :  { %4365 = vmatprep.subr.mxu1 %v791_v55 }
 0x14f   :  { %4366 = vmatpush3.msra.mxu1 %v791_v55 }
 0x151   :  { %v4945_v56 = vpop.permute.xlu1 %879  ;;  %v878_v9 = vpop.permute.xlu0 %877 }
 0x152   :  { %4370 = vmatprep.subr.mxu1 %v4945_v56 }
 0x197   :  { %v4341_v57 = vpop.f32.mrf.mxu1 }
 0x198   :  { %v713_v58 = vsel %vm709_vm2, %v4341_v57, -inf }
 0x199   :  { %714 = vmax.xlane.f32.xlu1 %v713_v58  ;;  %v451_v59 = vpop.f32.mrf.mxu1 }
 0x19a   :  { %v710_v60 = vsel %vm709_vm2, %v451_v59, -inf }
 0x19b   :  { %711 = vmax.xlane.f32.xlu0 %v710_v60 }
 0x19c   :  { %v4950_v61 = vpop.f32.mrf.mxu0 }
 0x19d   :  { %v719_v62 = vsel %vm709_vm2, %v4950_v61, -inf }
 0x19e   :  { %v4954_v63 = vpop.f32.mrf.mxu0 }
 0x19f   :  { %720 = vmax.xlane.f32.xlu0 %v719_v62  ;;  %v716_v2 = vsel %vm709_vm2, %v4954_v63, -inf }
 0x1a1   :  { %v4355_v0 = vpop.f32.mrf.mxu1 }
 0x1a2   :  { %v725_v1 = vsel %vm709_vm2, %v4355_v0, -inf }
 0x1a3   :  { %726 = vmax.xlane.f32.xlu1 %v725_v1  ;;  %v619_v3 = vpop.f32.mrf.mxu1  ;;  %717 = vmax.xlane.f32.xlu0 %v716_v2 }
 0x1a4   :  { %v722_v4 = vsel %vm709_vm2, %v619_v3, -inf  ;;  %v4978_v5 = vpop.f32.mrf.mxu0 }
 0x1a5   :  { %v731_v6 = vsel %vm709_vm2, %v4978_v5, -inf }
 0x1a6   :  { %v4982_v7 = vpop.f32.mrf.mxu0 }
 0x1a7   :  { %723 = vmax.xlane.f32.xlu0 %v722_v4  ;;  %v728_v8 = vsel %vm709_vm2, %v4982_v7, -inf }
 0x1b4   :  { %1150 = vrot.lane.b32.xlu1 %v4853_v28, %s4707_s4 }
 0x1b8   :  { %1146 = vrot.lane.b32.xlu1 %v4861_v30, %s4707_s4 }
 0x1bd   :  { %1051 = vrot.lane.b32.xlu0 %v4871_v36, %s4706_s2 }
 0x1c1   :  { %1243 = vrot.lane.b32.xlu0 %v4863_v32, %s4707_s4 }
 0x1c5   :  { %1241 = vrot.lane.b32.xlu0 %v4871_v36, %s4707_s4 }
 0x1c9   :  { %1148 = vrot.lane.b32.xlu0 %v4881_v39, %s4707_s4 }
 0x1cd   :  { %1328 = vrot.lane.b32.xlu0 %v4891_v44, %s4707_s4 }
 0x1d1   :  { %1239 = vrot.lane.b32.xlu0 %v4907_v47, %s4707_s4 }
 0x1d5   :  { %1576 = vrot.lane.b32.xlu0 %v4885_v41, %s4708_s6 }
 0x1dc   :  { %732 = vmax.xlane.f32.xlu1 %v731_v6 }
 0x1e0   :  { %729 = vmax.xlane.f32.xlu1 %v728_v8 }
 0x1f1   :  { %1330 = vrot.lane.b32.xlu1 %v4885_v41, %s4707_s4 }
 0x1f5   :  { %1237 = vrot.lane.b32.xlu1 %v4883_v40, %s4707_s4 }
 0x1f9   :  { %1413 = vrot.lane.b32.xlu1 %v4901_v46, %s4707_s4 }
 0x1fd   :  { %1411 = vrot.lane.b32.xlu1 %v4917_v49, %s4707_s4 }
 0x201   :  { %1574 = vrot.lane.b32.xlu1 %v4891_v44, %s4708_s6 }
 0x205   :  { %1663 = vrot.lane.b32.xlu1 %v4901_v46, %s4708_s6 }
 0x209   :  { %1750 = vrot.lane.b32.xlu1 %v4848_v23, %s4708_s6 }
 0x222   :  { %v715_v11 = vpop.xlane.xlu1 %714 }
 0x224   :  { %v712_v10 = vpop.xlane.xlu0 %711 }
 0x228   :  { %v721_v12 = vpop.xlane.xlu0 %720 }
 0x22c   :  { %v727_v13 = vpop.xlane.xlu1 %726  ;;  %v718_v15 = vpop.xlane.xlu0 %717 }
 0x22d   :  { %v735_v14 = vmax.f32 %v715_v11, %v727_v13 }
 0x22f   :  { %v739_v16 = vsub.f32 %v4341_v57, %v735_v14  ;;  %v751_v18 = vsub.f32 %v4355_v0, %v735_v14 }
 0x230   :  { %v724_v17 = vpop.xlane.xlu0 %723  ;;  %v1151_v31 = vpop.permute.xlu1 %1150 }
 0x231   :  { %v734_v19 = vmax.f32 %v712_v10, %v724_v17  ;;  %v744_v20 = vmul.f32 1.442695, %v739_v16  ;;  %v756_v24 = vmul.f32 1.442695, %v751_v18 }
 0x233   :  { %v738_v21 = vsub.f32 %v451_v59, %v734_v19  ;;  %v750_v22 = vsub.f32 %v619_v3, %v734_v19  ;;  %4598 = vpow2.f32 %v744_v20 }
 0x234   :  { %v5000_v27 = vpop.permute.xlu0 %1051  ;;  %v1147_v42 = vpop.permute.xlu1 %1146 }
 0x235   :  { %v742_v25 = vmul.f32 1.442695, %v738_v21  ;;  %v754_v26 = vmul.f32 1.442695, %v750_v22 }
 0x237   :  { %4600 = vpow2.f32 %v742_v25 }
 0x238   :  { %4602 = vpow2.f32 %v754_v26  ;;  %v5002_v29 = vpop.permute.xlu0 %1243 }
 0x239   :  { %4604 = vpow2.f32 %v756_v24 }
 0x23c   :  { %v5018_v38 = vpop.permute.xlu0 %1241 }
 0x240   :  { %v5004_v33 = vpop.eup %4598  ;;  %v1149_v43 = vpop.permute.xlu0 %1148 }
 0x244   :  { %v5006_v34 = vpop.eup %4600  ;;  %v1329_v50 = vpop.permute.xlu0 %1328 }
 0x245   :  { %v5008_v35 = vpop.eup %4602  ;;  %4381 = vmatprep.mubr.msk.f32.mxu0 %vm709_vm2, %v5006_v34 }
 0x246   :  { %v5012_v37 = vpop.eup %4604  ;;  %4367 = vmatprep.mubr.msk.f32.mxu1 %vm709_vm2, %v5008_v35  ;;  %4382 = vmatmul.mubr.msk.f32.vlgmr.msra.gmra.mxu0 %vm709_vm2, %v5004_v33 }
 0x247   :  { %4368 = vmatmul.mubr.msk.f32.vlgmr.msra.gmra.mxu1 %vm709_vm2, %v5012_v37  ;;  %4392 = vmatpush3.xpose.msk.msra.mxu0 %vm372_vm1, %v4939_v51 }
 0x248   :  { %4371 = vmatpush3.msra.mxu1 %v4945_v56  ;;  %4393 = vmatprep.subr.msk.mxu0 %vm372_vm1, %v1151_v31  ;;  %v1240_v57 = vpop.permute.xlu0 %1239 }
 0x249   :  { %4372 = vmatprep.subr.mxu1 %v878_v9  ;;  %4395 = vmatprep.mubr.msk.f32.mxu0 %vm372_vm1, %v1147_v42 }
 0x24a   :  { %4373 = vmatpush3.msra.mxu1 %v878_v9 }
 0x24b   :  { %4384 = vmatprep.subr.mxu1 %v4941_v52  ;;  %4394 = vmatpush3.xpose.msk.msra.mxu0 %vm372_vm1, %v1151_v31 }
 0x24e   :  { %4396 = vmatmul.mubr.msk.f32.vlgmr.msra.gmra.mxu0 %vm372_vm1, %v1149_v43 }
 0x24f   :  { %4409 = vmatprep.mubr.msk.f32.mxu0 %vm372_vm1, %v1147_v42 }
 0x265   :  { %v733_v45 = vpop.xlane.xlu1 %732 }
 0x266   :  { %v737_v48 = vmax.f32 %v721_v12, %v733_v45 }
 0x268   :  { %v753_v53 = vsub.f32 %v4978_v5, %v737_v48  ;;  %v741_v59 = vsub.f32 %v4950_v61, %v737_v48 }
 0x269   :  { %v730_v51 = vpop.xlane.xlu1 %729 }
 0x26a   :  { %v736_v54 = vmax.f32 %v718_v15, %v730_v51  ;;  %v760_v60 = vmul.f32 1.442695, %v753_v53  ;;  %v748_v2 = vmul.f32 1.442695, %v741_v59  ;;  %v774_v59 = vsel %vm709_vm2, %v5008_v35, 0.0 }
 0x26c   :  { %v740_v55 = vsub.f32 %v4954_v63, %v736_v54  ;;  %v752_v56 = vsub.f32 %v4982_v7, %v736_v54  ;;  %v1577_v63 = vpop.permute.xlu0 %1576 }
 0x26d   :  { %v1331_v58 = vpop.permute.xlu1 %1330 }
 0x26e   :  { %v758_v62 = vmul.f32 1.442695, %v752_v56  ;;  %4405 = vmatprep.subr.msk.mxu0 %vm372_vm1, %v1331_v58  ;;  %v746_v0 = vmul.f32 1.442695, %v740_v55  ;;  %v762_v55 = vsel %vm709_vm2, %v5006_v34, 0.0  ;;  %v765_v56 = vsel %vm709_vm2, %v5004_v33, 0.0 }
 0x26f   :  { %4406 = vmatpush3.xpose.msk.msra.mxu0 %vm372_vm1, %v1331_v58  ;;  %v777_v34 = vsel %vm709_vm2, %v5012_v37, 0.0 }
 0x270   :  { %4407 = vmatprep.subr.msk.mxu0 %vm372_vm1, %v1329_v50  ;;  %4606 = vpow2.f32 %v758_v62 }
 0x271   :  { %v1238_v1 = vpop.permute.xlu1 %1237  ;;  %4608 = vpow2.f32 %v760_v60 }
 0x272   :  { %4610 = vpow2.f32 %v746_v0 }
 0x273   :  { %4408 = vmatpush3.xpose.msk.msra.mxu0 %vm372_vm1, %v1329_v50  ;;  %4612 = vpow2.f32 %v748_v2 }
 0x274   :  { %4419 = vmatprep.subr.mxu0 %v1577_v63 }
 0x275   :  { %v1414_v3 = vpop.permute.xlu1 %1413 }
 0x276   :  { %4410 = vmatmul.mubr.msk.f32.vlgmr.msra.gmra.mxu0 %vm372_vm1, %v1149_v43 }
 0x277   :  { %4420 = vmatpush3.msra.mxu0 %v1577_v63 }
 0x279   :  { %v1412_v61 = vpop.permute.xlu1 %1411 }
 0x27d   :  { %v1575_v4 = vpop.permute.xlu1 %1574  ;;  %v5040_v5 = vpop.eup %4606 }
 0x27e   :  { %4421 = vmatprep.subr.mxu0 %v1575_v4  ;;  %v5042_v6 = vpop.eup %4608  ;;  %4374 = vmatprep.mubr.msk.f32.mxu1 %vm709_vm2, %v5040_v5  ;;  %v780_v33 = vsel %vm709_vm2, %v5040_v5, 0.0 }
 0x27f   :  { %4422 = vmatpush3.msra.mxu0 %v1575_v4  ;;  %v5046_v7 = vpop.eup %4610  ;;  %4375 = vmatmul.mubr.msk.f32.vlgmr.msra.gmra.mxu1 %vm709_vm2, %v5042_v6  ;;  %v783_v60 = vsel %vm709_vm2, %v5042_v6, 0.0 }
 0x280   :  { %4385 = vmatpush3.msra.mxu1 %v4941_v52  ;;  %4388 = vmatprep.mubr.msk.f32.mxu1 %vm709_vm2, %v5046_v7  ;;  %v5054_v9 = vpop.eup %4612 }
 0x281   :  { %v1664_v8 = vpop.permute.xlu1 %1663  ;;  %4386 = vmatprep.subr.mxu1 %v5000_v27  ;;  %v771_v58 = vsel %vm709_vm2, %v5054_v9, 0.0 }
 0x282   :  { %4387 = vmatpush3.msra.mxu1 %v5000_v27 }
 0x283   :  { %4398 = vmatprep.subr.msk.mxu1 %vm372_vm1, %v5002_v29  ;;  %4389 = vmatmul.mubr.msk.f32.vlgmr.msra.gmra.mxu1 %vm709_vm2, %v5054_v9 }
 0x284   :  { %4399 = vmatpush3.xpose.msk.msra.mxu1 %vm372_vm1, %v5002_v29  ;;  %4402 = vmatprep.mubr.msk.f32.mxu1 %vm372_vm1, %v1238_v1 }
 0x285   :  { %v5064_v52 = vpop.permute.xlu1 %1750  ;;  %4400 = vmatprep.subr.msk.mxu1 %vm372_vm1, %v5018_v38 }
 0x286   :  { %4433 = vmatprep.subr.mxu0 %v5064_v52 }
 0x288   :  { %4401 = vmatpush3.xpose.msk.msra.mxu1 %vm372_vm1, %v5018_v38 }
 0x289   :  { %4412 = vmatprep.subr.msk.mxu1 %vm372_vm1, %v1414_v3 }
 0x28b   :  { %4403 = vmatmul.mubr.msk.f32.vlgmr.msra.gmra.mxu1 %vm372_vm1, %v1240_v57 }
 0x28c   :  { %4413 = vmatpush3.xpose.msk.msra.mxu1 %vm372_vm1, %v1414_v3  ;;  %4416 = vmatprep.mubr.msk.f32.mxu1 %vm372_vm1, %v1238_v1 }
 0x28d   :  { %4414 = vmatprep.subr.msk.mxu1 %vm372_vm1, %v1412_v61 }
 0x290   :  { %4415 = vmatpush3.xpose.msk.msra.mxu1 %vm372_vm1, %v1412_v61 }
 0x291   :  { %4426 = vmatprep.subr.mxu1 %v1664_v8 }
 0x293   :  { %4417 = vmatmul.mubr.msk.f32.vlgmr.msra.gmra.mxu1 %vm372_vm1, %v1240_v57  ;;  %v768_v57 = vsel %vm709_vm2, %v5046_v7, 0.0 }
 0x294   :  { %4427 = vmatpush3.msra.mxu1 %v1664_v8 }
 0x306   :  { %v4383_v10 = vpop.f32.mrf.mxu0 }
 0x307   :  { %v4369_v11 = vpop.f32.mrf.mxu1 }
 0x308   :  { %v5078_v12 = vadd.f32 %v4383_v10, %v4369_v11  ;;  %v1042_v13 = vpop.f32.mrf.mxu0 }
 0x309   :  { %v868_v14 = vpop.f32.mrf.mxu1 }
 0x30a   :  { %v5080_v15 = vadd.f32 %v1042_v13, %v868_v14 }
 0x30e   :  { %v4397_v16 = vpop.f32.mrf.mxu0 }
 0x30f   :  { %v1497_v17 = vsel %vm709_vm2, %v4397_v16, -inf }
 0x310   :  { %1498 = vmax.xlane.f32.xlu0 %v1497_v17  ;;  %v5083_v18 = vpop.f32.mrf.mxu0 }
 0x311   :  { %v1494_v19 = vsel %vm709_vm2, %v5083_v18, -inf }
 0x314   :  { %1495 = vmax.xlane.f32.xlu0 %v1494_v19 }
 0x336   :  { %v4411_v20 = vpop.f32.mrf.mxu0 }
 0x337   :  { %v1509_v21 = vsel %vm709_vm2, %v4411_v20, -inf }
 0x338   :  { %1510 = vmax.xlane.f32.xlu0 %v1509_v21  ;;  %v1402_v22 = vpop.f32.mrf.mxu0 }
 0x339   :  { %v1506_v24 = vsel %vm709_vm2, %v1402_v22, -inf }
 0x33a   :  { %1507 = vmax.xlane.f32.xlu1 %v1506_v24 }
 0x33f   :  { %v4376_v25 = vpop.f32.mrf.mxu1 }
 0x341   :  { %v955_v26 = vpop.f32.mrf.mxu1 }
 0x343   :  { %v4390_v27 = vpop.f32.mrf.mxu1 }
 0x344   :  { %v5089_v29 = vadd.f32 %v4390_v27, %v4376_v25 }
 0x345   :  { %v1129_v31 = vpop.f32.mrf.mxu1 }
 0x346   :  { %v5091_v38 = vadd.f32 %v1129_v31, %v955_v26 }
 0x34b   :  { %1748 = vrot.lane.b32.xlu1 %v4853_v28, %s4708_s6  ;;  %v5095_v42 = vpop.f32.mrf.mxu1 }
 0x34c   :  { %v1503_v43 = vsel %vm709_vm2, %v5095_v42, -inf }
 0x34d   :  { %1504 = vmax.xlane.f32.xlu0 %v1503_v43  ;;  %v5099_v45 = vpop.f32.mrf.mxu1 }
 0x34e   :  { %v1500_v48 = vsel %vm709_vm2, %v5099_v45, -inf }
 0x351   :  { %1501 = vmax.xlane.f32.xlu0 %v1500_v48 }
 0x353   :  { %v5105_v50 = vpop.f32.mrf.mxu1 }
 0x354   :  { %v1515_v51 = vsel %vm709_vm2, %v5105_v50, -inf }
 0x355   :  { %v5111_v53 = vpop.f32.mrf.mxu1 }
 0x356   :  { %v1512_v54 = vsel %vm709_vm2, %v5111_v53, -inf }
 0x367   :  { %1661 = vrot.lane.b32.xlu0 %v4917_v49, %s4708_s6 }
 0x36b   :  { %1837 = vrot.lane.b32.xlu0 %v4863_v32, %s4708_s6 }
 0x36f   :  { %1516 = vmax.xlane.f32.xlu1 %v1515_v51 }
 0x373   :  { %1513 = vmax.xlane.f32.xlu1 %v1512_v54 }
 0x384   :  { %1835 = vrot.lane.b32.xlu1 %v4871_v36, %s4708_s6 }
 0x38a   :  { %763 = vadd.xlane.f32.xlu0 %v762_v55 }
 0x38e   :  { %766 = vadd.xlane.f32.xlu0 %v765_v56 }
 0x392   :  { %769 = vadd.xlane.f32.xlu0 %v768_v57 }
 0x396   :  { %772 = vadd.xlane.f32.xlu0 %v771_v58 }
 0x399   :  { %v1499_v35 = vpop.xlane.xlu0 %1498 }
 0x39d   :  { %v1496_v62 = vpop.xlane.xlu0 %1495 }
 0x3a8   :  { %775 = vadd.xlane.f32.xlu1 %v774_v59 }
 0x3ac   :  { %778 = vadd.xlane.f32.xlu1 %v777_v34  ;;  %2130 = vrot.lane.b32.xlu0 %v4848_v23, %s4709_s5 }
 0x3b0   :  { %781 = vadd.xlane.f32.xlu1 %v780_v33  ;;  %2219 = vrot.lane.b32.xlu0 %v4871_v36, %s4709_s5 }
 0x3b4   :  { %784 = vadd.xlane.f32.xlu1 %v783_v60 }
 0x3c1   :  { %v1511_v0 = vpop.xlane.xlu0 %1510 }
 0x3c2   :  { %v1519_v37 = vmax.f32 %v1499_v35, %v1511_v0  ;;  %v364_v0 = vld [vmem:[%s5480_s7] sm:$0xff] }
 0x3c3   :  { %v1508_v1 = vpop.xlane.xlu1 %1507 }
 0x3c4   :  { %v1523_v2 = vsub.f32 %v4397_v16, %v1519_v37  ;;  %v1535_v63 = vsub.f32 %v4411_v20, %v1519_v37  ;;  %v1518_v3 = vmax.f32 %v1496_v62, %v1508_v1  ;;  %v365_v20 = vld [vmem:[%s5480_s7 + $0x8] sm:$0xff] }
 0x3c5   :  { %2128 = vrot.lane.b32.xlu1 %v4853_v28, %s4709_s5 }
 0x3c6   :  { %v1528_v61 = vmul.f32 1.442695, %v1523_v2  ;;  %v1540_v4 = vmul.f32 1.442695, %v1535_v63  ;;  %v1522_v5 = vsub.f32 %v5083_v18, %v1518_v3  ;;  %v1534_v7 = vsub.f32 %v1402_v22, %v1518_v3 }
 0x3c7   :  { %v1749_v17 = vpop.permute.xlu1 %1748 }
 0x3c8   :  { %4614 = vpow2.f32 %v1528_v61  ;;  %v1538_v8 = vmul.f32 1.442695, %v1534_v7  ;;  %v1526_v6 = vmul.f32 1.442695, %v1522_v5 }
 0x3c9   :  { %2221 = vrot.lane.b32.xlu1 %v4863_v32, %s4709_s5  ;;  %4616 = vpow2.f32 %v1540_v4 }
 0x3ca   :  { %4618 = vpow2.f32 %v1538_v8 }
 0x3cb   :  { %4620 = vpow2.f32 %v1526_v6 }
 0x3cd   :  { %2124 = vrot.lane.b32.xlu1 %v4861_v30, %s4709_s5 }
 0x3d1   :  { %2308 = vrot.lane.b32.xlu1 %v4885_v41, %s4709_s5 }
 0x3d5   :  { %v4615_v9 = vpop.eup %4614 }
 0x3d6   :  { %v1549_v10 = vsel %vm709_vm2, %v4615_v9, 0.0  ;;  %v4617_v11 = vpop.eup %4616  ;;  %v1505_v13 = vpop.xlane.xlu0 %1504 }
 0x3d7   :  { %1550 = vadd.xlane.f32.xlu0 %v1549_v10  ;;  %v4619_v14 = vpop.eup %4618  ;;  %v1561_v19 = vsel %vm709_vm2, %v4617_v11, 0.0 }
 0x3d8   :  { %4423 = vmatprep.mubr.msk.f32.mxu0 %vm709_vm2, %v4619_v14  ;;  %v4621_v16 = vpop.eup %4620  ;;  %v1558_v24 = vsel %vm709_vm2, %v4619_v14, 0.0 }
 0x3d9   :  { %4424 = vmatmul.mubr.msk.f32.vlgmr.msra.gmra.mxu0 %vm709_vm2, %v4617_v11  ;;  %v1546_v22 = vsel %vm709_vm2, %v4621_v16, 0.0 }
 0x3da   :  { %4434 = vmatpush3.msra.mxu0 %v5064_v52  ;;  %v1502_v18 = vpop.xlane.xlu0 %1501  ;;  %4437 = vmatprep.mubr.msk.f32.mxu0 %vm709_vm2, %v4621_v16 }
 0x3db   :  { %4435 = vmatprep.subr.mxu0 %v1749_v17  ;;  %1562 = vadd.xlane.f32.xlu0 %v1561_v19 }
 0x3dc   :  { %4436 = vmatpush3.msra.mxu0 %v1749_v17 }
 0x3dd   :  { %4438 = vmatmul.mubr.msk.f32.vlgmr.msra.gmra.mxu0 %vm709_vm2, %v4615_v9  ;;  %4447 = vmatprep.subr.mxu0 %v365_v20 }
 0x3de   :  { %v1662_v21 = vpop.permute.xlu0 %1661  ;;  %4448 = vmatpush3.msra.mxu0 %v365_v20 }
 0x3df   :  { %4428 = vmatprep.subr.mxu1 %v1662_v21  ;;  %1547 = vadd.xlane.f32.xlu0 %v1546_v22 }
 0x3e0   :  { %4429 = vmatpush3.msra.mxu1 %v1662_v21 }
 0x3e2   :  { %v1838_v52 = vpop.permute.xlu0 %1837 }
 0x3e3   :  { %4440 = vmatprep.subr.mxu1 %v1838_v52 }
 0x3f5   :  { %1559 = vadd.xlane.f32.xlu1 %v1558_v24 }
 0x3f8   :  { %v1517_v25 = vpop.xlane.xlu1 %1516 }
 0x3f9   :  { %v1521_v26 = vmax.f32 %v1505_v13, %v1517_v25 }
 0x3fb   :  { %v1525_v27 = vsub.f32 %v5095_v42, %v1521_v26  ;;  %v1537_v31 = vsub.f32 %v5105_v50, %v1521_v26 }
 0x3fc   :  { %v1514_v43 = vpop.xlane.xlu1 %1513 }
 0x3fd   :  { %v1532_v48 = vmul.f32 1.442695, %v1525_v27  ;;  %v1544_v51 = vmul.f32 1.442695, %v1537_v31  ;;  %v1520_v54 = vmax.f32 %v1502_v18, %v1514_v43 }
 0x3ff   :  { %4622 = vpow2.f32 %v1532_v48  ;;  %v1524_v55 = vsub.f32 %v5099_v45, %v1520_v54  ;;  %v1536_v56 = vsub.f32 %v5111_v53, %v1520_v54 }
 0x400   :  { %4624 = vpow2.f32 %v1544_v51  ;;  %v1836_v53 = vpop.permute.xlu1 %1835 }
 0x401   :  { %v1530_v57 = vmul.f32 1.442695, %v1524_v55  ;;  %v1542_v58 = vmul.f32 1.442695, %v1536_v56 }
 0x403   :  { %4626 = vpow2.f32 %v1530_v57 }
 0x404   :  { %4628 = vpow2.f32 %v1542_v58 }
 0x40c   :  { %v4623_v59 = vpop.eup %4622 }
 0x40d   :  { %v4625_v34 = vpop.eup %4624  ;;  %v1555_v42 = vsel %vm709_vm2, %v4623_v59, 0.0 }
 0x40e   :  { %v1567_v50 = vsel %vm709_vm2, %v4625_v34, 0.0  ;;  %1556 = vadd.xlane.f32.xlu0 %v1555_v42 }
 0x40f   :  { %1568 = vadd.xlane.f32.xlu1 %v1567_v50 }
 0x410   :  { %v4627_v33 = vpop.eup %4626 }
 0x411   :  { %v4629_v60 = vpop.eup %4628  ;;  %v1552_v35 = vsel %vm709_vm2, %v4627_v33, 0.0 }
 0x412   :  { %4430 = vmatprep.mubr.msk.f32.mxu1 %vm709_vm2, %v4629_v60  ;;  %v1564_v45 = vsel %vm709_vm2, %v4629_v60, 0.0  ;;  %1553 = vadd.xlane.f32.xlu0 %v1552_v35 }
 0x413   :  { %1565 = vadd.xlane.f32.xlu1 %v1564_v45  ;;  %4431 = vmatmul.mubr.msk.f32.vlgmr.msra.gmra.mxu1 %vm709_vm2, %v4625_v34  ;;  %v764_v62 = vpop.xlane.xlu0 %763 }
 0x414   :  { %4441 = vmatpush3.msra.mxu1 %v1838_v52  ;;  %4444 = vmatprep.mubr.msk.f32.mxu1 %vm709_vm2, %v4627_v33 }
 0x415   :  { %4442 = vmatprep.subr.mxu1 %v1836_v53 }
 0x416   :  { %4443 = vmatpush3.msra.mxu1 %v1836_v53 }
 0x417   :  { %4445 = vmatmul.mubr.msk.f32.vlgmr.msra.gmra.mxu1 %vm709_vm2, %v4623_v59  ;;  %4455 = vmatprep.subr.mxu1 %v364_v0  ;;  %v767_v37 = vpop.xlane.xlu0 %766 }
 0x418   :  { %4456 = vmatpush3.msra.mxu1 %v364_v0 }
 0x41b   :  { %v770_v1 = vpop.xlane.xlu0 %769 }
 0x41f   :  { %v773_v2 = vpop.xlane.xlu0 %772 }
 0x423   :  { %v5173_v63 = vpop.permute.xlu0 %2130 }
 0x424   :  { %2215 = vrot.lane.b32.xlu1 %v4883_v40, %s4709_s5  ;;  %4463 = vmatprep.subr.msk.mxu0 %vm372_vm1, %v5173_v63 }
 0x427   :  { %v2220_v19 = vpop.permute.xlu0 %2219 }
 0x428   :  { %2391 = vrot.lane.b32.xlu1 %v4901_v46, %s4709_s5  ;;  %2126 = vrot.lane.b32.xlu0 %v4881_v39, %s4709_s5 }
 0x42c   :  { %2389 = vrot.lane.b32.xlu1 %v4917_v49, %s4709_s5  ;;  %2306 = vrot.lane.b32.xlu0 %v4891_v44, %s4709_s5 }
 0x430   :  { %2217 = vrot.lane.b32.xlu0 %v4907_v47, %s4709_s5 }
 0x431   :  { %v776_v3 = vpop.xlane.xlu1 %775 }
 0x432   :  { %v786_v61 = vadd.f32 %v776_v3, %v764_v62 }
 0x434   :  { %4630 = vrcp.f32 %v786_v61 }
 0x435   :  { %v779_v4 = vpop.xlane.xlu1 %778 }
 0x436   :  { %v787_v5 = vadd.f32 %v779_v4, %v767_v37 }
 0x438   :  { %4632 = vrcp.f32 %v787_v5 }
 0x439   :  { %v782_v7 = vpop.xlane.xlu1 %781 }
 0x43a   :  { %v788_v8 = vadd.f32 %v782_v7, %v770_v1 }
 0x43c   :  { %4634 = vrcp.f32 %v788_v8 }
 0x43d   :  { %v785_v6 = vpop.xlane.xlu1 %784 }
 0x43e   :  { %v789_v9 = vadd.f32 %v785_v6, %v773_v2 }
 0x440   :  { %4636 = vrcp.f32 %v789_v9 }
 0x441   :  { %v4631_v10 = vpop.eup %4630  ;;  %v2129_v11 = vpop.permute.xlu1 %2128 }
 0x442   :  { %v1142_v13 = vmul.f32 %v4631_v10, %v5080_v15 }
 0x444   :  { %4457 = vmatprep.mubr.msk.f32.mxu1 %vm372_vm1, %v1142_v13 }
 0x445   :  { %v4633_v14 = vpop.eup %4632  ;;  %v2222_v16 = vpop.permute.xlu1 %2221 }
 0x446   :  { %4470 = vmatprep.subr.msk.mxu1 %vm372_vm1, %v2222_v16  ;;  %v1143_v17 = vmul.f32 %v4633_v14, %v5078_v12 }
 0x448   :  { %4458 = vmatmul.mubr.msk.f32.vlgmr.msra.gmra.mxu1 %vm372_vm1, %v1143_v17 }
 0x449   :  { %v4635_v18 = vpop.eup %4634  ;;  %4471 = vmatpush3.xpose.msk.msra.mxu1 %vm372_vm1, %v2222_v16  ;;  %v5201_v12 = vpop.permute.xlu1 %2124 }
 0x44a   :  { %4472 = vmatprep.subr.msk.mxu1 %vm372_vm1, %v2220_v19  ;;  %v1144_v20 = vmul.f32 %v4635_v18, %v5091_v38 }
 0x44c   :  { %4460 = vmatprep.mubr.msk.f32.mxu1 %vm372_vm1, %v1144_v20 }
 0x44d   :  { %v4637_v15 = vpop.eup %4636  ;;  %4473 = vmatpush3.xpose.msk.msra.mxu1 %vm372_vm1, %v2220_v19  ;;  %v2309_v52 = vpop.permute.xlu1 %2308 }
 0x44e   :  { %v1145_v21 = vmul.f32 %v4637_v15, %v5089_v29 }
 0x450   :  { %4461 = vmatmul.mubr.msk.f32.gmra.mxu1 %vm372_vm1, %v1145_v21 }
 0x460   :  { %v1551_v22 = vpop.xlane.xlu0 %1550 }
 0x464   :  { %v1563_v24 = vpop.xlane.xlu0 %1562 }
 0x465   :  { %v1571_v31 = vadd.f32 %v1563_v24, %v1551_v22 }
 0x468   :  { %v1548_v26 = vpop.xlane.xlu0 %1547 }
 0x47e   :  { %v1560_v25 = vpop.xlane.xlu1 %1559 }
 0x47f   :  { %v1570_v27 = vadd.f32 %v1560_v25, %v1548_v26 }
 0x481   :  { %4638 = vrcp.f32 %v1570_v27 }
 0x482   :  { %4640 = vrcp.f32 %v1571_v31 }
 0x48e   :  { %v4639_v42 = vpop.eup %4638 }
 0x48f   :  { %v4641_v50 = vpop.eup %4640 }
 0x497   :  { %v1557_v38 = vpop.xlane.xlu0 %1556 }
 0x498   :  { %v1569_v43 = vpop.xlane.xlu1 %1568 }
 0x499   :  { %v4425_v48 = vpop.f32.mrf.mxu0  ;;  %v1573_v37 = vadd.f32 %v1569_v43, %v1557_v38 }
 0x49b   :  { %v1554_v51 = vpop.xlane.xlu0 %1553  ;;  %v1652_v54 = vpop.f32.mrf.mxu0 }
 0x49c   :  { %v1566_v55 = vpop.xlane.xlu1 %1565 }
 0x49d   :  { %v4439_v29 = vpop.f32.mrf.mxu0  ;;  %v1572_v0 = vadd.f32 %v1566_v55, %v1554_v51 }
 0x49e   :  { %v1832_v57 = vadd.f32 %v4439_v29, %v4425_v48 }
 0x49f   :  { %v2127_v56 = vpop.permute.xlu0 %2126  ;;  %v1826_v58 = vpop.f32.mrf.mxu0  ;;  %4642 = vrcp.f32 %v1572_v0 }
 0x4a0   :  { %v2216_v59 = vpop.permute.xlu1 %2215  ;;  %v1827_v34 = vadd.f32 %v1826_v58, %v1652_v54  ;;  %v1927_v35 = vmul.f32 %v4641_v50, %v1832_v57  ;;  %4644 = vrcp.f32 %v1573_v37 }
 0x4a1   :  { %4474 = vmatprep.mubr.msk.f32.mxu1 %vm372_vm1, %v2216_v59 }
 0x4a2   :  { %v1926_v33 = vmul.f32 %v4639_v42, %v1827_v34 }
 0x4a3   :  { %v2307_v60 = vpop.permute.xlu0 %2306 }
 0x4a4   :  { %v2392_v45 = vpop.permute.xlu1 %2391  ;;  %4449 = vmatprep.mubr.msk.f32.mxu0 %vm372_vm1, %v1926_v33 }
 0x4a5   :  { %4484 = vmatprep.subr.msk.mxu1 %vm372_vm1, %v2392_v45  ;;  %4450 = vmatmul.mubr.msk.f32.vlgmr.msra.gmra.mxu0 %vm372_vm1, %v1927_v35 }
 0x4a6   :  { %4464 = vmatpush3.xpose.msk.msra.mxu0 %vm372_vm1, %v5173_v63 }
 0x4a7   :  { %v2218_v53 = vpop.permute.xlu0 %2217  ;;  %4465 = vmatprep.subr.msk.mxu0 %vm372_vm1, %v2129_v11 }
 0x4a8   :  { %v2390_v62 = vpop.permute.xlu1 %2389  ;;  %4475 = vmatmul.mubr.msk.f32.vlgmr.msra.gmra.mxu1 %vm372_vm1, %v2218_v53 }
 0x4a9   :  { %4485 = vmatpush3.xpose.msk.msra.mxu1 %vm372_vm1, %v2392_v45  ;;  %4488 = vmatprep.mubr.msk.f32.mxu1 %vm372_vm1, %v2216_v59 }
 0x4aa   :  { %4486 = vmatprep.subr.msk.mxu1 %vm372_vm1, %v2390_v62  ;;  %4466 = vmatpush3.xpose.msk.msra.mxu0 %vm372_vm1, %v2129_v11 }
 0x4ab   :  { %4477 = vmatprep.subr.msk.mxu0 %vm372_vm1, %v2309_v52 }
 0x4ac   :  { %v4643_v5 = vpop.eup %4642 }
 0x4ad   :  { %4487 = vmatpush3.xpose.msk.msra.mxu1 %vm372_vm1, %v2390_v62  ;;  %v4645_v7 = vpop.eup %4644 }
 0x4b0   :  { %4489 = vmatmul.mubr.msk.f32.vlgmr.msra.gmra.mxu1 %vm372_vm1, %v2218_v53 }
 0x4d3   :  { %v4432_v1 = vpop.f32.mrf.mxu1 }
 0x4d5   :  { %v1739_v2 = vpop.f32.mrf.mxu1 }
 0x4d7   :  { %v4446_v63 = vpop.f32.mrf.mxu1 }
 0x4d8   :  { %v1919_v3 = vadd.f32 %v4446_v63, %v4432_v1 }
 0x4d9   :  { %v1913_v61 = vpop.f32.mrf.mxu1 }
 0x4da   :  { %v1914_v4 = vadd.f32 %v1913_v61, %v1739_v2  ;;  %v1929_v6 = vmul.f32 %v4645_v7, %v1919_v3 }
 0x4dc   :  { %v1928_v8 = vmul.f32 %v4643_v5, %v1914_v4 }
 0x4de   :  { %4452 = vmatprep.mubr.msk.f32.mxu0 %vm372_vm1, %v1928_v8 }
 0x4df   :  { %4453 = vmatmul.mubr.msk.f32.gmra.mxu0 %vm372_vm1, %v1929_v6 }
 0x4e0   :  { %4467 = vmatprep.mubr.msk.f32.mxu0 %vm372_vm1, %v5201_v12 }
 0x4e3   :  { %4468 = vmatmul.mubr.msk.f32.vlgmr.msra.gmra.mxu0 %vm372_vm1, %v2127_v56 }
 0x4e4   :  { %4478 = vmatpush3.xpose.msk.msra.mxu0 %vm372_vm1, %v2309_v52  ;;  %4481 = vmatprep.mubr.msk.f32.mxu0 %vm372_vm1, %v5201_v12 }
 0x4e5   :  { %4479 = vmatprep.subr.msk.mxu0 %vm372_vm1, %v2307_v60 }
 0x4e8   :  { %4480 = vmatpush3.xpose.msk.msra.mxu0 %vm372_vm1, %v2307_v60 }
 0x4eb   :  { %4482 = vmatmul.mubr.msk.f32.vlgmr.msra.gmra.mxu0 %vm372_vm1, %v2127_v56 }
 0x508   :  { %v5229_v9 = vpop.f32.mrf.mxu1 }
 0x50a   :  { %v5231_v10 = vpop.f32.mrf.mxu1 }
 0x510   :  { %v5233_v11 = vpop.f32.mrf.mxu1 }
 0x512   :  { %v2115_v13 = vpop.f32.mrf.mxu1 }
 0x565   :  { %v5242_v12 = vpop.f32.mrf.mxu0 }
 0x567   :  { %v5244_v22 = vpop.f32.mrf.mxu0 }
 0x568   :  { %v4476_v14 = vpop.f32.mrf.mxu1 }
 0x569   :  { %v2481_v16 = vsel %vm709_vm2, %v4476_v14, -inf }
 0x56a   :  { %2482 = vmax.xlane.f32.xlu0 %v2481_v16  ;;  %v2297_v17 = vpop.f32.mrf.mxu1 }
 0x56b   :  { %v2478_v18 = vsel %vm709_vm2, %v2297_v17, -inf }
 0x56e   :  { %2479 = vmax.xlane.f32.xlu0 %v2478_v18 }
 0x570   :  { %v4490_v19 = vpop.f32.mrf.mxu1 }
 0x571   :  { %v2493_v20 = vsel %vm709_vm2, %v4490_v19, -inf }
 0x572   :  { %2494 = vmax.xlane.f32.xlu1 %v2493_v20  ;;  %v2463_v15 = vpop.f32.mrf.mxu1 }
 0x573   :  { %v2490_v21 = vsel %vm709_vm2, %v2463_v15, -inf }
 0x576   :  { %2491 = vmax.xlane.f32.xlu1 %v2490_v21 }
 0x587   :  { %2552 = vrot.lane.b32.xlu1 %v4891_v44, %s4710_s23 }
 0x58b   :  { %2641 = vrot.lane.b32.xlu1 %v4901_v46, %s4710_s23 }
 0x58f   :  { %2728 = vrot.lane.b32.xlu1 %v4848_v23, %s4710_s23 }
 0x59f   :  { %v5246_v52 = vpop.f32.mrf.mxu0 }
 0x5a1   :  { %v2018_v24 = vpop.f32.mrf.mxu0 }
 0x5a2   :  { %v5248_v25 = vadd.f32 %v2115_v13, %v2018_v24 }
 0x5a3   :  { %v5250_v26 = vpop.f32.mrf.mxu0 }
 0x5a4   :  { %v2475_v27 = vsel %vm709_vm2, %v5250_v26, -inf }
 0x5a5   :  { %v5254_v31 = vpop.f32.mrf.mxu0  ;;  %2476 = vmax.xlane.f32.xlu0 %v2475_v27 }
 0x5a6   :  { %v2472_v38 = vsel %vm709_vm2, %v5254_v31, -inf }
 0x5a9   :  { %2473 = vmax.xlane.f32.xlu0 %v2472_v38 }
 0x5ab   :  { %v5258_v43 = vpop.f32.mrf.mxu0 }
 0x5ac   :  { %v2487_v48 = vsel %vm709_vm2, %v5258_v43, -inf }
 0x5ad   :  { %2488 = vmax.xlane.f32.xlu0 %v2487_v48  ;;  %v5262_v51 = vpop.f32.mrf.mxu0 }
 0x5ae   :  { %v2484_v54 = vsel %vm709_vm2, %v5262_v51, -inf }
 0x5b3   :  { %2485 = vmax.xlane.f32.xlu1 %v2484_v54 }
 0x5c3   :  { %2554 = vrot.lane.b32.xlu0 %v4885_v41, %s4710_s23 }
 0x5c4   :  { %2726 = vrot.lane.b32.xlu1 %v4853_v28, %s4710_s23 }
 0x5c7   :  { %2639 = vrot.lane.b32.xlu0 %v4917_v49, %s4710_s23 }
 0x5c8   :  { %2813 = vrot.lane.b32.xlu1 %v4871_v36, %s4710_s23 }
 0x5cb   :  { %2815 = vrot.lane.b32.xlu0 %v4863_v32, %s4710_s23 }
 0x5f3   :  { %v2483_v55 = vpop.xlane.xlu0 %2482 }
 0x5f7   :  { %v2480_v57 = vpop.xlane.xlu0 %2479 }
 0x5fb   :  { %v2495_v29 = vpop.xlane.xlu1 %2494 }
 0x5fc   :  { %v2499_v56 = vmax.f32 %v2483_v55, %v2495_v29 }
 0x5fe   :  { %v2503_v59 = vsub.f32 %v4476_v14, %v2499_v56  ;;  %v2515_v42 = vsub.f32 %v4490_v19, %v2499_v56 }
 0x5ff   :  { %v2492_v58 = vpop.xlane.xlu1 %2491 }
 0x600   :  { %v2498_v34 = vmax.f32 %v2480_v57, %v2492_v58  ;;  %v2510_v35 = vmul.f32 1.442695, %v2503_v59  ;;  %v2522_v62 = vmul.f32 1.442695, %v2515_v42  ;;  %v366_v57 = vld [vmem:[%s5480_s7 + $0x10] sm:$0xff] }
 0x602   :  { %v2502_v50 = vsub.f32 %v2297_v17, %v2498_v34  ;;  %v2514_v33 = vsub.f32 %v2463_v15, %v2498_v34 }
 0x603   :  { %v2553_v60 = vpop.permute.xlu1 %2552 }
 0x604   :  { %v2508_v45 = vmul.f32 1.442695, %v2502_v50  ;;  %v2520_v53 = vmul.f32 1.442695, %v2514_v33 }
 0x606   :  { %4646 = vpow2.f32 %v2508_v45 }
 0x607   :  { %4648 = vpow2.f32 %v2520_v53  ;;  %v2642_v0 = vpop.permute.xlu1 %2641 }
 0x608   :  { %4650 = vpow2.f32 %v2510_v35  ;;  %4498 = vmatprep.subr.mxu1 %v2642_v0 }
 0x609   :  { %4652 = vpow2.f32 %v2522_v62  ;;  %4499 = vmatpush3.msra.mxu1 %v2642_v0 }
 0x60b   :  { %v2729_v14 = vpop.permute.xlu1 %2728 }
 0x613   :  { %v4647_v37 = vpop.eup %4646 }
 0x614   :  { %v4649_v1 = vpop.eup %4648  ;;  %v2530_v2 = vsel %vm709_vm2, %v4647_v37, 0.0 }
 0x615   :  { %v4651_v63 = vpop.eup %4650  ;;  %4502 = vmatprep.mubr.msk.f32.mxu1 %vm709_vm2, %v4649_v1  ;;  %v2542_v3 = vsel %vm709_vm2, %v4649_v1, 0.0  ;;  %2531 = vadd.xlane.f32.xlu0 %v2530_v2 }
 0x616   :  { %v4653_v61 = vpop.eup %4652  ;;  %2543 = vadd.xlane.f32.xlu1 %v2542_v3  ;;  %v2533_v4 = vsel %vm709_vm2, %v4651_v63, 0.0 }
 0x617   :  { %v2545_v5 = vsel %vm709_vm2, %v4653_v61, 0.0 }
 0x619   :  { %2534 = vadd.xlane.f32.xlu0 %v2533_v4 }
 0x61a   :  { %2546 = vadd.xlane.f32.xlu1 %v2545_v5 }
 0x62b   :  { %3013 = vrot.lane.b32.xlu1 %v4853_v28, %s4711_s24 }
 0x62e   :  { %v2477_v7 = vpop.xlane.xlu0 %2476 }
 0x62f   :  { %3106 = vrot.lane.b32.xlu1 %v4863_v32, %s4711_s24  ;;  %3015 = vrot.lane.b32.xlu0 %v4848_v23, %s4711_s24 }
 0x632   :  { %v2474_v8 = vpop.xlane.xlu0 %2473 }
 0x633   :  { %3009 = vrot.lane.b32.xlu1 %v4861_v30, %s4711_s24  ;;  %3104 = vrot.lane.b32.xlu0 %v4871_v36, %s4711_s24 }
 0x636   :  { %v2489_v6 = vpop.xlane.xlu0 %2488 }
 0x637   :  { %v2497_v13 = vmax.f32 %v2477_v7, %v2489_v6  ;;  %3193 = vrot.lane.b32.xlu1 %v4885_v41, %s4711_s24 }
 0x639   :  { %v2501_v16 = vsub.f32 %v5250_v26, %v2497_v13  ;;  %v2513_v20 = vsub.f32 %v5258_v43, %v2497_v13 }
 0x63a   :  { %v2555_v17 = vpop.permute.xlu0 %2554 }
 0x63b   :  { %4491 = vmatprep.subr.mxu0 %v2555_v17  ;;  %v2506_v19 = vmul.f32 1.442695, %v2501_v16  ;;  %v2518_v26 = vmul.f32 1.442695, %v2513_v20 }
 0x63c   :  { %4492 = vmatpush3.msra.mxu0 %v2555_v17  ;;  %v2486_v18 = vpop.xlane.xlu1 %2485 }
 0x63d   :  { %v2496_v15 = vmax.f32 %v2474_v8, %v2486_v18  ;;  %4493 = vmatprep.subr.mxu0 %v2553_v60  ;;  %4654 = vpow2.f32 %v2506_v19 }
 0x63e   :  { %v2640_v30 = vpop.permute.xlu0 %2639  ;;  %4494 = vmatpush3.msra.mxu0 %v2553_v60 }
 0x63f   :  { %v2500_v21 = vsub.f32 %v5254_v31, %v2496_v15  ;;  %v2512_v24 = vsub.f32 %v5262_v51, %v2496_v15  ;;  %4500 = vmatprep.subr.mxu1 %v2640_v30  ;;  %4505 = vmatprep.subr.mxu0 %v2729_v14 }
 0x640   :  { %4501 = vmatpush3.msra.mxu1 %v2640_v30  ;;  %v2727_v27 = vpop.permute.xlu1 %2726 }
 0x641   :  { %v2516_v38 = vmul.f32 1.442695, %v2512_v24  ;;  %4503 = vmatmul.mubr.msk.f32.vlgmr.msra.gmra.mxu1 %vm709_vm2, %v4653_v61  ;;  %v2504_v48 = vmul.f32 1.442695, %v2500_v21 }
 0x642   :  { %v2816_v54 = vpop.permute.xlu0 %2815  ;;  %4516 = vmatprep.mubr.msk.f32.mxu1 %vm709_vm2, %v4647_v37 }
 0x643   :  { %4512 = vmatprep.subr.mxu1 %v2816_v54  ;;  %4656 = vpow2.f32 %v2516_v38 }
 0x644   :  { %4513 = vmatpush3.msra.mxu1 %v2816_v54  ;;  %v2814_v43 = vpop.permute.xlu1 %2813  ;;  %4658 = vpow2.f32 %v2518_v26 }
 0x645   :  { %4514 = vmatprep.subr.mxu1 %v2814_v43  ;;  %4660 = vpow2.f32 %v2504_v48 }
 0x646   :  { %4515 = vmatpush3.msra.mxu1 %v2814_v43 }
 0x647   :  { %4517 = vmatmul.mubr.msk.f32.vlgmr.msra.gmra.mxu1 %vm709_vm2, %v4651_v63 }
 0x64a   :  { %v4655_v31 = vpop.eup %4654 }
 0x64b   :  { %v2527_v55 = vsel %vm709_vm2, %v4655_v31, 0.0 }
 0x650   :  { %v4657_v51 = vpop.eup %4656 }
 0x651   :  { %v4659_v29 = vpop.eup %4658  ;;  %4495 = vmatprep.mubr.msk.f32.mxu0 %vm709_vm2, %v4657_v51  ;;  %v2536_v34 = vsel %vm709_vm2, %v4657_v51, 0.0 }
 0x652   :  { %2528 = vadd.xlane.f32.xlu0 %v2527_v55  ;;  %v4661_v56 = vpop.eup %4660  ;;  %4496 = vmatmul.mubr.msk.f32.vlgmr.msra.gmra.mxu0 %vm709_vm2, %v4659_v29  ;;  %v2539_v58 = vsel %vm709_vm2, %v4659_v29, 0.0 }
 0x653   :  { %4506 = vmatpush3.msra.mxu0 %v2729_v14  ;;  %4509 = vmatprep.mubr.msk.f32.mxu0 %vm709_vm2, %v4661_v56  ;;  %v2524_v59 = vsel %vm709_vm2, %v4661_v56, 0.0 }
 0x654   :  { %4507 = vmatprep.subr.mxu0 %v2727_v27 }
 0x655   :  { %4508 = vmatpush3.msra.mxu0 %v2727_v27 }
 0x656   :  { %2540 = vadd.xlane.f32.xlu0 %v2539_v58  ;;  %4510 = vmatmul.mubr.msk.f32.vlgmr.msra.gmra.mxu0 %vm709_vm2, %v4655_v31 }
 0x657   :  { %4519 = vmatprep.subr.mxu0 %v366_v57 }
 0x658   :  { %4520 = vmatpush3.msra.mxu0 %v366_v57 }
 0x65a   :  { %2525 = vadd.xlane.f32.xlu0 %v2524_v59 }
 0x65b   :  { %2537 = vadd.xlane.f32.xlu1 %v2536_v34 }
 0x66c   :  { %3100 = vrot.lane.b32.xlu1 %v4883_v40, %s4711_s24 }
 0x670   :  { %3276 = vrot.lane.b32.xlu1 %v4901_v46, %s4711_s24  ;;  %3011 = vrot.lane.b32.xlu0 %v4881_v39, %s4711_s24 }
 0x674   :  { %3274 = vrot.lane.b32.xlu1 %v4917_v49, %s4711_s24  ;;  %3191 = vrot.lane.b32.xlu0 %v4891_v44, %s4711_s24 }
 0x678   :  { %3437 = vrot.lane.b32.xlu1 %v4891_v44, %s4712_s27  ;;  %3102 = vrot.lane.b32.xlu0 %v4907_v47, %s4711_s24 }
 0x67c   :  { %3526 = vrot.lane.b32.xlu1 %v4901_v46, %s4712_s27  ;;  %3439 = vrot.lane.b32.xlu0 %v4885_v41, %s4712_s27 }
 0x680   :  { %3613 = vrot.lane.b32.xlu1 %v4848_v23, %s4712_s27 }
 0x69e   :  { %v2532_v39 = vpop.xlane.xlu0 %2531 }
 0x69f   :  { %v2544_v40 = vpop.xlane.xlu1 %2543 }
 0x6a0   :  { %v2550_v42 = vadd.f32 %v2544_v40, %v2532_v39 }
 0x6a2   :  { %v2535_v50 = vpop.xlane.xlu0 %2534 }
 0x6a3   :  { %v2547_v33 = vpop.xlane.xlu1 %2546 }
 0x6a4   :  { %v2551_v60 = vadd.f32 %v2547_v33, %v2535_v50  ;;  %v2111_v50 = vadd.f32 %v5229_v9, %v5242_v12 }
 0x6a6   :  { %v3016_v35 = vpop.permute.xlu0 %3015 }
 0x6a7   :  { %v3014_v44 = vpop.permute.xlu1 %3013  ;;  %4527 = vmatprep.subr.msk.mxu1 %vm372_vm1, %v3016_v35 }
 0x6a8   :  { %4528 = vmatpush3.xpose.msk.msra.mxu1 %vm372_vm1, %v3016_v35 }
 0x6a9   :  { %4529 = vmatprep.subr.msk.mxu1 %vm372_vm1, %v3014_v44 }
 0x6aa   :  { %v3105_v47 = vpop.permute.xlu0 %3104 }
 0x6ab   :  { %v3107_v46 = vpop.permute.xlu1 %3106 }
 0x6ac   :  { %4534 = vmatprep.subr.msk.mxu0 %vm372_vm1, %v3107_v46  ;;  %4530 = vmatpush3.xpose.msk.msra.mxu1 %vm372_vm1, %v3014_v44 }
 0x6af   :  { %v3010_v23 = vpop.permute.xlu1 %3009 }
 0x6b0   :  { %4531 = vmatprep.mubr.msk.f32.mxu1 %vm372_vm1, %v3010_v23 }
 0x6b3   :  { %v3194_v41 = vpop.permute.xlu1 %3193 }
 0x6b4   :  { %4541 = vmatprep.subr.msk.mxu1 %vm372_vm1, %v3194_v41 }
 0x6db   :  { %v2529_v45 = vpop.xlane.xlu0 %2528 }
 0x6df   :  { %v2541_v53 = vpop.xlane.xlu0 %2540 }
 0x6e0   :  { %v2549_v13 = vadd.f32 %v2541_v53, %v2529_v45 }
 0x6e3   :  { %v2526_v62 = vpop.xlane.xlu0 %2525 }
 0x6e4   :  { %v2538_v0 = vpop.xlane.xlu1 %2537 }
 0x6e5   :  { %v2548_v6 = vadd.f32 %v2538_v0, %v2526_v62 }
 0x6e7   :  { %v3012_v37 = vpop.permute.xlu0 %3011  ;;  %4662 = vrcp.f32 %v2548_v6 }
 0x6e8   :  { %v3101_v1 = vpop.permute.xlu1 %3100  ;;  %4532 = vmatmul.mubr.msk.f32.vlgmr.msra.gmra.mxu1 %vm372_vm1, %v3012_v37  ;;  %4664 = vrcp.f32 %v2549_v13 }
 0x6e9   :  { %4542 = vmatpush3.xpose.msk.msra.mxu1 %vm372_vm1, %v3194_v41  ;;  %4545 = vmatprep.mubr.msk.f32.mxu1 %vm372_vm1, %v3010_v23  ;;  %4666 = vrcp.f32 %v2550_v42 }
 0x6ea   :  { %4668 = vrcp.f32 %v2551_v60  ;;  %v2106_v60 = vadd.f32 %v5231_v10, %v5244_v22 }
 0x6eb   :  { %v3192_v2 = vpop.permute.xlu0 %3191 }
 0x6ec   :  { %v3277_v63 = vpop.permute.xlu1 %3276  ;;  %4543 = vmatprep.subr.msk.mxu1 %vm372_vm1, %v3192_v2 }
 0x6ed   :  { %4544 = vmatpush3.xpose.msk.msra.mxu1 %vm372_vm1, %v3192_v2 }
 0x6ef   :  { %v3103_v3 = vpop.permute.xlu0 %3102 }
 0x6f0   :  { %v3275_v61 = vpop.permute.xlu1 %3274  ;;  %4546 = vmatmul.mubr.msk.f32.vlgmr.msra.gmra.mxu1 %vm372_vm1, %v3012_v37 }
 0x6f3   :  { %v3440_v4 = vpop.permute.xlu0 %3439 }
 0x6f4   :  { %v3438_v5 = vpop.permute.xlu1 %3437  ;;  %4555 = vmatprep.subr.mxu1 %v3440_v4  ;;  %v4663_v26 = vpop.eup %4662 }
 0x6f5   :  { %4556 = vmatpush3.msra.mxu1 %v3440_v4  ;;  %v4665_v38 = vpop.eup %4664 }
 0x6f6   :  { %4557 = vmatprep.subr.mxu1 %v3438_v5  ;;  %v4667_v54 = vpop.eup %4666 }
 0x6f7   :  { %4558 = vmatpush3.msra.mxu1 %v3438_v5  ;;  %v4669_v55 = vpop.eup %4668 }
 0x6f8   :  { %v3527_v7 = vpop.permute.xlu1 %3526 }
 0x6fc   :  { %v5339_v8 = vpop.permute.xlu1 %3613 }
 0x6fd   :  { %4569 = vmatprep.subr.mxu1 %v5339_v8 }
 0x701   :  { %v4504_v14 = vpop.f32.mrf.mxu1 }
 0x703   :  { %v2717_v16 = vpop.f32.mrf.mxu1 }
 0x707   :  { %v4518_v17 = vpop.f32.mrf.mxu1 }
 0x708   :  { %v2897_v43 = vadd.f32 %v4518_v17, %v4504_v14 }
 0x709   :  { %v2891_v20 = vpop.f32.mrf.mxu1 }
 0x70a   :  { %v2892_v24 = vadd.f32 %v2891_v20, %v2717_v16  ;;  %v2907_v29 = vmul.f32 %v4669_v55, %v2897_v43 }
 0x70c   :  { %v2906_v51 = vmul.f32 %v4667_v54, %v2892_v24 }
 0x712   :  { %v4497_v18 = vpop.f32.mrf.mxu0 }
 0x714   :  { %v2630_v19 = vpop.f32.mrf.mxu0 }
 0x716   :  { %v4511_v15 = vpop.f32.mrf.mxu0 }
 0x717   :  { %v2810_v30 = vadd.f32 %v4511_v15, %v4497_v18 }
 0x718   :  { %v2804_v21 = vpop.f32.mrf.mxu0 }
 0x719   :  { %v2805_v27 = vadd.f32 %v2804_v21, %v2630_v19  ;;  %v2905_v31 = vmul.f32 %v4665_v38, %v2810_v30 }
 0x71b   :  { %v2904_v48 = vmul.f32 %v4663_v26, %v2805_v27 }
 0x71d   :  { %4521 = vmatprep.mubr.msk.f32.mxu0 %vm372_vm1, %v2904_v48 }
 0x71e   :  { %4522 = vmatmul.mubr.msk.f32.vlgmr.msra.gmra.mxu0 %vm372_vm1, %v2905_v31 }
 0x71f   :  { %4535 = vmatpush3.xpose.msk.msra.mxu0 %vm372_vm1, %v3107_v46  ;;  %4524 = vmatprep.mubr.msk.f32.mxu0 %vm372_vm1, %v2906_v51  ;;  %v2121_v46 = vadd.f32 %v5233_v11, %v5246_v52 }
 0x720   :  { %4536 = vmatprep.subr.msk.mxu0 %vm372_vm1, %v3105_v47 }
 0x722   :  { %4525 = vmatmul.mubr.msk.f32.gmra.mxu0 %vm372_vm1, %v2907_v29 }
 0x723   :  { %4537 = vmatpush3.xpose.msk.msra.mxu0 %vm372_vm1, %v3105_v47  ;;  %4538 = vmatprep.mubr.msk.f32.mxu0 %vm372_vm1, %v3101_v1 }
 0x724   :  { %4548 = vmatprep.subr.msk.mxu0 %vm372_vm1, %v3277_v63 }
 0x726   :  { %4539 = vmatmul.mubr.msk.f32.vlgmr.msra.gmra.mxu0 %vm372_vm1, %v3103_v3 }
 0x727   :  { %4549 = vmatpush3.xpose.msk.msra.mxu0 %vm372_vm1, %v3277_v63  ;;  %4552 = vmatprep.mubr.msk.f32.mxu0 %vm372_vm1, %v3101_v1 }
 0x728   :  { %4550 = vmatprep.subr.msk.mxu0 %vm372_vm1, %v3275_v61 }
 0x72b   :  { %4551 = vmatpush3.xpose.msk.msra.mxu0 %vm372_vm1, %v3275_v61 }
 0x72c   :  { %4562 = vmatprep.subr.mxu0 %v3527_v7 }
 0x72e   :  { %4553 = vmatmul.mubr.msk.f32.vlgmr.msra.gmra.mxu0 %vm372_vm1, %v3103_v3 }
 0x72f   :  { %4563 = vmatpush3.msra.mxu0 %v3527_v7 }
 0x7a8   :  { %v4533_v56 = vpop.f32.mrf.mxu1 }
 0x7a9   :  { %v3360_v57 = vsel %vm709_vm2, %v4533_v56, -inf }
 0x7aa   :  { %3361 = vmax.xlane.f32.xlu0 %v3360_v57  ;;  %v3091_v58 = vpop.f32.mrf.mxu1 }
 0x7ab   :  { %v3357_v59 = vsel %vm709_vm2, %v3091_v58, -inf }
 0x7ae   :  { %3358 = vmax.xlane.f32.xlu0 %v3357_v59 }
 0x7b0   :  { %v4547_v34 = vpop.f32.mrf.mxu1 }
 0x7b1   :  { %v3372_v39 = vsel %vm709_vm2, %v4547_v34, -inf }
 0x7b2   :  { %3373 = vmax.xlane.f32.xlu0 %v3372_v39  ;;  %v3265_v40 = vpop.f32.mrf.mxu1 }
 0x7b3   :  { %v3369_v42 = vsel %vm709_vm2, %v3265_v40, -inf }
 0x7b4   :  { %3370 = vmax.xlane.f32.xlu1 %v3369_v42 }
 0x7c5   :  { %3611 = vrot.lane.b32.xlu1 %v4853_v28, %s4712_s27 }
 0x7de   :  { %v4523_v33 = vpop.f32.mrf.mxu0 }
 0x7df   :  { %v5367_v35 = vadd.f32 %v4523_v33, %v2111_v50 }
 0x7e0   :  { %v2986_v44 = vpop.f32.mrf.mxu0 }
 0x7e1   :  { %v5371_v23 = vadd.f32 %v2986_v44, %v2106_v60  ;;  %v367_v44 = vld [vmem:[%s5480_s7 + $0x18] sm:$0xff] }
 0x7e2   :  { %v4526_v41 = vpop.f32.mrf.mxu0 }
 0x7e3   :  { %v5373_v47 = vadd.f32 %v4526_v41, %v2121_v46 }
 0x7e4   :  { %v2996_v45 = vpop.f32.mrf.mxu0 }
 0x7e5   :  { %v5376_v28 = vadd.f32 %v2996_v45, %v5248_v25 }
 0x7e6   :  { %v5378_v9 = vpop.f32.mrf.mxu0 }
 0x7e7   :  { %v3366_v10 = vsel %vm709_vm2, %v5378_v9, -inf }
 0x7e8   :  { %3367 = vmax.xlane.f32.xlu0 %v3366_v10  ;;  %v5382_v12 = vpop.f32.mrf.mxu0 }
 0x7e9   :  { %v3363_v11 = vsel %vm709_vm2, %v5382_v12, -inf }
 0x7ec   :  { %3364 = vmax.xlane.f32.xlu0 %v3363_v11 }
 0x7ee   :  { %v5386_v22 = vpop.f32.mrf.mxu0 }
 0x7ef   :  { %v3378_v52 = vsel %vm709_vm2, %v5386_v22, -inf }
 0x7f0   :  { %3379 = vmax.xlane.f32.xlu1 %v3378_v52  ;;  %v3348_v25 = vpop.f32.mrf.mxu0 }
 0x7f1   :  { %v3375_v53 = vsel %vm709_vm2, %v3348_v25, -inf }
 0x7f4   :  { %3376 = vmax.xlane.f32.xlu1 %v3375_v53 }
 0x802   :  { %3524 = vrot.lane.b32.xlu0 %v4917_v49, %s4712_s27 }
 0x805   :  { %3698 = vrot.lane.b32.xlu1 %v4871_v36, %s4712_s27 }
 0x806   :  { %3700 = vrot.lane.b32.xlu0 %v4863_v32, %s4712_s27 }
 0x833   :  { %v3362_v62 = vpop.xlane.xlu0 %3361 }
 0x837   :  { %v3359_v0 = vpop.xlane.xlu0 %3358 }
 0x83b   :  { %v3374_v37 = vpop.xlane.xlu0 %3373 }
 0x83c   :  { %v3382_v1 = vmax.f32 %v3362_v62, %v3374_v37 }
 0x83d   :  { %v3371_v2 = vpop.xlane.xlu1 %3370 }
 0x83e   :  { %v3386_v63 = vsub.f32 %v4533_v56, %v3382_v1  ;;  %v3398_v3 = vsub.f32 %v4547_v34, %v3382_v1  ;;  %v3381_v61 = vmax.f32 %v3359_v0, %v3371_v2 }
 0x840   :  { %v3391_v4 = vmul.f32 1.442695, %v3386_v63  ;;  %v3385_v5 = vsub.f32 %v3091_v58, %v3381_v61  ;;  %v3397_v7 = vsub.f32 %v3265_v40, %v3381_v61  ;;  %v3403_v6 = vmul.f32 1.442695, %v3398_v3 }
 0x841   :  { %v3612_v19 = vpop.permute.xlu1 %3611 }
 0x842   :  { %v3389_v13 = vmul.f32 1.442695, %v3385_v5  ;;  %v3401_v49 = vmul.f32 1.442695, %v3397_v7  ;;  %4670 = vpow2.f32 %v3391_v4 }
 0x844   :  { %4672 = vpow2.f32 %v3389_v13 }
 0x845   :  { %4674 = vpow2.f32 %v3401_v49 }
 0x846   :  { %4676 = vpow2.f32 %v3403_v6 }
 0x84f   :  { %v4671_v36 = vpop.eup %4670 }
 0x850   :  { %v3412_v20 = vsel %vm709_vm2, %v4671_v36, 0.0 }
 0x851   :  { %v4673_v32 = vpop.eup %4672 }
 0x852   :  { %v4675_v14 = vpop.eup %4674  ;;  %v3409_v16 = vsel %vm709_vm2, %v4673_v32, 0.0 }
 0x853   :  { %v4677_v17 = vpop.eup %4676  ;;  %4559 = vmatprep.mubr.msk.f32.mxu1 %vm709_vm2, %v4675_v14  ;;  %v3421_v18 = vsel %vm709_vm2, %v4675_v14, 0.0  ;;  %3410 = vadd.xlane.f32.xlu0 %v3409_v16 }
 0x854   :  { %4560 = vmatmul.mubr.msk.f32.vlgmr.msra.gmra.mxu1 %vm709_vm2, %v4677_v17  ;;  %3422 = vadd.xlane.f32.xlu1 %v3421_v18  ;;  %v3424_v15 = vsel %vm709_vm2, %v4677_v17, 0.0 }
 0x855   :  { %4570 = vmatpush3.msra.mxu1 %v5339_v8  ;;  %4573 = vmatprep.mubr.msk.f32.mxu1 %vm709_vm2, %v4673_v32 }
 0x856   :  { %4571 = vmatprep.subr.mxu1 %v3612_v19 }
 0x857   :  { %4572 = vmatpush3.msra.mxu1 %v3612_v19  ;;  %3413 = vadd.xlane.f32.xlu0 %v3412_v20 }
 0x858   :  { %4574 = vmatmul.mubr.msk.f32.vlgmr.msra.gmra.mxu1 %vm709_vm2, %v4671_v36  ;;  %4583 = vmatprep.subr.mxu1 %v367_v44 }
 0x859   :  { %4584 = vmatpush3.msra.mxu1 %v367_v44 }
 0x85b   :  { %3425 = vadd.xlane.f32.xlu0 %v3424_v15 }
 0x871   :  { %v3368_v30 = vpop.xlane.xlu0 %3367 }
 0x875   :  { %v3365_v21 = vpop.xlane.xlu0 %3364 }
 0x879   :  { %v3380_v24 = vpop.xlane.xlu1 %3379  ;;  %v3525_v27 = vpop.permute.xlu0 %3524 }
 0x87a   :  { %v3384_v26 = vmax.f32 %v3368_v30, %v3380_v24  ;;  %4564 = vmatprep.subr.mxu0 %v3525_v27  ;;  %v4702_v24 = vld [vmem:[%s5475_s0 + $0x8] sm:$0xff] }
 0x87b   :  { %4565 = vmatpush3.msra.mxu0 %v3525_v27 }
 0x87c   :  { %v3388_v8 = vsub.f32 %v5378_v9, %v3384_v26  ;;  %v3400_v54 = vsub.f32 %v5386_v22, %v3384_v26 }
 0x87d   :  { %v3377_v38 = vpop.xlane.xlu1 %3376  ;;  %v3701_v48 = vpop.permute.xlu0 %3700 }
 0x87e   :  { %v3383_v43 = vmax.f32 %v3365_v21, %v3377_v38  ;;  %4576 = vmatprep.subr.mxu0 %v3701_v48  ;;  %v3395_v31 = vmul.f32 1.442695, %v3388_v8  ;;  %v3407_v29 = vmul.f32 1.442695, %v3400_v54  ;;  %v4118_v21 = vld [vmem:[%s5481_s8] ss:$0 sm:$0xff] }
 0x87f   :  { %v4703_v8 = vld [vmem:[%s5475_s0] sm:$0xff] }
 0x880   :  { %v3387_v51 = vsub.f32 %v5382_v12, %v3383_v43  ;;  %v3399_v55 = vsub.f32 %v3348_v25, %v3383_v43  ;;  %4678 = vpow2.f32 %v3395_v31 }
 0x881   :  { %v3699_v50 = vpop.permute.xlu1 %3698 }
 0x882   :  { %v3393_v56 = vmul.f32 1.442695, %v3387_v51  ;;  %v3405_v57 = vmul.f32 1.442695, %v3399_v55 }
 0x884   :  { %4680 = vpow2.f32 %v3393_v56 }
 0x885   :  { %4682 = vpow2.f32 %v3405_v57  ;;  %v4705_v57 = vld [vmem:[%s5475_s0 + $0x10] sm:$0xff] }
 0x886   :  { %4684 = vpow2.f32 %v3407_v29 }
 0x88d   :  { %v4679_v58 = vpop.eup %4678 }
 0x88e   :  { %v3418_v33 = vsel %vm709_vm2, %v4679_v58, 0.0 }
 0x891   :  { %v4681_v59 = vpop.eup %4680 }
 0x892   :  { %v4683_v34 = vpop.eup %4682  ;;  %v3415_v39 = vsel %vm709_vm2, %v4681_v59, 0.0 }
 0x893   :  { %v4685_v40 = vpop.eup %4684  ;;  %4566 = vmatprep.mubr.msk.f32.mxu0 %vm709_vm2, %v4683_v34  ;;  %v3427_v42 = vsel %vm709_vm2, %v4683_v34, 0.0  ;;  %3416 = vadd.xlane.f32.xlu0 %v3415_v39 }
 0x894   :  { %4567 = vmatmul.mubr.msk.f32.vlgmr.msra.gmra.mxu0 %vm709_vm2, %v4685_v40  ;;  %3428 = vadd.xlane.f32.xlu1 %v3427_v42  ;;  %v3430_v60 = vsel %vm709_vm2, %v4685_v40, 0.0 }
 0x895   :  { %4577 = vmatpush3.msra.mxu0 %v3701_v48  ;;  %4580 = vmatprep.mubr.msk.f32.mxu0 %vm709_vm2, %v4681_v59 }
 0x896   :  { %4578 = vmatprep.subr.mxu0 %v3699_v50 }
 0x897   :  { %4579 = vmatpush3.msra.mxu0 %v3699_v50  ;;  %3419 = vadd.xlane.f32.xlu0 %v3418_v33 }
 0x898   :  { %3431 = vadd.xlane.f32.xlu1 %v3430_v60  ;;  %4581 = vmatmul.mubr.msk.f32.vlgmr.msra.gmra.mxu0 %vm709_vm2, %v4679_v58 }
 0x8dc   :  { %v3411_v46 = vpop.xlane.xlu0 %3410 }
 0x8dd   :  { %v3423_v45 = vpop.xlane.xlu1 %3422 }
 0x8de   :  { %v3433_v10 = vadd.f32 %v3423_v45, %v3411_v46 }
 0x8e0   :  { %v3414_v41 = vpop.xlane.xlu0 %3413  ;;  %4686 = vrcp.f32 %v3433_v10 }
 0x8e4   :  { %v3426_v9 = vpop.xlane.xlu0 %3425 }
 0x8e5   :  { %v3434_v12 = vadd.f32 %v3426_v9, %v3414_v41 }
 0x8e7   :  { %4688 = vrcp.f32 %v3434_v12 }
 0x8ed   :  { %v4687_v0 = vpop.eup %4686 }
 0x8f4   :  { %v4689_v37 = vpop.eup %4688 }
 0x914   :  { %v4561_v11 = vpop.f32.mrf.mxu1 }
 0x916   :  { %v3515_v22 = vpop.f32.mrf.mxu1 }
 0x918   :  { %v4575_v52 = vpop.f32.mrf.mxu1 }
 0x919   :  { %v3695_v25 = vadd.f32 %v4575_v52, %v4561_v11 }
 0x91a   :  { %v3689_v53 = vpop.f32.mrf.mxu1 }
 0x91b   :  { %v3690_v62 = vadd.f32 %v3689_v53, %v3515_v22  ;;  %v3790_v2 = vmul.f32 %v4689_v37, %v3695_v25 }
 0x91c   :  { %v3417_v63 = vpop.xlane.xlu0 %3416 }
 0x91d   :  { %v3789_v1 = vmul.f32 %v4687_v0, %v3690_v62  ;;  %v3429_v3 = vpop.xlane.xlu1 %3428 }
 0x91e   :  { %v3435_v5 = vadd.f32 %v3429_v3, %v3417_v63 }
 0x91f   :  { %4585 = vmatprep.mubr.msk.f32.mxu1 %vm372_vm1, %v3789_v1 }
 0x920   :  { %4586 = vmatmul.mubr.msk.f32.vlgmr.msra.gmra.mxu1 %vm372_vm1, %v3790_v2  ;;  %v3420_v61 = vpop.xlane.xlu0 %3419  ;;  %4690 = vrcp.f32 %v3435_v5  ;;  %v4119_v5 = vld [vmem:[%s5482_s9] ss:$0 sm:$0xff] }
 0x921   :  { %v3432_v4 = vpop.xlane.xlu1 %3431 }
 0x922   :  { %v3436_v7 = vadd.f32 %v3432_v4, %v3420_v61 }
 0x924   :  { %4692 = vrcp.f32 %v3436_v7 }
 0x92d   :  { %v4691_v16 = vpop.eup %4690 }
 0x931   :  { %v4693_v17 = vpop.eup %4692 }
 0x954   :  { %v4568_v6 = vpop.f32.mrf.mxu0 }
 0x956   :  { %v3602_v13 = vpop.f32.mrf.mxu0 }
 0x958   :  { %v4582_v49 = vpop.f32.mrf.mxu0 }
 0x959   :  { %v3782_v36 = vadd.f32 %v4582_v49, %v4568_v6 }
 0x95a   :  { %v3776_v32 = vpop.f32.mrf.mxu0 }
 0x95b   :  { %v3777_v14 = vadd.f32 %v3776_v32, %v3602_v13  ;;  %v3792_v19 = vmul.f32 %v4693_v17, %v3782_v36  ;;  %v4120_v13 = vld [vmem:[%s5483_s10] ss:$0 sm:$0xff] }
 0x95d   :  { %v3791_v18 = vmul.f32 %v4691_v16, %v3777_v14 }
 0x95f   :  { %4588 = vmatprep.mubr.msk.f32.mxu1 %vm372_vm1, %v3791_v18 }
 0x960   :  { %4589 = vmatmul.mubr.msk.f32.gmra.mxu1 %vm372_vm1, %v3792_v19 }
 0x9e0   :  { %v4587_v20 = vpop.f32.mrf.mxu1 }
 0x9e1   :  { %v3891_v15 = vadd.f32 %v4587_v20, %v5367_v35 }
 0x9e2   :  { %v3871_v30 = vpop.f32.mrf.mxu1 }
 0x9e3   :  { %v3895_v27 = vadd.f32 %v4702_v24, %v3891_v15  ;;  %v3890_v26 = vadd.f32 %v3871_v30, %v5371_v23  ;;  %v4704_v23 = vld [vmem:[%s5475_s0 + $0x18] sm:$0xff] }
 0x9e5   :  { %v3894_v38 = vadd.f32 %v4703_v8, %v3890_v26  ;;  %v3906_v48 = vadd.f32 %v4118_v21, %v3895_v27 }
 0x9e7   :  { %v3914_v35 = vsel %vm66_vm0, %v3906_v48, 0.0  ;;  %v3905_v54 = vadd.f32 %v4118_v21, %v3894_v38 }
 0x9e8   :  { %3915 = vadd.xlane.f32.xlu1 %v3914_v35 }
 0x9e9   :  { %v3911_v43 = vsel %vm66_vm0, %v3905_v54, 0.0 }
 0x9ea   :  { %3912 = vadd.xlane.f32.xlu0 %v3911_v43 }
 0xa20   :  { %v4590_v31 = vpop.f32.mrf.mxu1 }
 0xa21   :  { %v3893_v51 = vadd.f32 %v4590_v31, %v5373_v47 }
 0xa22   :  { %v3881_v55 = vpop.f32.mrf.mxu1 }
 0xa23   :  { %v3897_v29 = vadd.f32 %v4704_v23, %v3893_v51  ;;  %v3892_v56 = vadd.f32 %v3881_v55, %v5376_v28 }
 0xa25   :  { %v3896_v58 = vadd.f32 %v4705_v57, %v3892_v56  ;;  %v3908_v59 = vadd.f32 %v4118_v21, %v3897_v29 }
 0xa27   :  { %v3920_v34 = vsel %vm66_vm0, %v3908_v59, 0.0  ;;  %v3907_v39 = vadd.f32 %v4118_v21, %v3896_v58 }
 0xa28   :  { %3921 = vadd.xlane.f32.xlu1 %v3920_v34 }
 0xa29   :  { %v3917_v47 = vsel %vm66_vm0, %v3907_v39, 0.0 }
 0xa2a   :  { %3918 = vadd.xlane.f32.xlu0 %v3917_v47 }
 0xa71   :  { %v3916_v40 = vpop.xlane.xlu1 %3915 }
 0xa72   :  { %v3925_v42 = vmul.f32 0.03125, %v3916_v40 }
 0xa73   :  { %v3913_v50 = vpop.xlane.xlu0 %3912 }
 0xa74   :  { %v3929_v33 = vsub.f32 %v3906_v48, %v3925_v42  ;;  %v3924_v60 = vmul.f32 0.03125, %v3913_v50 }
 0xa76   :  { %v3928_v44 = vsub.f32 %v3905_v54, %v3924_v60  ;;  %v3933_v28 = vmul.f32 %v3929_v33, %v3929_v33 }
 0xa78   :  { %v3939_v46 = vsel %vm66_vm0, %v3933_v28, 0.0  ;;  %v3932_v41 = vmul.f32 %v3928_v44, %v3928_v44 }
 0xa79   :  { %3940 = vadd.xlane.f32.xlu1 %v3939_v46 }
 0xa7a   :  { %v3936_v45 = vsel %vm66_vm0, %v3932_v41, 0.0 }
 0xa7b   :  { %3937 = vadd.xlane.f32.xlu0 %v3936_v45 }
 0xab1   :  { %v3922_v9 = vpop.xlane.xlu1 %3921 }
 0xab2   :  { %v3927_v10 = vmul.f32 0.03125, %v3922_v9 }
 0xab3   :  { %v3919_v12 = vpop.xlane.xlu0 %3918 }
 0xab4   :  { %v3931_v11 = vsub.f32 %v3908_v59, %v3927_v10  ;;  %v3926_v22 = vmul.f32 0.03125, %v3919_v12 }
 0xab6   :  { %v3930_v52 = vsub.f32 %v3907_v39, %v3926_v22  ;;  %v3935_v25 = vmul.f32 %v3931_v11, %v3931_v11 }
 0xab8   :  { %v3945_v53 = vsel %vm66_vm0, %v3935_v25, 0.0  ;;  %v3934_v62 = vmul.f32 %v3930_v52, %v3930_v52 }
 0xab9   :  { %3946 = vadd.xlane.f32.xlu1 %v3945_v53 }
 0xaba   :  { %v3942_v0 = vsel %vm66_vm0, %v3934_v62, 0.0 }
 0xabb   :  { %3943 = vadd.xlane.f32.xlu0 %v3942_v0 }
 0xb02   :  { %v3941_v37 = vpop.xlane.xlu1 %3940 }
 0xb03   :  { %v3949_v1 = vmul.f32 0.03125, %v3941_v37 }
 0xb04   :  { %v3938_v2 = vpop.xlane.xlu0 %3937 }
 0xb05   :  { %v3953_v63 = vadd.f32 1e-05, %v3949_v1  ;;  %v3948_v3 = vmul.f32 0.03125, %v3938_v2 }
 0xb07   :  { %4694 = vrsqrt.f32 %v3953_v63  ;;  %v3952_v61 = vadd.f32 1e-05, %v3948_v3 }
 0xb09   :  { %4696 = vrsqrt.f32 %v3952_v61 }
 0xb14   :  { %v4695_v4 = vpop.eup %4694 }
 0xb15   :  { %v3961_v7 = vmul.f32 %v4695_v4, %v3929_v33 }
 0xb16   :  { %v4697_v6 = vpop.eup %4696 }
 0xb17   :  { %v3971_v49 = vmul.f32 %v4119_v5, %v3961_v7  ;;  %v3960_v36 = vmul.f32 %v4697_v6, %v3928_v44 }
 0xb19   :  { %v3981_v32 = vadd.f32 %v4120_v13, %v3971_v49  ;;  %v3970_v14 = vmul.f32 %v4119_v5, %v3960_v36 }
 0xb1b   :  { %3985 = vst.msk [vmem:[%s5484_s11 + $0x8] sm:$0xff] %vm66_vm0, %v3981_v32  ;;  %v3980_v16 = vadd.f32 %v4120_v13, %v3970_v14 }
 0xb1d   :  { %3984 = vst.msk [vmem:[%s5484_s11] sm:$0xff] %vm66_vm0, %v3980_v16 }
 0xb42   :  { %v3947_v17 = vpop.xlane.xlu1 %3946 }
 0xb43   :  { %v3951_v18 = vmul.f32 0.03125, %v3947_v17 }
 0xb44   :  { %v3944_v19 = vpop.xlane.xlu0 %3943 }
 0xb45   :  { %v3955_v20 = vadd.f32 1e-05, %v3951_v18  ;;  %v3950_v15 = vmul.f32 0.03125, %v3944_v19 }
 0xb47   :  { %4698 = vrsqrt.f32 %v3955_v20  ;;  %v3954_v30 = vadd.f32 1e-05, %v3950_v15 }
 0xb49   :  { %4700 = vrsqrt.f32 %v3954_v30 }
 0xb54   :  { %v4699_v21 = vpop.eup %4698 }
 0xb55   :  { %v3963_v24 = vmul.f32 %v4699_v21, %v3931_v11 }
 0xb56   :  { %v4701_v27 = vpop.eup %4700 }
 0xb57   :  { %v3973_v26 = vmul.f32 %v4119_v5, %v3963_v24  ;;  %v3962_v8 = vmul.f32 %v4701_v27, %v3930_v52 }
 0xb59   :  { %v3983_v38 = vadd.f32 %v4120_v13, %v3973_v26  ;;  %v3972_v48 = vmul.f32 %v4119_v5, %v3962_v8 }
 0xb5b   :  { %3987 = vst.msk [vmem:[%s5484_s11 + $0x18] sm:$0xff] %vm66_vm0, %v3983_v38  ;;  %v3982_v35 = vadd.f32 %v4120_v13, %v3972_v48 }
 0xb5d   :  { %3986 = vst.msk [vmem:[%s5484_s11 + $0x10] sm:$0xff] %vm66_vm0, %v3982_v35 }

// kernel: multimodal_encoder.8
= control target key start
LH: loop header
LB: loop body
LE: loop exit
PB: predicated region body
PF: predicated region fallthrough
CT: control target
= control target key end

     0   :  { %vm45_vm0 = vcmask 261120   ;;  %v7047_v12 = vmov 0.0   ;;  %vm7048_vm1 = vmmov 0   ;;  %s7049_s26 = smov 96   ;;  %s7051_s27 = smov 88   ;;  %vm190_vm2 = vcmask 64512   ;;  %s8104_s1 = inlined_call_operand.vmem [shape: f32[32,96], index: 1, kind: input, shape index: {}]   ;;  %s8105_s0 = inlined_call_operand.vmem [shape: f32[8,8,32], index: 0, kind: input, shape index: {}]   ;;  %s8106_s2 = inlined_call_operand.vmem [shape: f32[1,96], index: 2, kind: input, shape index: {}]   ;;  %s8107_s3 = inlined_call_operand.vmem [shape: f32[32,32], index: 3, kind: input, shape index: {}]   ;;  %s8108_s4 = inlined_call_operand.vmem [shape: f32[1,32], index: 4, kind: input, shape index: {}]   ;;  %s8109_s5 = inlined_call_operand.vmem [shape: f32[1,32], index: 5, kind: input, shape index: {}]   ;;  %s8110_s6 = inlined_call_operand.vmem [shape: f32[1,32], index: 6, kind: input, shape index: {}]   ;;  %s8111_s7 = inlined_call_operand.vmem [shape: f32[8,8,32], index: 7, kind: output, shape index: {}]  }
   0x1   :  { %v37_v0 = vld [vmem:[%s8104_s1 + $0x18] sm:$0xff]  ;;  %v36_v1 = vld [vmem:[%s8104_s1 + $0x10] sm:$0xff]  ;;  %v26_v2 = vld [vmem:[%s8105_s0] sm:$0xff]  ;;  %6511 = vmatprep.subr.mxu1 %v7047_v12  ;;  %6513 = vmatprep.mubr.msk.f32.mxu1 %vm7048_vm1, %v7047_v12  ;;  %s7052_s28 = smov 120   ;;  %s7053_s29 = smov 56  }
   0x2   :  { %6486 = vmatprep.subr.mxu0 %v37_v0  ;;  %v35_v3 = vld [vmem:[%s8104_s1 + $0x8] sm:$0xff]  ;;  %6494 = vmatprep.mubr.msk.f32.mxu0 %vm45_vm0, %v26_v2  ;;  %v34_v4 = vld [vmem:[%s8104_s1] sm:$0xff]  ;;  %v28_v6 = vld [vmem:[%s8105_s0 + $0x10] sm:$0xff]  ;;  %s7054_s30 = smov 80   ;;  %s7055_s8 = smov 112  }
   0x3   :  { %6487 = vmatpush3.msra.mxu0 %v37_v0  ;;  %v27_v5 = vld [vmem:[%s8105_s0 + $0x8] sm:$0xff]  ;;  %v29_v7 = vld [vmem:[%s8105_s0 + $0x18] sm:$0xff]  ;;  %v30_v8 = vld [vmem:[%s8105_s0 + $0x20] sm:$0xff]  ;;  %s7056_s13 = smov 48   ;;  %s7057_s14 = smov 104  }
   0x4   :  { %6488 = vmatprep.subr.mxu0 %v36_v1  ;;  %v31_v9 = vld [vmem:[%s8105_s0 + $0x28] sm:$0xff]  ;;  %v32_v10 = vld [vmem:[%s8105_s0 + $0x30] sm:$0xff]  ;;  %v33_v11 = vld [vmem:[%s8105_s0 + $0x38] sm:$0xff]  ;;  %s7058_s15 = smov 72   ;;  %s7059_s17 = smov 40  }
   0x5   :  { %6489 = vmatpush3.msra.mxu0 %v36_v1  ;;  %v6170_v13 = vld [vmem:[%s8106_s2] ss:$0 sm:$0xff]  ;;  %s7050_s2 = smov 64  }
   0x6   :  { %6490 = vmatprep.subr.mxu0 %v35_v3 }
   0x7   :  { %6491 = vmatpush3.msra.mxu0 %v35_v3 }
   0x8   :  { %6492 = vmatprep.subr.mxu0 %v34_v4 }
   0x9   :  { %6493 = vmatpush3.msra.mxu0 %v34_v4 }
   0xa   :  { %6495 = vmatmul.mubr.msk.f32.vlgmr.msra.gmra.mxu0 %vm45_vm0, %v27_v5  ;;  %6506 = vmatprep.subr.mxu0 %v7047_v12 }
   0xb   :  { %6497 = vmatprep.mubr.msk.f32.mxu0 %vm45_vm0, %v28_v6 }
   0xe   :  { %6498 = vmatmul.mubr.msk.f32.gmra.mxu0 %vm45_vm0, %v29_v7 }
   0xf   :  { %6500 = vmatprep.mubr.msk.f32.mxu0 %vm45_vm0, %v30_v8 }
  0x12   :  { %6501 = vmatmul.mubr.msk.f32.gmra.mxu0 %vm45_vm0, %v31_v9 }
  0x13   :  { %6503 = vmatprep.mubr.msk.f32.mxu0 %vm45_vm0, %v32_v10 }
  0x16   :  { %6504 = vmatmul.mubr.msk.f32.gmra.mxu0 %vm45_vm0, %v33_v11 }
  0x17   :  { %6508 = vmatprep.mubr.msk.f32.mxu0 %vm7048_vm1, %v7047_v12 }
  0xca   :  { %v6496_v14 = vpop.f32.mrf.mxu0 }
  0xcb   :  { %v7153_v15 = vadd.f32 %v6496_v14, %v6170_v13 }
  0xcc   :  { %v136_v16 = vpop.f32.mrf.mxu0 }
  0xcd   :  { %267 = vrot.lane.b32.xlu0 %v7153_v15, %s7049_s26  ;;  %v7156_v18 = vadd.f32 %v6170_v13, %v136_v16  ;;  %v7195_v31 = vmul.f32 0.35355338, %v7153_v15 }
  0xce   :  { %v6499_v17 = vpop.f32.mrf.mxu0 }
  0xcf   :  { %v7162_v23 = vadd.f32 %v6499_v17, %v6170_v13  ;;  %v7184_v30 = vmul.f32 0.35355338, %v7156_v18 }
  0xd0   :  { %v146_v19 = vpop.f32.mrf.mxu0 }
  0xd1   :  { %v7158_v20 = vadd.f32 %v6170_v13, %v146_v19  ;;  %188 = vrot.lane.b32.xlu0 %v7156_v18, %s7049_s26  ;;  %v7222_v38 = vmul.f32 0.35355338, %v7162_v23 }
  0xd2   :  { %v6502_v21 = vpop.f32.mrf.mxu0 }
  0xd3   :  { %345 = vrot.lane.b32.xlu1 %v7158_v20, %s7049_s26  ;;  %v7166_v26 = vadd.f32 %v6502_v21, %v6170_v13  ;;  %v7212_v35 = vmul.f32 0.35355338, %v7158_v20 }
  0xd4   :  { %v156_v22 = vpop.f32.mrf.mxu0 }
  0xd5   :  { %v7164_v24 = vadd.f32 %v6170_v13, %v156_v22  ;;  %v7236_v42 = vmul.f32 0.35355338, %v7166_v26 }
  0xd6   :  { %v6505_v25 = vpop.f32.mrf.mxu0 }
  0xd7   :  { %423 = vrot.lane.b32.xlu1 %v7162_v23, %s7049_s26  ;;  %501 = vrot.lane.b32.xlu0 %v7164_v24, %s7049_s26  ;;  %v7172_v29 = vadd.f32 %v6505_v25, %v6170_v13  ;;  %v7232_v41 = vmul.f32 0.35355338, %v7164_v24 }
  0xd8   :  { %v166_v27 = vpop.f32.mrf.mxu0 }
  0xd9   :  { %v7170_v28 = vadd.f32 %v6170_v13, %v166_v27  ;;  %v7253_v45 = vmul.f32 0.35355338, %v7172_v29 }
  0xdb   :  { %579 = vrot.lane.b32.xlu1 %v7166_v26, %s7049_s26  ;;  %657 = vrot.lane.b32.xlu0 %v7170_v28, %s7049_s26  ;;  %v7250_v44 = vmul.f32 0.35355338, %v7170_v28 }
  0xdf   :  { %735 = vrot.lane.b32.xlu1 %v7172_v29, %s7049_s26  ;;  %976 = vrot.lane.b32.xlu0 %v7153_v15, %s7050_s2 }
  0xe3   :  { %900 = vrot.lane.b32.xlu1 %v7156_v18, %s7050_s2  ;;  %1204 = vrot.lane.b32.xlu0 %v7164_v24, %s7050_s2 }
  0xe7   :  { %1052 = vrot.lane.b32.xlu1 %v7158_v20, %s7050_s2  ;;  %1510 = vrot.lane.b32.xlu0 %v7156_v18, %s7051_s27 }
  0xeb   :  { %1128 = vrot.lane.b32.xlu1 %v7162_v23, %s7050_s2  ;;  %1508 = vrot.lane.b32.xlu0 %v7184_v30, %s7052_s28 }
  0xef   :  { %1280 = vrot.lane.b32.xlu1 %v7166_v26, %s7050_s2  ;;  %1356 = vrot.lane.b32.xlu0 %v7170_v28, %s7050_s2 }
  0xf3   :  { %1432 = vrot.lane.b32.xlu1 %v7172_v29, %s7050_s2 }
  0xf7   :  { %1588 = vrot.lane.b32.xlu1 %v7153_v15, %s7051_s27 }
  0xfb   :  { %1586 = vrot.lane.b32.xlu1 %v7195_v31, %s7052_s28 }
 0x13f   :  { %v268_v32 = vpop.permute.xlu0 %267 }
 0x140   :  { %6512 = vmatpush3.xpose.msk.msra.mxu1 %vm190_vm2, %v268_v32 }
 0x141   :  { %6516 = vmatprep.subr.mxu1 %v7047_v12 }
 0x143   :  { %6514 = vmatmul.mubr.msk.f32.vlgmr.msra.gmra.mxu1 %vm190_vm2, %v7195_v31  ;;  %v189_v33 = vpop.permute.xlu0 %188 }
 0x144   :  { %6507 = vmatpush3.xpose.msk.msra.mxu0 %vm190_vm2, %v189_v33  ;;  %6518 = vmatprep.mubr.msk.f32.mxu1 %vm7048_vm1, %v7047_v12 }
 0x145   :  { %v346_v34 = vpop.permute.xlu1 %345  ;;  %6531 = vmatprep.subr.mxu0 %v7047_v12 }
 0x146   :  { %6517 = vmatpush3.xpose.msk.msra.mxu1 %vm190_vm2, %v346_v34 }
 0x147   :  { %6509 = vmatmul.mubr.msk.f32.vlgmr.msra.gmra.mxu0 %vm190_vm2, %v7184_v30  ;;  %6521 = vmatprep.subr.mxu1 %v7047_v12 }
 0x148   :  { %6533 = vmatprep.mubr.msk.f32.mxu0 %vm7048_vm1, %v7047_v12 }
 0x149   :  { %v424_v36 = vpop.permute.xlu1 %423  ;;  %6519 = vmatmul.mubr.msk.f32.vlgmr.msra.gmra.mxu1 %vm190_vm2, %v7212_v35  ;;  %v502_v37 = vpop.permute.xlu0 %501 }
 0x14a   :  { %6522 = vmatpush3.xpose.msk.msra.mxu1 %vm190_vm2, %v424_v36  ;;  %6523 = vmatprep.mubr.msk.f32.mxu1 %vm7048_vm1, %v7047_v12 }
 0x14b   :  { %6526 = vmatprep.subr.mxu1 %v7047_v12 }
 0x14d   :  { %v580_v39 = vpop.permute.xlu1 %579  ;;  %6524 = vmatmul.mubr.msk.f32.vlgmr.msra.gmra.mxu1 %vm190_vm2, %v7222_v38  ;;  %v658_v40 = vpop.permute.xlu0 %657 }
 0x14e   :  { %6527 = vmatpush3.xpose.msk.msra.mxu1 %vm190_vm2, %v502_v37  ;;  %6532 = vmatpush3.xpose.msk.msra.mxu0 %vm190_vm2, %v580_v39 }
 0x14f   :  { %6528 = vmatprep.mubr.msk.f32.mxu1 %vm7048_vm1, %v7047_v12  ;;  %6536 = vmatprep.subr.mxu1 %v7047_v12 }
 0x150   :  { %6541 = vmatprep.subr.mxu0 %v7047_v12 }
 0x151   :  { %v736_v43 = vpop.permute.xlu1 %735  ;;  %6529 = vmatmul.mubr.msk.f32.vlgmr.msra.gmra.mxu1 %vm190_vm2, %v7232_v41  ;;  %6534 = vmatmul.mubr.msk.f32.vlgmr.msra.gmra.mxu0 %vm190_vm2, %v7236_v42  ;;  %v977_v46 = vpop.permute.xlu0 %976 }
 0x152   :  { %6537 = vmatpush3.xpose.msk.msra.mxu1 %vm190_vm2, %v658_v40  ;;  %6542 = vmatpush3.xpose.msk.msra.mxu0 %vm190_vm2, %v736_v43 }
 0x153   :  { %6538 = vmatprep.mubr.msk.f32.mxu1 %vm7048_vm1, %v7047_v12  ;;  %6543 = vmatprep.mubr.msk.f32.mxu0 %vm7048_vm1, %v7047_v12 }
 0x154   :  { %6546 = vmatprep.subr.mxu1 %v7047_v12  ;;  %6551 = vmatprep.subr.mxu0 %v7047_v12 }
 0x155   :  { %v901_v47 = vpop.permute.xlu1 %900  ;;  %6539 = vmatmul.mubr.msk.f32.vlgmr.msra.gmra.mxu1 %vm190_vm2, %v7250_v44  ;;  %6544 = vmatmul.mubr.msk.f32.vlgmr.msra.gmra.mxu0 %vm190_vm2, %v7253_v45  ;;  %v7294_v11 = vpop.permute.xlu0 %1204 }
 0x156   :  { %6547 = vmatpush3.msra.mxu1 %v901_v47  ;;  %6552 = vmatpush3.msra.mxu0 %v977_v46 }
 0x157   :  { %6553 = vmatprep.mubr.msk.f32.mxu0 %vm7048_vm1, %v7047_v12  ;;  %6561 = vmatprep.subr.mxu0 %v7047_v12 }
 0x158   :  { %6548 = vmatprep.mubr.msk.f32.mxu1 %vm7048_vm1, %v7047_v12  ;;  %6556 = vmatprep.subr.mxu1 %v7047_v12 }
 0x159   :  { %v7288_v8 = vpop.permute.xlu1 %1052  ;;  %v7298_v14 = vpop.permute.xlu0 %1510 }
 0x15d   :  { %v7290_v9 = vpop.permute.xlu1 %1128  ;;  %v7302_v17 = vpop.permute.xlu0 %1508 }
 0x161   :  { %v7292_v10 = vpop.permute.xlu1 %1280  ;;  %v7306_v21 = vpop.permute.xlu0 %1356 }
 0x165   :  { %v7296_v13 = vpop.permute.xlu1 %1432 }
 0x169   :  { %v7300_v16 = vpop.permute.xlu1 %1588 }
 0x16d   :  { %v7304_v19 = vpop.permute.xlu1 %1586 }
 0x203   :  { %v340_v48 = vpop.f32.mrf.mxu1 }
 0x204   :  { %v815_v49 = vsel %vm190_vm2, %v340_v48, -inf }
 0x205   :  { %v6515_v50 = vpop.f32.mrf.mxu1  ;;  %816 = vmax.xlane.f32.xlu1 %v815_v49 }
 0x207   :  { %v262_v51 = vpop.f32.mrf.mxu0 }
 0x208   :  { %v812_v52 = vsel %vm190_vm2, %v262_v51, -inf }
 0x209   :  { %v418_v53 = vpop.f32.mrf.mxu1  ;;  %813 = vmax.xlane.f32.xlu0 %v812_v52  ;;  %v6510_v54 = vpop.f32.mrf.mxu0 }
 0x20a   :  { %v818_v56 = vsel %vm190_vm2, %v418_v53, -inf }
 0x20b   :  { %v6520_v55 = vpop.f32.mrf.mxu1 }
 0x20d   :  { %v496_v57 = vpop.f32.mrf.mxu1  ;;  %819 = vmax.xlane.f32.xlu0 %v818_v56 }
 0x20e   :  { %v821_v4 = vsel %vm190_vm2, %v496_v57, -inf }
 0x20f   :  { %v6525_v58 = vpop.f32.mrf.mxu1 }
 0x211   :  { %v7270_v59 = vpop.f32.mrf.mxu1  ;;  %v652_v60 = vpop.f32.mrf.mxu0 }
 0x212   :  { %v824_v61 = vsel %vm190_vm2, %v7270_v59, -inf  ;;  %v827_v62 = vsel %vm190_vm2, %v652_v60, -inf }
 0x213   :  { %825 = vmax.xlane.f32.xlu1 %v824_v61  ;;  %v6530_v63 = vpop.f32.mrf.mxu1  ;;  %828 = vmax.xlane.f32.xlu0 %v827_v62  ;;  %v6535_v0 = vpop.f32.mrf.mxu0 }
 0x215   :  { %v7275_v1 = vpop.f32.mrf.mxu1  ;;  %v7277_v2 = vpop.f32.mrf.mxu0 }
 0x216   :  { %v830_v3 = vsel %vm190_vm2, %v7275_v1, -inf  ;;  %v833_v7 = vsel %vm190_vm2, %v7277_v2, -inf }
 0x217   :  { %831 = vmax.xlane.f32.xlu1 %v830_v3  ;;  %v6540_v5 = vpop.f32.mrf.mxu1  ;;  %822 = vmax.xlane.f32.xlu0 %v821_v4  ;;  %v6545_v6 = vpop.f32.mrf.mxu0 }
 0x21b   :  { %834 = vmax.xlane.f32.xlu0 %v833_v7 }
 0x228   :  { %1744 = vrot.lane.b32.xlu1 %v7162_v23, %s7051_s27 }
 0x231   :  { %1666 = vrot.lane.b32.xlu0 %v7158_v20, %s7051_s27 }
 0x28e   :  { %v817_v22 = vpop.xlane.xlu1 %816 }
 0x28f   :  { %v837_v25 = vsub.f32 %v340_v48, %v817_v22 }
 0x291   :  { %v846_v27 = vmul.f32 1.442695, %v837_v25 }
 0x292   :  { %v814_v32 = vpop.xlane.xlu0 %813 }
 0x293   :  { %6895 = vpow2.f32 %v846_v27  ;;  %v836_v33 = vsub.f32 %v262_v51, %v814_v32 }
 0x295   :  { %v844_v34 = vmul.f32 1.442695, %v836_v33 }
 0x296   :  { %v820_v36 = vpop.xlane.xlu0 %819 }
 0x297   :  { %6897 = vpow2.f32 %v844_v34  ;;  %v838_v37 = vsub.f32 %v418_v53, %v820_v36 }
 0x299   :  { %v848_v39 = vmul.f32 1.442695, %v838_v37 }
 0x29b   :  { %6899 = vpow2.f32 %v848_v39 }
 0x29c   :  { %v829_v40 = vpop.xlane.xlu0 %828  ;;  %v826_v61 = vpop.xlane.xlu1 %825 }
 0x29d   :  { %v841_v43 = vsub.f32 %v652_v60, %v829_v40  ;;  %v840_v62 = vsub.f32 %v7270_v59, %v826_v61 }
 0x29f   :  { %v854_v46 = vmul.f32 1.442695, %v841_v43  ;;  %v852_v0 = vmul.f32 1.442695, %v840_v62 }
 0x2a0   :  { %v6896_v47 = vpop.eup %6895  ;;  %v823_v49 = vpop.xlane.xlu0 %822 }
 0x2a1   :  { %v839_v50 = vsub.f32 %v496_v57, %v823_v49  ;;  %v863_v52 = vsel %vm190_vm2, %v6896_v47, 0.0  ;;  %6901 = vpow2.f32 %v854_v46  ;;  %v832_v63 = vpop.xlane.xlu1 %831 }
 0x2a2   :  { %864 = vadd.xlane.f32.xlu0 %v863_v52  ;;  %v842_v3 = vsub.f32 %v7275_v1, %v832_v63 }
 0x2a3   :  { %v850_v48 = vmul.f32 1.442695, %v839_v50 }
 0x2a4   :  { %v6898_v54 = vpop.eup %6897  ;;  %v856_v4 = vmul.f32 1.442695, %v842_v3  ;;  %v835_v5 = vpop.xlane.xlu0 %834 }
 0x2a5   :  { %v860_v51 = vsel %vm190_vm2, %v6898_v54, 0.0  ;;  %6903 = vpow2.f32 %v850_v48  ;;  %v843_v6 = vsub.f32 %v7277_v2, %v835_v5  ;;  %v7359_v33 = vpop.permute.xlu1 %1744 }
 0x2a6   :  { %861 = vadd.xlane.f32.xlu1 %v860_v51  ;;  %6905 = vpow2.f32 %v852_v0 }
 0x2a7   :  { %6907 = vpow2.f32 %v856_v4  ;;  %v858_v7 = vmul.f32 1.442695, %v843_v6 }
 0x2a8   :  { %v7310_v55 = vpop.eup %6899  ;;  %v7357_v32 = vpop.permute.xlu0 %1666 }
 0x2a9   :  { %v866_v53 = vsel %vm190_vm2, %v7310_v55, 0.0  ;;  %6909 = vpow2.f32 %v858_v7 }
 0x2aa   :  { %867 = vadd.xlane.f32.xlu1 %v866_v53 }
 0x2ae   :  { %v7314_v56 = vpop.eup %6901 }
 0x2af   :  { %v875_v57 = vsel %vm190_vm2, %v7314_v56, 0.0 }
 0x2b0   :  { %876 = vadd.xlane.f32.xlu0 %v875_v57 }
 0x2b2   :  { %v7318_v58 = vpop.eup %6903 }
 0x2b3   :  { %v869_v60 = vsel %vm190_vm2, %v7318_v58, 0.0  ;;  %v7329_v22 = vpop.eup %6905 }
 0x2b4   :  { %870 = vadd.xlane.f32.xlu0 %v869_v60  ;;  %v872_v59 = vsel %vm190_vm2, %v7329_v22, 0.0  ;;  %v7333_v25 = vpop.eup %6907 }
 0x2b5   :  { %v878_v1 = vsel %vm190_vm2, %v7333_v25, 0.0 }
 0x2b6   :  { %v7337_v27 = vpop.eup %6909 }
 0x2b7   :  { %v881_v2 = vsel %vm190_vm2, %v7337_v27, 0.0 }
 0x2bb   :  { %1742 = vrot.lane.b32.xlu1 %v7222_v38, %s7052_s28 }
 0x2ca   :  { %1664 = vrot.lane.b32.xlu0 %v7212_v35, %s7052_s28 }
 0x2df   :  { %873 = vadd.xlane.f32.xlu1 %v872_v59 }
 0x2e3   :  { %879 = vadd.xlane.f32.xlu1 %v878_v1 }
 0x2e9   :  { %882 = vadd.xlane.f32.xlu0 %v881_v2 }
 0x2f4   :  { %1900 = vrot.lane.b32.xlu1 %v7166_v26, %s7051_s27 }
 0x2f8   :  { %1898 = vrot.lane.b32.xlu1 %v7236_v42, %s7052_s28 }
 0x2fc   :  { %2056 = vrot.lane.b32.xlu1 %v7172_v29, %s7051_s27 }
 0x2ff   :  { %1822 = vrot.lane.b32.xlu0 %v7164_v24, %s7051_s27 }
 0x300   :  { %2054 = vrot.lane.b32.xlu1 %v7253_v45, %s7052_s28 }
 0x303   :  { %1820 = vrot.lane.b32.xlu0 %v7232_v41, %s7052_s28 }
 0x307   :  { %1978 = vrot.lane.b32.xlu0 %v7170_v28, %s7051_s27 }
 0x30b   :  { %1976 = vrot.lane.b32.xlu0 %v7250_v44, %s7052_s28 }
 0x32b   :  { %v865_v34 = vpop.xlane.xlu0 %864 }
 0x32c   :  { %6911 = vrcp.f32 %v865_v34 }
 0x32f   :  { %v862_v36 = vpop.xlane.xlu1 %861 }
 0x330   :  { %6913 = vrcp.f32 %v862_v36 }
 0x333   :  { %v868_v37 = vpop.xlane.xlu1 %867 }
 0x334   :  { %6915 = vrcp.f32 %v868_v37 }
 0x339   :  { %v6912_v39 = vpop.eup %6911  ;;  %v877_v40 = vpop.xlane.xlu0 %876 }
 0x33a   :  { %v893_v43 = vmul.f32 %v6912_v39, %v6896_v47 }
 0x33c   :  { %6554 = vmatmul.mubr.msk.f32.vlgmr.msra.gmra.mxu0 %vm190_vm2, %v893_v43 }
 0x33d   :  { %v6914_v46 = vpop.eup %6913  ;;  %6562 = vmatpush3.msra.mxu0 %v7290_v9  ;;  %6563 = vmatprep.mubr.msk.f32.mxu0 %vm7048_vm1, %v7047_v12  ;;  %v871_v49 = vpop.xlane.xlu0 %870 }
 0x33e   :  { %v892_v50 = vmul.f32 %v6914_v46, %v6898_v54  ;;  %6571 = vmatprep.subr.mxu0 %v7047_v12  ;;  %6917 = vrcp.f32 %v871_v49  ;;  %v1743_v54 = vpop.permute.xlu1 %1742 }
 0x33f   :  { %6919 = vrcp.f32 %v877_v40 }
 0x340   :  { %6549 = vmatmul.mubr.msk.f32.vlgmr.msra.gmra.mxu1 %vm190_vm2, %v892_v50 }
 0x341   :  { %v6916_v52 = vpop.eup %6915  ;;  %6557 = vmatpush3.msra.mxu1 %v7288_v8  ;;  %6558 = vmatprep.mubr.msk.f32.mxu1 %vm7048_vm1, %v7047_v12 }
 0x342   :  { %6566 = vmatprep.subr.mxu1 %v7047_v12  ;;  %v894_v9 = vmul.f32 %v6916_v52, %v7310_v55  ;;  %v1665_v55 = vpop.permute.xlu0 %1664 }
 0x344   :  { %6559 = vmatmul.mubr.msk.f32.vlgmr.msra.gmra.mxu1 %vm190_vm2, %v894_v9 }
 0x345   :  { %6567 = vmatpush3.msra.mxu1 %v7294_v11  ;;  %6568 = vmatprep.mubr.msk.f32.mxu1 %vm7048_vm1, %v7047_v12 }
 0x346   :  { %6576 = vmatprep.subr.mxu1 %v7047_v12 }
 0x34b   :  { %v6918_v47 = vpop.eup %6917 }
 0x34c   :  { %v895_v48 = vmul.f32 %v6918_v47, %v7318_v58  ;;  %v6920_v8 = vpop.eup %6919 }
 0x34d   :  { %v897_v11 = vmul.f32 %v6920_v8, %v7314_v56 }
 0x34e   :  { %6564 = vmatmul.mubr.msk.f32.vlgmr.msra.gmra.mxu0 %vm190_vm2, %v895_v48 }
 0x34f   :  { %6572 = vmatpush3.msra.mxu0 %v7292_v10  ;;  %6573 = vmatprep.mubr.msk.f32.mxu0 %vm7048_vm1, %v7047_v12 }
 0x350   :  { %6581 = vmatprep.subr.mxu0 %v7047_v12 }
 0x352   :  { %6574 = vmatmul.mubr.msk.f32.vlgmr.msra.gmra.mxu0 %vm190_vm2, %v897_v11 }
 0x353   :  { %6582 = vmatpush3.msra.mxu0 %v7296_v13  ;;  %6583 = vmatprep.mubr.msk.f32.mxu0 %vm7048_vm1, %v7047_v12 }
 0x354   :  { %6591 = vmatprep.subr.mxu0 %v7047_v12 }
 0x368   :  { %v874_v51 = vpop.xlane.xlu1 %873 }
 0x369   :  { %6921 = vrcp.f32 %v874_v51 }
 0x36c   :  { %v880_v10 = vpop.xlane.xlu1 %879 }
 0x36d   :  { %6923 = vrcp.f32 %v880_v10 }
 0x372   :  { %v883_v53 = vpop.xlane.xlu0 %882 }
 0x373   :  { %6925 = vrcp.f32 %v883_v53 }
 0x376   :  { %v6922_v57 = vpop.eup %6921  ;;  %v1823_v13 = vpop.permute.xlu0 %1822 }
 0x377   :  { %v896_v56 = vmul.f32 %v6922_v57, %v7329_v22 }
 0x379   :  { %6569 = vmatmul.mubr.msk.f32.vlgmr.msra.gmra.mxu1 %vm190_vm2, %v896_v56 }
 0x37a   :  { %v6924_v58 = vpop.eup %6923  ;;  %6577 = vmatpush3.msra.mxu1 %v7306_v21  ;;  %6578 = vmatprep.mubr.msk.f32.mxu1 %vm7048_vm1, %v7047_v12  ;;  %v1821_v61 = vpop.permute.xlu0 %1820 }
 0x37b   :  { %6586 = vmatprep.subr.mxu1 %v7047_v12  ;;  %v898_v60 = vmul.f32 %v6924_v58, %v7333_v25  ;;  %v1901_v21 = vpop.permute.xlu1 %1900 }
 0x37d   :  { %6579 = vmatmul.mubr.msk.f32.vlgmr.msra.gmra.mxu1 %vm190_vm2, %v898_v60 }
 0x37e   :  { %6587 = vmatpush3.xpose.msk.msra.mxu1 %vm190_vm2, %v7298_v14  ;;  %6588 = vmatprep.mubr.msk.f32.mxu1 %vm7048_vm1, %v7047_v12  ;;  %v1979_v14 = vpop.permute.xlu0 %1978 }
 0x37f   :  { %6596 = vmatprep.subr.mxu1 %v7047_v12 }
 0x380   :  { %v6926_v62 = vpop.eup %6925 }
 0x381   :  { %6589 = vmatmul.mubr.msk.f32.vlgmr.msra.gmra.mxu1 %vm190_vm2, %v7302_v17  ;;  %v899_v63 = vmul.f32 %v6926_v62, %v7337_v27  ;;  %v1899_v17 = vpop.permute.xlu1 %1898 }
 0x382   :  { %6597 = vmatpush3.xpose.msk.msra.mxu1 %vm190_vm2, %v7357_v32  ;;  %6598 = vmatprep.mubr.msk.f32.mxu1 %vm7048_vm1, %v7047_v12 }
 0x383   :  { %6606 = vmatprep.subr.mxu1 %v7047_v12  ;;  %6584 = vmatmul.mubr.msk.f32.vlgmr.msra.gmra.mxu0 %vm190_vm2, %v899_v63 }
 0x384   :  { %6592 = vmatpush3.xpose.msk.msra.mxu0 %vm190_vm2, %v7300_v16  ;;  %6593 = vmatprep.mubr.msk.f32.mxu0 %vm7048_vm1, %v7047_v12  ;;  %v1977_v16 = vpop.permute.xlu0 %1976 }
 0x385   :  { %6599 = vmatmul.mubr.msk.f32.vlgmr.msra.gmra.mxu1 %vm190_vm2, %v1665_v55  ;;  %6601 = vmatprep.subr.mxu0 %v7047_v12 }
 0x386   :  { %6607 = vmatpush3.xpose.msk.msra.mxu1 %vm190_vm2, %v1823_v13  ;;  %6608 = vmatprep.mubr.msk.f32.mxu1 %vm7048_vm1, %v7047_v12 }
 0x387   :  { %6594 = vmatmul.mubr.msk.f32.vlgmr.msra.gmra.mxu0 %vm190_vm2, %v7304_v19  ;;  %6616 = vmatprep.subr.mxu1 %v7047_v12  ;;  %v2057_v19 = vpop.permute.xlu1 %2056 }
 0x388   :  { %6602 = vmatpush3.xpose.msk.msra.mxu0 %vm190_vm2, %v7359_v33  ;;  %6603 = vmatprep.mubr.msk.f32.mxu0 %vm7048_vm1, %v7047_v12 }
 0x389   :  { %6609 = vmatmul.mubr.msk.f32.vlgmr.msra.gmra.mxu1 %vm190_vm2, %v1821_v61  ;;  %6611 = vmatprep.subr.mxu0 %v7047_v12 }
 0x38a   :  { %6617 = vmatpush3.xpose.msk.msra.mxu1 %vm190_vm2, %v1979_v14  ;;  %6618 = vmatprep.mubr.msk.f32.mxu1 %vm7048_vm1, %v7047_v12 }
 0x38b   :  { %6604 = vmatmul.mubr.msk.f32.vlgmr.msra.gmra.mxu0 %vm190_vm2, %v1743_v54  ;;  %6626 = vmatprep.subr.mxu1 %v7047_v12  ;;  %v2055_v0 = vpop.permute.xlu1 %2054 }
 0x38c   :  { %6612 = vmatpush3.xpose.msk.msra.mxu0 %vm190_vm2, %v1901_v21  ;;  %6613 = vmatprep.mubr.msk.f32.mxu0 %vm7048_vm1, %v7047_v12 }
 0x38d   :  { %6619 = vmatmul.mubr.msk.f32.vlgmr.msra.gmra.mxu1 %vm190_vm2, %v1977_v16  ;;  %6621 = vmatprep.subr.mxu0 %v7047_v12 }
 0x38e   :  { %6628 = vmatprep.mubr.msk.f32.mxu1 %vm7048_vm1, %v7047_v12 }
 0x38f   :  { %6614 = vmatmul.mubr.msk.f32.vlgmr.msra.gmra.mxu0 %vm190_vm2, %v1899_v17 }
 0x390   :  { %6622 = vmatpush3.xpose.msk.msra.mxu0 %vm190_vm2, %v2057_v19  ;;  %6623 = vmatprep.mubr.msk.f32.mxu0 %vm7048_vm1, %v7047_v12 }
 0x391   :  { %6631 = vmatprep.subr.mxu0 %v7047_v12 }
 0x393   :  { %6624 = vmatmul.mubr.msk.f32.vlgmr.msra.gmra.mxu0 %vm190_vm2, %v2055_v0 }
 0x394   :  { %6633 = vmatprep.mubr.msk.f32.mxu0 %vm7048_vm1, %v7047_v12 }
 0x3fc   :  { %v7449_v3 = vpop.f32.mrf.mxu0 }
 0x3fe   :  { %v6555_v4 = vpop.f32.mrf.mxu0 }
 0x400   :  { %v7451_v5 = vpop.f32.mrf.mxu1 }
 0x402   :  { %v6550_v6 = vpop.f32.mrf.mxu1 }
 0x404   :  { %v7453_v7 = vpop.f32.mrf.mxu1 }
 0x406   :  { %v6560_v22 = vpop.f32.mrf.mxu1 }
 0x40e   :  { %v7455_v59 = vpop.f32.mrf.mxu0 }
 0x410   :  { %v6565_v25 = vpop.f32.mrf.mxu0 }
 0x412   :  { %v7457_v1 = vpop.f32.mrf.mxu0 }
 0x414   :  { %v6575_v27 = vpop.f32.mrf.mxu0 }
 0x439   :  { %v7459_v2 = vpop.f32.mrf.mxu1 }
 0x43b   :  { %v6570_v32 = vpop.f32.mrf.mxu1 }
 0x43d   :  { %v7461_v33 = vpop.f32.mrf.mxu1 }
 0x43f   :  { %v6580_v34 = vpop.f32.mrf.mxu1 }
 0x441   :  { %v1582_v36 = vpop.f32.mrf.mxu1 }
 0x442   :  { %v2132_v37 = vsel %vm190_vm2, %v1582_v36, -inf }
 0x443   :  { %v6590_v39 = vpop.f32.mrf.mxu1  ;;  %2133 = vmax.xlane.f32.xlu0 %v2132_v37  ;;  %v7464_v40 = vpop.f32.mrf.mxu0 }
 0x445   :  { %v1738_v43 = vpop.f32.mrf.mxu1  ;;  %v6585_v46 = vpop.f32.mrf.mxu0 }
 0x446   :  { %v2138_v49 = vsel %vm190_vm2, %v1738_v43, -inf }
 0x447   :  { %2139 = vmax.xlane.f32.xlu0 %v2138_v49  ;;  %v6600_v50 = vpop.f32.mrf.mxu1  ;;  %v1660_v52 = vpop.f32.mrf.mxu0 }
 0x448   :  { %v2135_v47 = vsel %vm190_vm2, %v1660_v52, -inf }
 0x449   :  { %v1894_v9 = vpop.f32.mrf.mxu1  ;;  %2136 = vmax.xlane.f32.xlu1 %v2135_v47  ;;  %v6595_v48 = vpop.f32.mrf.mxu0 }
 0x44a   :  { %v2144_v51 = vsel %vm190_vm2, %v1894_v9, -inf }
 0x44b   :  { %v6610_v8 = vpop.f32.mrf.mxu1  ;;  %v1816_v11 = vpop.f32.mrf.mxu0 }
 0x44c   :  { %v2141_v10 = vsel %vm190_vm2, %v1816_v11, -inf }
 0x44d   :  { %v2050_v54 = vpop.f32.mrf.mxu1  ;;  %2145 = vmax.xlane.f32.xlu1 %v2144_v51  ;;  %2142 = vmax.xlane.f32.xlu0 %v2141_v10  ;;  %v6605_v55 = vpop.f32.mrf.mxu0 }
 0x44e   :  { %v2150_v56 = vsel %vm190_vm2, %v2050_v54, -inf }
 0x44f   :  { %v6620_v53 = vpop.f32.mrf.mxu1  ;;  %v1972_v57 = vpop.f32.mrf.mxu0 }
 0x450   :  { %v2147_v58 = vsel %vm190_vm2, %v1972_v57, -inf }
 0x451   :  { %2151 = vmax.xlane.f32.xlu1 %v2150_v56  ;;  %2148 = vmax.xlane.f32.xlu0 %v2147_v58  ;;  %v6615_v13 = vpop.f32.mrf.mxu0 }
 0x453   :  { %v2128_v60 = vpop.f32.mrf.mxu0 }
 0x454   :  { %v2153_v61 = vsel %vm190_vm2, %v2128_v60, -inf }
 0x455   :  { %2154 = vmax.xlane.f32.xlu0 %v2153_v61  ;;  %v6625_v62 = vpop.f32.mrf.mxu0 }
 0x462   :  { %2220 = vrot.lane.b32.xlu1 %v7156_v18, %s7053_s29 }
 0x466   :  { %2372 = vrot.lane.b32.xlu1 %v7158_v20, %s7053_s29 }
 0x46a   :  { %2448 = vrot.lane.b32.xlu1 %v7162_v23, %s7053_s29 }
 0x46b   :  { %2296 = vrot.lane.b32.xlu0 %v7153_v15, %s7053_s29 }
 0x46e   :  { %2600 = vrot.lane.b32.xlu1 %v7166_v26, %s7053_s29 }
 0x46f   :  { %2524 = vrot.lane.b32.xlu0 %v7164_v24, %s7053_s29 }
 0x4cc   :  { %v2134_v21 = vpop.xlane.xlu0 %2133 }
 0x4cd   :  { %v2156_v63 = vsub.f32 %v1582_v36, %v2134_v21 }
 0x4cf   :  { %v2164_v14 = vmul.f32 1.442695, %v2156_v63 }
 0x4d0   :  { %v2140_v17 = vpop.xlane.xlu0 %2139 }
 0x4d1   :  { %6927 = vpow2.f32 %v2164_v14  ;;  %v2158_v16 = vsub.f32 %v1738_v43, %v2140_v17 }
 0x4d2   :  { %v2137_v0 = vpop.xlane.xlu1 %2136 }
 0x4d3   :  { %v2168_v19 = vmul.f32 1.442695, %v2158_v16  ;;  %v2157_v4 = vsub.f32 %v1660_v52, %v2137_v0 }
 0x4d5   :  { %6929 = vpow2.f32 %v2168_v19  ;;  %v2166_v6 = vmul.f32 1.442695, %v2157_v4 }
 0x4d6   :  { %v2146_v22 = vpop.xlane.xlu1 %2145  ;;  %v2143_v25 = vpop.xlane.xlu0 %2142 }
 0x4d7   :  { %6931 = vpow2.f32 %v2166_v6  ;;  %v2160_v27 = vsub.f32 %v1894_v9, %v2146_v22  ;;  %v2159_v32 = vsub.f32 %v1816_v11, %v2143_v25 }
 0x4d9   :  { %v2172_v34 = vmul.f32 1.442695, %v2160_v27  ;;  %v2170_v37 = vmul.f32 1.442695, %v2159_v32 }
 0x4da   :  { %v2152_v39 = vpop.xlane.xlu1 %2151  ;;  %v2149_v46 = vpop.xlane.xlu0 %2148 }
 0x4db   :  { %6933 = vpow2.f32 %v2172_v34  ;;  %v2162_v36 = vsub.f32 %v2050_v54, %v2152_v39  ;;  %v2161_v49 = vsub.f32 %v1972_v57, %v2149_v46 }
 0x4dc   :  { %6935 = vpow2.f32 %v2170_v37 }
 0x4dd   :  { %v2176_v43 = vmul.f32 1.442695, %v2162_v36  ;;  %v2174_v47 = vmul.f32 1.442695, %v2161_v49 }
 0x4de   :  { %v7485_v50 = vpop.eup %6927  ;;  %v2221_v52 = vpop.permute.xlu1 %2220 }
 0x4df   :  { %v2155_v48 = vpop.xlane.xlu0 %2154  ;;  %v2180_v8 = vsel %vm190_vm2, %v7485_v50, 0.0  ;;  %6937 = vpow2.f32 %v2176_v43  ;;  %6627 = vmatpush3.msra.mxu1 %v2221_v52 }
 0x4e0   :  { %v2163_v9 = vsub.f32 %v2128_v60, %v2155_v48  ;;  %2181 = vadd.xlane.f32.xlu1 %v2180_v8  ;;  %6939 = vpow2.f32 %v2174_v47  ;;  %6636 = vmatprep.subr.mxu1 %v7047_v12 }
 0x4e2   :  { %v7490_v11 = vpop.eup %6929  ;;  %v2178_v54 = vmul.f32 1.442695, %v2163_v9  ;;  %v2373_v17 = vpop.permute.xlu1 %2372 }
 0x4e3   :  { %v2297_v51 = vpop.permute.xlu0 %2296  ;;  %v2186_v10 = vsel %vm190_vm2, %v7490_v11, 0.0 }
 0x4e4   :  { %6941 = vpow2.f32 %v2178_v54  ;;  %6632 = vmatpush3.msra.mxu0 %v2297_v51  ;;  %2187 = vadd.xlane.f32.xlu1 %v2186_v10  ;;  %v7494_v55 = vpop.eup %6931 }
 0x4e5   :  { %6641 = vmatprep.subr.mxu0 %v7047_v12  ;;  %v2183_v53 = vsel %vm190_vm2, %v7494_v55, 0.0 }
 0x4e6   :  { %2184 = vadd.xlane.f32.xlu0 %v2183_v53  ;;  %v2449_v16 = vpop.permute.xlu1 %2448 }
 0x4e7   :  { %v2525_v4 = vpop.permute.xlu0 %2524 }
 0x4e8   :  { %v7499_v57 = vpop.eup %6933 }
 0x4e9   :  { %v7501_v56 = vpop.eup %6935  ;;  %v2192_v58 = vsel %vm190_vm2, %v7499_v57, 0.0 }
 0x4ea   :  { %2193 = vadd.xlane.f32.xlu1 %v2192_v58  ;;  %v2189_v13 = vsel %vm190_vm2, %v7501_v56, 0.0  ;;  %v2601_v19 = vpop.permute.xlu1 %2600 }
 0x4eb   :  { %2190 = vadd.xlane.f32.xlu0 %v2189_v13 }
 0x4ec   :  { %v7507_v60 = vpop.eup %6937 }
 0x4ed   :  { %v7509_v61 = vpop.eup %6939  ;;  %v2198_v62 = vsel %vm190_vm2, %v7507_v60, 0.0 }
 0x4ee   :  { %2199 = vadd.xlane.f32.xlu1 %v2198_v62  ;;  %v2195_v21 = vsel %vm190_vm2, %v7509_v61, 0.0 }
 0x4ef   :  { %2196 = vadd.xlane.f32.xlu0 %v2195_v21 }
 0x4f1   :  { %v7515_v63 = vpop.eup %6941 }
 0x4f2   :  { %v2201_v14 = vsel %vm190_vm2, %v7515_v63, 0.0 }
 0x4f3   :  { %2202 = vadd.xlane.f32.xlu0 %v2201_v14 }
 0x4ff   :  { %2752 = vrot.lane.b32.xlu1 %v7172_v29, %s7053_s29 }
 0x503   :  { %3166 = vrot.lane.b32.xlu1 %v7153_v15, %s7054_s30 }
 0x507   :  { %3164 = vrot.lane.b32.xlu1 %v7195_v31, %s7055_s8 }
 0x509   :  { %2676 = vrot.lane.b32.xlu0 %v7170_v28, %s7053_s29 }
 0x50b   :  { %3322 = vrot.lane.b32.xlu1 %v7162_v23, %s7054_s30 }
 0x50d   :  { %3088 = vrot.lane.b32.xlu0 %v7156_v18, %s7054_s30 }
 0x50f   :  { %3320 = vrot.lane.b32.xlu1 %v7222_v38, %s7055_s8 }
 0x511   :  { %3086 = vrot.lane.b32.xlu0 %v7184_v30, %s7055_s8 }
 0x513   :  { %3478 = vrot.lane.b32.xlu1 %v7166_v26, %s7054_s30 }
 0x515   :  { %3244 = vrot.lane.b32.xlu0 %v7158_v20, %s7054_s30 }
 0x517   :  { %3476 = vrot.lane.b32.xlu1 %v7236_v42, %s7055_s8 }
 0x519   :  { %3242 = vrot.lane.b32.xlu0 %v7212_v35, %s7055_s8 }
 0x51b   :  { %3634 = vrot.lane.b32.xlu1 %v7172_v29, %s7054_s30 }
 0x51d   :  { %3400 = vrot.lane.b32.xlu0 %v7164_v24, %s7054_s30 }
 0x51f   :  { %3632 = vrot.lane.b32.xlu1 %v7253_v45, %s7055_s8 }
 0x521   :  { %3398 = vrot.lane.b32.xlu0 %v7232_v41, %s7055_s8 }
 0x525   :  { %3556 = vrot.lane.b32.xlu0 %v7170_v28, %s7054_s30 }
 0x529   :  { %3554 = vrot.lane.b32.xlu0 %v7250_v44, %s7055_s8 }
 0x569   :  { %v2182_v0 = vpop.xlane.xlu1 %2181 }
 0x56a   :  { %6943 = vrcp.f32 %v2182_v0 }
 0x56d   :  { %v2188_v6 = vpop.xlane.xlu1 %2187 }
 0x56e   :  { %6945 = vrcp.f32 %v2188_v6 }
 0x56f   :  { %v2185_v22 = vpop.xlane.xlu0 %2184 }
 0x570   :  { %6947 = vrcp.f32 %v2185_v22 }
 0x573   :  { %v2194_v25 = vpop.xlane.xlu1 %2193 }
 0x574   :  { %6949 = vrcp.f32 %v2194_v25  ;;  %v2191_v27 = vpop.xlane.xlu0 %2190 }
 0x575   :  { %6951 = vrcp.f32 %v2191_v27 }
 0x577   :  { %v6944_v32 = vpop.eup %6943  ;;  %v2200_v34 = vpop.xlane.xlu1 %2199 }
 0x578   :  { %v2212_v37 = vmul.f32 %v6944_v32, %v7485_v50  ;;  %6953 = vrcp.f32 %v2200_v34  ;;  %v2197_v39 = vpop.xlane.xlu0 %2196 }
 0x579   :  { %6955 = vrcp.f32 %v2197_v39 }
 0x57a   :  { %6629 = vmatmul.mubr.msk.f32.vlgmr.msra.gmra.mxu1 %vm190_vm2, %v2212_v37 }
 0x57b   :  { %v6946_v46 = vpop.eup %6945  ;;  %6637 = vmatpush3.msra.mxu1 %v2373_v17  ;;  %6638 = vmatprep.mubr.msk.f32.mxu1 %vm7048_vm1, %v7047_v12  ;;  %v2753_v49 = vpop.permute.xlu1 %2752 }
 0x57c   :  { %6646 = vmatprep.subr.mxu1 %v7047_v12  ;;  %v2214_v36 = vmul.f32 %v6946_v46, %v7490_v11  ;;  %v2203_v43 = vpop.xlane.xlu0 %2202 }
 0x57d   :  { %v6948_v47 = vpop.eup %6947  ;;  %6957 = vrcp.f32 %v2203_v43 }
 0x57e   :  { %6639 = vmatmul.mubr.msk.f32.vlgmr.msra.gmra.mxu1 %vm190_vm2, %v2214_v36  ;;  %v2213_v50 = vmul.f32 %v6948_v47, %v7494_v55 }
 0x57f   :  { %6647 = vmatpush3.msra.mxu1 %v2525_v4  ;;  %6648 = vmatprep.mubr.msk.f32.mxu1 %vm7048_vm1, %v7047_v12  ;;  %v3167_v8 = vpop.permute.xlu1 %3166 }
 0x580   :  { %6656 = vmatprep.subr.mxu1 %v7047_v12  ;;  %6634 = vmatmul.mubr.msk.f32.vlgmr.msra.gmra.mxu0 %vm190_vm2, %v2213_v50  ;;  %v2677_v54 = vpop.permute.xlu0 %2676 }
 0x581   :  { %v6950_v52 = vpop.eup %6949  ;;  %6642 = vmatpush3.msra.mxu0 %v2449_v16  ;;  %6643 = vmatprep.mubr.msk.f32.mxu0 %vm7048_vm1, %v7047_v12 }
 0x582   :  { %v6952_v48 = vpop.eup %6951  ;;  %6651 = vmatprep.subr.mxu0 %v7047_v12  ;;  %v2216_v9 = vmul.f32 %v6950_v52, %v7499_v57 }
 0x583   :  { %v2215_v11 = vmul.f32 %v6952_v48, %v7501_v56  ;;  %v3165_v57 = vpop.permute.xlu1 %3164  ;;  %v175_v56 = vld [vmem:[%s8107_s3] sm:$0xff] }
 0x584   :  { %6649 = vmatmul.mubr.msk.f32.vlgmr.msra.gmra.mxu1 %vm190_vm2, %v2216_v9 }
 0x585   :  { %v6954_v51 = vpop.eup %6953  ;;  %6644 = vmatmul.mubr.msk.f32.vlgmr.msra.gmra.mxu0 %vm190_vm2, %v2215_v11  ;;  %6657 = vmatpush3.msra.mxu1 %v2677_v54 }
 0x586   :  { %v6956_v10 = vpop.eup %6955  ;;  %6652 = vmatpush3.msra.mxu0 %v2601_v19  ;;  %6653 = vmatprep.mubr.msk.f32.mxu0 %vm7048_vm1, %v7047_v12  ;;  %v2218_v55 = vmul.f32 %v6954_v51, %v7507_v60 }
 0x587   :  { %6658 = vmatprep.mubr.msk.f32.mxu1 %vm7048_vm1, %v7047_v12  ;;  %6661 = vmatprep.subr.mxu0 %v7047_v12  ;;  %v2217_v53 = vmul.f32 %v6956_v10, %v7509_v61  ;;  %v3323_v60 = vpop.permute.xlu1 %3322 }
 0x588   :  { %6659 = vmatmul.mubr.msk.f32.vlgmr.msra.gmra.mxu1 %vm190_vm2, %v2218_v55 }
 0x589   :  { %6654 = vmatmul.mubr.msk.f32.vlgmr.msra.gmra.mxu0 %vm190_vm2, %v2217_v53 }
 0x58a   :  { %v6958_v58 = vpop.eup %6957  ;;  %6662 = vmatpush3.msra.mxu0 %v2753_v49  ;;  %6663 = vmatprep.mubr.msk.f32.mxu0 %vm7048_vm1, %v7047_v12 }
 0x58b   :  { %v2219_v13 = vmul.f32 %v6958_v58, %v7515_v63  ;;  %6680 = vmatprep.subr.mxu0 %v175_v56  ;;  %v3321_v61 = vpop.permute.xlu1 %3320 }
 0x58d   :  { %6664 = vmatmul.mubr.msk.f32.vlgmr.msra.gmra.mxu0 %vm190_vm2, %v2219_v13 }
 0x58e   :  { %6682 = vmatprep.mubr.msk.f32.mxu0 %vm190_vm2, %v7451_v5  ;;  %6681 = vmatpush3.msra.mxu0 %v175_v56 }
 0x58f   :  { %6699 = vmatprep.subr.mxu0 %v7047_v12  ;;  %v3479_v5 = vpop.permute.xlu1 %3478 }
 0x591   :  { %6683 = vmatmul.mubr.msk.f32.vlgmr.msra.gmra.mxu0 %vm190_vm2, %v7449_v3 }
 0x592   :  { %6700 = vmatpush3.xpose.msk.msra.mxu0 %vm190_vm2, %v3167_v8  ;;  %6685 = vmatprep.mubr.msk.f32.mxu0 %vm190_vm2, %v7453_v7 }
 0x593   :  { %6709 = vmatprep.subr.mxu0 %v7047_v12  ;;  %v3477_v3 = vpop.permute.xlu1 %3476 }
 0x595   :  { %6686 = vmatmul.mubr.msk.f32.gmra.mxu0 %vm190_vm2, %v7455_v59 }
 0x596   :  { %6688 = vmatprep.mubr.msk.f32.mxu0 %vm190_vm2, %v7459_v2  ;;  %v3089_v2 = vpop.permute.xlu0 %3088 }
 0x597   :  { %v3635_v7 = vpop.permute.xlu1 %3634 }
 0x599   :  { %6689 = vmatmul.mubr.msk.f32.gmra.mxu0 %vm190_vm2, %v7457_v1  ;;  %v176_v1 = vld [vmem:[%s8107_s3 + $0x8] sm:$0xff] }
 0x59a   :  { %6691 = vmatprep.mubr.msk.f32.mxu0 %vm190_vm2, %v7461_v33  ;;  %6666 = vmatprep.subr.mxu1 %v176_v1  ;;  %v3087_v33 = vpop.permute.xlu0 %3086 }
 0x59b   :  { %v3633_v59 = vpop.permute.xlu1 %3632  ;;  %6667 = vmatpush3.msra.mxu1 %v176_v1 }
 0x59c   :  { %6694 = vmatprep.subr.mxu1 %v7047_v12 }
 0x59d   :  { %6692 = vmatmul.mubr.msk.f32.gmra.mxu0 %vm190_vm2, %v7464_v40 }
 0x59e   :  { %6701 = vmatprep.mubr.msk.f32.mxu0 %vm7048_vm1, %v7047_v12  ;;  %v3245_v63 = vpop.permute.xlu0 %3244 }
 0x5a1   :  { %6702 = vmatmul.mubr.msk.f32.vlgmr.msra.gmra.mxu0 %vm190_vm2, %v3165_v57 }
 0x5a2   :  { %6710 = vmatpush3.xpose.msk.msra.mxu0 %vm190_vm2, %v3323_v60  ;;  %6711 = vmatprep.mubr.msk.f32.mxu0 %vm7048_vm1, %v7047_v12  ;;  %v3243_v0 = vpop.permute.xlu0 %3242 }
 0x5a3   :  { %6719 = vmatprep.subr.mxu0 %v7047_v12 }
 0x5a5   :  { %6712 = vmatmul.mubr.msk.f32.vlgmr.msra.gmra.mxu0 %vm190_vm2, %v3321_v61 }
 0x5a6   :  { %6720 = vmatpush3.xpose.msk.msra.mxu0 %vm190_vm2, %v3479_v5  ;;  %6721 = vmatprep.mubr.msk.f32.mxu0 %vm7048_vm1, %v7047_v12  ;;  %v3401_v34 = vpop.permute.xlu0 %3400 }
 0x5a7   :  { %6729 = vmatprep.subr.mxu0 %v7047_v12 }
 0x5a9   :  { %6722 = vmatmul.mubr.msk.f32.vlgmr.msra.gmra.mxu0 %vm190_vm2, %v3477_v3 }
 0x5aa   :  { %6730 = vmatpush3.xpose.msk.msra.mxu0 %vm190_vm2, %v3635_v7  ;;  %6731 = vmatprep.mubr.msk.f32.mxu0 %vm7048_vm1, %v7047_v12  ;;  %v3399_v36 = vpop.permute.xlu0 %3398 }
 0x5ab   :  { %6739 = vmatprep.subr.mxu0 %v7047_v12 }
 0x5ad   :  { %6732 = vmatmul.mubr.msk.f32.vlgmr.msra.gmra.mxu0 %vm190_vm2, %v3633_v59 }
 0x5ae   :  { %6741 = vmatprep.mubr.msk.f32.mxu0 %vm7048_vm1, %v7047_v12  ;;  %v3557_v50 = vpop.permute.xlu0 %3556 }
 0x5b2   :  { %v3555_v9 = vpop.permute.xlu0 %3554 }
 0x63a   :  { %v2292_v40 = vpop.f32.mrf.mxu1 }
 0x63b   :  { %6668 = vmatprep.mubr.msk.f32.mxu1 %vm190_vm2, %v2292_v40 }
 0x63c   :  { %v6630_v62 = vpop.f32.mrf.mxu1 }
 0x63e   :  { %v2444_v21 = vpop.f32.mrf.mxu1 }
 0x640   :  { %v6640_v14 = vpop.f32.mrf.mxu1  ;;  %v2368_v17 = vpop.f32.mrf.mxu0 }
 0x641   :  { %6669 = vmatmul.mubr.msk.f32.vlgmr.msra.gmra.mxu1 %vm190_vm2, %v2368_v17 }
 0x642   :  { %6695 = vmatpush3.xpose.msk.msra.mxu1 %vm190_vm2, %v3089_v2  ;;  %v6635_v16 = vpop.f32.mrf.mxu0  ;;  %6671 = vmatprep.mubr.msk.f32.mxu1 %vm190_vm2, %v2444_v21 }
 0x643   :  { %6704 = vmatprep.subr.mxu1 %v7047_v12 }
 0x644   :  { %v2596_v19 = vpop.f32.mrf.mxu1 }
 0x645   :  { %v2520_v4 = vpop.f32.mrf.mxu0 }
 0x646   :  { %6672 = vmatmul.mubr.msk.f32.gmra.mxu1 %vm190_vm2, %v2520_v4  ;;  %v6650_v6 = vpop.f32.mrf.mxu1 }
 0x647   :  { %v6645_v22 = vpop.f32.mrf.mxu0  ;;  %6674 = vmatprep.mubr.msk.f32.mxu1 %vm190_vm2, %v2596_v19 }
 0x648   :  { %v2748_v25 = vpop.f32.mrf.mxu1 }
 0x649   :  { %v2672_v27 = vpop.f32.mrf.mxu0 }
 0x64a   :  { %6675 = vmatmul.mubr.msk.f32.gmra.mxu1 %vm190_vm2, %v2672_v27  ;;  %v6660_v32 = vpop.f32.mrf.mxu1 }
 0x64b   :  { %v6655_v37 = vpop.f32.mrf.mxu0  ;;  %6677 = vmatprep.mubr.msk.f32.mxu1 %vm190_vm2, %v2748_v25 }
 0x64d   :  { %v2824_v39 = vpop.f32.mrf.mxu0 }
 0x64e   :  { %6678 = vmatmul.mubr.msk.f32.gmra.mxu1 %vm190_vm2, %v2824_v39 }
 0x64f   :  { %v6665_v46 = vpop.f32.mrf.mxu0  ;;  %6696 = vmatprep.mubr.msk.f32.mxu1 %vm7048_vm1, %v7047_v12 }
 0x651   :  { %v7629_v49 = vpop.f32.mrf.mxu0 }
 0x652   :  { %6697 = vmatmul.mubr.msk.f32.vlgmr.msra.gmra.mxu1 %vm190_vm2, %v3087_v33 }
 0x653   :  { %6705 = vmatpush3.xpose.msk.msra.mxu1 %vm190_vm2, %v3245_v63  ;;  %v7633_v43 = vpop.f32.mrf.mxu0  ;;  %6706 = vmatprep.mubr.msk.f32.mxu1 %vm7048_vm1, %v7047_v12 }
 0x654   :  { %6714 = vmatprep.subr.mxu1 %v7047_v12 }
 0x655   :  { %v7638_v47 = vpop.f32.mrf.mxu0 }
 0x656   :  { %6707 = vmatmul.mubr.msk.f32.vlgmr.msra.gmra.mxu1 %vm190_vm2, %v3243_v0 }
 0x657   :  { %6715 = vmatpush3.xpose.msk.msra.mxu1 %vm190_vm2, %v3401_v34  ;;  %v7642_v52 = vpop.f32.mrf.mxu0  ;;  %6716 = vmatprep.mubr.msk.f32.mxu1 %vm7048_vm1, %v7047_v12 }
 0x658   :  { %6724 = vmatprep.subr.mxu1 %v7047_v12 }
 0x659   :  { %v7647_v48 = vpop.f32.mrf.mxu0 }
 0x65a   :  { %6717 = vmatmul.mubr.msk.f32.vlgmr.msra.gmra.mxu1 %vm190_vm2, %v3399_v36 }
 0x65b   :  { %6725 = vmatpush3.xpose.msk.msra.mxu1 %vm190_vm2, %v3557_v50  ;;  %v7651_v8 = vpop.f32.mrf.mxu0  ;;  %6726 = vmatprep.mubr.msk.f32.mxu1 %vm7048_vm1, %v7047_v12 }
 0x65c   :  { %6734 = vmatprep.subr.mxu1 %v7047_v12 }
 0x65d   :  { %v7656_v11 = vpop.f32.mrf.mxu0 }
 0x65e   :  { %6727 = vmatmul.mubr.msk.f32.vlgmr.msra.gmra.mxu1 %vm190_vm2, %v3555_v9 }
 0x65f   :  { %v7659_v54 = vpop.f32.mrf.mxu0  ;;  %6736 = vmatprep.mubr.msk.f32.mxu1 %vm7048_vm1, %v7047_v12 }
 0x661   :  { %v3238_v51 = vpop.f32.mrf.mxu0 }
 0x662   :  { %v3713_v10 = vsel %vm190_vm2, %v3238_v51, -inf }
 0x663   :  { %3714 = vmax.xlane.f32.xlu1 %v3713_v10  ;;  %v6703_v55 = vpop.f32.mrf.mxu0 }
 0x665   :  { %v3394_v53 = vpop.f32.mrf.mxu0 }
 0x666   :  { %v3719_v22 = vsel %vm190_vm2, %v3394_v53, -inf }
 0x667   :  { %v6713_v57 = vpop.f32.mrf.mxu0 }
 0x669   :  { %v7664_v56 = vpop.f32.mrf.mxu0 }
 0x66a   :  { %v3725_v34 = vsel %vm190_vm2, %v7664_v56, -inf }
 0x66b   :  { %v6723_v58 = vpop.f32.mrf.mxu0 }
 0x66d   :  { %v7666_v13 = vpop.f32.mrf.mxu0 }
 0x66e   :  { %v3731_v39 = vsel %vm190_vm2, %v7666_v13, -inf }
 0x66f   :  { %v6733_v60 = vpop.f32.mrf.mxu0 }
 0x6ec   :  { %v3715_v1 = vpop.xlane.xlu1 %3714 }
 0x6ed   :  { %v3735_v40 = vsub.f32 %v3238_v51, %v3715_v1 }
 0x6ef   :  { %v3744_v63 = vmul.f32 1.442695, %v3735_v40 }
 0x6f1   :  { %6959 = vpow2.f32 %v3744_v63 }
 0x6fe   :  { %v7693_v46 = vpop.eup %6959 }
 0x6ff   :  { %v3761_v36 = vsel %vm190_vm2, %v7693_v46, 0.0 }
 0x701   :  { %v7668_v61 = vpop.f32.mrf.mxu1 }
 0x703   :  { %v7670_v5 = vpop.f32.mrf.mxu1 }
 0x706   :  { %v7672_v3 = vpop.f32.mrf.mxu1 }
 0x708   :  { %v7674_v7 = vpop.f32.mrf.mxu1 }
 0x70a   :  { %v7676_v59 = vpop.f32.mrf.mxu1 }
 0x70c   :  { %v7678_v2 = vpop.f32.mrf.mxu1 }
 0x70e   :  { %v7680_v33 = vpop.f32.mrf.mxu1 }
 0x710   :  { %v7682_v62 = vpop.f32.mrf.mxu1 }
 0x712   :  { %v3160_v21 = vpop.f32.mrf.mxu1 }
 0x713   :  { %v3710_v14 = vsel %vm190_vm2, %v3160_v21, -inf }
 0x714   :  { %3711 = vmax.xlane.f32.xlu0 %v3710_v14  ;;  %v6698_v17 = vpop.f32.mrf.mxu1 }
 0x716   :  { %v3316_v16 = vpop.f32.mrf.mxu1 }
 0x717   :  { %v3716_v19 = vsel %vm190_vm2, %v3316_v16, -inf }
 0x718   :  { %3717 = vmax.xlane.f32.xlu0 %v3716_v19  ;;  %v6708_v0 = vpop.f32.mrf.mxu1 }
 0x71a   :  { %v3472_v4 = vpop.f32.mrf.mxu1 }
 0x71b   :  { %v3722_v6 = vsel %vm190_vm2, %v3472_v4, -inf }
 0x71c   :  { %v6718_v25 = vpop.f32.mrf.mxu1  ;;  %3723 = vmax.xlane.f32.xlu1 %v3722_v6  ;;  %3720 = vmax.xlane.f32.xlu0 %v3719_v22 }
 0x71e   :  { %v3628_v27 = vpop.f32.mrf.mxu1 }
 0x71f   :  { %v3728_v32 = vsel %vm190_vm2, %v3628_v27, -inf }
 0x720   :  { %v6728_v37 = vpop.f32.mrf.mxu1  ;;  %3729 = vmax.xlane.f32.xlu1 %v3728_v32  ;;  %3726 = vmax.xlane.f32.xlu0 %v3725_v34 }
 0x724   :  { %3732 = vmax.xlane.f32.xlu0 %v3731_v39 }
 0x728   :  { %3762 = vadd.xlane.f32.xlu0 %v3761_v36 }
 0x731   :  { %3798 = vrot.lane.b32.xlu1 %v7156_v18, %s7056_s13 }
 0x735   :  { %3950 = vrot.lane.b32.xlu1 %v7158_v20, %s7056_s13 }
 0x739   :  { %4026 = vrot.lane.b32.xlu1 %v7162_v23, %s7056_s13 }
 0x73d   :  { %4178 = vrot.lane.b32.xlu1 %v7166_v26, %s7056_s13 }
 0x79d   :  { %v3712_v50 = vpop.xlane.xlu0 %3711 }
 0x79e   :  { %v3734_v9 = vsub.f32 %v3160_v21, %v3712_v50 }
 0x7a0   :  { %v3742_v51 = vmul.f32 1.442695, %v3734_v9 }
 0x7a1   :  { %v3718_v10 = vpop.xlane.xlu0 %3717 }
 0x7a2   :  { %6961 = vpow2.f32 %v3742_v51  ;;  %v3736_v55 = vsub.f32 %v3316_v16, %v3718_v10 }
 0x7a4   :  { %v3746_v57 = vmul.f32 1.442695, %v3736_v55 }
 0x7a5   :  { %v3724_v58 = vpop.xlane.xlu1 %3723  ;;  %v3721_v60 = vpop.xlane.xlu0 %3720 }
 0x7a6   :  { %6963 = vpow2.f32 %v3746_v57  ;;  %v3738_v1 = vsub.f32 %v3472_v4, %v3724_v58  ;;  %v3737_v40 = vsub.f32 %v3394_v53, %v3721_v60 }
 0x7a8   :  { %v3750_v63 = vmul.f32 1.442695, %v3738_v1  ;;  %v3748_v14 = vmul.f32 1.442695, %v3737_v40 }
 0x7a9   :  { %v3730_v17 = vpop.xlane.xlu1 %3729  ;;  %v3727_v19 = vpop.xlane.xlu0 %3726 }
 0x7aa   :  { %6965 = vpow2.f32 %v3750_v63  ;;  %v3740_v0 = vsub.f32 %v3628_v27, %v3730_v17  ;;  %v3739_v6 = vsub.f32 %v7664_v56, %v3727_v19 }
 0x7ab   :  { %6967 = vpow2.f32 %v3748_v14 }
 0x7ac   :  { %v3754_v21 = vmul.f32 1.442695, %v3740_v0  ;;  %v3752_v22 = vmul.f32 1.442695, %v3739_v6 }
 0x7ad   :  { %v3799_v25 = vpop.permute.xlu1 %3798  ;;  %v3733_v32 = vpop.xlane.xlu0 %3732 }
 0x7ae   :  { %6969 = vpow2.f32 %v3754_v21  ;;  %v3741_v16 = vsub.f32 %v7666_v13, %v3733_v32  ;;  %6735 = vmatpush3.msra.mxu1 %v3799_v25 }
 0x7af   :  { %v7707_v34 = vpop.eup %6961  ;;  %6971 = vpow2.f32 %v3752_v22  ;;  %6744 = vmatprep.subr.mxu1 %v7047_v12 }
 0x7b0   :  { %v3756_v53 = vmul.f32 1.442695, %v3741_v16  ;;  %v3758_v4 = vsel %vm190_vm2, %v7707_v34, 0.0 }
 0x7b1   :  { %3759 = vadd.xlane.f32.xlu1 %v3758_v4 }
 0x7b2   :  { %6973 = vpow2.f32 %v3756_v53 }
 0x7b3   :  { %v7712_v56 = vpop.eup %6963 }
 0x7b4   :  { %v3764_v27 = vsel %vm190_vm2, %v7712_v56, 0.0 }
 0x7b5   :  { %3765 = vadd.xlane.f32.xlu1 %v3764_v27 }
 0x7b7   :  { %v7716_v37 = vpop.eup %6965 }
 0x7b8   :  { %v7718_v13 = vpop.eup %6967  ;;  %v3770_v39 = vsel %vm190_vm2, %v7716_v37, 0.0 }
 0x7b9   :  { %3771 = vadd.xlane.f32.xlu1 %v3770_v39  ;;  %v3767_v36 = vsel %vm190_vm2, %v7718_v13, 0.0 }
 0x7ba   :  { %3768 = vadd.xlane.f32.xlu0 %v3767_v36 }
 0x7bb   :  { %v7724_v50 = vpop.eup %6969 }
 0x7bc   :  { %v7726_v9 = vpop.eup %6971  ;;  %v3776_v51 = vsel %vm190_vm2, %v7724_v50, 0.0 }
 0x7bd   :  { %3777 = vadd.xlane.f32.xlu1 %v3776_v51  ;;  %v3773_v10 = vsel %vm190_vm2, %v7726_v9, 0.0 }
 0x7be   :  { %3774 = vadd.xlane.f32.xlu0 %v3773_v10 }
 0x7bf   :  { %v7732_v55 = vpop.eup %6973 }
 0x7c0   :  { %v3779_v57 = vsel %vm190_vm2, %v7732_v55, 0.0 }
 0x7c2   :  { %3780 = vadd.xlane.f32.xlu0 %v3779_v57 }
 0x7ce   :  { %4330 = vrot.lane.b32.xlu1 %v7172_v29, %s7056_s13 }
 0x7d2   :  { %4543 = vrot.lane.b32.xlu1 %v7184_v30, %s7057_s14  ;;  %v3951_v30 = vpop.permute.xlu1 %3950 }
 0x7d6   :  { %4621 = vrot.lane.b32.xlu1 %v7195_v31, %s7057_s14  ;;  %v4027_v31 = vpop.permute.xlu1 %4026 }
 0x7d8   :  { %3874 = vrot.lane.b32.xlu0 %v7153_v15, %s7056_s13 }
 0x7da   :  { %4699 = vrot.lane.b32.xlu1 %v7212_v35, %s7057_s14  ;;  %v4179_v35 = vpop.permute.xlu1 %4178 }
 0x7dc   :  { %4102 = vrot.lane.b32.xlu0 %v7164_v24, %s7056_s13 }
 0x7de   :  { %4777 = vrot.lane.b32.xlu1 %v7222_v38, %s7057_s14 }
 0x7e0   :  { %4254 = vrot.lane.b32.xlu0 %v7170_v28, %s7056_s13 }
 0x7e2   :  { %4935 = vrot.lane.b32.xlu1 %v7166_v26, %s7058_s15 }
 0x7e4   :  { %4545 = vrot.lane.b32.xlu0 %v7156_v18, %s7058_s15 }
 0x7e6   :  { %4933 = vrot.lane.b32.xlu1 %v7236_v42, %s7057_s14  ;;  %v3763_v42 = vpop.xlane.xlu0 %3762 }
 0x7e8   :  { %4623 = vrot.lane.b32.xlu0 %v7153_v15, %s7058_s15 }
 0x7ea   :  { %5091 = vrot.lane.b32.xlu1 %v7172_v29, %s7058_s15 }
 0x7ec   :  { %4701 = vrot.lane.b32.xlu0 %v7158_v20, %s7058_s15 }
 0x7ee   :  { %5089 = vrot.lane.b32.xlu1 %v7253_v45, %s7057_s14 }
 0x7f0   :  { %4779 = vrot.lane.b32.xlu0 %v7162_v23, %s7058_s15 }
 0x7f4   :  { %4857 = vrot.lane.b32.xlu0 %v7164_v24, %s7058_s15 }
 0x7f8   :  { %4855 = vrot.lane.b32.xlu0 %v7232_v41, %s7057_s14 }
 0x7fc   :  { %5013 = vrot.lane.b32.xlu0 %v7170_v28, %s7058_s15 }
 0x800   :  { %5011 = vrot.lane.b32.xlu0 %v7250_v44, %s7057_s14 }
 0x83a   :  { %v3760_v38 = vpop.xlane.xlu1 %3759 }
 0x83b   :  { %6975 = vrcp.f32 %v3760_v38 }
 0x83c   :  { %6977 = vrcp.f32 %v3763_v42  ;;  %v177_v42 = vld [vmem:[%s8107_s3 + $0x10] sm:$0xff] }
 0x83e   :  { %v3766_v58 = vpop.xlane.xlu1 %3765 }
 0x83f   :  { %6979 = vrcp.f32 %v3766_v58 }
 0x842   :  { %v3772_v45 = vpop.xlane.xlu1 %3771 }
 0x843   :  { %6981 = vrcp.f32 %v3772_v45  ;;  %v3769_v60 = vpop.xlane.xlu0 %3768 }
 0x844   :  { %6983 = vrcp.f32 %v3769_v60 }
 0x846   :  { %v3778_v1 = vpop.xlane.xlu1 %3777 }
 0x847   :  { %6985 = vrcp.f32 %v3778_v1  ;;  %v3775_v41 = vpop.xlane.xlu0 %3774 }
 0x848   :  { %v6976_v40 = vpop.eup %6975  ;;  %6987 = vrcp.f32 %v3775_v41 }
 0x849   :  { %v3790_v44 = vmul.f32 %v6976_v40, %v7707_v34  ;;  %v6978_v14 = vpop.eup %6977 }
 0x84a   :  { %v4331_v63 = vpop.permute.xlu1 %4330  ;;  %v3791_v22 = vmul.f32 %v6978_v14, %v7693_v46 }
 0x84b   :  { %v3781_v17 = vpop.xlane.xlu0 %3780  ;;  %6737 = vmatmul.mubr.msk.f32.vlgmr.msra.gmra.mxu1 %vm190_vm2, %v3790_v44 }
 0x84c   :  { %v6980_v19 = vpop.eup %6979  ;;  %6989 = vrcp.f32 %v3781_v17  ;;  %6745 = vmatpush3.msra.mxu1 %v3951_v30  ;;  %6746 = vmatprep.mubr.msk.f32.mxu1 %vm7048_vm1, %v7047_v12 }
 0x84d   :  { %v3792_v0 = vmul.f32 %v6980_v19, %v7712_v56  ;;  %6754 = vmatprep.subr.mxu1 %v7047_v12 }
 0x84e   :  { %v4544_v6 = vpop.permute.xlu1 %4543 }
 0x84f   :  { %v3875_v21 = vpop.permute.xlu0 %3874  ;;  %6747 = vmatmul.mubr.msk.f32.vlgmr.msra.gmra.mxu1 %vm190_vm2, %v3792_v0 }
 0x850   :  { %v6982_v25 = vpop.eup %6981  ;;  %6740 = vmatpush3.msra.mxu0 %v3875_v21  ;;  %6756 = vmatprep.mubr.msk.f32.mxu1 %vm7048_vm1, %v7047_v12 }
 0x851   :  { %v6984_v32 = vpop.eup %6983  ;;  %6742 = vmatmul.mubr.msk.f32.vlgmr.msra.gmra.mxu0 %vm190_vm2, %v3791_v22  ;;  %6749 = vmatprep.subr.mxu0 %v7047_v12  ;;  %v3794_v16 = vmul.f32 %v6982_v25, %v7716_v37 }
 0x852   :  { %6750 = vmatpush3.msra.mxu0 %v4027_v31  ;;  %v4622_v34 = vpop.permute.xlu1 %4621  ;;  %6751 = vmatprep.mubr.msk.f32.mxu0 %vm7048_vm1, %v7047_v12  ;;  %v3793_v53 = vmul.f32 %v6984_v32, %v7718_v13 }
 0x853   :  { %v4103_v46 = vpop.permute.xlu0 %4102  ;;  %6759 = vmatprep.subr.mxu0 %v7047_v12 }
 0x854   :  { %v6986_v4 = vpop.eup %6985  ;;  %6755 = vmatpush3.msra.mxu1 %v4103_v46 }
 0x855   :  { %v6988_v56 = vpop.eup %6987  ;;  %6752 = vmatmul.mubr.msk.f32.vlgmr.msra.gmra.mxu0 %vm190_vm2, %v3793_v53  ;;  %6757 = vmatmul.mubr.msk.f32.vlgmr.msra.gmra.mxu1 %vm190_vm2, %v3794_v16  ;;  %v3796_v27 = vmul.f32 %v6986_v4, %v7724_v50 }
 0x856   :  { %6760 = vmatpush3.msra.mxu0 %v4179_v35  ;;  %v4700_v37 = vpop.permute.xlu1 %4699  ;;  %6764 = vmatprep.subr.mxu1 %v7047_v12  ;;  %v3795_v39 = vmul.f32 %v6988_v56, %v7726_v9 }
 0x857   :  { %v4255_v36 = vpop.permute.xlu0 %4254  ;;  %6761 = vmatprep.mubr.msk.f32.mxu0 %vm7048_vm1, %v7047_v12  ;;  %6766 = vmatprep.mubr.msk.f32.mxu1 %vm7048_vm1, %v7047_v12 }
 0x858   :  { %6765 = vmatpush3.msra.mxu1 %v4255_v36  ;;  %6769 = vmatprep.subr.mxu0 %v7047_v12 }
 0x859   :  { %v6990_v13 = vpop.eup %6989  ;;  %6762 = vmatmul.mubr.msk.f32.vlgmr.msra.gmra.mxu0 %vm190_vm2, %v3795_v39  ;;  %6767 = vmatmul.mubr.msk.f32.vlgmr.msra.gmra.mxu1 %vm190_vm2, %v3796_v27 }
 0x85a   :  { %6770 = vmatpush3.msra.mxu0 %v4331_v63  ;;  %6771 = vmatprep.mubr.msk.f32.mxu0 %vm7048_vm1, %v7047_v12  ;;  %v3797_v50 = vmul.f32 %v6990_v13, %v7732_v55  ;;  %v4778_v51 = vpop.permute.xlu1 %4777 }
 0x85b   :  { %v4546_v9 = vpop.permute.xlu0 %4545  ;;  %6788 = vmatprep.subr.mxu0 %v7047_v12  ;;  %6774 = vmatprep.subr.mxu1 %v177_v42 }
 0x85c   :  { %6775 = vmatpush3.msra.mxu1 %v177_v42 }
 0x85d   :  { %6772 = vmatmul.mubr.msk.f32.vlgmr.msra.gmra.mxu0 %vm190_vm2, %v3797_v50  ;;  %6808 = vmatprep.subr.mxu1 %v7047_v12 }
 0x85e   :  { %6789 = vmatpush3.xpose.msk.msra.mxu0 %vm190_vm2, %v4546_v9  ;;  %6790 = vmatprep.mubr.msk.f32.mxu0 %vm7048_vm1, %v7047_v12  ;;  %v4936_v57 = vpop.permute.xlu1 %4935 }
 0x85f   :  { %v4624_v10 = vpop.permute.xlu0 %4623  ;;  %6793 = vmatprep.subr.mxu0 %v7047_v12 }
 0x861   :  { %6791 = vmatmul.mubr.msk.f32.vlgmr.msra.gmra.mxu0 %vm190_vm2, %v4544_v6 }
 0x862   :  { %6794 = vmatpush3.xpose.msk.msra.mxu0 %vm190_vm2, %v4624_v10  ;;  %6795 = vmatprep.mubr.msk.f32.mxu0 %vm7048_vm1, %v7047_v12  ;;  %v4934_v31 = vpop.permute.xlu1 %4933 }
 0x863   :  { %v4702_v55 = vpop.permute.xlu0 %4701  ;;  %6798 = vmatprep.subr.mxu0 %v7047_v12 }
 0x865   :  { %6796 = vmatmul.mubr.msk.f32.vlgmr.msra.gmra.mxu0 %vm190_vm2, %v4622_v34 }
 0x866   :  { %6799 = vmatpush3.xpose.msk.msra.mxu0 %vm190_vm2, %v4702_v55  ;;  %6800 = vmatprep.mubr.msk.f32.mxu0 %vm7048_vm1, %v7047_v12  ;;  %v5092_v35 = vpop.permute.xlu1 %5091 }
 0x867   :  { %v4780_v30 = vpop.permute.xlu0 %4779  ;;  %6803 = vmatprep.subr.mxu0 %v7047_v12 }
 0x869   :  { %6801 = vmatmul.mubr.msk.f32.vlgmr.msra.gmra.mxu0 %vm190_vm2, %v4700_v37 }
 0x86a   :  { %6804 = vmatpush3.xpose.msk.msra.mxu0 %vm190_vm2, %v4780_v30  ;;  %6805 = vmatprep.mubr.msk.f32.mxu0 %vm7048_vm1, %v7047_v12  ;;  %v5090_v38 = vpop.permute.xlu1 %5089 }
 0x86b   :  { %6813 = vmatprep.subr.mxu0 %v7047_v12  ;;  %v4858_v40 = vpop.permute.xlu0 %4857 }
 0x86d   :  { %6806 = vmatmul.mubr.msk.f32.vlgmr.msra.gmra.mxu0 %vm190_vm2, %v4778_v51 }
 0x86e   :  { %6814 = vmatpush3.xpose.msk.msra.mxu0 %vm190_vm2, %v4936_v57  ;;  %6815 = vmatprep.mubr.msk.f32.mxu0 %vm7048_vm1, %v7047_v12 }
 0x86f   :  { %6823 = vmatprep.subr.mxu0 %v7047_v12  ;;  %v4856_v0 = vpop.permute.xlu0 %4855 }
 0x871   :  { %6816 = vmatmul.mubr.msk.f32.vlgmr.msra.gmra.mxu0 %vm190_vm2, %v4934_v31 }
 0x872   :  { %6824 = vmatpush3.xpose.msk.msra.mxu0 %vm190_vm2, %v5092_v35  ;;  %6825 = vmatprep.mubr.msk.f32.mxu0 %vm7048_vm1, %v7047_v12 }
 0x873   :  { %6833 = vmatprep.subr.mxu0 %v7047_v12  ;;  %v5014_v16 = vpop.permute.xlu0 %5013 }
 0x875   :  { %6826 = vmatmul.mubr.msk.f32.vlgmr.msra.gmra.mxu0 %vm190_vm2, %v5090_v38 }
 0x876   :  { %6835 = vmatprep.mubr.msk.f32.mxu0 %vm7048_vm1, %v7047_v12 }
 0x877   :  { %v5012_v56 = vpop.permute.xlu0 %5011 }
 0x90b   :  { %v3870_v58 = vpop.f32.mrf.mxu1 }
 0x90c   :  { %6776 = vmatprep.mubr.msk.f32.mxu1 %vm190_vm2, %v3870_v58 }
 0x90d   :  { %v6738_v45 = vpop.f32.mrf.mxu1 }
 0x90f   :  { %v4022_v60 = vpop.f32.mrf.mxu1 }
 0x911   :  { %v3946_v1 = vpop.f32.mrf.mxu0  ;;  %v6748_v41 = vpop.f32.mrf.mxu1 }
 0x912   :  { %6777 = vmatmul.mubr.msk.f32.vlgmr.msra.gmra.mxu1 %vm190_vm2, %v3946_v1 }
 0x913   :  { %6809 = vmatpush3.xpose.msk.msra.mxu1 %vm190_vm2, %v4858_v40  ;;  %v6743_v44 = vpop.f32.mrf.mxu0  ;;  %6779 = vmatprep.mubr.msk.f32.mxu1 %vm190_vm2, %v4022_v60 }
 0x914   :  { %6818 = vmatprep.subr.mxu1 %v7047_v12 }
 0x915   :  { %v4098_v63 = vpop.f32.mrf.mxu0  ;;  %v4174_v14 = vpop.f32.mrf.mxu1 }
 0x916   :  { %6780 = vmatmul.mubr.msk.f32.gmra.mxu1 %vm190_vm2, %v4098_v63 }
 0x917   :  { %v6753_v17 = vpop.f32.mrf.mxu0  ;;  %v6758_v19 = vpop.f32.mrf.mxu1  ;;  %6782 = vmatprep.mubr.msk.f32.mxu1 %vm190_vm2, %v4174_v14 }
 0x919   :  { %v4250_v6 = vpop.f32.mrf.mxu0  ;;  %v4326_v21 = vpop.f32.mrf.mxu1 }
 0x91a   :  { %6783 = vmatmul.mubr.msk.f32.gmra.mxu1 %vm190_vm2, %v4250_v6 }
 0x91b   :  { %v6763_v22 = vpop.f32.mrf.mxu0  ;;  %v6768_v25 = vpop.f32.mrf.mxu1  ;;  %6785 = vmatprep.mubr.msk.f32.mxu1 %vm190_vm2, %v4326_v21 }
 0x91d   :  { %v4402_v32 = vpop.f32.mrf.mxu0 }
 0x91e   :  { %6786 = vmatmul.mubr.msk.f32.gmra.mxu1 %vm190_vm2, %v4402_v32 }
 0x91f   :  { %v6773_v34 = vpop.f32.mrf.mxu0  ;;  %6810 = vmatprep.mubr.msk.f32.mxu1 %vm7048_vm1, %v7047_v12 }
 0x921   :  { %v7842_v53 = vpop.f32.mrf.mxu0 }
 0x922   :  { %6811 = vmatmul.mubr.msk.f32.vlgmr.msra.gmra.mxu1 %vm190_vm2, %v4856_v0  ;;  %v5167_v46 = vsel %vm190_vm2, %v7842_v53, -inf }
 0x923   :  { %6819 = vmatpush3.xpose.msk.msra.mxu1 %vm190_vm2, %v5014_v16  ;;  %5168 = vmax.xlane.f32.xlu0 %v5167_v46  ;;  %v6792_v4 = vpop.f32.mrf.mxu0  ;;  %v3053_v46 = vadd.f32 %v7629_v49, %v7668_v61  ;;  %v3058_v61 = vadd.f32 %v7642_v52, %v7674_v7  ;;  %v3083_v7 = vadd.f32 %v7656_v11, %v7680_v33 }
 0x924   :  { %6820 = vmatprep.mubr.msk.f32.mxu1 %vm7048_vm1, %v7047_v12  ;;  %6828 = vmatprep.subr.mxu1 %v7047_v12 }
 0x925   :  { %v4695_v27 = vpop.f32.mrf.mxu0 }
 0x926   :  { %6821 = vmatmul.mubr.msk.f32.vlgmr.msra.gmra.mxu1 %vm190_vm2, %v5012_v56  ;;  %v5170_v37 = vsel %vm190_vm2, %v4695_v27, -inf }
 0x927   :  { %5171 = vmax.xlane.f32.xlu1 %v5170_v37  ;;  %v6797_v39 = vpop.f32.mrf.mxu0  ;;  %6830 = vmatprep.mubr.msk.f32.mxu1 %vm7048_vm1, %v7047_v12 }
 0x929   :  { %v7855_v36 = vpop.f32.mrf.mxu0 }
 0x92a   :  { %v5173_v13 = vsel %vm190_vm2, %v7855_v36, -inf }
 0x92b   :  { %5174 = vmax.xlane.f32.xlu0 %v5173_v13  ;;  %v6802_v50 = vpop.f32.mrf.mxu0 }
 0x92d   :  { %v4851_v9 = vpop.f32.mrf.mxu0 }
 0x92e   :  { %v5176_v51 = vsel %vm190_vm2, %v4851_v9, -inf }
 0x92f   :  { %5177 = vmax.xlane.f32.xlu0 %v5176_v51  ;;  %v6807_v10 = vpop.f32.mrf.mxu0 }
 0x931   :  { %v5007_v57 = vpop.f32.mrf.mxu0 }
 0x932   :  { %v5182_v55 = vsel %vm190_vm2, %v5007_v57, -inf }
 0x933   :  { %5183 = vmax.xlane.f32.xlu0 %v5182_v55  ;;  %v6817_v30 = vpop.f32.mrf.mxu0 }
 0x935   :  { %v5163_v31 = vpop.f32.mrf.mxu0 }
 0x936   :  { %v5188_v35 = vsel %vm190_vm2, %v5163_v31, -inf }
 0x937   :  { %5189 = vmax.xlane.f32.xlu0 %v5188_v35  ;;  %v6827_v38 = vpop.f32.mrf.mxu0 }
 0x9ac   :  { %v5169_v42 = vpop.xlane.xlu0 %5168 }
 0x9ad   :  { %v5191_v37 = vsub.f32 %v7842_v53, %v5169_v42 }
 0x9af   :  { %v5199_v10 = vmul.f32 1.442695, %v5191_v37 }
 0x9b0   :  { %v5172_v58 = vpop.xlane.xlu1 %5171 }
 0x9b1   :  { %v5192_v45 = vsub.f32 %v4695_v27, %v5172_v58  ;;  %v3048_v27 = vadd.f32 %v7633_v43, %v7670_v5 }
 0x9b3   :  { %v5201_v60 = vmul.f32 1.442695, %v5192_v45 }
 0x9b4   :  { %v5175_v1 = vpop.xlane.xlu0 %5174 }
 0x9b5   :  { %6991 = vpow2.f32 %v5201_v60  ;;  %v5193_v43 = vsub.f32 %v7855_v36, %v5175_v1 }
 0x9b8   :  { %v5178_v41 = vpop.xlane.xlu0 %5177 }
 0x9b9   :  { %v5194_v40 = vsub.f32 %v4851_v9, %v5178_v41  ;;  %v3063_v9 = vadd.f32 %v7638_v47, %v7672_v3  ;;  %v3068_v47 = vadd.f32 %v7651_v8, %v7678_v2  ;;  %v5203_v3 = vmul.f32 1.442695, %v5193_v43 }
 0x9bb   :  { %v5205_v44 = vmul.f32 1.442695, %v5194_v40 }
 0x9bc   :  { %v5184_v63 = vpop.xlane.xlu0 %5183 }
 0x9bd   :  { %6993 = vpow2.f32 %v5205_v44  ;;  %v5196_v14 = vsub.f32 %v5007_v57, %v5184_v63  ;;  %v3073_v57 = vadd.f32 %v7647_v48, %v7676_v59  ;;  %v3078_v48 = vadd.f32 %v7659_v54, %v7682_v62 }
 0x9bf   :  { %v5209_v17 = vmul.f32 1.442695, %v5196_v14 }
 0x9c0   :  { %v5190_v19 = vpop.xlane.xlu0 %5189 }
 0x9c1   :  { %6995 = vpow2.f32 %v5209_v17  ;;  %v5198_v0 = vsub.f32 %v5163_v31, %v5190_v19 }
 0x9c2   :  { %v7862_v6 = vpop.eup %6991 }
 0x9c3   :  { %v5213_v21 = vmul.f32 1.442695, %v5198_v0  ;;  %v5218_v22 = vsel %vm190_vm2, %v7862_v6, 0.0 }
 0x9c4   :  { %5219 = vadd.xlane.f32.xlu0 %v5218_v22 }
 0x9c5   :  { %6997 = vpow2.f32 %v5213_v21 }
 0x9c6   :  { %6999 = vpow2.f32 %v5199_v10 }
 0x9c7   :  { %7001 = vpow2.f32 %v5203_v3 }
 0x9ca   :  { %v7866_v25 = vpop.eup %6993 }
 0x9cb   :  { %v5224_v32 = vsel %vm190_vm2, %v7866_v25, 0.0 }
 0x9cc   :  { %5225 = vadd.xlane.f32.xlu0 %v5224_v32 }
 0x9ce   :  { %v7870_v16 = vpop.eup %6995 }
 0x9cf   :  { %v5230_v34 = vsel %vm190_vm2, %v7870_v16, 0.0 }
 0x9d0   :  { %5231 = vadd.xlane.f32.xlu0 %v5230_v34 }
 0x9d2   :  { %v7876_v4 = vpop.eup %6997  ;;  %v6778_v56 = vpop.f32.mrf.mxu1 }
 0x9d3   :  { %v7881_v39 = vadd.f32 %v6778_v56, %v3053_v46  ;;  %v5236_v13 = vsel %vm190_vm2, %v7876_v4, 0.0  ;;  %v7000_v33 = vpop.eup %6999 }
 0x9d4   :  { %v4496_v50 = vpop.f32.mrf.mxu1  ;;  %5237 = vadd.xlane.f32.xlu0 %v5236_v13  ;;  %v5215_v54 = vsel %vm190_vm2, %v7000_v33, 0.0  ;;  %v7002_v62 = vpop.eup %7001 }
 0x9d5   :  { %v7887_v51 = vadd.f32 %v4496_v50, %v3048_v27  ;;  %v5221_v1 = vsel %vm190_vm2, %v7002_v62, 0.0 }
 0x9d6   :  { %v6781_v49 = vpop.f32.mrf.mxu1 }
 0x9d7   :  { %v7892_v5 = vadd.f32 %v6781_v49, %v3063_v9 }
 0x9d8   :  { %v4506_v53 = vpop.f32.mrf.mxu1 }
 0x9d9   :  { %v7896_v55 = vadd.f32 %v4506_v53, %v3058_v61 }
 0x9da   :  { %v6784_v30 = vpop.f32.mrf.mxu1 }
 0x9db   :  { %v7900_v31 = vadd.f32 %v6784_v30, %v3073_v57 }
 0x9dc   :  { %v4516_v52 = vpop.f32.mrf.mxu1 }
 0x9dd   :  { %v7904_v36 = vadd.f32 %v4516_v52, %v3068_v47 }
 0x9de   :  { %v6787_v35 = vpop.f32.mrf.mxu1 }
 0x9df   :  { %v7908_v59 = vadd.f32 %v6787_v35, %v3083_v7  ;;  %v178_v7 = vld [vmem:[%s8107_s3 + $0x18] sm:$0xff] }
 0x9e0   :  { %v4526_v38 = vpop.f32.mrf.mxu1 }
 0x9e1   :  { %v7910_v42 = vadd.f32 %v4526_v38, %v3078_v48 }
 0x9e2   :  { %v4929_v8 = vpop.f32.mrf.mxu1 }
 0x9e3   :  { %v5179_v2 = vsel %vm190_vm2, %v4929_v8, -inf }
 0x9e4   :  { %v6812_v58 = vpop.f32.mrf.mxu1  ;;  %5180 = vmax.xlane.f32.xlu1 %v5179_v2 }
 0x9e6   :  { %v5085_v45 = vpop.f32.mrf.mxu1 }
 0x9e7   :  { %v5185_v11 = vsel %vm190_vm2, %v5085_v45, -inf }
 0x9e8   :  { %v6822_v60 = vpop.f32.mrf.mxu1  ;;  %5186 = vmax.xlane.f32.xlu1 %v5185_v11 }
 0x9ea   :  { %5331 = vrot.lane.b32.xlu0 %v7153_v15, %s7059_s17 }
 0x9ec   :  { %5216 = vadd.xlane.f32.xlu1 %v5215_v54 }
 0x9ee   :  { %5559 = vrot.lane.b32.xlu0 %v7164_v24, %s7059_s17 }
 0x9f0   :  { %5222 = vadd.xlane.f32.xlu1 %v5221_v1 }
 0x9f2   :  { %5711 = vrot.lane.b32.xlu0 %v7170_v28, %s7059_s17 }
 0xa01   :  { %5255 = vrot.lane.b32.xlu1 %v7156_v18, %s7059_s17 }
 0xa05   :  { %5407 = vrot.lane.b32.xlu1 %v7158_v20, %s7059_s17 }
 0xa09   :  { %5483 = vrot.lane.b32.xlu1 %v7162_v23, %s7059_s17 }
 0xa0d   :  { %5635 = vrot.lane.b32.xlu1 %v7166_v26, %s7059_s17 }
 0xa4d   :  { %v5220_v15 = vpop.xlane.xlu0 %5219 }
 0xa4e   :  { %7003 = vrcp.f32 %v5220_v15 }
 0xa55   :  { %v5226_v24 = vpop.xlane.xlu0 %5225 }
 0xa59   :  { %v5232_v41 = vpop.xlane.xlu0 %5231 }
 0xa5b   :  { %v7004_v44 = vpop.eup %7003 }
 0xa5c   :  { %v5248_v28 = vmul.f32 %v7004_v44, %v7862_v6 }
 0xa5d   :  { %v5238_v40 = vpop.xlane.xlu0 %5237 }
 0xa61   :  { %v5332_v63 = vpop.permute.xlu0 %5331 }
 0xa62   :  { %6834 = vmatpush3.msra.mxu0 %v5332_v63 }
 0xa63   :  { %6836 = vmatmul.mubr.msk.f32.vlgmr.msra.gmra.mxu0 %vm190_vm2, %v5248_v28  ;;  %6843 = vmatprep.subr.mxu0 %v7047_v12  ;;  %v6307_v28 = vld [vmem:[%s8108_s4] ss:$0 sm:$0xff] }
 0xa64   :  { %6845 = vmatprep.mubr.msk.f32.mxu0 %vm7048_vm1, %v7047_v12 }
 0xa6d   :  { %v5181_v18 = vpop.xlane.xlu1 %5180 }
 0xa6e   :  { %v5195_v20 = vsub.f32 %v4929_v8, %v5181_v18  ;;  %v7039_v18 = vld [vmem:[%s8105_s0 + $0x8] sm:$0xff] }
 0xa70   :  { %v5207_v23 = vmul.f32 1.442695, %v5195_v20 }
 0xa71   :  { %v5187_v26 = vpop.xlane.xlu1 %5186 }
 0xa72   :  { %7005 = vpow2.f32 %v5207_v23  ;;  %v5197_v14 = vsub.f32 %v5085_v45, %v5187_v26 }
 0xa73   :  { %7007 = vrcp.f32 %v5226_v24 }
 0xa74   :  { %v5211_v17 = vmul.f32 1.442695, %v5197_v14  ;;  %v7040_v14 = vld [vmem:[%s8105_s0] sm:$0xff] }
 0xa75   :  { %v5217_v19 = vpop.xlane.xlu1 %5216 }
 0xa76   :  { %7009 = vpow2.f32 %v5211_v17 }
 0xa77   :  { %7011 = vrcp.f32 %v5217_v19 }
 0xa78   :  { %7013 = vrcp.f32 %v5232_v41 }
 0xa79   :  { %v5223_v0 = vpop.xlane.xlu1 %5222 }
 0xa7a   :  { %7015 = vrcp.f32 %v5223_v0 }
 0xa7b   :  { %7017 = vrcp.f32 %v5238_v40 }
 0xa7d   :  { %v5256_v6 = vpop.permute.xlu1 %5255 }
 0xa7e   :  { %6829 = vmatpush3.msra.mxu1 %v5256_v6  ;;  %v7041_v6 = vld [vmem:[%s8105_s0 + $0x18] sm:$0xff] }
 0xa7f   :  { %v7006_v21 = vpop.eup %7005  ;;  %6838 = vmatprep.subr.mxu1 %v7047_v12 }
 0xa80   :  { %v5227_v22 = vsel %vm190_vm2, %v7006_v21, 0.0  ;;  %v7008_v34 = vpop.eup %7007 }
 0xa81   :  { %5228 = vadd.xlane.f32.xlu1 %v5227_v22  ;;  %v5408_v32 = vpop.permute.xlu1 %5407  ;;  %v5250_v50 = vmul.f32 %v7008_v34, %v7866_v25  ;;  %v5560_v25 = vpop.permute.xlu0 %5559  ;;  %v7042_v34 = vld [vmem:[%s8105_s0 + $0x10] sm:$0xff] }
 0xa83   :  { %v7010_v46 = vpop.eup %7009 }
 0xa84   :  { %v7012_v56 = vpop.eup %7011  ;;  %v5233_v27 = vsel %vm190_vm2, %v7010_v46, 0.0 }
 0xa85   :  { %5234 = vadd.xlane.f32.xlu1 %v5233_v27  ;;  %v5484_v37 = vpop.permute.xlu1 %5483  ;;  %v5247_v13 = vmul.f32 %v7012_v56, %v7000_v33  ;;  %v7014_v9 = vpop.eup %7013 }
 0xa86   :  { %6844 = vmatpush3.msra.mxu0 %v5484_v37  ;;  %v5252_v43 = vmul.f32 %v7014_v9, %v7870_v16  ;;  %v5712_v35 = vpop.permute.xlu0 %5711 }
 0xa87   :  { %v7016_v49 = vpop.eup %7015  ;;  %6831 = vmatmul.mubr.msk.f32.vlgmr.msra.gmra.mxu1 %vm190_vm2, %v5247_v13  ;;  %6846 = vmatmul.mubr.msk.f32.vlgmr.msra.gmra.mxu0 %vm190_vm2, %v5250_v50 }
 0xa88   :  { %6839 = vmatpush3.msra.mxu1 %v5408_v32  ;;  %6840 = vmatprep.mubr.msk.f32.mxu1 %vm7048_vm1, %v7047_v12  ;;  %v5249_v61 = vmul.f32 %v7016_v49, %v7002_v62  ;;  %v7018_v57 = vpop.eup %7017 }
 0xa89   :  { %6848 = vmatprep.subr.mxu1 %v7047_v12  ;;  %v5636_v10 = vpop.permute.xlu1 %5635  ;;  %6853 = vmatprep.subr.mxu0 %v7047_v12  ;;  %v5254_v47 = vmul.f32 %v7018_v57, %v7876_v4 }
 0xa8a   :  { %6854 = vmatpush3.msra.mxu0 %v5636_v10  ;;  %6855 = vmatprep.mubr.msk.f32.mxu0 %vm7048_vm1, %v7047_v12 }
 0xa8b   :  { %6841 = vmatmul.mubr.msk.f32.vlgmr.msra.gmra.mxu1 %vm190_vm2, %v5249_v61  ;;  %6856 = vmatmul.mubr.msk.f32.vlgmr.msra.gmra.mxu0 %vm190_vm2, %v5252_v43  ;;  %v7043_v43 = vld [vmem:[%s8105_s0 + $0x28] sm:$0xff] }
 0xa8c   :  { %6849 = vmatpush3.msra.mxu1 %v5560_v25  ;;  %6863 = vmatprep.subr.mxu0 %v7047_v12 }
 0xa8d   :  { %6865 = vmatprep.mubr.msk.f32.mxu0 %vm7048_vm1, %v7047_v12  ;;  %6850 = vmatprep.mubr.msk.f32.mxu1 %vm7048_vm1, %v7047_v12 }
 0xa8e   :  { %6858 = vmatprep.subr.mxu1 %v7047_v12 }
 0xa96   :  { %5787 = vrot.lane.b32.xlu1 %v7172_v29, %s7059_s17 }
 0xb0a   :  { %v5229_v16 = vpop.xlane.xlu1 %5228 }
 0xb0b   :  { %7019 = vrcp.f32 %v5229_v16 }
 0xb0e   :  { %v5235_v53 = vpop.xlane.xlu1 %5234 }
 0xb0f   :  { %7021 = vrcp.f32 %v5235_v53 }
 0xb12   :  { %v5788_v30 = vpop.permute.xlu1 %5787 }
 0xb13   :  { %6864 = vmatpush3.msra.mxu0 %v5788_v30 }
 0xb14   :  { %6866 = vmatmul.mubr.msk.f32.vlgmr.msra.gmra.mxu0 %vm190_vm2, %v5254_v47  ;;  %v7044_v47 = vld [vmem:[%s8105_s0 + $0x20] sm:$0xff] }
 0xb18   :  { %v7020_v3 = vpop.eup %7019 }
 0xb19   :  { %v5251_v52 = vmul.f32 %v7020_v3, %v7006_v21 }
 0xb1b   :  { %6851 = vmatmul.mubr.msk.f32.vlgmr.msra.gmra.mxu1 %vm190_vm2, %v5251_v52 }
 0xb1c   :  { %v7022_v29 = vpop.eup %7021  ;;  %6859 = vmatpush3.msra.mxu1 %v5712_v35  ;;  %6860 = vmatprep.mubr.msk.f32.mxu1 %vm7048_vm1, %v7047_v12 }
 0xb1d   :  { %v5253_v48 = vmul.f32 %v7022_v29, %v7010_v46  ;;  %6868 = vmatprep.subr.mxu1 %v178_v7 }
 0xb1f   :  { %6861 = vmatmul.mubr.msk.f32.vlgmr.msra.gmra.mxu1 %vm190_vm2, %v5253_v48  ;;  %v7045_v48 = vld [vmem:[%s8105_s0 + $0x38] sm:$0xff] }
 0xb20   :  { %6869 = vmatpush3.msra.mxu1 %v178_v7 }
 0xb23   :  { %v5403_v4 = vpop.f32.mrf.mxu0 }
 0xb25   :  { %v6837_v38 = vpop.f32.mrf.mxu0 }
 0xb47   :  { %v5327_v8 = vpop.f32.mrf.mxu1  ;;  %v5555_v2 = vpop.f32.mrf.mxu0 }
 0xb48   :  { %6870 = vmatprep.mubr.msk.f32.mxu1 %vm190_vm2, %v5327_v8 }
 0xb49   :  { %v6832_v58 = vpop.f32.mrf.mxu1  ;;  %6871 = vmatmul.mubr.msk.f32.vlgmr.msra.gmra.mxu1 %vm190_vm2, %v5403_v4  ;;  %v6847_v45 = vpop.f32.mrf.mxu0 }
 0xb4b   :  { %v5479_v11 = vpop.f32.mrf.mxu1  ;;  %v5707_v33 = vpop.f32.mrf.mxu0 }
 0xb4c   :  { %6873 = vmatprep.mubr.msk.f32.mxu1 %vm190_vm2, %v5479_v11 }
 0xb4d   :  { %v6842_v12 = vpop.f32.mrf.mxu1  ;;  %6874 = vmatmul.mubr.msk.f32.gmra.mxu1 %vm190_vm2, %v5555_v2  ;;  %v6857_v60 = vpop.f32.mrf.mxu0 }
 0xbd4   :  { %v5859_v54 = vpop.f32.mrf.mxu0 }
 0xbd6   :  { %v6867_v62 = vpop.f32.mrf.mxu0 }
 0xbdb   :  { %v5631_v1 = vpop.f32.mrf.mxu1 }
 0xbdc   :  { %6876 = vmatprep.mubr.msk.f32.mxu1 %vm190_vm2, %v5631_v1 }
 0xbdd   :  { %v6852_v15 = vpop.f32.mrf.mxu1  ;;  %6877 = vmatmul.mubr.msk.f32.gmra.mxu1 %vm190_vm2, %v5707_v33 }
 0xbdf   :  { %v5783_v24 = vpop.f32.mrf.mxu1 }
 0xbe0   :  { %6879 = vmatprep.mubr.msk.f32.mxu1 %vm190_vm2, %v5783_v24 }
 0xbe1   :  { %v6862_v41 = vpop.f32.mrf.mxu1  ;;  %6880 = vmatmul.mubr.msk.f32.gmra.mxu1 %vm190_vm2, %v5859_v54 }
 0xc09   :  { %v6872_v40 = vpop.f32.mrf.mxu1 }
 0xc0a   :  { %v5993_v44 = vadd.f32 %v6872_v40, %v7881_v39 }
 0xc0b   :  { %v5953_v63 = vpop.f32.mrf.mxu1 }
 0xc0c   :  { %v6001_v20 = vadd.f32 %v7039_v18, %v5993_v44  ;;  %v5992_v23 = vadd.f32 %v5953_v63, %v7887_v51 }
 0xc0d   :  { %v6875_v26 = vpop.f32.mrf.mxu1 }
 0xc0e   :  { %v6000_v17 = vadd.f32 %v7040_v14, %v5992_v23  ;;  %v5995_v39 = vadd.f32 %v6875_v26, %v7892_v5  ;;  %v6016_v19 = vadd.f32 %v6307_v28, %v6001_v20 }
 0xc0f   :  { %v5963_v0 = vpop.f32.mrf.mxu1 }
 0xc10   :  { %v6003_v21 = vadd.f32 %v7041_v6, %v5995_v39  ;;  %v5994_v22 = vadd.f32 %v5963_v0, %v7896_v55  ;;  %v6028_v32 = vsel %vm45_vm0, %v6016_v19, 0.0  ;;  %v6015_v51 = vadd.f32 %v6307_v28, %v6000_v17 }
 0xc11   :  { %6029 = vadd.xlane.f32.xlu1 %v6028_v32 }
 0xc12   :  { %v6002_v46 = vadd.f32 %v7042_v34, %v5994_v22  ;;  %v6025_v5 = vsel %vm45_vm0, %v6015_v51, 0.0  ;;  %v6018_v56 = vadd.f32 %v6307_v28, %v6003_v21 }
 0xc13   :  { %6026 = vadd.xlane.f32.xlu0 %v6025_v5 }
 0xc14   :  { %v6034_v27 = vsel %vm45_vm0, %v6018_v56, 0.0  ;;  %v6017_v37 = vadd.f32 %v6307_v28, %v6002_v46 }
 0xc16   :  { %v6031_v13 = vsel %vm45_vm0, %v6017_v37, 0.0 }
 0xc17   :  { %6035 = vadd.xlane.f32.xlu0 %v6034_v27 }
 0xc1b   :  { %6032 = vadd.xlane.f32.xlu0 %v6031_v13 }
 0xc9a   :  { %v6030_v55 = vpop.xlane.xlu1 %6029 }
 0xc9b   :  { %v6051_v61 = vmul.f32 0.03125, %v6030_v55 }
 0xc9c   :  { %v6027_v50 = vpop.xlane.xlu0 %6026 }
 0xc9d   :  { %v6878_v9 = vpop.f32.mrf.mxu1  ;;  %v6050_v57 = vmul.f32 0.03125, %v6027_v50  ;;  %v8007_v7 = vsub.f32 %v6016_v19, %v6051_v61 }
 0xc9e   :  { %v5997_v49 = vadd.f32 %v6878_v9, %v7900_v31 }
 0xc9f   :  { %v5973_v10 = vpop.f32.mrf.mxu1  ;;  %v8014_v58 = vsub.f32 %v6015_v51, %v6050_v57  ;;  %v6067_v62 = vmul.f32 %v8007_v7, %v8007_v7 }
 0xca0   :  { %v6005_v25 = vadd.f32 %v7043_v43, %v5997_v49  ;;  %v5996_v16 = vadd.f32 %v5973_v10, %v7904_v36  ;;  %v6036_v53 = vpop.xlane.xlu0 %6035 }
 0xca1   :  { %v6881_v30 = vpop.f32.mrf.mxu1  ;;  %v6053_v35 = vmul.f32 0.03125, %v6036_v53  ;;  %v6066_v24 = vmul.f32 %v8014_v58, %v8014_v58  ;;  %v6077_v41 = vsel %vm45_vm0, %v6067_v62, 0.0 }
 0xca2   :  { %v6004_v3 = vadd.f32 %v7044_v47, %v5996_v16  ;;  %v5999_v52 = vadd.f32 %v6881_v30, %v7908_v59  ;;  %v6020_v31 = vadd.f32 %v6307_v28, %v6005_v25  ;;  %v7046_v59 = vld [vmem:[%s8105_s0 + $0x30] sm:$0xff] }
 0xca3   :  { %v5983_v29 = vpop.f32.mrf.mxu1  ;;  %v8020_v60 = vsub.f32 %v6018_v56, %v6053_v35  ;;  %v6074_v44 = vsel %vm45_vm0, %v6066_v24, 0.0  ;;  %v6309_v35 = vld [vmem:[%s8110_s6] ss:$0 sm:$0xff] }
 0xca4   :  { %v6007_v36 = vadd.f32 %v7045_v48, %v5999_v52  ;;  %v5998_v4 = vadd.f32 %v5983_v29, %v7910_v42  ;;  %v6033_v38 = vpop.xlane.xlu0 %6032  ;;  %v6040_v8 = vsel %vm45_vm0, %v6020_v31, 0.0  ;;  %v6019_v2 = vadd.f32 %v6307_v28, %v6004_v3  ;;  %v6308_v3 = vld [vmem:[%s8109_s5] ss:$0 sm:$0xff] }
 0xca5   :  { %6041 = vadd.xlane.f32.xlu0 %v6040_v8  ;;  %v6052_v11 = vmul.f32 0.03125, %v6033_v38  ;;  %v6069_v40 = vmul.f32 %v8020_v60, %v8020_v60 }
 0xca6   :  { %v6006_v45 = vadd.f32 %v7046_v59, %v5998_v4  ;;  %v6037_v33 = vsel %vm45_vm0, %v6019_v2, 0.0  ;;  %v6022_v12 = vadd.f32 %v6307_v28, %v6007_v36 }
 0xca7   :  { %6038 = vadd.xlane.f32.xlu1 %v6037_v33  ;;  %v8025_v1 = vsub.f32 %v6017_v37, %v6052_v11 }
 0xca8   :  { %v6046_v42 = vsel %vm45_vm0, %v6022_v12, 0.0  ;;  %v6021_v54 = vadd.f32 %v6307_v28, %v6006_v45  ;;  %v6083_v28 = vsel %vm45_vm0, %v6069_v40, 0.0 }
 0xca9   :  { %6047 = vadd.xlane.f32.xlu0 %v6046_v42  ;;  %v6068_v63 = vmul.f32 %v8025_v1, %v8025_v1 }
 0xcaa   :  { %v6043_v15 = vsel %vm45_vm0, %v6021_v54, 0.0 }
 0xcab   :  { %6044 = vadd.xlane.f32.xlu1 %v6043_v15  ;;  %v6080_v18 = vsel %vm45_vm0, %v6068_v63, 0.0 }
 0xcad   :  { %6078 = vadd.xlane.f32.xlu0 %v6077_v41 }
 0xcaf   :  { %6075 = vadd.xlane.f32.xlu1 %v6074_v44 }
 0xcb1   :  { %6084 = vadd.xlane.f32.xlu0 %v6083_v28 }
 0xcb3   :  { %6081 = vadd.xlane.f32.xlu1 %v6080_v18 }
 0xd2e   :  { %v6042_v20 = vpop.xlane.xlu0 %6041 }
 0xd2f   :  { %v6055_v23 = vmul.f32 0.03125, %v6042_v20 }
 0xd30   :  { %v6039_v26 = vpop.xlane.xlu1 %6038 }
 0xd31   :  { %v8038_v14 = vsub.f32 %v6020_v31, %v6055_v23  ;;  %v6054_v17 = vmul.f32 0.03125, %v6039_v26 }
 0xd32   :  { %v6048_v39 = vpop.xlane.xlu0 %6047 }
 0xd33   :  { %v8040_v19 = vsub.f32 %v6019_v2, %v6054_v17  ;;  %v6057_v0 = vmul.f32 0.03125, %v6048_v39  ;;  %v6071_v6 = vmul.f32 %v8038_v14, %v8038_v14 }
 0xd34   :  { %v6045_v21 = vpop.xlane.xlu1 %6044 }
 0xd35   :  { %v8044_v22 = vsub.f32 %v6022_v12, %v6057_v0  ;;  %v6056_v32 = vmul.f32 0.03125, %v6045_v21  ;;  %v6089_v51 = vsel %vm45_vm0, %v6071_v6, 0.0  ;;  %v6070_v34 = vmul.f32 %v8040_v19, %v8040_v19 }
 0xd36   :  { %6090 = vadd.xlane.f32.xlu0 %v6089_v51  ;;  %v6079_v46 = vpop.xlane.xlu0 %6078 }
 0xd37   :  { %v8049_v5 = vsub.f32 %v6021_v54, %v6056_v32  ;;  %v6099_v56 = vmul.f32 0.03125, %v6079_v46  ;;  %v6086_v27 = vsel %vm45_vm0, %v6070_v34, 0.0  ;;  %v6073_v37 = vmul.f32 %v8044_v22, %v8044_v22 }
 0xd38   :  { %v6076_v13 = vpop.xlane.xlu1 %6075  ;;  %6087 = vadd.xlane.f32.xlu1 %v6086_v27 }
 0xd39   :  { %v6107_v55 = vadd.f32 1e-05, %v6099_v56  ;;  %v6098_v50 = vmul.f32 0.03125, %v6076_v13  ;;  %v6095_v9 = vsel %vm45_vm0, %v6073_v37, 0.0  ;;  %v6072_v49 = vmul.f32 %v8049_v5, %v8049_v5 }
 0xd3a   :  { %6096 = vadd.xlane.f32.xlu0 %v6095_v9  ;;  %v6085_v61 = vpop.xlane.xlu0 %6084 }
 0xd3b   :  { %7023 = vrsqrt.f32 %v6107_v55  ;;  %v6106_v10 = vadd.f32 1e-05, %v6098_v50  ;;  %v6101_v43 = vmul.f32 0.03125, %v6085_v61  ;;  %v6092_v25 = vsel %vm45_vm0, %v6072_v49, 0.0 }
 0xd3c   :  { %6093 = vadd.xlane.f32.xlu1 %v6092_v25  ;;  %v6082_v16 = vpop.xlane.xlu1 %6081 }
 0xd3d   :  { %7025 = vrsqrt.f32 %v6106_v10  ;;  %v6109_v53 = vadd.f32 1e-05, %v6101_v43  ;;  %v6100_v57 = vmul.f32 0.03125, %v6082_v16 }
 0xd3f   :  { %7027 = vrsqrt.f32 %v6109_v53  ;;  %v6108_v30 = vadd.f32 1e-05, %v6100_v57 }
 0xd41   :  { %7029 = vrsqrt.f32 %v6108_v30 }
 0xd48   :  { %v7024_v47 = vpop.eup %7023 }
 0xd49   :  { %v6123_v52 = vmul.f32 %v7024_v47, %v8007_v7 }
 0xd4a   :  { %v7026_v31 = vpop.eup %7025 }
 0xd4b   :  { %v6137_v29 = vmul.f32 %v6308_v3, %v6123_v52  ;;  %v6122_v48 = vmul.f32 %v7026_v31, %v8014_v58 }
 0xd4c   :  { %v7028_v36 = vpop.eup %7027 }
 0xd4d   :  { %v6151_v4 = vadd.f32 %v6309_v35, %v6137_v29  ;;  %v6136_v38 = vmul.f32 %v6308_v3, %v6122_v48  ;;  %v6125_v8 = vmul.f32 %v7028_v36, %v8020_v60 }
 0xd4e   :  { %v7030_v2 = vpop.eup %7029 }
 0xd4f   :  { %6159 = vst.msk [vmem:[%s8111_s7 + $0x8] sm:$0xff] %vm45_vm0, %v6151_v4  ;;  %v6150_v7 = vadd.f32 %v6309_v35, %v6136_v38  ;;  %v6139_v59 = vmul.f32 %v6308_v3, %v6125_v8  ;;  %v6124_v45 = vmul.f32 %v7030_v2, %v8025_v1 }
 0xd51   :  { %6158 = vst.msk [vmem:[%s8111_s7] sm:$0xff] %vm45_vm0, %v6150_v7  ;;  %v6153_v58 = vadd.f32 %v6309_v35, %v6139_v59  ;;  %v6138_v11 = vmul.f32 %v6308_v3, %v6124_v45 }
 0xd53   :  { %6161 = vst.msk [vmem:[%s8111_s7 + $0x18] sm:$0xff] %vm45_vm0, %v6153_v58  ;;  %v6152_v33 = vadd.f32 %v6309_v35, %v6138_v11 }
 0xd55   :  { %6160 = vst.msk [vmem:[%s8111_s7 + $0x10] sm:$0xff] %vm45_vm0, %v6152_v33 }
 0xdbf   :  { %v6091_v12 = vpop.xlane.xlu0 %6090 }
 0xdc0   :  { %v6103_v60 = vmul.f32 0.03125, %v6091_v12 }
 0xdc1   :  { %v6088_v42 = vpop.xlane.xlu1 %6087 }
 0xdc2   :  { %v6111_v54 = vadd.f32 1e-05, %v6103_v60  ;;  %v6102_v62 = vmul.f32 0.03125, %v6088_v42 }
 0xdc3   :  { %v6097_v1 = vpop.xlane.xlu0 %6096 }
 0xdc4   :  { %7031 = vrsqrt.f32 %v6111_v54  ;;  %v6110_v15 = vadd.f32 1e-05, %v6102_v62  ;;  %v6105_v24 = vmul.f32 0.03125, %v6097_v1 }
 0xdc5   :  { %v6094_v41 = vpop.xlane.xlu1 %6093 }
 0xdc6   :  { %7033 = vrsqrt.f32 %v6110_v15  ;;  %v6113_v40 = vadd.f32 1e-05, %v6105_v24  ;;  %v6104_v44 = vmul.f32 0.03125, %v6094_v41 }
 0xdc8   :  { %7035 = vrsqrt.f32 %v6113_v40  ;;  %v6112_v63 = vadd.f32 1e-05, %v6104_v44 }
 0xdca   :  { %7037 = vrsqrt.f32 %v6112_v63 }
 0xdd1   :  { %v7032_v28 = vpop.eup %7031 }
 0xdd2   :  { %v6127_v18 = vmul.f32 %v7032_v28, %v8038_v14 }
 0xdd3   :  { %v7034_v20 = vpop.eup %7033 }
 0xdd4   :  { %v6141_v23 = vmul.f32 %v6308_v3, %v6127_v18  ;;  %v6126_v26 = vmul.f32 %v7034_v20, %v8040_v19 }
 0xdd5   :  { %v7036_v17 = vpop.eup %7035 }
 0xdd6   :  { %v6155_v39 = vadd.f32 %v6309_v35, %v6141_v23  ;;  %v6140_v0 = vmul.f32 %v6308_v3, %v6126_v26  ;;  %v6129_v6 = vmul.f32 %v7036_v17, %v8044_v22 }
 0xdd7   :  { %v7038_v21 = vpop.eup %7037 }
 0xdd8   :  { %6163 = vst.msk [vmem:[%s8111_s7 + $0x28] sm:$0xff] %vm45_vm0, %v6155_v39  ;;  %v6154_v32 = vadd.f32 %v6309_v35, %v6140_v0  ;;  %v6143_v51 = vmul.f32 %v6308_v3, %v6129_v6  ;;  %v6128_v34 = vmul.f32 %v7038_v21, %v8049_v5 }
 0xdda   :  { %6162 = vst.msk [vmem:[%s8111_s7 + $0x20] sm:$0xff] %vm45_vm0, %v6154_v32  ;;  %v6157_v14 = vadd.f32 %v6309_v35, %v6143_v51  ;;  %v6142_v19 = vmul.f32 %v6308_v3, %v6128_v34 }
 0xddc   :  { %6165 = vst.msk [vmem:[%s8111_s7 + $0x38] sm:$0xff] %vm45_vm0, %v6157_v14  ;;  %v6156_v22 = vadd.f32 %v6309_v35, %v6142_v19 }
 0xdde   :  { %6164 = vst.msk [vmem:[%s8111_s7 + $0x30] sm:$0xff] %vm45_vm0, %v6156_v22 }

// kernel: multimodal_encoder.10
= control target key start
LH: loop header
LB: loop body
LE: loop exit
PB: predicated region body
PF: predicated region fallthrough
CT: control target
= control target key end

     0   :  { %v109_v0 = vlaneseq  ;;  %v13665_v3 = vmov 1983009808   ;;  %vm172_vm0 = vcmask 261120   ;;  %vm13667_vm1 = vmmov 0   ;;  %s13670_s16 = smov 104   ;;  %s13671_s17 = smov 8   ;;  %s16490_s2 = inlined_call_operand.vmem [shape: f32[32,32], index: 2, kind: input, shape index: {}]   ;;  %s16491_s4 = inlined_call_operand.vmem [shape: f32[64,32], index: 4, kind: input, shape index: {}]   ;;  %s16492_s0 = inlined_call_operand.vmem [shape: f32[16,2,32], index: 0, kind: input, shape index: {}]   ;;  %s16493_s1 = inlined_call_operand.vmem [shape: f32[16,2,32], index: 1, kind: input, shape index: {}]   ;;  %s16494_s6 = inlined_call_operand.vmem [shape: f32[64,32], index: 6, kind: input, shape index: {}]   ;;  %s16495_s3 = inlined_call_operand.vmem [shape: f32[1,32], index: 3, kind: input, shape index: {}]   ;;  %s16496_s5 = inlined_call_operand.vmem [shape: f32[1,32], index: 5, kind: input, shape index: {}]   ;;  %s16497_s7 = inlined_call_operand.vmem [shape: f32[1,32], index: 7, kind: input, shape index: {}]   ;;  %s16498_s8 = inlined_call_operand.vmem [shape: f32[16,2,32], index: 8, kind: output, shape index: {}]  }
   0x1   :  { %v80_v1 = vld [vmem:[%s16490_s2 + $0x18] sm:$0xff]  ;;  %v79_v2 = vld [vmem:[%s16490_s2 + $0x10] sm:$0xff]  ;;  %v107_v4 = vunpack.c.l.s4 %v13665_v3  ;;  %v78_v5 = vld [vmem:[%s16490_s2 + $0x8] sm:$0xff]  ;;  %vm968_vm2 = vcmask 64512   ;;  %vm2350_vm3 = vcmask 1041408   ;;  %vm2169_vm4 = vcmask 9216  }
   0x2   :  { %12690 = vmatprep.subr.mxu0 %v80_v1  ;;  %v68_v6 = vld [vmem:[%s16491_s4 + $0x38] sm:$0xff]  ;;  %v29_v7 = vld [vmem:[%s16492_s0] sm:$0x3]  ;;  %v110_v8 = vshrl.u32 %v109_v0, 7  ;;  %v30_v9 = vld [vmem:[%s16492_s0 + $0x2] sm:$0x3] }
   0x3   :  { %12691 = vmatpush3.msra.mxu0 %v80_v1  ;;  %12704 = vmatprep.subr.mxu1 %v68_v6  ;;  %v31_v10 = vld [vmem:[%s16492_s0 + $0x4] sm:$0x3]  ;;  %v32_v11 = vld [vmem:[%s16492_s0 + $0x6] sm:$0x3]  ;;  %v108_v12 = vunpack.c.0.s8 %v107_v4  ;;  %v104_v13 = vcombine.low %v29_v7, %v30_v9  ;;  %v33_v15 = vld [vmem:[%s16492_s0 + $0x8] sm:$0x3] }
   0x4   :  { %12692 = vmatprep.subr.mxu0 %v79_v2  ;;  %v105_v14 = vcombine.low %v31_v10, %v32_v11  ;;  %12705 = vmatpush3.msra.mxu1 %v68_v6  ;;  %v34_v16 = vld [vmem:[%s16492_s0 + $0xa] sm:$0x3]  ;;  %v35_v17 = vld [vmem:[%s16492_s0 + $0xc] sm:$0x3]  ;;  %v77_v18 = vld [vmem:[%s16490_s2] sm:$0xff]  ;;  %vm2346_vm5 = vcmask 15360  }
   0x5   :  { %12693 = vmatpush3.msra.mxu0 %v79_v2  ;;  %v13755_v19 = vsub.s32 %v108_v12, %v110_v8  ;;  %v36_v20 = vld [vmem:[%s16492_s0 + $0xe] sm:$0x3]  ;;  %v121_v21 = vcombine.low %v33_v15, %v34_v16  ;;  %v67_v22 = vld [vmem:[%s16491_s4 + $0x30] sm:$0xff]  ;;  %v64_v24 = vld [vmem:[%s16491_s4 + $0x18] sm:$0xff]  ;;  %s13672_s18 = smov 16   ;;  %vm12060_vm6 = vcmask 130048  }
   0x6   :  { %12694 = vmatprep.subr.mxu0 %v78_v5  ;;  %v122_v23 = vcombine.low %v35_v17, %v36_v20  ;;  %12706 = vmatprep.subr.mxu1 %v67_v22  ;;  %v66_v25 = vld [vmem:[%s16491_s4 + $0x28] sm:$0xff]  ;;  %v37_v26 = vld [vmem:[%s16492_s0 + $0x10] sm:$0x3]  ;;  %v38_v30 = vld [vmem:[%s16492_s0 + $0x12] sm:$0x3]  ;;  %s13673_s19 = smov 24  }
   0x7   :  { %12695 = vmatpush3.msra.mxu0 %v78_v5  ;;  %v112_v27 = vrot.slane %v104_v13, %v13755_v19  ;;  %v119_v28 = vrot.slane %v105_v14, %v13755_v19  ;;  %v129_v29 = vrot.slane %v121_v21, %v13755_v19  ;;  %12707 = vmatpush3.msra.mxu1 %v67_v22  ;;  %v39_v31 = vld [vmem:[%s16492_s0 + $0x14] sm:$0x3]  ;;  %v40_v32 = vld [vmem:[%s16492_s0 + $0x16] sm:$0x3]  ;;  %v41_v36 = vld [vmem:[%s16492_s0 + $0x18] sm:$0x3] }
   0x8   :  { %12696 = vmatprep.subr.mxu0 %v77_v18  ;;  %v136_v33 = vrot.slane %v122_v23, %v13755_v19  ;;  %12708 = vmatprep.subr.mxu1 %v66_v25  ;;  %v138_v34 = vcombine.low %v37_v26, %v38_v30  ;;  %v139_v35 = vcombine.low %v39_v31, %v40_v32  ;;  %v42_v37 = vld [vmem:[%s16492_s0 + $0x1a] sm:$0x3]  ;;  %v43_v38 = vld [vmem:[%s16492_s0 + $0x1c] sm:$0x3]  ;;  %v63_v40 = vld [vmem:[%s16491_s4 + $0x10] sm:$0xff]  ;;  %vm12077_vm7 = vcmask 195584  }
   0x9   :  { %12697 = vmatpush3.msra.mxu0 %v77_v18  ;;  %v13794_v39 = vcombine.low %v112_v27, %v119_v28  ;;  %12709 = vmatpush3.msra.mxu1 %v66_v25  ;;  %v44_v41 = vld [vmem:[%s16492_s0 + $0x1e] sm:$0x3]  ;;  %v155_v42 = vcombine.low %v41_v36, %v42_v37  ;;  %v65_v43 = vld [vmem:[%s16491_s4 + $0x20] sm:$0xff]  ;;  %v49_v54 = vld [vmem:[%s16493_s1 + $0x8] sm:$0x3]  ;;  %vm12094_vm8 = vcmask 254976  }
   0xa   :  { %v13805_v44 = vcombine.low %v129_v29, %v136_v33  ;;  %12718 = vmatprep.subr.mxu0 %v64_v24  ;;  %v146_v45 = vrot.slane %v138_v34, %v13755_v19  ;;  %v153_v46 = vrot.slane %v139_v35, %v13755_v19  ;;  %v156_v47 = vcombine.low %v43_v38, %v44_v41  ;;  %v45_v48 = vld [vmem:[%s16493_s1] sm:$0x3]  ;;  %v46_v49 = vld [vmem:[%s16493_s1 + $0x2] sm:$0x3]  ;;  %v47_v50 = vld [vmem:[%s16493_s1 + $0x4] sm:$0x3] }
   0xb   :  { %12698 = vmatprep.mubr.msk.f32.mxu0 %vm172_vm0, %v13794_v39  ;;  %v163_v51 = vrot.slane %v155_v42, %v13755_v19  ;;  %12710 = vmatprep.subr.mxu1 %v65_v43  ;;  %v48_v52 = vld [vmem:[%s16493_s1 + $0x6] sm:$0x3]  ;;  %v370_v53 = vcombine.low %v45_v48, %v46_v49  ;;  %v50_v55 = vld [vmem:[%s16493_s1 + $0xa] sm:$0x3]  ;;  %v51_v60 = vld [vmem:[%s16493_s1 + $0xc] sm:$0x3] }
   0xc   :  { %12699 = vmatmul.mubr.msk.f32.vlgmr.msra.gmra.mxu0 %vm172_vm0, %v13805_v44  ;;  %v13832_v56 = vcombine.low %v146_v45, %v153_v46  ;;  %v170_v57 = vrot.slane %v156_v47, %v13755_v19  ;;  %v62_v58 = vld [vmem:[%s16491_s4 + $0x8] sm:$0xff]  ;;  %12711 = vmatpush3.msra.mxu1 %v65_v43  ;;  %v371_v59 = vcombine.low %v47_v50, %v48_v52  ;;  %v53_v1 = vld [vmem:[%s16493_s1 + $0x10] sm:$0x3]  ;;  %v54_v2 = vld [vmem:[%s16493_s1 + $0x12] sm:$0x3]  ;;  %v16499_v35 = vmov 0.0  }
   0xd   :  { %v52_v61 = vld [vmem:[%s16493_s1 + $0xe] sm:$0x3]  ;;  %12719 = vmatpush3.msra.mxu0 %v64_v24  ;;  %v378_v62 = vrot.slane %v370_v53, %v13755_v19  ;;  %v387_v63 = vcombine.low %v49_v54, %v50_v55  ;;  %v55_v3 = vld [vmem:[%s16493_s1 + $0x14] sm:$0x3]  ;;  %v56_v6 = vld [vmem:[%s16493_s1 + $0x16] sm:$0x3]  ;;  %v404_v7 = vcombine.low %v53_v1, %v54_v2 }
   0xe   :  { %v388_v0 = vcombine.low %v51_v60, %v52_v61  ;;  %12720 = vmatprep.subr.mxu0 %v63_v40  ;;  %12701 = vmatprep.mubr.msk.f32.mxu0 %vm172_vm0, %v13832_v56  ;;  %v13856_v4 = vcombine.low %v163_v51, %v170_v57  ;;  %v385_v5 = vrot.slane %v371_v59, %v13755_v19  ;;  %v57_v8 = vld [vmem:[%s16493_s1 + $0x18] sm:$0x3]  ;;  %v58_v9 = vld [vmem:[%s16493_s1 + $0x1a] sm:$0x3]  ;;  %v61_v12 = vld [vmem:[%s16491_s4] sm:$0xff] }
   0xf   :  { %12721 = vmatpush3.msra.mxu0 %v63_v40  ;;  %v395_v10 = vrot.slane %v387_v63, %v13755_v19  ;;  %v405_v13 = vcombine.low %v55_v3, %v56_v6  ;;  %v59_v14 = vld [vmem:[%s16493_s1 + $0x1c] sm:$0x3]  ;;  %v60_v15 = vld [vmem:[%s16493_s1 + $0x1e] sm:$0x3]  ;;  %v421_v16 = vcombine.low %v57_v8, %v58_v9  ;;  %v412_v18 = vrot.slane %v404_v7, %v13755_v19  ;;  %v75_v29 = vld [vmem:[%s16494_s6 + $0x30] sm:$0xff] }
  0x10   :  { %v402_v11 = vrot.slane %v388_v0, %v13755_v19  ;;  %12702 = vmatmul.mubr.msk.f32.gmra.mxu0 %vm172_vm0, %v13856_v4  ;;  %12722 = vmatprep.subr.mxu0 %v62_v58  ;;  %v386_v17 = vcombine.low %v378_v62, %v385_v5  ;;  %v422_v20 = vcombine.low %v59_v14, %v60_v15  ;;  %v76_v27 = vld [vmem:[%s16494_s6 + $0x38] sm:$0xff]  ;;  %v71_v30 = vld [vmem:[%s16494_s6 + $0x10] sm:$0xff]  ;;  %v74_v31 = vld [vmem:[%s16494_s6 + $0x28] sm:$0xff] }
  0x11   :  { %12723 = vmatpush3.msra.mxu0 %v62_v58  ;;  %12726 = vmatprep.mubr.msk.f32.mxu0 %vm172_vm0, %v13794_v39  ;;  %v419_v22 = vrot.slane %v405_v13, %v13755_v19  ;;  %v429_v23 = vrot.slane %v421_v16, %v13755_v19  ;;  %v72_v28 = vld [vmem:[%s16494_s6 + $0x18] sm:$0xff]  ;;  %v70_v32 = vld [vmem:[%s16494_s6 + $0x8] sm:$0xff]  ;;  %v73_v33 = vld [vmem:[%s16494_s6 + $0x20] sm:$0xff] }
  0x12   :  { %v403_v21 = vcombine.low %v395_v10, %v402_v11  ;;  %12712 = vmatprep.mubr.msk.f32.mxu1 %vm172_vm0, %v386_v17  ;;  %12724 = vmatprep.subr.mxu0 %v61_v12  ;;  %v436_v24 = vrot.slane %v422_v20, %v13755_v19  ;;  %v69_v34 = vld [vmem:[%s16494_s6] sm:$0xff] }
  0x13   :  { %12725 = vmatpush3.msra.mxu0 %v61_v12  ;;  %v420_v25 = vcombine.low %v412_v18, %v419_v22  ;;  %12732 = vmatprep.subr.mxu1 %v76_v27  ;;  %v13942_v37 = vld [vmem:[%s16495_s3] ss:$0 sm:$0xff]  ;;  %s13668_s3 = smov 120  }
  0x14   :  { %12713 = vmatmul.mubr.msk.f32.vlgmr.msra.gmra.mxu1 %vm172_vm0, %v403_v21  ;;  %12727 = vmatmul.mubr.msk.f32.vlgmr.msra.gmra.mxu0 %vm172_vm0, %v13805_v44  ;;  %v437_v26 = vcombine.low %v429_v23, %v436_v24  ;;  %v13951_v51 = vld [vmem:[%s16496_s5] ss:$0 sm:$0xff] }
  0x15   :  { %12715 = vmatprep.mubr.msk.f32.mxu1 %vm172_vm0, %v420_v25  ;;  %12729 = vmatprep.mubr.msk.f32.mxu0 %vm172_vm0, %v13832_v56 }
  0x16   :  { %12733 = vmatpush3.msra.mxu1 %v76_v27  ;;  %12746 = vmatprep.subr.mxu0 %v72_v28 }
  0x17   :  { %12747 = vmatpush3.msra.mxu0 %v72_v28  ;;  %12734 = vmatprep.subr.mxu1 %v75_v29 }
  0x18   :  { %12716 = vmatmul.mubr.msk.f32.gmra.mxu1 %vm172_vm0, %v437_v26  ;;  %12730 = vmatmul.mubr.msk.f32.gmra.mxu0 %vm172_vm0, %v13856_v4 }
  0x19   :  { %12740 = vmatprep.mubr.msk.f32.mxu1 %vm172_vm0, %v386_v17  ;;  %12754 = vmatprep.mubr.msk.f32.mxu0 %vm172_vm0, %v13794_v39 }
  0x1a   :  { %12748 = vmatprep.subr.mxu0 %v71_v30  ;;  %12735 = vmatpush3.msra.mxu1 %v75_v29 }
  0x1b   :  { %12749 = vmatpush3.msra.mxu0 %v71_v30  ;;  %12736 = vmatprep.subr.mxu1 %v74_v31 }
  0x1c   :  { %12750 = vmatprep.subr.mxu0 %v70_v32  ;;  %12737 = vmatpush3.msra.mxu1 %v74_v31 }
  0x1d   :  { %12751 = vmatpush3.msra.mxu0 %v70_v32  ;;  %12738 = vmatprep.subr.mxu1 %v73_v33 }
  0x1e   :  { %12739 = vmatpush3.msra.mxu1 %v73_v33  ;;  %12752 = vmatprep.subr.mxu0 %v69_v34 }
  0x1f   :  { %12741 = vmatmul.mubr.msk.f32.vlgmr.msra.gmra.mxu1 %vm172_vm0, %v403_v21  ;;  %12753 = vmatpush3.msra.mxu0 %v69_v34 }
  0x20   :  { %12743 = vmatprep.mubr.msk.f32.mxu1 %vm172_vm0, %v420_v25  ;;  %12755 = vmatmul.mubr.msk.f32.vlgmr.msra.gmra.mxu0 %vm172_vm0, %v13805_v44 }
  0x21   :  { %12757 = vmatprep.mubr.msk.f32.mxu0 %vm172_vm0, %v13832_v56  ;;  %12760 = vmatprep.subr.mxu1 %v16499_v35 }
  0x22   :  { %12770 = vmatprep.subr.mxu0 %v16499_v35 }
  0x23   :  { %12744 = vmatmul.mubr.msk.f32.gmra.mxu1 %vm172_vm0, %v437_v26 }
  0x24   :  { %12758 = vmatmul.mubr.msk.f32.gmra.mxu0 %vm172_vm0, %v13856_v4  ;;  %12762 = vmatprep.mubr.msk.f32.mxu1 %vm13667_vm1, %v16499_v35 }
  0x25   :  { %12772 = vmatprep.mubr.msk.f32.mxu0 %vm13667_vm1, %v16499_v35 }
  0xcc   :  { %v12700_v36 = vpop.f32.mrf.mxu0 }
  0xcd   :  { %v253_v61 = vadd.f32 %v12700_v36, %v13942_v37 }
  0xce   :  { %v247_v38 = vpop.f32.mrf.mxu0 }
  0xcf   :  { %v248_v39 = vadd.f32 %v13942_v37, %v247_v38  ;;  %v294_v7 = vrot.slane %v253_v61, %v13755_v19  ;;  %v287_v10 = vcombine.high %v253_v61, %v253_v61 }
  0xd0   :  { %v13945_v40 = vpop.f32.mrf.mxu0 }
  0xd1   :  { %v277_v41 = vrot.slane %v248_v39, %v13755_v19  ;;  %v270_v49 = vcombine.high %v248_v39, %v248_v39  ;;  %v14002_v15 = vmul.f32 0.35355338, %v294_v7  ;;  %v301_v17 = vrot.slane %v287_v10, %v13755_v19 }
  0xd2   :  { %v257_v42 = vpop.f32.mrf.mxu0  ;;  %v302_v23 = vcombine.high %v294_v7, %v294_v7  ;;  %v263_v38 = vadd.f32 %v13945_v40, %v13942_v37 }
  0xd3   :  { %v952_v45 = vmul.f32 0.35355338, %v277_v41  ;;  %v285_v50 = vcombine.high %v277_v41, %v277_v41  ;;  %v284_v58 = vrot.slane %v270_v49, %v13755_v19  ;;  %v258_v18 = vadd.f32 %v13942_v37, %v257_v42 }
  0xd4   :  { %v12714_v43 = vpop.f32.mrf.mxu1  ;;  %v12728_v44 = vpop.f32.mrf.mxu0  ;;  %v14038_v28 = vmul.f32 0.35355338, %v301_v17  ;;  %v303_v31 = vcombine.high %v301_v17, %v301_v17  ;;  %v14047_v32 = vmul.f32 0.35355338, %v302_v23 }
  0xd5   :  { %v603_v52 = vadd.f32 %v12728_v44, %v12714_v43  ;;  %v13955_v54 = vrot.slane %v952_v45, %v13755_v19  ;;  %v953_v60 = vmul.f32 0.35355338, %v285_v50  ;;  %v13973_v5 = vmul.f32 0.35355338, %v284_v58 }
  0xd6   :  { %v512_v46 = vpop.f32.mrf.mxu1  ;;  %v597_v47 = vpop.f32.mrf.mxu0  ;;  %v286_v13 = vcombine.high %v284_v58, %v284_v58  ;;  %v304_v29 = vcombine.high %v258_v18, %v258_v18  ;;  %v311_v30 = vrot.slane %v258_v18, %v13755_v19  ;;  %v14080_v37 = vmul.f32 0.35355338, %v303_v31 }
  0xd7   :  { %v598_v48 = vadd.f32 %v597_v47, %v512_v46  ;;  %16548 = vst [vmem:[#allocation2_spill] sm:$0xff] %v13955_v54  ;;  %3555 = vrot.lane.b32.xlu1 %v13955_v54, %s13668_s3  ;;  %v624_v62 = vadd.f32 %v13951_v51, %v603_v52  ;;  %v13965_v1 = vrot.slane %v953_v60, %v13755_v19 }
  0xd8   :  { %v12717_v55 = vpop.f32.mrf.mxu1  ;;  %v12731_v56 = vpop.f32.mrf.mxu0  ;;  %v14015_v21 = vmul.f32 0.35355338, %v286_v13  ;;  %v318_v39 = vrot.slane %v304_v29, %v13755_v19  ;;  %v14067_v41 = vmul.f32 0.35355338, %v311_v30  ;;  %v319_v40 = vcombine.high %v311_v30, %v311_v30 }
  0xd9   :  { %v623_v53 = vadd.f32 %v13951_v51, %v598_v48  ;;  %v13984_v8 = vrot.slane %v624_v62, %v13755_v19  ;;  %v648_v14 = vcombine.high %v624_v62, %v624_v62  ;;  %v613_v25 = vadd.f32 %v12731_v56, %v12717_v55 }
  0xda   :  { %v522_v3 = vpop.f32.mrf.mxu1  ;;  %v607_v4 = vpop.f32.mrf.mxu0  ;;  %v328_v46 = vrot.slane %v263_v38, %v13755_v19  ;;  %v14093_v47 = vmul.f32 0.35355338, %v318_v39  ;;  %v320_v49 = vcombine.high %v318_v39, %v318_v39  ;;  %v14106_v50 = vmul.f32 0.35355338, %v319_v40 }
  0xdb   :  { %v631_v57 = vcombine.high %v623_v53, %v623_v53  ;;  %v638_v59 = vrot.slane %v623_v53, %v13755_v19  ;;  %3647 = vrot.lane.b32.xlu1 %v13965_v1, %s13668_s3  ;;  %v608_v9 = vadd.f32 %v607_v4, %v522_v3  ;;  %v14018_v22 = vrot.slane %v648_v14, %v13755_v19  ;;  %v14179_v4 = vld [vmem:[%s16497_s7] ss:$0 sm:$0xff]  ;;  %s13669_s7 = smov 112  }
  0xdc   :  { %v14025_v24 = vcombine.high %v13984_v8, %v13984_v8  ;;  %v626_v34 = vadd.f32 %v13951_v51, %v613_v25  ;;  %v14119_v53 = vmul.f32 0.35355338, %v328_v46  ;;  %v336_v56 = vcombine.high %v328_v46, %v328_v46 }
  0xdd   :  { %v645_v63 = vrot.slane %v631_v57, %v13755_v19  ;;  %v646_v0 = vcombine.high %v638_v59, %v638_v59  ;;  %12761 = vmatpush3.xpose.msk.msra.mxu1 %vm968_vm2, %v638_v59  ;;  %v13969_v2 = vrot.slane %v638_v59, %v13755_v19  ;;  %v625_v16 = vadd.f32 %v13951_v51, %v608_v9 }
  0xde   :  { %12765 = vmatprep.subr.mxu1 %v16499_v35  ;;  %v14055_v33 = vcombine.high %v14018_v22, %v14018_v22  ;;  %v682_v43 = vcombine.high %v626_v34, %v626_v34  ;;  %v14087_v44 = vrot.slane %v626_v34, %v13755_v19  ;;  %v14132_v57 = vmul.f32 0.35355338, %v320_v49 }
  0xdf   :  { %16549 = vst [vmem:[#allocation3_spill] sm:$0xff] %v13969_v2  ;;  %12771 = vmatpush3.xpose.msk.msra.mxu0 %vm968_vm2, %v645_v63  ;;  %3564 = vrot.lane.b32.xlu0 %v13969_v2, %s13668_s3  ;;  %v13980_v6 = vrot.slane %v646_v0, %v13755_v19  ;;  %v13992_v11 = vrot.slane %v645_v63, %v13755_v19  ;;  %v14155_v61 = vmul.f32 0.35355338, %v336_v56 }
  0xe0   :  { %12763 = vmatmul.mubr.msk.f32.vlgmr.msra.gmra.mxu1 %vm968_vm2, %v952_v45  ;;  %12780 = vmatprep.subr.mxu0 %v16499_v35  ;;  %v647_v12 = vcombine.high %v645_v63, %v645_v63  ;;  %v665_v26 = vcombine.high %v625_v16, %v625_v16  ;;  %v14032_v27 = vrot.slane %v625_v16, %v13755_v19  ;;  %v12742_v63 = vpop.f32.mrf.mxu1  ;;  %v12756_v3 = vpop.f32.mrf.mxu0 }
  0xe1   :  { %12766 = vmatpush3.xpose.msk.msra.mxu1 %vm968_vm2, %v646_v0  ;;  %16550 = vst [vmem:[#allocation4_spill] sm:$0xff] %v13992_v11  ;;  %12767 = vmatprep.mubr.msk.f32.mxu1 %vm13667_vm1, %v16499_v35  ;;  %v321_v45 = vcombine.high %v263_v38, %v263_v38  ;;  %v14113_v51 = vrot.slane %v682_v43, %v13755_v19 }
  0xe2   :  { %12773 = vmatmul.mubr.msk.f32.vlgmr.msra.gmra.mxu0 %vm968_vm2, %v13973_v5  ;;  %3656 = vrot.lane.b32.xlu1 %v13980_v6, %s13668_s3  ;;  %v14010_v20 = vrot.slane %v647_v12, %v13755_v19  ;;  %v14059_v36 = vrot.slane %v665_v26, %v13755_v19  ;;  %v14075_v42 = vcombine.high %v14032_v27, %v14032_v27  ;;  %v765_v0 = vpop.f32.mrf.mxu1  ;;  %v850_v9 = vpop.f32.mrf.mxu0 }
  0xe3   :  { %12781 = vmatpush3.xpose.msk.msra.mxu0 %vm968_vm2, %v13984_v8  ;;  %3748 = vrot.lane.b32.xlu0 %v13992_v11, %s13668_s3  ;;  %v335_v52 = vrot.slane %v321_v45, %v13755_v19  ;;  %v14127_v55 = vcombine.high %v14087_v44, %v14087_v44  ;;  %v14149_v59 = vcombine.high %v14113_v51, %v14113_v51 }
  0xe4   :  { %12768 = vmatmul.mubr.msk.f32.vlgmr.msra.gmra.mxu1 %vm968_vm2, %v953_v60  ;;  %12775 = vmatprep.subr.mxu1 %v16499_v35  ;;  %v14104_v48 = vcombine.high %v14059_v36, %v14059_v36  ;;  %v856_v7 = vadd.f32 %v12756_v3, %v12742_v63  ;;  %v12745_v13 = vpop.f32.mrf.mxu1  ;;  %v12759_v14 = vpop.f32.mrf.mxu0 }
  0xe5   :  { %12776 = vmatpush3.xpose.msk.msra.mxu1 %vm968_vm2, %v647_v12  ;;  %12782 = vmatprep.mubr.msk.f32.mxu0 %vm13667_vm1, %v16499_v35  ;;  %v14141_v58 = vmul.f32 0.35355338, %v335_v52  ;;  %v337_v60 = vcombine.high %v335_v52, %v335_v52  ;;  %v851_v12 = vadd.f32 %v850_v9, %v765_v0  ;;  %v866_v17 = vadd.f32 %v12759_v14, %v12745_v13 }
  0xe6   :  { %12783 = vmatmul.mubr.msk.f32.vlgmr.msra.gmra.mxu0 %vm968_vm2, %v14002_v15  ;;  %12790 = vmatprep.subr.mxu0 %v16499_v35  ;;  %v14182_v10 = vadd.f32 %v14179_v4, %v856_v7  ;;  %v14204_v26 = vpop.f32.mrf.mxu1  ;;  %v14206_v29 = vpop.f32.mrf.mxu0  ;;  %v14234_v14 = vrot.slane %v14015_v21, %v13755_v19 }
  0xe7   :  { %3840 = vrot.lane.b32.xlu1 %v14010_v20, %s13668_s3  ;;  %12777 = vmatprep.mubr.msk.f32.mxu1 %vm13667_vm1, %v16499_v35  ;;  %v14169_v62 = vmul.f32 0.35355338, %v337_v60  ;;  %v14185_v16 = vadd.f32 %v14179_v4, %v851_v12  ;;  %v14192_v23 = vadd.f32 %v14179_v4, %v866_v17 }
  0xe8   :  { %12791 = vmatpush3.xpose.msk.msra.mxu0 %vm968_vm2, %v14018_v22  ;;  %12778 = vmatmul.mubr.msk.f32.vlgmr.msra.gmra.mxu1 %vm968_vm2, %v14015_v21  ;;  %16551 = vst [vmem:[#allocation5_spill] sm:$0xff] %v14234_v14 }
  0xe9   :  { %12785 = vmatprep.subr.mxu1 %v16499_v35  ;;  %12792 = vmatprep.mubr.msk.f32.mxu0 %vm13667_vm1, %v16499_v35  ;;  %v14189_v18 = vrot.slane %v14185_v16, %v13755_v19 }
  0xea   :  { %12786 = vmatpush3.xpose.msk.msra.mxu1 %vm968_vm2, %v14025_v24  ;;  %12800 = vmatprep.subr.mxu0 %v16499_v35 }
  0xeb   :  { %12793 = vmatmul.mubr.msk.f32.vlgmr.msra.gmra.mxu0 %vm968_vm2, %v14038_v28  ;;  %12787 = vmatprep.mubr.msk.f32.mxu1 %vm13667_vm1, %v16499_v35  ;;  %v14196_v25 = vcombine.high %v14189_v18, %v14189_v18 }
  0xec   :  { %12801 = vmatpush3.xpose.msk.msra.mxu0 %vm968_vm2, %v14032_v27  ;;  %12795 = vmatprep.subr.mxu1 %v16499_v35 }
  0xed   :  { %12788 = vmatmul.mubr.msk.f32.vlgmr.msra.gmra.mxu1 %vm968_vm2, %v14047_v32  ;;  %12802 = vmatprep.mubr.msk.f32.mxu0 %vm13667_vm1, %v16499_v35 }
  0xee   :  { %12796 = vmatpush3.xpose.msk.msra.mxu1 %vm968_vm2, %v14055_v33  ;;  %12810 = vmatprep.subr.mxu0 %v16499_v35 }
  0xef   :  { %12803 = vmatmul.mubr.msk.f32.vlgmr.msra.gmra.mxu0 %vm968_vm2, %v14067_v41  ;;  %12797 = vmatprep.mubr.msk.f32.mxu1 %vm13667_vm1, %v16499_v35 }
  0xf0   :  { %12811 = vmatpush3.xpose.msk.msra.mxu0 %vm968_vm2, %v14059_v36  ;;  %12805 = vmatprep.subr.mxu1 %v16499_v35 }
  0xf1   :  { %12798 = vmatmul.mubr.msk.f32.vlgmr.msra.gmra.mxu1 %vm968_vm2, %v14080_v37  ;;  %12812 = vmatprep.mubr.msk.f32.mxu0 %vm13667_vm1, %v16499_v35 }
  0xf2   :  { %12806 = vmatpush3.xpose.msk.msra.mxu1 %vm968_vm2, %v14075_v42  ;;  %12820 = vmatprep.subr.mxu0 %v16499_v35 }
  0xf3   :  { %12813 = vmatmul.mubr.msk.f32.vlgmr.msra.gmra.mxu0 %vm968_vm2, %v14093_v47  ;;  %12807 = vmatprep.mubr.msk.f32.mxu1 %vm13667_vm1, %v16499_v35 }
  0xf4   :  { %12821 = vmatpush3.xpose.msk.msra.mxu0 %vm968_vm2, %v14087_v44  ;;  %12815 = vmatprep.subr.mxu1 %v16499_v35 }
  0xf5   :  { %12808 = vmatmul.mubr.msk.f32.vlgmr.msra.gmra.mxu1 %vm968_vm2, %v14106_v50  ;;  %12822 = vmatprep.mubr.msk.f32.mxu0 %vm13667_vm1, %v16499_v35 }
  0xf6   :  { %12816 = vmatpush3.xpose.msk.msra.mxu1 %vm968_vm2, %v14104_v48  ;;  %12830 = vmatprep.subr.mxu0 %v16499_v35 }
  0xf7   :  { %12823 = vmatmul.mubr.msk.f32.vlgmr.msra.gmra.mxu0 %vm968_vm2, %v14119_v53  ;;  %12817 = vmatprep.mubr.msk.f32.mxu1 %vm13667_vm1, %v16499_v35 }
  0xf8   :  { %12831 = vmatpush3.xpose.msk.msra.mxu0 %vm968_vm2, %v14113_v51  ;;  %12825 = vmatprep.subr.mxu1 %v16499_v35 }
  0xf9   :  { %12818 = vmatmul.mubr.msk.f32.vlgmr.msra.gmra.mxu1 %vm968_vm2, %v14132_v57  ;;  %12832 = vmatprep.mubr.msk.f32.mxu0 %vm13667_vm1, %v16499_v35 }
  0xfa   :  { %12826 = vmatpush3.xpose.msk.msra.mxu1 %vm968_vm2, %v14127_v55  ;;  %12827 = vmatprep.mubr.msk.f32.mxu1 %vm13667_vm1, %v16499_v35 }
  0xfb   :  { %12833 = vmatmul.mubr.msk.f32.vlgmr.msra.gmra.mxu0 %vm968_vm2, %v14141_v58  ;;  %12835 = vmatprep.subr.mxu1 %v16499_v35 }
  0xfc   :  { %12840 = vmatprep.subr.mxu0 %v16499_v35  ;;  %12842 = vmatprep.mubr.msk.f32.mxu0 %vm13667_vm1, %v16499_v35 }
  0xfd   :  { %12828 = vmatmul.mubr.msk.f32.vlgmr.msra.gmra.mxu1 %vm968_vm2, %v14155_v61  ;;  %12841 = vmatpush3.msk.msra.mxu0 %vm2350_vm3, %v14189_v18 }
  0xfe   :  { %12836 = vmatpush3.xpose.msk.msra.mxu1 %vm968_vm2, %v14149_v59  ;;  %12837 = vmatprep.mubr.msk.f32.mxu1 %vm13667_vm1, %v16499_v35 }
  0xff   :  { %12845 = vmatprep.subr.mxu1 %v16499_v35  ;;  %12850 = vmatprep.subr.mxu0 %v16499_v35 }
 0x101   :  { %12838 = vmatmul.mubr.msk.f32.vlgmr.msra.gmra.mxu1 %vm968_vm2, %v14169_v62 }
 0x102   :  { %12847 = vmatprep.mubr.msk.f32.mxu1 %vm13667_vm1, %v16499_v35  ;;  %12846 = vmatpush3.msk.msra.mxu1 %vm2350_vm3, %v14196_v25 }
 0x103   :  { %12855 = vmatprep.subr.mxu1 %v16499_v35 }
 0x1a0   :  { %v14208_v30 = vpop.f32.mrf.mxu1 }
 0x1a1   :  { %v2170_v31 = vsel %vm2169_vm4, %v14208_v30, -inf }
 0x1a2   :  { %v14212_v34 = vpop.f32.mrf.mxu0  ;;  %2171 = vmax.xlane.f32.xlu0 %v2170_v31  ;;  %v12764_v38 = vpop.f32.mrf.mxu1 }
 0x1a3   :  { %v2176_v39 = vsel %vm2169_vm4, %v14212_v34, -inf }
 0x1a4   :  { %2177 = vmax.xlane.f32.xlu1 %v2176_v39  ;;  %v12774_v40 = vpop.f32.mrf.mxu0  ;;  %v14216_v43 = vpop.f32.mrf.mxu1 }
 0x1a5   :  { %v2173_v45 = vsel %vm2169_vm4, %v14216_v43, -inf }
 0x1a6   :  { %2174 = vmax.xlane.f32.xlu0 %v2173_v45  ;;  %v12769_v46 = vpop.f32.mrf.mxu1  ;;  %v14220_v49 = vpop.f32.mrf.mxu0 }
 0x1a8   :  { %v14222_v52 = vpop.f32.mrf.mxu1  ;;  %v12784_v56 = vpop.f32.mrf.mxu0 }
 0x1aa   :  { %v12779_v60 = vpop.f32.mrf.mxu1 }
 0x1ab   :  { %v14224_v63 = vpop.f32.mrf.mxu0  ;;  %v14248_v60 = vrot.slane %v13973_v5, %v13755_v19  ;;  %v2182_v5 = vsel %vm2169_vm4, %v14220_v49, -inf }
 0x1ac   :  { %v2188_v35 = vsel %vm2169_vm4, %v14224_v63, -inf }
 0x1ad   :  { %v14226_v0 = vpop.f32.mrf.mxu1  ;;  %v12794_v3 = vpop.f32.mrf.mxu0  ;;  %16552 = vst [vmem:[#allocation6_spill] sm:$0xff] %v14248_v60 }
 0x1af   :  { %v12789_v7 = vpop.f32.mrf.mxu1  ;;  %v14228_v9 = vpop.f32.mrf.mxu0 }
 0x1b1   :  { %v14230_v12 = vpop.f32.mrf.mxu1  ;;  %v12804_v13 = vpop.f32.mrf.mxu0 }
 0x1b3   :  { %v12799_v17 = vpop.f32.mrf.mxu1  ;;  %v14236_v31 = vpop.f32.mrf.mxu0 }
 0x1b5   :  { %3831 = vrot.lane.b32.xlu1 %v14234_v14, %s13668_s3  ;;  %v14240_v38 = vpop.f32.mrf.mxu1  ;;  %v12814_v39 = vpop.f32.mrf.mxu0 }
 0x1b7   :  { %v12809_v40 = vpop.f32.mrf.mxu1  ;;  %v14242_v45 = vpop.f32.mrf.mxu0 }
 0x1b9   :  { %v14244_v46 = vpop.f32.mrf.mxu1  ;;  %v12824_v56 = vpop.f32.mrf.mxu0 }
 0x1ba   :  { %v2179_v56 = vsel %vm2169_vm4, %v14222_v52, -inf }
 0x1bb   :  { %v12819_v21 = vpop.f32.mrf.mxu1  ;;  %v14250_v3 = vpop.f32.mrf.mxu0 }
 0x1bc   :  { %3739 = vrot.lane.b32.xlu0 %v14248_v60, %s13668_s3  ;;  %v2185_v21 = vsel %vm2169_vm4, %v14226_v0, -inf }
 0x1bd   :  { %v14254_v7 = vpop.f32.mrf.mxu1  ;;  %v12834_v13 = vpop.f32.mrf.mxu0 }
 0x1be   :  { %v2191_v13 = vsel %vm2169_vm4, %v14230_v12, -inf }
 0x1bf   :  { %v12829_v17 = vpop.f32.mrf.mxu1 }
 0x1c0   :  { %v2194_v17 = vsel %vm2169_vm4, %v14228_v9, -inf }
 0x1c1   :  { %v14256_v39 = vpop.f32.mrf.mxu1 }
 0x1c3   :  { %v12839_v40 = vpop.f32.mrf.mxu1 }
 0x1c4   :  { %v2197_v40 = vsel %vm2169_vm4, %v14240_v38, -inf }
 0x1d9   :  { %2180 = vmax.xlane.f32.xlu1 %v2179_v56  ;;  %v2200_v56 = vsel %vm2169_vm4, %v14236_v31, -inf }
 0x1db   :  { %2183 = vmax.xlane.f32.xlu0 %v2182_v5  ;;  %v2203_v5 = vsel %vm2169_vm4, %v14244_v46, -inf }
 0x1dd   :  { %2186 = vmax.xlane.f32.xlu1 %v2185_v21  ;;  %v2212_v21 = vsel %vm2169_vm4, %v14250_v3, -inf }
 0x1df   :  { %2189 = vmax.xlane.f32.xlu0 %v2188_v35  ;;  %v2206_v35 = vsel %vm2169_vm4, %v14242_v45, -inf }
 0x1e1   :  { %2192 = vmax.xlane.f32.xlu1 %v2191_v13  ;;  %v14282_v13 = vrot.slane %v14025_v24, %v13755_v19  ;;  %v14300_v24 = vrot.slane %v14002_v15, %v13755_v19 }
 0x1e3   :  { %2195 = vmax.xlane.f32.xlu0 %v2194_v17  ;;  %16553 = vst [vmem:[#allocation7_spill] sm:$0xff] %v14282_v13  ;;  %v14288_v17 = vrot.slane %v14047_v32, %v13755_v19  ;;  %16556 = vst [vmem:[#allocation10_spill] sm:$0xff] %v14300_v24  ;;  %v14306_v32 = vrot.slane %v14018_v22, %v13755_v19 }
 0x1e5   :  { %2198 = vmax.xlane.f32.xlu1 %v2197_v40  ;;  %16554 = vst [vmem:[#allocation8_spill] sm:$0xff] %v14288_v17  ;;  %v14294_v40 = vrot.slane %v13984_v8, %v13755_v19  ;;  %16557 = vst [vmem:[#allocation11_spill] sm:$0xff] %v14306_v32 }
 0x1e7   :  { %2201 = vmax.xlane.f32.xlu0 %v2200_v56  ;;  %16555 = vst [vmem:[#allocation9_spill] sm:$0xff] %v14294_v40  ;;  %v14310_v56 = vpop.permute.xlu1 %3555 }
 0x1e8   :  { %16558 = vst [vmem:[#allocation12_spill] sm:$0xff] %v14310_v56 }
 0x1e9   :  { %2204 = vmax.xlane.f32.xlu1 %v2203_v5  ;;  %v2209_v5 = vsel %vm2169_vm4, %v14254_v7, -inf }
 0x1eb   :  { %2207 = vmax.xlane.f32.xlu0 %v2206_v35  ;;  %v14312_v8 = vpop.permute.xlu1 %3647  ;;  %v14316_v35 = vpop.permute.xlu0 %3564 }
 0x1ec   :  { %16559 = vst [vmem:[#allocation13_spill] sm:$0xff] %v14312_v8  ;;  %16560 = vst [vmem:[#allocation14_spill] sm:$0xff] %v14316_v35 }
 0x1ef   :  { %2213 = vmax.xlane.f32.xlu0 %v2212_v21  ;;  %v14318_v15 = vpop.permute.xlu1 %3656  ;;  %v2215_v21 = vsel %vm2169_vm4, %v14256_v39, -inf  ;;  %v14322_v22 = vpop.permute.xlu0 %3748 }
 0x1f0   :  { %16561 = vst [vmem:[#allocation15_spill] sm:$0xff] %v14318_v15  ;;  %16562 = vst [vmem:[#allocation16_spill] sm:$0xff] %v14322_v22 }
 0x1fa   :  { %4024 = vrot.lane.b32.xlu1 %v14282_v13, %s13668_s3 }
 0x1fe   :  { %4015 = vrot.lane.b32.xlu1 %v14288_v17, %s13668_s3 }
 0x205   :  { %3932 = vrot.lane.b32.xlu0 %v14294_v40, %s13668_s3 }
 0x209   :  { %3923 = vrot.lane.b32.xlu0 %v14300_v24, %s13668_s3  ;;  %v14324_v24 = vpop.permute.xlu1 %3840 }
 0x20a   :  { %16563 = vst [vmem:[#allocation17_spill] sm:$0xff] %v14324_v24 }
 0x20d   :  { %4116 = vrot.lane.b32.xlu0 %v14306_v32, %s13668_s3 }
 0x222   :  { %2210 = vmax.xlane.f32.xlu1 %v2209_v5  ;;  %v14330_v5 = vrot.slane %v14055_v33, %v13755_v19 }
 0x224   :  { %16564 = vst [vmem:[#allocation18_spill] sm:$0xff] %v14330_v5 }
 0x226   :  { %2216 = vmax.xlane.f32.xlu1 %v2215_v21 }
 0x22b   :  { %v2172_v32 = vpop.xlane.xlu0 %2171 }
 0x22c   :  { %v2218_v40 = vsub.f32 %v14208_v30, %v2172_v32 }
 0x22d   :  { %v2178_v17 = vpop.xlane.xlu1 %2177 }
 0x22e   :  { %v2220_v13 = vsub.f32 %v14212_v34, %v2178_v17  ;;  %v2234_v8 = vmul.f32 1.442695, %v2218_v40 }
 0x22f   :  { %v2175_v24 = vpop.xlane.xlu0 %2174 }
 0x230   :  { %v2238_v56 = vmul.f32 1.442695, %v2220_v13  ;;  %13409 = vpow2.f32 %v2234_v8  ;;  %v2219_v34 = vsub.f32 %v14216_v43, %v2175_v24 }
 0x232   :  { %13411 = vpow2.f32 %v2238_v56  ;;  %v2236_v33 = vmul.f32 1.442695, %v2219_v34  ;;  %v14347_v56 = vpop.permute.xlu1 %3831 }
 0x233   :  { %16565 = vst [vmem:[#allocation19_spill] sm:$0xff] %v14347_v56  ;;  %v14349_v8 = vpop.permute.xlu0 %3739 }
 0x234   :  { %13413 = vpow2.f32 %v2236_v33  ;;  %16566 = vst [vmem:[#allocation20_spill] sm:$0xff] %v14349_v8 }
 0x237   :  { %4208 = vrot.lane.b32.xlu1 %v14330_v5, %s13668_s3 }
 0x23d   :  { %v14334_v21 = vpop.eup %13409 }
 0x23e   :  { %v2266_v30 = vsel %vm2169_vm4, %v14334_v21, 0.0 }
 0x23f   :  { %v14338_v32 = vpop.eup %13411  ;;  %2267 = vadd.xlane.f32.xlu0 %v2266_v30 }
 0x240   :  { %v2272_v13 = vsel %vm2169_vm4, %v14338_v32, 0.0 }
 0x241   :  { %v14343_v17 = vpop.eup %13413 }
 0x242   :  { %v2269_v40 = vsel %vm2169_vm4, %v14343_v17, 0.0 }
 0x243   :  { %2273 = vadd.xlane.f32.xlu0 %v2272_v13 }
 0x25b   :  { %2270 = vadd.xlane.f32.xlu1 %v2269_v40 }
 0x262   :  { %v2181_v5 = vpop.xlane.xlu1 %2180 }
 0x263   :  { %v2221_v30 = vsub.f32 %v14222_v52, %v2181_v5 }
 0x264   :  { %v2184_v24 = vpop.xlane.xlu0 %2183 }
 0x265   :  { %v2240_v43 = vmul.f32 1.442695, %v2221_v30  ;;  %v2222_v15 = vsub.f32 %v14220_v49, %v2184_v24 }
 0x266   :  { %v2187_v13 = vpop.xlane.xlu1 %2186 }
 0x267   :  { %13415 = vpow2.f32 %v2240_v43  ;;  %v2223_v34 = vsub.f32 %v14226_v0, %v2187_v13  ;;  %v2242_v33 = vmul.f32 1.442695, %v2222_v15 }
 0x268   :  { %v2190_v35 = vpop.xlane.xlu0 %2189 }
 0x269   :  { %v2244_v22 = vmul.f32 1.442695, %v2223_v34  ;;  %13417 = vpow2.f32 %v2242_v33  ;;  %v2224_v40 = vsub.f32 %v14224_v63, %v2190_v35 }
 0x26a   :  { %v2193_v56 = vpop.xlane.xlu1 %2192 }
 0x26b   :  { %13419 = vpow2.f32 %v2244_v22  ;;  %v2225_v8 = vsub.f32 %v14230_v12, %v2193_v56  ;;  %v2246_v14 = vmul.f32 1.442695, %v2224_v40 }
 0x26c   :  { %v2196_v5 = vpop.xlane.xlu0 %2195 }
 0x26d   :  { %v2248_v52 = vmul.f32 1.442695, %v2225_v8  ;;  %13421 = vpow2.f32 %v2246_v14  ;;  %v2226_v49 = vsub.f32 %v14228_v9, %v2196_v5 }
 0x26e   :  { %v2199_v30 = vpop.xlane.xlu1 %2198 }
 0x26f   :  { %13423 = vpow2.f32 %v2248_v52  ;;  %v2227_v0 = vsub.f32 %v14240_v38, %v2199_v30  ;;  %v2250_v15 = vmul.f32 1.442695, %v2226_v49 }
 0x270   :  { %v2202_v24 = vpop.xlane.xlu0 %2201 }
 0x271   :  { %v2252_v43 = vmul.f32 1.442695, %v2227_v0  ;;  %13425 = vpow2.f32 %v2250_v15  ;;  %v2228_v63 = vsub.f32 %v14236_v31, %v2202_v24 }
 0x272   :  { %v2205_v35 = vpop.xlane.xlu1 %2204 }
 0x273   :  { %13427 = vpow2.f32 %v2252_v43  ;;  %v2229_v12 = vsub.f32 %v14244_v46, %v2205_v35  ;;  %v2254_v56 = vmul.f32 1.442695, %v2228_v63 }
 0x274   :  { %v14360_v22 = vpop.eup %13415  ;;  %v2208_v8 = vpop.xlane.xlu0 %2207 }
 0x275   :  { %v2256_v14 = vmul.f32 1.442695, %v2229_v12  ;;  %v2275_v9 = vsel %vm2169_vm4, %v14360_v22, 0.0  ;;  %13429 = vpow2.f32 %v2254_v56  ;;  %v2230_v38 = vsub.f32 %v14242_v45, %v2208_v8 }
 0x276   :  { %2276 = vadd.xlane.f32.xlu1 %v2275_v9  ;;  %v14365_v13 = vpop.eup %13417 }
 0x277   :  { %13431 = vpow2.f32 %v2256_v14  ;;  %v2258_v34 = vmul.f32 1.442695, %v2230_v38  ;;  %v2278_v46 = vsel %vm2169_vm4, %v14365_v13, 0.0 }
 0x278   :  { %v14367_v31 = vpop.eup %13419  ;;  %2279 = vadd.xlane.f32.xlu0 %v2278_v46  ;;  %v2214_v33 = vpop.xlane.xlu0 %2213  ;;  %v14414_v46 = vrot.slane %v14075_v42, %v13755_v19  ;;  %v14436_v42 = vrot.slane %v14067_v41, %v13755_v19  ;;  %v14450_v41 = vrot.slane %v14093_v47, %v13755_v19 }
 0x279   :  { %v2281_v40 = vsel %vm2169_vm4, %v14367_v31, 0.0  ;;  %13433 = vpow2.f32 %v2258_v34  ;;  %v2232_v52 = vsub.f32 %v14250_v3, %v2214_v33  ;;  %v14408_v34 = vrot.slane %v14080_v37, %v13755_v19  ;;  %v14418_v33 = vpop.permute.xlu1 %4024 }
 0x27a   :  { %2282 = vadd.xlane.f32.xlu1 %v2281_v40  ;;  %v14374_v45 = vpop.eup %13421  ;;  %v14422_v40 = vrot.slane %v14038_v28, %v13755_v19  ;;  %v14428_v37 = vrot.slane %v14032_v27, %v13755_v19  ;;  %16568 = vst [vmem:[#allocation22_spill] sm:$0xff] %v14450_v41 }
 0x27b   :  { %v2262_v49 = vmul.f32 1.442695, %v2232_v52  ;;  %v2284_v30 = vsel %vm2169_vm4, %v14374_v45, 0.0 }
 0x27c   :  { %v14376_v5 = vpop.eup %13423  ;;  %2285 = vadd.xlane.f32.xlu0 %v2284_v30  ;;  %v14443_v30 = vrot.slane %v14059_v36, %v13755_v19  ;;  %v14456_v36 = vrot.slane %v14087_v44, %v13755_v19 }
 0x27d   :  { %v2287_v0 = vsel %vm2169_vm4, %v14376_v5, 0.0  ;;  %13435 = vpow2.f32 %v2262_v49  ;;  %v14430_v52 = vpop.permute.xlu1 %4015 }
 0x27e   :  { %2288 = vadd.xlane.f32.xlu1 %v2287_v0  ;;  %v14382_v15 = vpop.eup %13425  ;;  %16567 = vst [vmem:[#allocation21_spill] sm:$0xff] %v14443_v30  ;;  %16569 = vst [vmem:[#allocation23_spill] sm:$0xff] %v14456_v36 }
 0x27f   :  { %v2290_v3 = vsel %vm2169_vm4, %v14382_v15, 0.0 }
 0x280   :  { %v14384_v43 = vpop.eup %13427  ;;  %2291 = vadd.xlane.f32.xlu0 %v2290_v3 }
 0x281   :  { %v2293_v24 = vsel %vm2169_vm4, %v14384_v43, 0.0 }
 0x282   :  { %2294 = vadd.xlane.f32.xlu1 %v2293_v24  ;;  %v14390_v63 = vpop.eup %13429 }
 0x283   :  { %v2296_v12 = vsel %vm2169_vm4, %v14390_v63, 0.0 }
 0x284   :  { %v14392_v35 = vpop.eup %13431  ;;  %2297 = vadd.xlane.f32.xlu0 %v2296_v12  ;;  %v14472_v12 = vrot.slane %v14113_v51, %v13755_v19 }
 0x285   :  { %v2299_v56 = vsel %vm2169_vm4, %v14392_v35, 0.0 }
 0x286   :  { %2300 = vadd.xlane.f32.xlu1 %v2299_v56  ;;  %v14398_v14 = vpop.eup %13433  ;;  %16571 = vst [vmem:[#allocation25_spill] sm:$0xff] %v14472_v12 }
 0x287   :  { %v2302_v8 = vsel %vm2169_vm4, %v14398_v14, 0.0 }
 0x288   :  { %2303 = vadd.xlane.f32.xlu0 %v2302_v8  ;;  %v884_v8 = vcombine.high %v14185_v16, %v14185_v16  ;;  %v861_v16 = vadd.f32 %v14206_v29, %v14204_v26 }
 0x28a   :  { %v14402_v9 = vpop.eup %13435 }
 0x28b   :  { %v2308_v38 = vsel %vm2169_vm4, %v14402_v9, 0.0 }
 0x28c   :  { %2309 = vadd.xlane.f32.xlu0 %v2308_v38  ;;  %v14486_v38 = vrot.slane %v14141_v58, %v13755_v19  ;;  %v14503_v58 = vrot.slane %v14189_v18, %v13755_v19 }
 0x28e   :  { %16572 = vst [vmem:[#allocation26_spill] sm:$0xff] %v14486_v38  ;;  %16573 = vst [vmem:[#allocation27_spill] sm:$0xff] %v14503_v58 }
 0x297   :  { %4199 = vrot.lane.b32.xlu1 %v14408_v34, %s13668_s3 }
 0x29b   :  { %4392 = vrot.lane.b32.xlu1 %v14414_v46, %s13668_s3 }
 0x2a2   :  { %4107 = vrot.lane.b32.xlu0 %v14422_v40, %s13668_s3 }
 0x2a6   :  { %4300 = vrot.lane.b32.xlu0 %v14428_v37, %s13668_s3 }
 0x2aa   :  { %4291 = vrot.lane.b32.xlu0 %v14436_v42, %s13668_s3 }
 0x2ab   :  { %v2211_v28 = vpop.xlane.xlu1 %2210 }
 0x2ac   :  { %v2231_v49 = vsub.f32 %v14254_v7, %v2211_v28  ;;  %v14460_v7 = vpop.permute.xlu0 %3932  ;;  %v901_v28 = vcombine.high %v14182_v10, %v14182_v10 }
 0x2ae   :  { %v2260_v27 = vmul.f32 1.442695, %v2231_v49  ;;  %4484 = vrot.lane.b32.xlu0 %v14443_v30, %s13668_s3  ;;  %v14495_v49 = vrot.slane %v884_v8, %v13755_v19 }
 0x2af   :  { %v2217_v0 = vpop.xlane.xlu1 %2216 }
 0x2b0   :  { %13437 = vpow2.f32 %v2260_v27  ;;  %v2233_v3 = vsub.f32 %v14256_v39, %v2217_v0  ;;  %v14464_v39 = vrot.slane %v14119_v53, %v13755_v19  ;;  %v14476_v56 = vpop.permute.xlu0 %3923  ;;  %v14508_v0 = vrot.slane %v901_v28, %v13755_v19 }
 0x2b1   :  { %v14535_v28 = vrot.slane %v14106_v50, %v13755_v19  ;;  %v14553_v50 = vrot.slane %v14104_v48, %v13755_v19 }
 0x2b2   :  { %v2264_v24 = vmul.f32 1.442695, %v2233_v3  ;;  %4475 = vrot.lane.b32.xlu0 %v14450_v41, %s13668_s3  ;;  %16570 = vst [vmem:[#allocation24_spill] sm:$0xff] %v14464_v39  ;;  %v878_v3 = vadd.f32 %v14179_v4, %v861_v16  ;;  %v14522_v8 = vrot.slane %v14508_v0, %v13755_v19  ;;  %v935_v16 = vcombine.high %v14192_v23, %v14192_v23 }
 0x2b4   :  { %13439 = vpow2.f32 %v2264_v24  ;;  %v14499_v27 = vpop.permute.xlu0 %4116  ;;  %v918_v26 = vcombine.high %v878_v3, %v878_v3  ;;  %v14518_v18 = vrot.slane %v878_v3, %v13755_v19  ;;  %16575 = vst [vmem:[#allocation29_spill] sm:$0xff] %v14522_v8  ;;  %v14545_v3 = vrot.slane %v14192_v23, %v13755_v19 }
 0x2b5   :  { %v14561_v23 = vrot.slane %v935_v16, %v13755_v19 }
 0x2b6   :  { %4668 = vrot.lane.b32.xlu0 %v14456_v36, %s13668_s3  ;;  %v14527_v4 = vrot.slane %v918_v26, %v13755_v19 }
 0x2ba   :  { %4659 = vrot.lane.b32.xlu0 %v14464_v39, %s13668_s3 }
 0x2bd   :  { %v14468_v47 = vpop.eup %13437 }
 0x2be   :  { %v2305_v44 = vsel %vm2169_vm4, %v14468_v47, 0.0  ;;  %4852 = vrot.lane.b32.xlu0 %v14472_v12, %s13668_s3 }
 0x2bf   :  { %2306 = vadd.xlane.f32.xlu1 %v2305_v44  ;;  %v14513_v44 = vrot.slane %v14495_v49, %v13755_v19 }
 0x2c1   :  { %v14480_v53 = vpop.eup %13439  ;;  %16574 = vst [vmem:[#allocation28_spill] sm:$0xff] %v14513_v44 }
 0x2c2   :  { %v2311_v51 = vsel %vm2169_vm4, %v14480_v53, 0.0  ;;  %4843 = vrot.lane.b32.xlu0 %v14486_v38, %s13668_s3 }
 0x2c3   :  { %2312 = vadd.xlane.f32.xlu1 %v2311_v51  ;;  %v14531_v51 = vrot.slane %v14518_v18, %v13755_v19 }
 0x2c5   :  { %16576 = vst [vmem:[#allocation30_spill] sm:$0xff] %v14531_v51 }
 0x2c6   :  { %5203 = vrot.lane.b32.xlu0 %v14503_v58, %s13668_s3 }
 0x2c8   :  { %v2268_v24 = vpop.xlane.xlu0 %2267 }
 0x2c9   :  { %13441 = vrcp.f32 %v2268_v24  ;;  %v14549_v24 = vrot.slane %v14527_v4, %v13755_v19 }
 0x2ca   :  { %5371 = vrot.lane.b32.xlu0 %v14513_v44, %s13668_s3 }
 0x2cb   :  { %16577 = vst [vmem:[#allocation31_spill] sm:$0xff] %v14549_v24 }
 0x2cc   :  { %v2274_v29 = vpop.xlane.xlu0 %2273 }
 0x2cd   :  { %13443 = vrcp.f32 %v2274_v29 }
 0x2ce   :  { %5707 = vrot.lane.b32.xlu0 %v14522_v8, %s13668_s3 }
 0x2d2   :  { %5875 = vrot.lane.b32.xlu0 %v14531_v51, %s13668_s3  ;;  %v14565_v51 = vrot.slane %v14545_v3, %v13755_v19 }
 0x2d4   :  { %4383 = vrot.lane.b32.xlu1 %v14535_v28, %s13668_s3  ;;  %16578 = vst [vmem:[#allocation32_spill] sm:$0xff] %v14565_v51 }
 0x2d6   :  { %v13442_v26 = vpop.eup %13441  ;;  %6043 = vrot.lane.b32.xlu0 %v14549_v24, %s13668_s3  ;;  %v14574_v24 = vrot.slane %v14132_v57, %v13755_v19  ;;  %v14594_v57 = vrot.slane %v14127_v55, %v13755_v19 }
 0x2d7   :  { %v2330_v29 = vmul.f32 %v13442_v26, %v14334_v21  ;;  %v16579_v21 = vmov 0.0   ;;  %v908_v26 = vrot.slane %v14182_v10, %v13755_v19  ;;  %v14607_v10 = vrot.slane %v14155_v61, %v13755_v19 }
 0x2d8   :  { %4576 = vrot.lane.b32.xlu1 %v14553_v50, %s13668_s3  ;;  %v14623_v61 = vrot.slane %v14169_v62, %v13755_v19 }
 0x2d9   :  { %12843 = vmatmul.mubr.msk.f32.vlgmr.msra.gmra.mxu0 %vm2346_vm5, %v2330_v29  ;;  %v14586_v29 = vrot.slane %v14561_v23, %v13755_v19 }
 0x2da   :  { %v13444_v48 = vpop.eup %13443  ;;  %12851 = vmatpush3.msk.msra.mxu0 %vm2350_vm3, %v14495_v49  ;;  %6211 = vrot.lane.b32.xlu0 %v14565_v51, %s13668_s3 }
 0x2db   :  { %12852 = vmatprep.mubr.msk.f32.mxu0 %vm13667_vm1, %v16579_v21  ;;  %12860 = vmatprep.subr.mxu0 %v16579_v21  ;;  %v2332_v16 = vmul.f32 %v13444_v48, %v14338_v32  ;;  %16580 = vst [vmem:[#allocation33_spill] sm:$0xff] %v14586_v29  ;;  %v14596_v32 = vpop.permute.xlu1 %4208  ;;  %v14615_v48 = vrot.slane %v14149_v59, %v13755_v19 }
 0x2dc   :  { %4567 = vrot.lane.b32.xlu1 %v14574_v24, %s13668_s3  ;;  %v14631_v59 = vrot.slane %v14196_v25, %v13755_v19  ;;  %v14648_v25 = vrot.slane %v908_v26, %v13755_v19 }
 0x2dd   :  { %12853 = vmatmul.mubr.msk.f32.vlgmr.msra.gmra.mxu0 %vm2346_vm5, %v2332_v16  ;;  %v900_v16 = vcombine.high %v14495_v49, %v14495_v49  ;;  %v916_v49 = vcombine.high %v908_v26, %v908_v26 }
 0x2de   :  { %12861 = vmatpush3.msk.msra.mxu0 %vm2350_vm3, %v908_v26  ;;  %6379 = vrot.lane.b32.xlu0 %v14586_v29, %s13668_s3  ;;  %v14665_v26 = vcombine.high %v14518_v18, %v14518_v18  ;;  %v14675_v29 = vcombine.high %v14527_v4, %v14527_v4 }
 0x2df   :  { %12862 = vmatprep.mubr.msk.f32.mxu0 %vm13667_vm1, %v16579_v21  ;;  %12870 = vmatprep.subr.mxu0 %v16579_v21  ;;  %v14638_v62 = vrot.slane %v900_v16, %v13755_v19 }
 0x2e0   :  { %4760 = vrot.lane.b32.xlu1 %v14594_v57, %s13668_s3  ;;  %v14681_v8 = vrot.slane %v14675_v29, %v13755_v19 }
 0x2e2   :  { %6542 = vrot.lane.b32.xlu0 %v13969_v2, %s13669_s7  ;;  %v14671_v2 = vrot.slane %v14665_v26, %v13755_v19  ;;  %16581 = vst [vmem:[#allocation34_spill] sm:$0xff] %v14681_v8 }
 0x2e4   :  { %v2271_v55 = vpop.xlane.xlu1 %2270  ;;  %4751 = vrot.lane.b32.xlu1 %v14607_v10, %s13668_s3 }
 0x2e5   :  { %13445 = vrcp.f32 %v2271_v55 }
 0x2e6   :  { %6540 = vrot.lane.b32.xlu0 %v13955_v54, %s13669_s7 }
 0x2e8   :  { %4944 = vrot.lane.b32.xlu1 %v14615_v48, %s13668_s3 }
 0x2ea   :  { %6698 = vrot.lane.b32.xlu0 %v13992_v11, %s13669_s7 }
 0x2ec   :  { %4935 = vrot.lane.b32.xlu1 %v14623_v61, %s13668_s3 }
 0x2ee   :  { %6696 = vrot.lane.b32.xlu0 %v14248_v60, %s13669_s7 }
 0x2f0   :  { %5287 = vrot.lane.b32.xlu1 %v14631_v59, %s13668_s3 }
 0x2f2   :  { %v13446_v55 = vpop.eup %13445 }
 0x2f3   :  { %v2331_v11 = vmul.f32 %v13446_v55, %v14343_v17  ;;  %v14654_v17 = vrot.slane %v916_v49, %v13755_v19 }
 0x2f4   :  { %5455 = vrot.lane.b32.xlu1 %v14638_v62, %s13668_s3 }
 0x2f5   :  { %12848 = vmatmul.mubr.msk.f32.vlgmr.msra.gmra.mxu1 %vm2346_vm5, %v2331_v11  ;;  %v917_v11 = vcombine.high %v14508_v0, %v14508_v0 }
 0x2f6   :  { %12856 = vmatpush3.msk.msra.mxu1 %vm2350_vm3, %v900_v16  ;;  %12857 = vmatprep.mubr.msk.f32.mxu1 %vm13667_vm1, %v16579_v21 }
 0x2f7   :  { %12865 = vmatprep.subr.mxu1 %v16579_v21  ;;  %v14661_v55 = vrot.slane %v917_v11, %v13755_v19 }
 0x2f8   :  { %5539 = vrot.lane.b32.xlu1 %v14648_v25, %s13668_s3 }
 0x2fc   :  { %5623 = vrot.lane.b32.xlu1 %v14654_v17, %s13668_s3 }
 0x2ff   :  { %v2277_v16 = vpop.xlane.xlu1 %2276 }
 0x300   :  { %13447 = vrcp.f32 %v2277_v16  ;;  %5791 = vrot.lane.b32.xlu1 %v14661_v55, %s13668_s3 }
 0x301   :  { %v2280_v60 = vpop.xlane.xlu0 %2279 }
 0x302   :  { %13449 = vrcp.f32 %v2280_v60  ;;  %v14685_v60 = vcombine.high %v14545_v3, %v14545_v3 }
 0x303   :  { %v2283_v54 = vpop.xlane.xlu1 %2282 }
 0x304   :  { %13451 = vrcp.f32 %v2283_v54  ;;  %5959 = vrot.lane.b32.xlu1 %v14671_v2, %s13668_s3  ;;  %v14691_v58 = vrot.slane %v14685_v60, %v13755_v19 }
 0x305   :  { %v2286_v51 = vpop.xlane.xlu0 %2285 }
 0x306   :  { %13453 = vrcp.f32 %v2286_v51  ;;  %16582 = vst [vmem:[#allocation35_spill] sm:$0xff] %v14691_v58  ;;  %v14695_v51 = vcombine.high %v14561_v23, %v14561_v23 }
 0x307   :  { %v2289_v16 = vpop.xlane.xlu1 %2288 }
 0x308   :  { %13455 = vrcp.f32 %v2289_v16  ;;  %6127 = vrot.lane.b32.xlu1 %v14681_v8, %s13668_s3 }
 0x309   :  { %v2292_v44 = vpop.xlane.xlu0 %2291 }
 0x30a   :  { %13457 = vrcp.f32 %v2292_v44  ;;  %v14702_v44 = vrot.slane %v14695_v51, %v13755_v19 }
 0x30b   :  { %v2295_v54 = vpop.xlane.xlu1 %2294 }
 0x30c   :  { %13459 = vrcp.f32 %v2295_v54  ;;  %6295 = vrot.lane.b32.xlu1 %v14691_v58, %s13668_s3  ;;  %16583 = vst [vmem:[#allocation36_spill] sm:$0xff] %v14702_v44 }
 0x30d   :  { %v13448_v38 = vpop.eup %13447  ;;  %v2298_v16 = vpop.xlane.xlu0 %2297 }
 0x30e   :  { %v2333_v12 = vmul.f32 %v13448_v38, %v14360_v22  ;;  %13461 = vrcp.f32 %v2298_v16  ;;  %v16588_v16 = vld [vmem:[#allocation20_spill] sm:$0xff] }
 0x30f   :  { %v2301_v39 = vpop.xlane.xlu1 %2300  ;;  %v13450_v36 = vpop.eup %13449 }
 0x310   :  { %13463 = vrcp.f32 %v2301_v39  ;;  %12858 = vmatmul.mubr.msk.f32.vlgmr.msra.gmra.mxu1 %vm2346_vm5, %v2333_v12  ;;  %6463 = vrot.lane.b32.xlu1 %v14702_v44, %s13668_s3  ;;  %v2334_v54 = vmul.f32 %v13450_v36, %v14365_v13 }
 0x311   :  { %v13452_v41 = vpop.eup %13451  ;;  %12866 = vmatpush3.msk.msra.mxu1 %vm2350_vm3, %v916_v49  ;;  %v2304_v30 = vpop.xlane.xlu0 %2303  ;;  %12867 = vmatprep.mubr.msk.f32.mxu1 %vm13667_vm1, %v16579_v21 }
 0x312   :  { %12875 = vmatprep.subr.mxu1 %v16579_v21  ;;  %v2335_v19 = vmul.f32 %v13452_v41, %v14367_v31  ;;  %13465 = vrcp.f32 %v2304_v30  ;;  %12863 = vmatmul.mubr.msk.f32.vlgmr.msra.gmra.mxu0 %vm2346_vm5, %v2334_v54 }
 0x313   :  { %v13454_v22 = vpop.eup %13453  ;;  %12871 = vmatpush3.msk.msra.mxu0 %vm2350_vm3, %v14508_v0  ;;  %12872 = vmatprep.mubr.msk.f32.mxu0 %vm13667_vm1, %v16579_v21 }
 0x314   :  { %12868 = vmatmul.mubr.msk.f32.vlgmr.msra.gmra.mxu1 %vm2346_vm5, %v2335_v19  ;;  %6620 = vrot.lane.b32.xlu1 %v13980_v6, %s13669_s7  ;;  %v2336_v13 = vmul.f32 %v13454_v22, %v14374_v45 }
 0x315   :  { %v13456_v39 = vpop.eup %13455  ;;  %12876 = vmatpush3.msk.msra.mxu1 %vm2350_vm3, %v917_v11  ;;  %12880 = vmatprep.subr.mxu0 %v16579_v21  ;;  %v2310_v31 = vpop.xlane.xlu0 %2309  ;;  %v16585_v11 = vld [vmem:[#allocation14_spill] sm:$0xff] }
 0x316   :  { %v2337_v30 = vmul.f32 %v13456_v39, %v14376_v5  ;;  %13467 = vrcp.f32 %v2310_v31  ;;  %12873 = vmatmul.mubr.msk.f32.vlgmr.msra.gmra.mxu0 %vm2346_vm5, %v2336_v13  ;;  %12877 = vmatprep.mubr.msk.f32.mxu1 %vm13667_vm1, %v16579_v21 }
 0x317   :  { %v13458_v41 = vpop.eup %13457  ;;  %12881 = vmatpush3.msk.msra.mxu0 %vm2350_vm3, %v14518_v18  ;;  %12885 = vmatprep.subr.mxu1 %v16579_v21 }
 0x318   :  { %6618 = vrot.lane.b32.xlu1 %v13965_v1, %s13669_s7  ;;  %12878 = vmatmul.mubr.msk.f32.vlgmr.msra.gmra.mxu1 %vm2346_vm5, %v2337_v30  ;;  %v2338_v5 = vmul.f32 %v13458_v41, %v14382_v15 }
 0x319   :  { %v13460_v45 = vpop.eup %13459  ;;  %12886 = vmatpush3.msk.msra.mxu1 %vm2350_vm3, %v14665_v26  ;;  %12882 = vmatprep.mubr.msk.f32.mxu0 %vm13667_vm1, %v16579_v21  ;;  %v4108_v36 = vpop.permute.xlu0 %4107  ;;  %v16587_v26 = vld [vmem:[#allocation16_spill] sm:$0xff] }
 0x31a   :  { %v2339_v12 = vmul.f32 %v13460_v45, %v14384_v43  ;;  %12890 = vmatprep.subr.mxu0 %v16579_v21  ;;  %12883 = vmatmul.mubr.msk.f32.vlgmr.msra.gmra.mxu0 %vm2346_vm5, %v2338_v5 }
 0x31b   :  { %v13462_v38 = vpop.eup %13461  ;;  %12891 = vmatpush3.msk.msra.mxu0 %vm2350_vm3, %v14527_v4  ;;  %12887 = vmatprep.mubr.msk.f32.mxu1 %vm13667_vm1, %v16579_v21 }
 0x31c   :  { %12895 = vmatprep.subr.mxu1 %v16579_v21  ;;  %6776 = vrot.lane.b32.xlu1 %v14010_v20, %s13669_s7  ;;  %v2340_v0 = vmul.f32 %v13462_v38, %v14390_v63  ;;  %v16590_v38 = vld [vmem:[#allocation13_spill] sm:$0xff] }
 0x31d   :  { %v13464_v15 = vpop.eup %13463  ;;  %12888 = vmatmul.mubr.msk.f32.vlgmr.msra.gmra.mxu1 %vm2346_vm5, %v2339_v12  ;;  %12892 = vmatprep.mubr.msk.f32.mxu0 %vm13667_vm1, %v16579_v21  ;;  %v4301_v43 = vpop.permute.xlu0 %4300  ;;  %v16589_v12 = vld [vmem:[#allocation15_spill] sm:$0xff] }
 0x31e   :  { %v2341_v18 = vmul.f32 %v13464_v15, %v14392_v35  ;;  %12896 = vmatpush3.msk.msra.mxu1 %vm2350_vm3, %v14675_v29  ;;  %12900 = vmatprep.subr.mxu0 %v16579_v21  ;;  %v16584_v35 = vld [vmem:[#allocation5_spill] sm:$0xff]  ;;  %v16592_v15 = vld [vmem:[#allocation19_spill] sm:$0xff] }
 0x31f   :  { %v13466_v4 = vpop.eup %13465  ;;  %12893 = vmatmul.mubr.msk.f32.vlgmr.msra.gmra.mxu0 %vm2346_vm5, %v2340_v0  ;;  %12897 = vmatprep.mubr.msk.f32.mxu1 %vm13667_vm1, %v16579_v21 }
 0x320   :  { %12901 = vmatpush3.msk.msra.mxu0 %vm2350_vm3, %v14545_v3  ;;  %12905 = vmatprep.subr.mxu1 %v16579_v21  ;;  %v2342_v63 = vmul.f32 %v13466_v4, %v14398_v14 }
 0x321   :  { %6774 = vrot.lane.b32.xlu1 %v16584_v35, %s13669_s7  ;;  %12898 = vmatmul.mubr.msk.f32.vlgmr.msra.gmra.mxu1 %vm2346_vm5, %v2341_v18  ;;  %v4292_v29 = vpop.permute.xlu0 %4291 }
 0x322   :  { %12906 = vmatpush3.msk.msra.mxu1 %vm2350_vm3, %v14685_v60  ;;  %12902 = vmatprep.mubr.msk.f32.mxu0 %vm13667_vm1, %v16579_v21 }
 0x323   :  { %v13468_v49 = vpop.eup %13467  ;;  %12910 = vmatprep.subr.mxu0 %v16579_v21  ;;  %12903 = vmatmul.mubr.msk.f32.vlgmr.msra.gmra.mxu0 %vm2346_vm5, %v2342_v63 }
 0x324   :  { %12911 = vmatpush3.msk.msra.mxu0 %vm2350_vm3, %v14561_v23  ;;  %12912 = vmatprep.mubr.msk.f32.mxu0 %vm13667_vm1, %v16579_v21  ;;  %v2344_v14 = vmul.f32 %v13468_v49, %v14402_v9  ;;  %v16586_v9 = vld [vmem:[#allocation12_spill] sm:$0xff] }
 0x325   :  { %12920 = vmatprep.subr.mxu0 %v16579_v21  ;;  %v4485_v3 = vpop.permute.xlu0 %4484  ;;  %12907 = vmatprep.mubr.msk.f32.mxu1 %vm13667_vm1, %v16579_v21 }
 0x326   :  { %12915 = vmatprep.subr.mxu1 %v16579_v21 }
 0x327   :  { %12913 = vmatmul.mubr.msk.f32.vlgmr.msra.gmra.mxu0 %vm2346_vm5, %v2344_v14 }
 0x328   :  { %12921 = vmatpush3.xpose.msk.msra.mxu0 %vm968_vm2, %v16585_v11  ;;  %12922 = vmatprep.mubr.msk.f32.mxu0 %vm13667_vm1, %v16579_v21 }
 0x329   :  { %12930 = vmatprep.subr.mxu0 %v16579_v21  ;;  %v4476_v23 = vpop.permute.xlu0 %4475 }
 0x32b   :  { %12923 = vmatmul.mubr.msk.f32.vlgmr.msra.gmra.mxu0 %vm968_vm2, %v16586_v9 }
 0x32c   :  { %12931 = vmatpush3.xpose.msk.msra.mxu0 %vm968_vm2, %v16587_v26  ;;  %12932 = vmatprep.mubr.msk.f32.mxu0 %vm13667_vm1, %v16579_v21 }
 0x32d   :  { %12940 = vmatprep.subr.mxu0 %v16579_v21  ;;  %v4669_v60 = vpop.permute.xlu0 %4668 }
 0x32f   :  { %12933 = vmatmul.mubr.msk.f32.vlgmr.msra.gmra.mxu0 %vm968_vm2, %v16588_v16 }
 0x330   :  { %12941 = vmatpush3.xpose.msk.msra.mxu0 %vm968_vm2, %v14460_v7  ;;  %12942 = vmatprep.mubr.msk.f32.mxu0 %vm13667_vm1, %v16579_v21 }
 0x331   :  { %12950 = vmatprep.subr.mxu0 %v16579_v21  ;;  %v4660_v54 = vpop.permute.xlu0 %4659 }
 0x333   :  { %12943 = vmatmul.mubr.msk.f32.vlgmr.msra.gmra.mxu0 %vm968_vm2, %v14476_v56  ;;  %v4200_v56 = vpop.permute.xlu1 %4199 }
 0x334   :  { %12951 = vmatpush3.xpose.msk.msra.mxu0 %vm968_vm2, %v14499_v27  ;;  %12952 = vmatprep.mubr.msk.f32.mxu0 %vm13667_vm1, %v16579_v21 }
 0x335   :  { %12960 = vmatprep.subr.mxu0 %v16579_v21  ;;  %v4853_v7 = vpop.permute.xlu0 %4852 }
 0x337   :  { %12953 = vmatmul.mubr.msk.f32.vlgmr.msra.gmra.mxu0 %vm968_vm2, %v4108_v36  ;;  %v4393_v19 = vpop.permute.xlu1 %4392 }
 0x338   :  { %12961 = vmatpush3.xpose.msk.msra.mxu0 %vm968_vm2, %v4301_v43  ;;  %12962 = vmatprep.mubr.msk.f32.mxu0 %vm13667_vm1, %v16579_v21 }
 0x339   :  { %12970 = vmatprep.subr.mxu0 %v16579_v21  ;;  %v4844_v27 = vpop.permute.xlu0 %4843 }
 0x33b   :  { %12963 = vmatmul.mubr.msk.f32.vlgmr.msra.gmra.mxu0 %vm968_vm2, %v4292_v29 }
 0x33c   :  { %12971 = vmatpush3.xpose.msk.msra.mxu0 %vm968_vm2, %v4485_v3  ;;  %12972 = vmatprep.mubr.msk.f32.mxu0 %vm13667_vm1, %v16579_v21 }
 0x33d   :  { %12980 = vmatprep.subr.mxu0 %v16579_v21  ;;  %v5204_v22 = vpop.permute.xlu0 %5203 }
 0x33f   :  { %12973 = vmatmul.mubr.msk.f32.vlgmr.msra.gmra.mxu0 %vm968_vm2, %v4476_v23 }
 0x340   :  { %12981 = vmatpush3.xpose.msk.msra.mxu0 %vm968_vm2, %v4669_v60  ;;  %12982 = vmatprep.mubr.msk.f32.mxu0 %vm13667_vm1, %v16579_v21 }
 0x341   :  { %12990 = vmatprep.subr.mxu0 %v16579_v21 }
 0x343   :  { %12983 = vmatmul.mubr.msk.f32.vlgmr.msra.gmra.mxu0 %vm968_vm2, %v4660_v54 }
 0x344   :  { %12991 = vmatpush3.xpose.msk.msra.mxu0 %vm968_vm2, %v4853_v7  ;;  %12992 = vmatprep.mubr.msk.f32.mxu0 %vm13667_vm1, %v16579_v21 }
 0x345   :  { %13000 = vmatprep.subr.mxu0 %v16579_v21 }
 0x347   :  { %12993 = vmatmul.mubr.msk.f32.vlgmr.msra.gmra.mxu0 %vm968_vm2, %v4844_v27 }
 0x348   :  { %v2307_v39 = vpop.xlane.xlu1 %2306  ;;  %13001 = vmatpush3.msk.msra.mxu0 %vm2350_vm3, %v5204_v22  ;;  %13002 = vmatprep.mubr.msk.f32.mxu0 %vm13667_vm1, %v16579_v21 }
 0x349   :  { %13469 = vrcp.f32 %v2307_v39  ;;  %13010 = vmatprep.subr.mxu0 %v16579_v21 }
 0x34c   :  { %v2313_v13 = vpop.xlane.xlu1 %2312 }
 0x34d   :  { %13471 = vrcp.f32 %v2313_v13 }
 0x350   :  { %v4384_v31 = vpop.permute.xlu1 %4383 }
 0x354   :  { %v4577_v45 = vpop.permute.xlu1 %4576 }
 0x356   :  { %v13470_v30 = vpop.eup %13469 }
 0x357   :  { %v2343_v41 = vmul.f32 %v13470_v30, %v14468_v47 }
 0x358   :  { %v4568_v47 = vpop.permute.xlu1 %4567 }
 0x359   :  { %12908 = vmatmul.mubr.msk.f32.vlgmr.msra.gmra.mxu1 %vm2346_vm5, %v2343_v41 }
 0x35a   :  { %v13472_v5 = vpop.eup %13471  ;;  %12916 = vmatpush3.msk.msra.mxu1 %vm2350_vm3, %v14695_v51  ;;  %12917 = vmatprep.mubr.msk.f32.mxu1 %vm13667_vm1, %v16579_v21  ;;  %v16591_v51 = vld [vmem:[#allocation17_spill] sm:$0xff] }
 0x35b   :  { %12925 = vmatprep.subr.mxu1 %v16579_v21  ;;  %v2345_v36 = vmul.f32 %v13472_v5, %v14480_v53 }
 0x35c   :  { %v4761_v53 = vpop.permute.xlu1 %4760 }
 0x35d   :  { %12918 = vmatmul.mubr.msk.f32.vlgmr.msra.gmra.mxu1 %vm2346_vm5, %v2345_v36 }
 0x35e   :  { %12926 = vmatpush3.xpose.msk.msra.mxu1 %vm968_vm2, %v16589_v12  ;;  %12927 = vmatprep.mubr.msk.f32.mxu1 %vm13667_vm1, %v16579_v21 }
 0x35f   :  { %12935 = vmatprep.subr.mxu1 %v16579_v21 }
 0x360   :  { %v4752_v0 = vpop.permute.xlu1 %4751 }
 0x361   :  { %12928 = vmatmul.mubr.msk.f32.vlgmr.msra.gmra.mxu1 %vm968_vm2, %v16590_v38 }
 0x362   :  { %12936 = vmatpush3.xpose.msk.msra.mxu1 %vm968_vm2, %v16591_v51  ;;  %12937 = vmatprep.mubr.msk.f32.mxu1 %vm13667_vm1, %v16579_v21 }
 0x363   :  { %12945 = vmatprep.subr.mxu1 %v16579_v21 }
 0x365   :  { %12938 = vmatmul.mubr.msk.f32.vlgmr.msra.gmra.mxu1 %vm968_vm2, %v16592_v15 }
 0x366   :  { %12946 = vmatpush3.xpose.msk.msra.mxu1 %vm968_vm2, %v14418_v33  ;;  %12947 = vmatprep.mubr.msk.f32.mxu1 %vm13667_vm1, %v16579_v21  ;;  %v4945_v33 = vpop.permute.xlu1 %4944 }
 0x367   :  { %12955 = vmatprep.subr.mxu1 %v16579_v21 }
 0x369   :  { %12948 = vmatmul.mubr.msk.f32.vlgmr.msra.gmra.mxu1 %vm968_vm2, %v14430_v52 }
 0x36a   :  { %12956 = vmatpush3.xpose.msk.msra.mxu1 %vm968_vm2, %v14596_v32  ;;  %12957 = vmatprep.mubr.msk.f32.mxu1 %vm13667_vm1, %v16579_v21  ;;  %v4936_v52 = vpop.permute.xlu1 %4935 }
 0x36b   :  { %12965 = vmatprep.subr.mxu1 %v16579_v21 }
 0x36d   :  { %12958 = vmatmul.mubr.msk.f32.vlgmr.msra.gmra.mxu1 %vm968_vm2, %v4200_v56 }
 0x36e   :  { %12966 = vmatpush3.xpose.msk.msra.mxu1 %vm968_vm2, %v4393_v19  ;;  %12967 = vmatprep.mubr.msk.f32.mxu1 %vm13667_vm1, %v16579_v21  ;;  %v5288_v32 = vpop.permute.xlu1 %5287 }
 0x36f   :  { %12975 = vmatprep.subr.mxu1 %v16579_v21 }
 0x371   :  { %12968 = vmatmul.mubr.msk.f32.vlgmr.msra.gmra.mxu1 %vm968_vm2, %v4384_v31 }
 0x372   :  { %12976 = vmatpush3.xpose.msk.msra.mxu1 %vm968_vm2, %v4577_v45  ;;  %12977 = vmatprep.mubr.msk.f32.mxu1 %vm13667_vm1, %v16579_v21 }
 0x373   :  { %12985 = vmatprep.subr.mxu1 %v16579_v21 }
 0x375   :  { %12978 = vmatmul.mubr.msk.f32.vlgmr.msra.gmra.mxu1 %vm968_vm2, %v4568_v47 }
 0x376   :  { %12986 = vmatpush3.xpose.msk.msra.mxu1 %vm968_vm2, %v4761_v53  ;;  %12987 = vmatprep.mubr.msk.f32.mxu1 %vm13667_vm1, %v16579_v21 }
 0x377   :  { %12995 = vmatprep.subr.mxu1 %v16579_v21 }
 0x379   :  { %12988 = vmatmul.mubr.msk.f32.vlgmr.msra.gmra.mxu1 %vm968_vm2, %v4752_v0 }
 0x37a   :  { %12996 = vmatpush3.xpose.msk.msra.mxu1 %vm968_vm2, %v4945_v33  ;;  %12997 = vmatprep.mubr.msk.f32.mxu1 %vm13667_vm1, %v16579_v21 }
 0x37b   :  { %13005 = vmatprep.subr.mxu1 %v16579_v21 }
 0x37d   :  { %12998 = vmatmul.mubr.msk.f32.vlgmr.msra.gmra.mxu1 %vm968_vm2, %v4936_v52 }
 0x37e   :  { %13006 = vmatpush3.msk.msra.mxu1 %vm2350_vm3, %v5288_v32  ;;  %13007 = vmatprep.mubr.msk.f32.mxu1 %vm13667_vm1, %v16579_v21 }
 0x37f   :  { %13015 = vmatprep.subr.mxu1 %v16579_v21 }
 0x399   :  { %v14894_v43 = vpop.f32.mrf.mxu0 }
 0x39a   :  { %16593 = vst [vmem:[#allocation5_spill] sm:$0xff] %v14894_v43 }
 0x39b   :  { %v12844_v18 = vpop.f32.mrf.mxu0 }
 0x39d   :  { %v14896_v4 = vpop.f32.mrf.mxu0 }
 0x39e   :  { %16594 = vst [vmem:[#allocation14_spill] sm:$0xff] %v14896_v4 }
 0x39f   :  { %v12854_v63 = vpop.f32.mrf.mxu0 }
 0x3b5   :  { %v14898_v29 = vpop.f32.mrf.mxu1 }
 0x3b6   :  { %16595 = vst [vmem:[#allocation12_spill] sm:$0xff] %v14898_v29 }
 0x3b7   :  { %v12849_v49 = vpop.f32.mrf.mxu1 }
 0x3d0   :  { %v14900_v14 = vpop.f32.mrf.mxu1 }
 0x3d1   :  { %16596 = vst [vmem:[#allocation16_spill] sm:$0xff] %v14900_v14 }
 0x3d2   :  { %v12859_v3 = vpop.f32.mrf.mxu1  ;;  %v14902_v11 = vpop.f32.mrf.mxu0 }
 0x3d3   :  { %16597 = vst [vmem:[#allocation20_spill] sm:$0xff] %v14902_v11 }
 0x3d4   :  { %v14904_v23 = vpop.f32.mrf.mxu1  ;;  %v12864_v9 = vpop.f32.mrf.mxu0 }
 0x3d5   :  { %16598 = vst [vmem:[#allocation15_spill] sm:$0xff] %v14904_v23  ;;  %v15012_v23 = vpop.permute.xlu1 %5455 }
 0x3d6   :  { %v12869_v26 = vpop.f32.mrf.mxu1  ;;  %v14906_v60 = vpop.f32.mrf.mxu0 }
 0x3d7   :  { %16599 = vst [vmem:[#allocation13_spill] sm:$0xff] %v14906_v60 }
 0x3d8   :  { %v12874_v16 = vpop.f32.mrf.mxu0  ;;  %v14908_v54 = vpop.f32.mrf.mxu1 }
 0x3d9   :  { %16600 = vst [vmem:[#allocation17_spill] sm:$0xff] %v14908_v54  ;;  %v15016_v29 = vpop.permute.xlu1 %5539 }
 0x3da   :  { %v12879_v7 = vpop.f32.mrf.mxu1  ;;  %v14910_v56 = vpop.f32.mrf.mxu0 }
 0x3db   :  { %16601 = vst [vmem:[#allocation19_spill] sm:$0xff] %v14910_v56 }
 0x3dc   :  { %v12884_v27 = vpop.f32.mrf.mxu0 }
 0x3dd   :  { %v14912_v19 = vpop.f32.mrf.mxu1  ;;  %v15020_v43 = vpop.permute.xlu1 %5623 }
 0x3de   :  { %16602 = vst [vmem:[#allocation37_spill] sm:$0xff] %v14912_v19  ;;  %v16616_v19 = vld [vmem:[#allocation11_spill] sm:$0xff] }
 0x3df   :  { %v12889_v22 = vpop.f32.mrf.mxu1  ;;  %v14914_v39 = vpop.f32.mrf.mxu0 }
 0x3e0   :  { %16603 = vst [vmem:[#allocation38_spill] sm:$0xff] %v14914_v39 }
 0x3e1   :  { %v12894_v13 = vpop.f32.mrf.mxu0  ;;  %v14916_v31 = vpop.f32.mrf.mxu1 }
 0x3e2   :  { %16604 = vst [vmem:[#allocation39_spill] sm:$0xff] %v14916_v31  ;;  %v15026_v60 = vpop.permute.xlu1 %5791 }
 0x3e3   :  { %v12899_v30 = vpop.f32.mrf.mxu1  ;;  %v14918_v41 = vpop.f32.mrf.mxu0 }
 0x3e4   :  { %16605 = vst [vmem:[#allocation40_spill] sm:$0xff] %v14918_v41 }
 0x3e5   :  { %v12904_v45 = vpop.f32.mrf.mxu0 }
 0x3e7   :  { %v14920_v5 = vpop.f32.mrf.mxu0 }
 0x3e8   :  { %16606 = vst [vmem:[#allocation41_spill] sm:$0xff] %v14920_v5 }
 0x3e9   :  { %v12914_v36 = vpop.f32.mrf.mxu0 }
 0x3eb   :  { %v14922_v12 = vpop.f32.mrf.mxu0 }
 0x3ec   :  { %v5020_v47 = vsel %vm2169_vm4, %v14922_v12, -inf }
 0x3ed   :  { %5021 = vmax.xlane.f32.xlu0 %v5020_v47  ;;  %v12924_v38 = vpop.f32.mrf.mxu0 }
 0x3ef   :  { %v14926_v51 = vpop.f32.mrf.mxu0 }
 0x3f0   :  { %v5026_v53 = vsel %vm2169_vm4, %v14926_v51, -inf }
 0x3f1   :  { %5027 = vmax.xlane.f32.xlu0 %v5026_v53  ;;  %v12934_v15 = vpop.f32.mrf.mxu0 }
 0x3f3   :  { %v14930_v0 = vpop.f32.mrf.mxu0 }
 0x3f5   :  { %v12944_v33 = vpop.f32.mrf.mxu0 }
 0x3f7   :  { %v14932_v52 = vpop.f32.mrf.mxu0 }
 0x3f9   :  { %v12954_v32 = vpop.f32.mrf.mxu0 }
 0x3fa   :  { %v5032_v32 = vsel %vm2169_vm4, %v14930_v0, -inf }
 0x3fb   :  { %v14934_v18 = vpop.f32.mrf.mxu0 }
 0x3fd   :  { %v12964_v63 = vpop.f32.mrf.mxu0 }
 0x3ff   :  { %v14936_v49 = vpop.f32.mrf.mxu0 }
 0x401   :  { %v12974_v3 = vpop.f32.mrf.mxu0 }
 0x403   :  { %v14938_v9 = vpop.f32.mrf.mxu0 }
 0x405   :  { %v12984_v26 = vpop.f32.mrf.mxu0 }
 0x407   :  { %v14940_v16 = vpop.f32.mrf.mxu0 }
 0x409   :  { %v12994_v7 = vpop.f32.mrf.mxu0 }
 0x40a   :  { %v5038_v7 = vsel %vm2169_vm4, %v14932_v52, -inf }
 0x419   :  { %v14942_v27 = vpop.f32.mrf.mxu1 }
 0x41a   :  { %16607 = vst [vmem:[#allocation42_spill] sm:$0xff] %v14942_v27  ;;  %v16609_v27 = vld [vmem:[#allocation7_spill] sm:$0xff] }
 0x41b   :  { %v12909_v22 = vpop.f32.mrf.mxu1 }
 0x41d   :  { %v14944_v13 = vpop.f32.mrf.mxu1 }
 0x41e   :  { %16608 = vst [vmem:[#allocation43_spill] sm:$0xff] %v14944_v13 }
 0x41f   :  { %v12919_v30 = vpop.f32.mrf.mxu1 }
 0x421   :  { %v14946_v45 = vpop.f32.mrf.mxu1 }
 0x422   :  { %v5023_v36 = vsel %vm2169_vm4, %v14946_v45, -inf }
 0x423   :  { %5024 = vmax.xlane.f32.xlu1 %v5023_v36  ;;  %v12929_v47 = vpop.f32.mrf.mxu1 }
 0x424   :  { %v5044_v47 = vsel %vm2169_vm4, %v14934_v18, -inf }
 0x425   :  { %v14950_v38 = vpop.f32.mrf.mxu1 }
 0x426   :  { %v5029_v53 = vsel %vm2169_vm4, %v14950_v38, -inf }
 0x427   :  { %5030 = vmax.xlane.f32.xlu0 %v5029_v53  ;;  %v12939_v15 = vpop.f32.mrf.mxu1 }
 0x429   :  { %v14954_v33 = vpop.f32.mrf.mxu1 }
 0x42a   :  { %v5035_v63 = vsel %vm2169_vm4, %v14954_v33, -inf }
 0x42b   :  { %5033 = vmax.xlane.f32.xlu0 %v5032_v32  ;;  %5036 = vmax.xlane.f32.xlu1 %v5035_v63  ;;  %v12949_v3 = vpop.f32.mrf.mxu1  ;;  %v5050_v63 = vsel %vm2169_vm4, %v14936_v49, -inf }
 0x42d   :  { %v14960_v26 = vpop.f32.mrf.mxu1 }
 0x42e   :  { %v5041_v22 = vsel %vm2169_vm4, %v14960_v26, -inf }
 0x42f   :  { %5039 = vmax.xlane.f32.xlu0 %v5038_v7  ;;  %5042 = vmax.xlane.f32.xlu1 %v5041_v22  ;;  %v12959_v30 = vpop.f32.mrf.mxu1 }
 0x430   :  { %v5056_v30 = vsel %vm2169_vm4, %v14938_v9, -inf }
 0x431   :  { %v14966_v36 = vpop.f32.mrf.mxu1 }
 0x432   :  { %v5047_v53 = vsel %vm2169_vm4, %v14966_v36, -inf }
 0x433   :  { %5045 = vmax.xlane.f32.xlu0 %v5044_v47  ;;  %5048 = vmax.xlane.f32.xlu1 %v5047_v53  ;;  %v12969_v15 = vpop.f32.mrf.mxu1 }
 0x434   :  { %v14984_v15 = vpop.permute.xlu0 %5371 }
 0x435   :  { %v14972_v32 = vpop.f32.mrf.mxu1 }
 0x436   :  { %v5053_v3 = vsel %vm2169_vm4, %v14972_v32, -inf }
 0x437   :  { %5051 = vmax.xlane.f32.xlu0 %v5050_v63  ;;  %5054 = vmax.xlane.f32.xlu1 %v5053_v3  ;;  %v12979_v7 = vpop.f32.mrf.mxu1  ;;  %v5062_v63 = vsel %vm2169_vm4, %v14940_v16, -inf }
 0x438   :  { %v14990_v7 = vpop.permute.xlu0 %5707 }
 0x439   :  { %v14978_v22 = vpop.f32.mrf.mxu1 }
 0x43a   :  { %v5059_v47 = vsel %vm2169_vm4, %v14978_v22, -inf }
 0x43b   :  { %5057 = vmax.xlane.f32.xlu0 %v5056_v30  ;;  %5060 = vmax.xlane.f32.xlu1 %v5059_v47  ;;  %v12989_v53 = vpop.f32.mrf.mxu1  ;;  %v16611_v30 = vld [vmem:[#allocation8_spill] sm:$0xff] }
 0x43c   :  { %v14992_v5 = vpop.permute.xlu0 %5875  ;;  %v16613_v53 = vld [vmem:[#allocation9_spill] sm:$0xff] }
 0x43d   :  { %v14986_v13 = vpop.f32.mrf.mxu1 }
 0x43e   :  { %v5065_v39 = vsel %vm2169_vm4, %v14986_v13, -inf }
 0x43f   :  { %5063 = vmax.xlane.f32.xlu0 %v5062_v63  ;;  %v12999_v3 = vpop.f32.mrf.mxu1  ;;  %v16614_v63 = vld [vmem:[#allocation10_spill] sm:$0xff] }
 0x440   :  { %v14996_v31 = vpop.permute.xlu0 %6043 }
 0x441   :  { %16610 = vst [vmem:[#allocation44_spill] sm:$0xff] %v14996_v31 }
 0x444   :  { %v15000_v47 = vpop.permute.xlu0 %6211 }
 0x445   :  { %16612 = vst [vmem:[#allocation45_spill] sm:$0xff] %v15000_v47 }
 0x448   :  { %v15006_v3 = vpop.permute.xlu0 %6379 }
 0x449   :  { %16615 = vst [vmem:[#allocation46_spill] sm:$0xff] %v15006_v3 }
 0x44c   :  { %6932 = vrot.lane.b32.xlu1 %v16609_v27, %s13669_s7  ;;  %v15010_v54 = vpop.permute.xlu0 %6542 }
 0x44d   :  { %16617 = vst [vmem:[#allocation47_spill] sm:$0xff] %v15010_v54 }
 0x450   :  { %6930 = vrot.lane.b32.xlu1 %v16611_v30, %s13669_s7  ;;  %v15014_v14 = vpop.permute.xlu0 %6540  ;;  %v15030_v30 = vpop.permute.xlu1 %5959 }
 0x451   :  { %16618 = vst [vmem:[#allocation48_spill] sm:$0xff] %v15014_v14 }
 0x454   :  { %v15018_v4 = vpop.permute.xlu0 %6698 }
 0x455   :  { %6854 = vrot.lane.b32.xlu0 %v16613_v53, %s13669_s7  ;;  %16619 = vst [vmem:[#allocation49_spill] sm:$0xff] %v15018_v4  ;;  %v15032_v4 = vpop.permute.xlu1 %6127 }
 0x456   :  { %16621 = vst [vmem:[#allocation51_spill] sm:$0xff] %v15032_v4 }
 0x458   :  { %v15022_v41 = vpop.permute.xlu0 %6696 }
 0x459   :  { %6852 = vrot.lane.b32.xlu0 %v16614_v63, %s13669_s7  ;;  %16620 = vst [vmem:[#allocation50_spill] sm:$0xff] %v15022_v41  ;;  %v16622_v41 = vld [vmem:[#allocation18_spill] sm:$0xff]  ;;  %v15038_v14 = vpop.permute.xlu1 %6295 }
 0x45a   :  { %16623 = vst [vmem:[#allocation52_spill] sm:$0xff] %v15038_v14 }
 0x45d   :  { %7010 = vrot.lane.b32.xlu0 %v16616_v19, %s13669_s7 }
 0x474   :  { %5066 = vmax.xlane.f32.xlu1 %v5065_v39 }
 0x476   :  { %v5022_v56 = vpop.xlane.xlu0 %5021 }
 0x477   :  { %v5068_v11 = vsub.f32 %v14922_v12, %v5022_v56  ;;  %v15046_v12 = vpop.permute.xlu1 %6463 }
 0x478   :  { %16624 = vst [vmem:[#allocation53_spill] sm:$0xff] %v15046_v12 }
 0x479   :  { %v5084_v19 = vmul.f32 1.442695, %v5068_v11 }
 0x47a   :  { %v5028_v63 = vpop.xlane.xlu0 %5027 }
 0x47b   :  { %13473 = vpow2.f32 %v5084_v19  ;;  %v5070_v53 = vsub.f32 %v14926_v51, %v5028_v63  ;;  %v15048_v51 = vpop.permute.xlu1 %6620 }
 0x47c   :  { %16625 = vst [vmem:[#allocation54_spill] sm:$0xff] %v15048_v51 }
 0x47d   :  { %v5088_v27 = vmul.f32 1.442695, %v5070_v53 }
 0x47f   :  { %13475 = vpow2.f32 %v5088_v27  ;;  %v15050_v27 = vpop.permute.xlu1 %6618 }
 0x480   :  { %16626 = vst [vmem:[#allocation55_spill] sm:$0xff] %v15050_v27 }
 0x483   :  { %v15052_v53 = vpop.permute.xlu1 %6776 }
 0x484   :  { %16627 = vst [vmem:[#allocation56_spill] sm:$0xff] %v15052_v53 }
 0x485   :  { %7088 = vrot.lane.b32.xlu1 %v16622_v41, %s13669_s7 }
 0x487   :  { %v15054_v63 = vpop.permute.xlu1 %6774 }
 0x488   :  { %v15036_v39 = vpop.eup %13473  ;;  %16628 = vst [vmem:[#allocation57_spill] sm:$0xff] %v15054_v63 }
 0x489   :  { %v5116_v11 = vsel %vm2169_vm4, %v15036_v39, 0.0 }
 0x48a   :  { %5117 = vadd.xlane.f32.xlu0 %v5116_v11 }
 0x48c   :  { %v15042_v56 = vpop.eup %13475 }
 0x48d   :  { %v5122_v19 = vsel %vm2169_vm4, %v15042_v56, 0.0 }
 0x48e   :  { %5123 = vadd.xlane.f32.xlu0 %v5122_v19 }
 0x4ac   :  { %v5025_v41 = vpop.xlane.xlu1 %5024 }
 0x4ad   :  { %v5069_v54 = vsub.f32 %v14946_v45, %v5025_v41 }
 0x4af   :  { %v5086_v11 = vmul.f32 1.442695, %v5069_v54 }
 0x4b0   :  { %v5031_v3 = vpop.xlane.xlu0 %5030 }
 0x4b1   :  { %13477 = vpow2.f32 %v5086_v11  ;;  %v5071_v14 = vsub.f32 %v14950_v38, %v5031_v3 }
 0x4b3   :  { %v5090_v47 = vmul.f32 1.442695, %v5071_v14 }
 0x4b4   :  { %v5034_v19 = vpop.xlane.xlu0 %5033  ;;  %v5037_v4 = vpop.xlane.xlu1 %5036 }
 0x4b5   :  { %13479 = vpow2.f32 %v5090_v47  ;;  %v5072_v51 = vsub.f32 %v14930_v0, %v5034_v19  ;;  %v5073_v27 = vsub.f32 %v14954_v33, %v5037_v4 }
 0x4b7   :  { %v5092_v12 = vmul.f32 1.442695, %v5072_v51  ;;  %v5094_v53 = vmul.f32 1.442695, %v5073_v27 }
 0x4b8   :  { %v5040_v31 = vpop.xlane.xlu0 %5039  ;;  %v5043_v63 = vpop.xlane.xlu1 %5042 }
 0x4b9   :  { %13481 = vpow2.f32 %v5092_v12  ;;  %v5074_v41 = vsub.f32 %v14932_v52, %v5040_v31  ;;  %v5075_v54 = vsub.f32 %v14960_v26, %v5043_v63 }
 0x4ba   :  { %13483 = vpow2.f32 %v5094_v53 }
 0x4bb   :  { %v5096_v45 = vmul.f32 1.442695, %v5074_v41  ;;  %v5098_v38 = vmul.f32 1.442695, %v5075_v54 }
 0x4bc   :  { %v5046_v14 = vpop.xlane.xlu0 %5045  ;;  %v5049_v3 = vpop.xlane.xlu1 %5048 }
 0x4bd   :  { %13485 = vpow2.f32 %v5096_v45  ;;  %v5076_v47 = vsub.f32 %v14934_v18, %v5046_v14  ;;  %v5077_v0 = vsub.f32 %v14966_v36, %v5049_v3 }
 0x4be   :  { %v15064_v4 = vpop.eup %13477  ;;  %13487 = vpow2.f32 %v5098_v38 }
 0x4bf   :  { %v5100_v33 = vmul.f32 1.442695, %v5076_v47  ;;  %v5102_v51 = vmul.f32 1.442695, %v5077_v0  ;;  %v5119_v31 = vsel %vm2169_vm4, %v15064_v4, 0.0 }
 0x4c0   :  { %v5052_v52 = vpop.xlane.xlu0 %5051  ;;  %v5055_v26 = vpop.xlane.xlu1 %5054  ;;  %5120 = vadd.xlane.f32.xlu1 %v5119_v31 }
 0x4c1   :  { %13489 = vpow2.f32 %v5100_v33  ;;  %v5078_v12 = vsub.f32 %v14936_v49, %v5052_v52  ;;  %v5079_v27 = vsub.f32 %v14972_v32, %v5055_v26 }
 0x4c2   :  { %v15070_v53 = vpop.eup %13479  ;;  %13491 = vpow2.f32 %v5102_v51 }
 0x4c3   :  { %v5104_v18 = vmul.f32 1.442695, %v5078_v12  ;;  %v5106_v36 = vmul.f32 1.442695, %v5079_v27  ;;  %v5125_v63 = vsel %vm2169_vm4, %v15070_v53, 0.0 }
 0x4c4   :  { %v5058_v11 = vpop.xlane.xlu0 %5057  ;;  %v5061_v19 = vpop.xlane.xlu1 %5060  ;;  %5126 = vadd.xlane.f32.xlu1 %v5125_v63 }
 0x4c5   :  { %13493 = vpow2.f32 %v5104_v18  ;;  %v5080_v41 = vsub.f32 %v14938_v9, %v5058_v11  ;;  %v5081_v54 = vsub.f32 %v14978_v22, %v5061_v19 }
 0x4c6   :  { %v15076_v45 = vpop.eup %13481  ;;  %13495 = vpow2.f32 %v5106_v36 }
 0x4c7   :  { %v15078_v49 = vpop.eup %13483  ;;  %v5108_v32 = vmul.f32 1.442695, %v5080_v41  ;;  %v5110_v38 = vmul.f32 1.442695, %v5081_v54  ;;  %v5128_v14 = vsel %vm2169_vm4, %v15076_v45, 0.0 }
 0x4c8   :  { %5129 = vadd.xlane.f32.xlu0 %v5128_v14  ;;  %v5064_v3 = vpop.xlane.xlu0 %5063  ;;  %v5131_v47 = vsel %vm2169_vm4, %v15078_v49, 0.0  ;;  %v15125_v14 = vpop.permute.xlu1 %6932 }
 0x4c9   :  { %13497 = vpow2.f32 %v5108_v32  ;;  %v5082_v9 = vsub.f32 %v14940_v16, %v5064_v3  ;;  %5132 = vadd.xlane.f32.xlu1 %v5131_v47 }
 0x4ca   :  { %v15085_v22 = vpop.eup %13485  ;;  %13499 = vpow2.f32 %v5110_v38 }
 0x4cb   :  { %v15087_v0 = vpop.eup %13487  ;;  %v5112_v33 = vmul.f32 1.442695, %v5082_v9  ;;  %v5134_v51 = vsel %vm2169_vm4, %v15085_v22, 0.0 }
 0x4cc   :  { %5135 = vadd.xlane.f32.xlu0 %v5134_v51  ;;  %v5137_v31 = vsel %vm2169_vm4, %v15087_v0, 0.0  ;;  %v15129_v3 = vpop.permute.xlu1 %6930  ;;  %v15138_v51 = vpop.permute.xlu0 %6854 }
 0x4cd   :  { %13501 = vpow2.f32 %v5112_v33  ;;  %5138 = vadd.xlane.f32.xlu1 %v5137_v31 }
 0x4ce   :  { %v15093_v52 = vpop.eup %13489 }
 0x4cf   :  { %v15095_v26 = vpop.eup %13491  ;;  %v5140_v16 = vsel %vm2169_vm4, %v15093_v52, 0.0 }
 0x4d0   :  { %5141 = vadd.xlane.f32.xlu0 %v5140_v16  ;;  %v5143_v12 = vsel %vm2169_vm4, %v15095_v26, 0.0  ;;  %v15142_v31 = vpop.permute.xlu0 %6852 }
 0x4d1   :  { %5144 = vadd.xlane.f32.xlu1 %v5143_v12 }
 0x4d2   :  { %v15101_v27 = vpop.eup %13493 }
 0x4d3   :  { %v15103_v18 = vpop.eup %13495  ;;  %v5146_v36 = vsel %vm2169_vm4, %v15101_v27, 0.0 }
 0x4d4   :  { %5147 = vadd.xlane.f32.xlu0 %v5146_v36  ;;  %v5149_v63 = vsel %vm2169_vm4, %v15103_v18, 0.0 }
 0x4d5   :  { %5150 = vadd.xlane.f32.xlu1 %v5149_v63 }
 0x4d6   :  { %v15109_v11 = vpop.eup %13497 }
 0x4d7   :  { %v15111_v19 = vpop.eup %13499  ;;  %v5152_v41 = vsel %vm2169_vm4, %v15109_v11, 0.0 }
 0x4d8   :  { %5153 = vadd.xlane.f32.xlu0 %v5152_v41  ;;  %v5155_v54 = vsel %vm2169_vm4, %v15111_v19, 0.0 }
 0x4d9   :  { %5156 = vadd.xlane.f32.xlu1 %v5155_v54 }
 0x4da   :  { %v15117_v32 = vpop.eup %13501 }
 0x4db   :  { %v5158_v38 = vsel %vm2169_vm4, %v15117_v32, 0.0 }
 0x4dd   :  { %5159 = vadd.xlane.f32.xlu1 %v5158_v38 }
 0x4ee   :  { %7086 = vrot.lane.b32.xlu1 %v14408_v34, %s13669_s7 }
 0x4f2   :  { %7244 = vrot.lane.b32.xlu1 %v14414_v46, %s13669_s7 }
 0x4f6   :  { %7242 = vrot.lane.b32.xlu1 %v14535_v28, %s13669_s7 }
 0x4fa   :  { %7400 = vrot.lane.b32.xlu1 %v14553_v50, %s13669_s7 }
 0x4fd   :  { %v5067_v47 = vpop.xlane.xlu1 %5066 }
 0x4fe   :  { %7398 = vrot.lane.b32.xlu1 %v14574_v24, %s13669_s7  ;;  %v5083_v9 = vsub.f32 %v14986_v13, %v5067_v47  ;;  %v15150_v13 = vpop.permute.xlu0 %7010 }
 0x500   :  { %v5114_v33 = vmul.f32 1.442695, %v5083_v9 }
 0x501   :  { %v15210_v9 = vpop.permute.xlu1 %7088 }
 0x502   :  { %13503 = vpow2.f32 %v5114_v33  ;;  %7556 = vrot.lane.b32.xlu1 %v14594_v57, %s13669_s7  ;;  %v16634_v33 = vld [vmem:[#allocation26_spill] sm:$0xff] }
 0x506   :  { %7554 = vrot.lane.b32.xlu1 %v14607_v10, %s13669_s7 }
 0x50a   :  { %7712 = vrot.lane.b32.xlu1 %v14615_v48, %s13669_s7 }
 0x50e   :  { %7710 = vrot.lane.b32.xlu1 %v14623_v61, %s13669_s7 }
 0x50f   :  { %v15148_v16 = vpop.eup %13503 }
 0x510   :  { %v5161_v12 = vsel %vm2169_vm4, %v15148_v16, 0.0 }
 0x511   :  { %5162 = vadd.xlane.f32.xlu0 %v5161_v12  ;;  %v16635_v12 = vld [vmem:[#allocation27_spill] sm:$0xff] }
 0x512   :  { %8041 = vrot.lane.b32.xlu1 %v14631_v59, %s13669_s7 }
 0x513   :  { %v5118_v36 = vpop.xlane.xlu0 %5117 }
 0x514   :  { %13505 = vrcp.f32 %v5118_v36  ;;  %v16636_v36 = vld [vmem:[#allocation28_spill] sm:$0xff] }
 0x516   :  { %8195 = vrot.lane.b32.xlu1 %v14638_v62, %s13669_s7 }
 0x517   :  { %v5124_v63 = vpop.xlane.xlu0 %5123 }
 0x518   :  { %13507 = vrcp.f32 %v5124_v63 }
 0x51a   :  { %8272 = vrot.lane.b32.xlu1 %v14648_v25, %s13669_s7 }
 0x51e   :  { %8349 = vrot.lane.b32.xlu1 %v14654_v17, %s13669_s7 }
 0x521   :  { %v13506_v41 = vpop.eup %13505 }
 0x522   :  { %8503 = vrot.lane.b32.xlu1 %v14661_v55, %s13669_s7  ;;  %v5180_v54 = vmul.f32 %v13506_v41, %v15036_v39  ;;  %v16631_v39 = vld [vmem:[#allocation23_spill] sm:$0xff]  ;;  %v16637_v41 = vld [vmem:[#allocation29_spill] sm:$0xff] }
 0x524   :  { %13003 = vmatmul.mubr.msk.f32.vlgmr.msra.gmra.mxu0 %vm2346_vm5, %v5180_v54 }
 0x525   :  { %v13508_v38 = vpop.eup %13507  ;;  %13011 = vmatpush3.msk.msra.mxu0 %vm2350_vm3, %v14984_v15  ;;  %13012 = vmatprep.mubr.msk.f32.mxu0 %vm13667_vm1, %v16579_v21  ;;  %v16630_v15 = vld [vmem:[#allocation22_spill] sm:$0xff] }
 0x526   :  { %8657 = vrot.lane.b32.xlu1 %v14671_v2, %s13669_s7  ;;  %13020 = vmatprep.subr.mxu0 %v16579_v21  ;;  %v5182_v47 = vmul.f32 %v13508_v38, %v15042_v56  ;;  %v16632_v56 = vld [vmem:[#allocation24_spill] sm:$0xff] }
 0x527   :  { %7008 = vrot.lane.b32.xlu0 %v14422_v40, %s13669_s7 }
 0x528   :  { %13013 = vmatmul.mubr.msk.f32.vlgmr.msra.gmra.mxu0 %vm2346_vm5, %v5182_v47 }
 0x529   :  { %13021 = vmatpush3.msk.msra.mxu0 %vm2350_vm3, %v15016_v29  ;;  %13022 = vmatprep.mubr.msk.f32.mxu0 %vm13667_vm1, %v16579_v21  ;;  %v16629_v29 = vld [vmem:[#allocation21_spill] sm:$0xff] }
 0x52a   :  { %8811 = vrot.lane.b32.xlu1 %v14681_v8, %s13669_s7  ;;  %13030 = vmatprep.subr.mxu0 %v16579_v21 }
 0x52b   :  { %7166 = vrot.lane.b32.xlu0 %v14428_v37, %s13669_s7 }
 0x52e   :  { %8965 = vrot.lane.b32.xlu1 %v14691_v58, %s13669_s7 }
 0x52f   :  { %7164 = vrot.lane.b32.xlu0 %v14436_v42, %s13669_s7 }
 0x532   :  { %9119 = vrot.lane.b32.xlu1 %v14702_v44, %s13669_s7 }
 0x533   :  { %7322 = vrot.lane.b32.xlu0 %v16629_v29, %s13669_s7 }
 0x536   :  { %9276 = vrot.lane.b32.xlu1 %v13980_v6, %s13670_s16  ;;  %v16633_v6 = vld [vmem:[#allocation25_spill] sm:$0xff] }
 0x537   :  { %7320 = vrot.lane.b32.xlu0 %v16630_v15, %s13669_s7 }
 0x53a   :  { %9274 = vrot.lane.b32.xlu1 %v13965_v1, %s13670_s16 }
 0x53b   :  { %7478 = vrot.lane.b32.xlu0 %v16631_v39, %s13669_s7 }
 0x53e   :  { %9432 = vrot.lane.b32.xlu1 %v14010_v20, %s13670_s16 }
 0x53f   :  { %7476 = vrot.lane.b32.xlu0 %v16632_v56, %s13669_s7 }
 0x542   :  { %9430 = vrot.lane.b32.xlu1 %v16584_v35, %s13670_s16 }
 0x543   :  { %7634 = vrot.lane.b32.xlu0 %v16633_v6, %s13669_s7 }
 0x547   :  { %7632 = vrot.lane.b32.xlu0 %v16634_v33, %s13669_s7 }
 0x549   :  { %v5121_v1 = vpop.xlane.xlu1 %5120 }
 0x54a   :  { %13509 = vrcp.f32 %v5121_v1  ;;  %v16638_v1 = vld [vmem:[#allocation30_spill] sm:$0xff] }
 0x54b   :  { %7964 = vrot.lane.b32.xlu0 %v16635_v12, %s13669_s7 }
 0x54d   :  { %v5127_v20 = vpop.xlane.xlu1 %5126 }
 0x54e   :  { %13511 = vrcp.f32 %v5127_v20 }
 0x54f   :  { %8118 = vrot.lane.b32.xlu0 %v16636_v36, %s13669_s7 }
 0x551   :  { %v5130_v63 = vpop.xlane.xlu0 %5129 }
 0x552   :  { %13513 = vrcp.f32 %v5130_v63  ;;  %v5133_v35 = vpop.xlane.xlu1 %5132 }
 0x553   :  { %13515 = vrcp.f32 %v5133_v35  ;;  %8426 = vrot.lane.b32.xlu0 %v16637_v41, %s13669_s7  ;;  %v16639_v35 = vld [vmem:[#allocation31_spill] sm:$0xff] }
 0x555   :  { %v5136_v54 = vpop.xlane.xlu0 %5135 }
 0x556   :  { %13517 = vrcp.f32 %v5136_v54  ;;  %v5139_v38 = vpop.xlane.xlu1 %5138 }
 0x557   :  { %v13510_v47 = vpop.eup %13509  ;;  %13519 = vrcp.f32 %v5139_v38  ;;  %8580 = vrot.lane.b32.xlu0 %v16638_v1, %s13669_s7 }
 0x558   :  { %v5181_v20 = vmul.f32 %v13510_v47, %v15064_v4 }
 0x559   :  { %v5142_v44 = vpop.xlane.xlu0 %5141 }
 0x55a   :  { %13521 = vrcp.f32 %v5142_v44  ;;  %v5145_v58 = vpop.xlane.xlu1 %5144  ;;  %13008 = vmatmul.mubr.msk.f32.vlgmr.msra.gmra.mxu1 %vm2346_vm5, %v5181_v20 }
 0x55b   :  { %v13512_v63 = vpop.eup %13511  ;;  %13523 = vrcp.f32 %v5145_v58  ;;  %13016 = vmatpush3.msk.msra.mxu1 %vm2350_vm3, %v15012_v23  ;;  %13017 = vmatprep.mubr.msk.f32.mxu1 %vm13667_vm1, %v16579_v21  ;;  %v16640_v23 = vld [vmem:[#allocation32_spill] sm:$0xff] }
 0x55c   :  { %8734 = vrot.lane.b32.xlu0 %v16639_v35, %s13669_s7  ;;  %13025 = vmatprep.subr.mxu1 %v16579_v21  ;;  %v5183_v4 = vmul.f32 %v13512_v63, %v15070_v53 }
 0x55d   :  { %v5148_v54 = vpop.xlane.xlu0 %5147 }
 0x55e   :  { %13525 = vrcp.f32 %v5148_v54  ;;  %v5151_v44 = vpop.xlane.xlu1 %5150  ;;  %13018 = vmatmul.mubr.msk.f32.vlgmr.msra.gmra.mxu1 %vm2346_vm5, %v5183_v4 }
 0x55f   :  { %v13514_v38 = vpop.eup %13513  ;;  %13527 = vrcp.f32 %v5151_v44  ;;  %13026 = vmatpush3.msk.msra.mxu1 %vm2350_vm3, %v15020_v43  ;;  %13027 = vmatprep.mubr.msk.f32.mxu1 %vm13667_vm1, %v16579_v21 }
 0x560   :  { %v13516_v58 = vpop.eup %13515  ;;  %8888 = vrot.lane.b32.xlu0 %v16640_v23, %s13669_s7  ;;  %13035 = vmatprep.subr.mxu1 %v16579_v21  ;;  %v5184_v53 = vmul.f32 %v13514_v38, %v15076_v45  ;;  %v16641_v45 = vld [vmem:[#allocation33_spill] sm:$0xff] }
 0x561   :  { %v5154_v47 = vpop.xlane.xlu0 %5153  ;;  %v5185_v20 = vmul.f32 %v13516_v58, %v15078_v49 }
 0x562   :  { %13529 = vrcp.f32 %v5154_v47  ;;  %v5157_v63 = vpop.xlane.xlu1 %5156  ;;  %13023 = vmatmul.mubr.msk.f32.vlgmr.msra.gmra.mxu0 %vm2346_vm5, %v5184_v53  ;;  %v16644_v53 = vld [vmem:[#allocation51_spill] sm:$0xff] }
 0x563   :  { %v13518_v4 = vpop.eup %13517  ;;  %13531 = vrcp.f32 %v5157_v63  ;;  %13028 = vmatmul.mubr.msk.f32.vlgmr.msra.gmra.mxu1 %vm2346_vm5, %v5185_v20  ;;  %13031 = vmatpush3.msk.msra.mxu0 %vm2350_vm3, %v14990_v7 }
 0x564   :  { %v13520_v43 = vpop.eup %13519  ;;  %13036 = vmatpush3.msk.msra.mxu1 %vm2350_vm3, %v15026_v60  ;;  %9042 = vrot.lane.b32.xlu0 %v16641_v45, %s13669_s7  ;;  %v5186_v49 = vmul.f32 %v13518_v4, %v15085_v22  ;;  %v16646_v4 = vld [vmem:[#allocation45_spill] sm:$0xff] }
 0x565   :  { %13032 = vmatprep.mubr.msk.f32.mxu0 %vm13667_vm1, %v16579_v21  ;;  %13037 = vmatprep.mubr.msk.f32.mxu1 %vm13667_vm1, %v16579_v21  ;;  %v5187_v54 = vmul.f32 %v13520_v43, %v15087_v0  ;;  %v16642_v0 = vld [vmem:[#allocation3_spill] sm:$0xff] }
 0x566   :  { %13040 = vmatprep.subr.mxu0 %v16579_v21  ;;  %13045 = vmatprep.subr.mxu1 %v16579_v21  ;;  %v5160_v7 = vpop.xlane.xlu1 %5159 }
 0x567   :  { %v13522_v44 = vpop.eup %13521  ;;  %13533 = vrcp.f32 %v5160_v7  ;;  %13033 = vmatmul.mubr.msk.f32.vlgmr.msra.gmra.mxu0 %vm2346_vm5, %v5186_v49  ;;  %13038 = vmatmul.mubr.msk.f32.vlgmr.msra.gmra.mxu1 %vm2346_vm5, %v5187_v54  ;;  %v16648_v49 = vld [vmem:[#allocation4_spill] sm:$0xff]  ;;  %v16649_v54 = vld [vmem:[#allocation46_spill] sm:$0xff]  ;;  %v16650_v7 = vld [vmem:[#allocation53_spill] sm:$0xff] }
 0x568   :  { %v13524_v60 = vpop.eup %13523  ;;  %13041 = vmatpush3.msk.msra.mxu0 %vm2350_vm3, %v14992_v5  ;;  %13046 = vmatpush3.msk.msra.mxu1 %vm2350_vm3, %v15030_v30  ;;  %v5188_v22 = vmul.f32 %v13522_v44, %v15093_v52  ;;  %v16643_v30 = vld [vmem:[#allocation44_spill] sm:$0xff]  ;;  %v16651_v44 = vld [vmem:[#allocation6_spill] sm:$0xff] }
 0x569   :  { %9198 = vrot.lane.b32.xlu0 %v16642_v0, %s13670_s16  ;;  %13042 = vmatprep.mubr.msk.f32.mxu0 %vm13667_vm1, %v16579_v21  ;;  %v5189_v38 = vmul.f32 %v13524_v60, %v15095_v26  ;;  %v16645_v26 = vld [vmem:[#allocation2_spill] sm:$0xff]  ;;  %v16652_v60 = vld [vmem:[#allocation47_spill] sm:$0xff] }
 0x56a   :  { %13047 = vmatprep.mubr.msk.f32.mxu1 %vm13667_vm1, %v16579_v21  ;;  %13050 = vmatprep.subr.mxu0 %v16579_v21  ;;  %v16655_v0 = vld [vmem:[#allocation50_spill] sm:$0xff] }
 0x56b   :  { %v13526_v58 = vpop.eup %13525  ;;  %13055 = vmatprep.subr.mxu1 %v16579_v21  ;;  %13043 = vmatmul.mubr.msk.f32.vlgmr.msra.gmra.mxu0 %vm2346_vm5, %v5188_v22  ;;  %v16654_v22 = vld [vmem:[#allocation49_spill] sm:$0xff] }
 0x56c   :  { %v13528_v5 = vpop.eup %13527  ;;  %13048 = vmatmul.mubr.msk.f32.vlgmr.msra.gmra.mxu1 %vm2346_vm5, %v5189_v38  ;;  %13051 = vmatpush3.msk.msra.mxu0 %vm2350_vm3, %v16643_v30  ;;  %v5190_v52 = vmul.f32 %v13526_v58, %v15101_v27  ;;  %v7087_v38 = vpop.permute.xlu1 %7086 }
 0x56d   :  { %13056 = vmatpush3.msk.msra.mxu1 %vm2350_vm3, %v16644_v53  ;;  %9196 = vrot.lane.b32.xlu0 %v16645_v26, %s13670_s16  ;;  %v5191_v47 = vmul.f32 %v13528_v5, %v15103_v18  ;;  %v16647_v18 = vld [vmem:[#allocation52_spill] sm:$0xff] }
 0x56e   :  { %13052 = vmatprep.mubr.msk.f32.mxu0 %vm13667_vm1, %v16579_v21  ;;  %13057 = vmatprep.mubr.msk.f32.mxu1 %vm13667_vm1, %v16579_v21 }
 0x56f   :  { %v13530_v20 = vpop.eup %13529  ;;  %13060 = vmatprep.subr.mxu0 %v16579_v21  ;;  %13065 = vmatprep.subr.mxu1 %v16579_v21 }
 0x570   :  { %v13532_v27 = vpop.eup %13531  ;;  %13053 = vmatmul.mubr.msk.f32.vlgmr.msra.gmra.mxu0 %vm2346_vm5, %v5190_v52  ;;  %13058 = vmatmul.mubr.msk.f32.vlgmr.msra.gmra.mxu1 %vm2346_vm5, %v5191_v47  ;;  %v5192_v63 = vmul.f32 %v13530_v20, %v15109_v11  ;;  %v7245_v5 = vpop.permute.xlu1 %7244  ;;  %v16656_v20 = vld [vmem:[#allocation54_spill] sm:$0xff] }
 0x571   :  { %13061 = vmatpush3.msk.msra.mxu0 %vm2350_vm3, %v16646_v4  ;;  %13066 = vmatpush3.msk.msra.mxu1 %vm2350_vm3, %v16647_v18  ;;  %v5193_v43 = vmul.f32 %v13532_v27, %v15111_v19  ;;  %v16657_v4 = vld [vmem:[#allocation55_spill] sm:$0xff] }
 0x572   :  { %9354 = vrot.lane.b32.xlu0 %v16648_v49, %s13670_s16  ;;  %13062 = vmatprep.mubr.msk.f32.mxu0 %vm13667_vm1, %v16579_v21  ;;  %v16659_v49 = vld [vmem:[#allocation57_spill] sm:$0xff] }
 0x573   :  { %13067 = vmatprep.mubr.msk.f32.mxu1 %vm13667_vm1, %v16579_v21  ;;  %13070 = vmatprep.subr.mxu0 %v16579_v21 }
 0x574   :  { %v13534_v11 = vpop.eup %13533  ;;  %13075 = vmatprep.subr.mxu1 %v16579_v21  ;;  %13063 = vmatmul.mubr.msk.f32.vlgmr.msra.gmra.mxu0 %vm2346_vm5, %v5192_v63  ;;  %v7243_v30 = vpop.permute.xlu1 %7242 }
 0x575   :  { %13068 = vmatmul.mubr.msk.f32.vlgmr.msra.gmra.mxu1 %vm2346_vm5, %v5193_v43  ;;  %13071 = vmatpush3.msk.msra.mxu0 %vm2350_vm3, %v16649_v54  ;;  %v5194_v19 = vmul.f32 %v13534_v11, %v15117_v32  ;;  %v16653_v32 = vld [vmem:[#allocation48_spill] sm:$0xff] }
 0x576   :  { %13076 = vmatpush3.msk.msra.mxu1 %vm2350_vm3, %v16650_v7  ;;  %9352 = vrot.lane.b32.xlu0 %v16651_v44, %s13670_s16 }
 0x577   :  { %13072 = vmatprep.mubr.msk.f32.mxu0 %vm13667_vm1, %v16579_v21  ;;  %13080 = vmatprep.subr.mxu0 %v16579_v21 }
 0x578   :  { %13073 = vmatmul.mubr.msk.f32.vlgmr.msra.gmra.mxu0 %vm2346_vm5, %v5194_v19  ;;  %13077 = vmatprep.mubr.msk.f32.mxu1 %vm13667_vm1, %v16579_v21  ;;  %v7401_v52 = vpop.permute.xlu1 %7400 }
 0x579   :  { %13081 = vmatpush3.xpose.msk.msra.mxu0 %vm968_vm2, %v16652_v60  ;;  %13082 = vmatprep.mubr.msk.f32.mxu0 %vm13667_vm1, %v16579_v21 }
 0x57a   :  { %13090 = vmatprep.subr.mxu0 %v16579_v21  ;;  %13085 = vmatprep.subr.mxu1 %v16579_v21 }
 0x57c   :  { %13083 = vmatmul.mubr.msk.f32.vlgmr.msra.gmra.mxu0 %vm968_vm2, %v16653_v32  ;;  %v7399_v27 = vpop.permute.xlu1 %7398 }
 0x57d   :  { %13091 = vmatpush3.xpose.msk.msra.mxu0 %vm968_vm2, %v16654_v22  ;;  %13092 = vmatprep.mubr.msk.f32.mxu0 %vm13667_vm1, %v16579_v21 }
 0x57e   :  { %13100 = vmatprep.subr.mxu0 %v16579_v21 }
 0x580   :  { %13093 = vmatmul.mubr.msk.f32.vlgmr.msra.gmra.mxu0 %vm968_vm2, %v16655_v0  ;;  %v7557_v43 = vpop.permute.xlu1 %7556 }
 0x581   :  { %13101 = vmatpush3.xpose.msk.msra.mxu0 %vm968_vm2, %v15138_v51  ;;  %13102 = vmatprep.mubr.msk.f32.mxu0 %vm13667_vm1, %v16579_v21 }
 0x582   :  { %13110 = vmatprep.subr.mxu0 %v16579_v21 }
 0x584   :  { %13103 = vmatmul.mubr.msk.f32.vlgmr.msra.gmra.mxu0 %vm968_vm2, %v15142_v31 }
 0x585   :  { %13111 = vmatpush3.xpose.msk.msra.mxu0 %vm968_vm2, %v15150_v13  ;;  %13112 = vmatprep.mubr.msk.f32.mxu0 %vm13667_vm1, %v16579_v21 }
 0x586   :  { %13120 = vmatprep.subr.mxu0 %v16579_v21 }
 0x59a   :  { %v5163_v58 = vpop.xlane.xlu0 %5162 }
 0x59b   :  { %13535 = vrcp.f32 %v5163_v58 }
 0x59e   :  { %v7009_v51 = vpop.permute.xlu0 %7008 }
 0x59f   :  { %13113 = vmatmul.mubr.msk.f32.vlgmr.msra.gmra.mxu0 %vm968_vm2, %v7009_v51 }
 0x5a0   :  { %13122 = vmatprep.mubr.msk.f32.mxu0 %vm13667_vm1, %v16579_v21 }
 0x5a2   :  { %v7167_v31 = vpop.permute.xlu0 %7166 }
 0x5a3   :  { %13121 = vmatpush3.xpose.msk.msra.mxu0 %vm968_vm2, %v7167_v31 }
 0x5a4   :  { %13130 = vmatprep.subr.mxu0 %v16579_v21 }
 0x5a6   :  { %v7165_v13 = vpop.permute.xlu0 %7164 }
 0x5a7   :  { %13123 = vmatmul.mubr.msk.f32.vlgmr.msra.gmra.mxu0 %vm968_vm2, %v7165_v13 }
 0x5a8   :  { %v13536_v53 = vpop.eup %13535  ;;  %13132 = vmatprep.mubr.msk.f32.mxu0 %vm13667_vm1, %v16579_v21 }
 0x5a9   :  { %v5195_v26 = vmul.f32 %v13536_v53, %v15148_v16  ;;  %v16658_v16 = vld [vmem:[#allocation56_spill] sm:$0xff] }
 0x5aa   :  { %v7323_v47 = vpop.permute.xlu0 %7322 }
 0x5ab   :  { %13078 = vmatmul.mubr.msk.f32.vlgmr.msra.gmra.mxu1 %vm2346_vm5, %v5195_v26  ;;  %13131 = vmatpush3.xpose.msk.msra.mxu0 %vm968_vm2, %v7323_v47 }
 0x5ac   :  { %13086 = vmatpush3.xpose.msk.msra.mxu1 %vm968_vm2, %v16656_v20  ;;  %13087 = vmatprep.mubr.msk.f32.mxu1 %vm13667_vm1, %v16579_v21 }
 0x5ad   :  { %13095 = vmatprep.subr.mxu1 %v16579_v21  ;;  %13140 = vmatprep.subr.mxu0 %v16579_v21 }
 0x5ae   :  { %v7321_v63 = vpop.permute.xlu0 %7320 }
 0x5af   :  { %13088 = vmatmul.mubr.msk.f32.vlgmr.msra.gmra.mxu1 %vm968_vm2, %v16657_v4  ;;  %13133 = vmatmul.mubr.msk.f32.vlgmr.msra.gmra.mxu0 %vm968_vm2, %v7321_v63 }
 0x5b0   :  { %13096 = vmatpush3.xpose.msk.msra.mxu1 %vm968_vm2, %v16658_v16  ;;  %13097 = vmatprep.mubr.msk.f32.mxu1 %vm13667_vm1, %v16579_v21 }
 0x5b1   :  { %13105 = vmatprep.subr.mxu1 %v16579_v21  ;;  %13142 = vmatprep.mubr.msk.f32.mxu0 %vm13667_vm1, %v16579_v21 }
 0x5b2   :  { %v7479_v18 = vpop.permute.xlu0 %7478 }
 0x5b3   :  { %13098 = vmatmul.mubr.msk.f32.vlgmr.msra.gmra.mxu1 %vm968_vm2, %v16659_v49  ;;  %13141 = vmatpush3.xpose.msk.msra.mxu0 %vm968_vm2, %v7479_v18 }
 0x5b4   :  { %13106 = vmatpush3.xpose.msk.msra.mxu1 %vm968_vm2, %v15125_v14  ;;  %13107 = vmatprep.mubr.msk.f32.mxu1 %vm13667_vm1, %v16579_v21  ;;  %v7555_v14 = vpop.permute.xlu1 %7554 }
 0x5b5   :  { %13115 = vmatprep.subr.mxu1 %v16579_v21  ;;  %13150 = vmatprep.subr.mxu0 %v16579_v21 }
 0x5b6   :  { %v7477_v11 = vpop.permute.xlu0 %7476 }
 0x5b7   :  { %13108 = vmatmul.mubr.msk.f32.vlgmr.msra.gmra.mxu1 %vm968_vm2, %v15129_v3  ;;  %13143 = vmatmul.mubr.msk.f32.vlgmr.msra.gmra.mxu0 %vm968_vm2, %v7477_v11 }
 0x5b8   :  { %13116 = vmatpush3.xpose.msk.msra.mxu1 %vm968_vm2, %v15210_v9  ;;  %13117 = vmatprep.mubr.msk.f32.mxu1 %vm13667_vm1, %v16579_v21  ;;  %v7713_v9 = vpop.permute.xlu1 %7712 }
 0x5b9   :  { %13125 = vmatprep.subr.mxu1 %v16579_v21  ;;  %13152 = vmatprep.mubr.msk.f32.mxu0 %vm13667_vm1, %v16579_v21 }
 0x5ba   :  { %v7635_v54 = vpop.permute.xlu0 %7634 }
 0x5bb   :  { %13118 = vmatmul.mubr.msk.f32.vlgmr.msra.gmra.mxu1 %vm968_vm2, %v7087_v38  ;;  %13151 = vmatpush3.xpose.msk.msra.mxu0 %vm968_vm2, %v7635_v54 }
 0x5bc   :  { %13126 = vmatpush3.xpose.msk.msra.mxu1 %vm968_vm2, %v7245_v5  ;;  %13127 = vmatprep.mubr.msk.f32.mxu1 %vm13667_vm1, %v16579_v21  ;;  %v7711_v7 = vpop.permute.xlu1 %7710 }
 0x5bd   :  { %13135 = vmatprep.subr.mxu1 %v16579_v21  ;;  %13160 = vmatprep.subr.mxu0 %v16579_v21 }
 0x5be   :  { %v7633_v3 = vpop.permute.xlu0 %7632 }
 0x5bf   :  { %13128 = vmatmul.mubr.msk.f32.vlgmr.msra.gmra.mxu1 %vm968_vm2, %v7243_v30  ;;  %13153 = vmatmul.mubr.msk.f32.vlgmr.msra.gmra.mxu0 %vm968_vm2, %v7633_v3 }
 0x5c0   :  { %13136 = vmatpush3.xpose.msk.msra.mxu1 %vm968_vm2, %v7401_v52  ;;  %13137 = vmatprep.mubr.msk.f32.mxu1 %vm13667_vm1, %v16579_v21  ;;  %v8042_v44 = vpop.permute.xlu1 %8041 }
 0x5c1   :  { %13145 = vmatprep.subr.mxu1 %v16579_v21  ;;  %13162 = vmatprep.mubr.msk.f32.mxu0 %vm13667_vm1, %v16579_v21 }
 0x5c2   :  { %v7965_v19 = vpop.permute.xlu0 %7964 }
 0x5c3   :  { %13138 = vmatmul.mubr.msk.f32.vlgmr.msra.gmra.mxu1 %vm968_vm2, %v7399_v27  ;;  %13161 = vmatpush3.msk.msra.mxu0 %vm2350_vm3, %v7965_v19 }
 0x5c4   :  { %13146 = vmatpush3.xpose.msk.msra.mxu1 %vm968_vm2, %v7557_v43  ;;  %13147 = vmatprep.mubr.msk.f32.mxu1 %vm13667_vm1, %v16579_v21 }
 0x5c5   :  { %13155 = vmatprep.subr.mxu1 %v16579_v21  ;;  %13170 = vmatprep.subr.mxu0 %v16579_v21 }
 0x5c6   :  { %v15520_v45 = vpop.permute.xlu0 %8118 }
 0x5c7   :  { %13148 = vmatmul.mubr.msk.f32.vlgmr.msra.gmra.mxu1 %vm968_vm2, %v7555_v14 }
 0x5c8   :  { %13156 = vmatpush3.xpose.msk.msra.mxu1 %vm968_vm2, %v7713_v9  ;;  %13157 = vmatprep.mubr.msk.f32.mxu1 %vm13667_vm1, %v16579_v21 }
 0x5c9   :  { %13165 = vmatprep.subr.mxu1 %v16579_v21 }
 0x5cb   :  { %13158 = vmatmul.mubr.msk.f32.vlgmr.msra.gmra.mxu1 %vm968_vm2, %v7711_v7 }
 0x5cc   :  { %13166 = vmatpush3.msk.msra.mxu1 %vm2350_vm3, %v8042_v44  ;;  %13167 = vmatprep.mubr.msk.f32.mxu1 %vm13667_vm1, %v16579_v21 }
 0x5cd   :  { %13175 = vmatprep.subr.mxu1 %v16579_v21 }
 0x5e4   :  { %v15426_v60 = vpop.f32.mrf.mxu0 }
 0x5e5   :  { %16660 = vst [vmem:[#allocation21_spill] sm:$0xff] %v15426_v60 }
 0x5e6   :  { %v13004_v32 = vpop.f32.mrf.mxu0 }
 0x5e8   :  { %v15428_v22 = vpop.f32.mrf.mxu0 }
 0x5e9   :  { %16661 = vst [vmem:[#allocation22_spill] sm:$0xff] %v15428_v22 }
 0x5ea   :  { %v13014_v0 = vpop.f32.mrf.mxu0 }
 0x61a   :  { %v15430_v38 = vpop.f32.mrf.mxu1 }
 0x61b   :  { %16662 = vst [vmem:[#allocation23_spill] sm:$0xff] %v15430_v38 }
 0x61c   :  { %v13009_v58 = vpop.f32.mrf.mxu1 }
 0x61e   :  { %v15432_v5 = vpop.f32.mrf.mxu1 }
 0x61f   :  { %16663 = vst [vmem:[#allocation24_spill] sm:$0xff] %v15432_v5 }
 0x620   :  { %v13019_v51 = vpop.f32.mrf.mxu1 }
 0x622   :  { %v15434_v30 = vpop.f32.mrf.mxu0 }
 0x623   :  { %16664 = vst [vmem:[#allocation25_spill] sm:$0xff] %v15434_v30  ;;  %v15436_v31 = vpop.f32.mrf.mxu1 }
 0x624   :  { %16665 = vst [vmem:[#allocation26_spill] sm:$0xff] %v15436_v31  ;;  %v13024_v13 = vpop.f32.mrf.mxu0 }
 0x625   :  { %v13029_v52 = vpop.f32.mrf.mxu1 }
 0x627   :  { %v15438_v53 = vpop.f32.mrf.mxu0  ;;  %v15440_v26 = vpop.f32.mrf.mxu1 }
 0x628   :  { %16666 = vst [vmem:[#allocation27_spill] sm:$0xff] %v15438_v53  ;;  %16667 = vst [vmem:[#allocation28_spill] sm:$0xff] %v15440_v26 }
 0x629   :  { %v13034_v47 = vpop.f32.mrf.mxu0  ;;  %v13039_v20 = vpop.f32.mrf.mxu1 }
 0x62b   :  { %v15442_v27 = vpop.f32.mrf.mxu0 }
 0x62c   :  { %16668 = vst [vmem:[#allocation29_spill] sm:$0xff] %v15442_v27  ;;  %v15444_v63 = vpop.f32.mrf.mxu1 }
 0x62d   :  { %16669 = vst [vmem:[#allocation30_spill] sm:$0xff] %v15444_v63  ;;  %v13044_v4 = vpop.f32.mrf.mxu0 }
 0x62e   :  { %v13049_v16 = vpop.f32.mrf.mxu1 }
 0x630   :  { %v15446_v18 = vpop.f32.mrf.mxu0  ;;  %v15448_v43 = vpop.f32.mrf.mxu1 }
 0x631   :  { %16670 = vst [vmem:[#allocation3_spill] sm:$0xff] %v15446_v18  ;;  %16671 = vst [vmem:[#allocation44_spill] sm:$0xff] %v15448_v43  ;;  %v16684_v43 = vld [vmem:[#allocation11_spill] sm:$0xff] }
 0x632   :  { %v13054_v49 = vpop.f32.mrf.mxu0  ;;  %v13059_v11 = vpop.f32.mrf.mxu1 }
 0x634   :  { %v15450_v14 = vpop.f32.mrf.mxu0 }
 0x635   :  { %16672 = vst [vmem:[#allocation51_spill] sm:$0xff] %v15450_v14  ;;  %v15452_v54 = vpop.f32.mrf.mxu1 }
 0x636   :  { %16673 = vst [vmem:[#allocation2_spill] sm:$0xff] %v15452_v54  ;;  %v13064_v3 = vpop.f32.mrf.mxu0 }
 0x637   :  { %v13069_v9 = vpop.f32.mrf.mxu1 }
 0x638   :  { %v15454_v19 = vpop.f32.mrf.mxu0 }
 0x639   :  { %16674 = vst [vmem:[#allocation45_spill] sm:$0xff] %v15454_v19 }
 0x63a   :  { %v13074_v7 = vpop.f32.mrf.mxu0 }
 0x63c   :  { %v15456_v44 = vpop.f32.mrf.mxu0 }
 0x63d   :  { %v7788_v32 = vsel %vm2169_vm4, %v15456_v44, -inf }
 0x63e   :  { %7789 = vmax.xlane.f32.xlu0 %v7788_v32  ;;  %v13084_v0 = vpop.f32.mrf.mxu0 }
 0x640   :  { %v15460_v58 = vpop.f32.mrf.mxu0 }
 0x641   :  { %v7794_v51 = vsel %vm2169_vm4, %v15460_v58, -inf }
 0x642   :  { %7795 = vmax.xlane.f32.xlu0 %v7794_v51  ;;  %v13094_v13 = vpop.f32.mrf.mxu0 }
 0x644   :  { %v15464_v52 = vpop.f32.mrf.mxu0 }
 0x645   :  { %v7800_v19 = vsel %vm2169_vm4, %v15464_v52, -inf }
 0x646   :  { %v13104_v47 = vpop.f32.mrf.mxu0 }
 0x65f   :  { %v15466_v20 = vpop.f32.mrf.mxu0 }
 0x661   :  { %v13114_v4 = vpop.f32.mrf.mxu0 }
 0x667   :  { %v15468_v16 = vpop.f32.mrf.mxu0 }
 0x669   :  { %v13124_v49 = vpop.f32.mrf.mxu0 }
 0x66b   :  { %v15470_v11 = vpop.f32.mrf.mxu1 }
 0x66c   :  { %16675 = vst [vmem:[#allocation52_spill] sm:$0xff] %v15470_v11  ;;  %v16677_v11 = vld [vmem:[#allocation7_spill] sm:$0xff] }
 0x66d   :  { %v13079_v3 = vpop.f32.mrf.mxu1 }
 0x66f   :  { %v15472_v9 = vpop.f32.mrf.mxu1  ;;  %v15474_v7 = vpop.f32.mrf.mxu0 }
 0x670   :  { %v7791_v32 = vsel %vm2169_vm4, %v15472_v9, -inf }
 0x671   :  { %v13134_v0 = vpop.f32.mrf.mxu0  ;;  %7792 = vmax.xlane.f32.xlu1 %v7791_v32  ;;  %v13089_v51 = vpop.f32.mrf.mxu1 }
 0x673   :  { %v15478_v13 = vpop.f32.mrf.mxu1 }
 0x674   :  { %v7797_v47 = vsel %vm2169_vm4, %v15478_v13, -inf }
 0x675   :  { %7798 = vmax.xlane.f32.xlu0 %v7797_v47  ;;  %v13099_v4 = vpop.f32.mrf.mxu1  ;;  %v7806_v47 = vsel %vm2169_vm4, %v15466_v20, -inf }
 0x677   :  { %v15482_v49 = vpop.f32.mrf.mxu1  ;;  %v15484_v3 = vpop.f32.mrf.mxu0 }
 0x678   :  { %v7803_v14 = vsel %vm2169_vm4, %v15482_v49, -inf  ;;  %v7824_v60 = vsel %vm2169_vm4, %v15484_v3, -inf }
 0x679   :  { %v13144_v0 = vpop.f32.mrf.mxu0  ;;  %7801 = vmax.xlane.f32.xlu0 %v7800_v19  ;;  %7804 = vmax.xlane.f32.xlu1 %v7803_v14  ;;  %v13109_v32 = vpop.f32.mrf.mxu1  ;;  %v7812_v19 = vsel %vm2169_vm4, %v15468_v16, -inf }
 0x67b   :  { %v15490_v51 = vpop.f32.mrf.mxu1 }
 0x67c   :  { %v7809_v4 = vsel %vm2169_vm4, %v15490_v51, -inf }
 0x67d   :  { %7807 = vmax.xlane.f32.xlu0 %v7806_v47  ;;  %7810 = vmax.xlane.f32.xlu1 %v7809_v4  ;;  %v13119_v18 = vpop.f32.mrf.mxu1  ;;  %v7818_v47 = vsel %vm2169_vm4, %v15474_v7, -inf }
 0x67f   :  { %v15496_v27 = vpop.f32.mrf.mxu1  ;;  %v15498_v53 = vpop.f32.mrf.mxu0 }
 0x680   :  { %v7815_v14 = vsel %vm2169_vm4, %v15496_v27, -inf }
 0x681   :  { %v13154_v0 = vpop.f32.mrf.mxu0  ;;  %7813 = vmax.xlane.f32.xlu0 %v7812_v19  ;;  %7816 = vmax.xlane.f32.xlu1 %v7815_v14  ;;  %v13129_v32 = vpop.f32.mrf.mxu1 }
 0x682   :  { %v7830_v32 = vsel %vm2169_vm4, %v15498_v53, -inf }
 0x683   :  { %v15504_v30 = vpop.f32.mrf.mxu1 }
 0x684   :  { %v7821_v18 = vsel %vm2169_vm4, %v15504_v30, -inf }
 0x685   :  { %7819 = vmax.xlane.f32.xlu0 %v7818_v47  ;;  %7822 = vmax.xlane.f32.xlu1 %v7821_v18  ;;  %v13139_v4 = vpop.f32.mrf.mxu1  ;;  %v15522_v18 = vpop.permute.xlu0 %8426 }
 0x687   :  { %v15510_v22 = vpop.f32.mrf.mxu1 }
 0x688   :  { %v7827_v19 = vsel %vm2169_vm4, %v15510_v22, -inf }
 0x689   :  { %7825 = vmax.xlane.f32.xlu0 %v7824_v60  ;;  %7828 = vmax.xlane.f32.xlu1 %v7827_v19  ;;  %v13149_v14 = vpop.f32.mrf.mxu1  ;;  %v15524_v4 = vpop.permute.xlu0 %8580  ;;  %v16678_v60 = vld [vmem:[#allocation8_spill] sm:$0xff] }
 0x68a   :  { %16676 = vst [vmem:[#allocation4_spill] sm:$0xff] %v15524_v4  ;;  %v16680_v14 = vld [vmem:[#allocation9_spill] sm:$0xff] }
 0x68b   :  { %v15516_v0 = vpop.f32.mrf.mxu1 }
 0x68d   :  { %7831 = vmax.xlane.f32.xlu0 %v7830_v32  ;;  %v13159_v47 = vpop.f32.mrf.mxu1  ;;  %v15530_v19 = vpop.permute.xlu0 %8734  ;;  %v16682_v32 = vld [vmem:[#allocation10_spill] sm:$0xff] }
 0x68e   :  { %16679 = vst [vmem:[#allocation46_spill] sm:$0xff] %v15530_v19 }
 0x691   :  { %v15534_v54 = vpop.permute.xlu0 %8888 }
 0x692   :  { %16681 = vst [vmem:[#allocation53_spill] sm:$0xff] %v15534_v54 }
 0x695   :  { %v15538_v47 = vpop.permute.xlu0 %9042 }
 0x696   :  { %16683 = vst [vmem:[#allocation6_spill] sm:$0xff] %v15538_v47 }
 0x699   :  { %v15542_v63 = vpop.permute.xlu0 %9198 }
 0x69a   :  { %9588 = vrot.lane.b32.xlu1 %v16677_v11, %s13670_s16  ;;  %16685 = vst [vmem:[#allocation47_spill] sm:$0xff] %v15542_v63  ;;  %v15544_v11 = vpop.permute.xlu1 %8195 }
 0x69e   :  { %9586 = vrot.lane.b32.xlu1 %v16678_v60, %s13670_s16  ;;  %v15546_v60 = vpop.permute.xlu0 %9196  ;;  %v15548_v26 = vpop.permute.xlu1 %8272 }
 0x69f   :  { %16686 = vst [vmem:[#allocation48_spill] sm:$0xff] %v15546_v60 }
 0x6a2   :  { %v15550_v31 = vpop.permute.xlu0 %9354 }
 0x6a3   :  { %9510 = vrot.lane.b32.xlu0 %v16680_v14, %s13670_s16  ;;  %16687 = vst [vmem:[#allocation49_spill] sm:$0xff] %v15550_v31  ;;  %v15552_v14 = vpop.permute.xlu1 %8349 }
 0x6a6   :  { %v15556_v5 = vpop.permute.xlu0 %9352 }
 0x6a7   :  { %9508 = vrot.lane.b32.xlu0 %v16682_v32, %s13670_s16  ;;  %v7833_v32 = vsel %vm2169_vm4, %v15516_v0, -inf  ;;  %16688 = vst [vmem:[#allocation50_spill] sm:$0xff] %v15556_v5  ;;  %v15558_v38 = vpop.permute.xlu1 %8503 }
 0x6a8   :  { %16689 = vst [vmem:[#allocation54_spill] sm:$0xff] %v15558_v38 }
 0x6ab   :  { %9666 = vrot.lane.b32.xlu0 %v16684_v43, %s13670_s16  ;;  %v15561_v60 = vpop.permute.xlu1 %8657 }
 0x6ac   :  { %16690 = vst [vmem:[#allocation55_spill] sm:$0xff] %v15561_v60 }
 0x6af   :  { %v15564_v47 = vpop.permute.xlu1 %8811 }
 0x6b0   :  { %16691 = vst [vmem:[#allocation56_spill] sm:$0xff] %v15564_v47 }
 0x6b3   :  { %v15568_v5 = vpop.permute.xlu1 %8965 }
 0x6b4   :  { %16693 = vst [vmem:[#allocation57_spill] sm:$0xff] %v15568_v5 }
 0x6c2   :  { %7834 = vmax.xlane.f32.xlu1 %v7833_v32  ;;  %v16692_v32 = vld [vmem:[#allocation18_spill] sm:$0xff] }
 0x6c7   :  { %v7790_v43 = vpop.xlane.xlu0 %7789 }
 0x6c8   :  { %v7836_v23 = vsub.f32 %v15456_v44, %v7790_v43 }
 0x6ca   :  { %v7852_v35 = vmul.f32 1.442695, %v7836_v23 }
 0x6cb   :  { %v7796_v8 = vpop.xlane.xlu0 %7795 }
 0x6cc   :  { %13537 = vpow2.f32 %v7852_v35  ;;  %v7838_v31 = vsub.f32 %v15460_v58, %v7796_v8  ;;  %v15576_v35 = vpop.permute.xlu1 %9119 }
 0x6cd   :  { %16694 = vst [vmem:[#allocation7_spill] sm:$0xff] %v15576_v35 }
 0x6ce   :  { %v7856_v63 = vmul.f32 1.442695, %v7838_v31 }
 0x6d0   :  { %13539 = vpow2.f32 %v7856_v63  ;;  %v15580_v31 = vpop.permute.xlu1 %9276 }
 0x6d1   :  { %16695 = vst [vmem:[#allocation8_spill] sm:$0xff] %v15580_v31 }
 0x6d3   :  { %9744 = vrot.lane.b32.xlu1 %v16692_v32, %s13670_s16 }
 0x6d4   :  { %v15582_v63 = vpop.permute.xlu1 %9274 }
 0x6d5   :  { %16696 = vst [vmem:[#allocation9_spill] sm:$0xff] %v15582_v63 }
 0x6d8   :  { %v15584_v58 = vpop.permute.xlu1 %9432 }
 0x6d9   :  { %v15570_v54 = vpop.eup %13537  ;;  %16697 = vst [vmem:[#allocation10_spill] sm:$0xff] %v15584_v58 }
 0x6da   :  { %v7884_v23 = vsel %vm2169_vm4, %v15570_v54, 0.0 }
 0x6db   :  { %7885 = vadd.xlane.f32.xlu0 %v7884_v23 }
 0x6dc   :  { %v15586_v43 = vpop.permute.xlu1 %9430 }
 0x6dd   :  { %v15574_v44 = vpop.eup %13539  ;;  %16698 = vst [vmem:[#allocation11_spill] sm:$0xff] %v15586_v43 }
 0x6de   :  { %v7890_v8 = vsel %vm2169_vm4, %v15574_v44, 0.0 }
 0x6df   :  { %7891 = vadd.xlane.f32.xlu0 %v7890_v8 }
 0x6fa   :  { %v7793_v32 = vpop.xlane.xlu1 %7792 }
 0x6fb   :  { %v7837_v5 = vsub.f32 %v15472_v9, %v7793_v32 }
 0x6fd   :  { %v7854_v23 = vmul.f32 1.442695, %v7837_v5 }
 0x6fe   :  { %v7799_v47 = vpop.xlane.xlu0 %7798 }
 0x6ff   :  { %13541 = vpow2.f32 %v7854_v23  ;;  %v7839_v35 = vsub.f32 %v15478_v13, %v7799_v47 }
 0x701   :  { %v7858_v19 = vmul.f32 1.442695, %v7839_v35 }
 0x702   :  { %v7802_v60 = vpop.xlane.xlu0 %7801  ;;  %v7805_v4 = vpop.xlane.xlu1 %7804 }
 0x703   :  { %13543 = vpow2.f32 %v7858_v19  ;;  %v7840_v8 = vsub.f32 %v15464_v52, %v7802_v60  ;;  %v7841_v63 = vsub.f32 %v15482_v49, %v7805_v4 }
 0x705   :  { %v7860_v31 = vmul.f32 1.442695, %v7840_v8  ;;  %v7862_v58 = vmul.f32 1.442695, %v7841_v63 }
 0x706   :  { %v7808_v38 = vpop.xlane.xlu0 %7807  ;;  %v7811_v43 = vpop.xlane.xlu1 %7810 }
 0x707   :  { %13545 = vpow2.f32 %v7860_v31  ;;  %v7842_v9 = vsub.f32 %v15466_v20, %v7808_v38  ;;  %v7843_v5 = vsub.f32 %v15490_v51, %v7811_v43 }
 0x708   :  { %13547 = vpow2.f32 %v7862_v58 }
 0x709   :  { %v7864_v32 = vmul.f32 1.442695, %v7842_v9  ;;  %v7866_v13 = vmul.f32 1.442695, %v7843_v5 }
 0x70a   :  { %v7814_v47 = vpop.xlane.xlu0 %7813  ;;  %v7817_v35 = vpop.xlane.xlu1 %7816 }
 0x70b   :  { %13549 = vpow2.f32 %v7864_v32  ;;  %v7844_v19 = vsub.f32 %v15468_v16, %v7814_v47  ;;  %v7845_v52 = vsub.f32 %v15496_v27, %v7817_v35 }
 0x70c   :  { %v15596_v49 = vpop.eup %13541  ;;  %13551 = vpow2.f32 %v7866_v13 }
 0x70d   :  { %v7868_v4 = vmul.f32 1.442695, %v7844_v19  ;;  %v7870_v60 = vmul.f32 1.442695, %v7845_v52  ;;  %v7887_v38 = vsel %vm2169_vm4, %v15596_v49, 0.0 }
 0x70e   :  { %v7820_v20 = vpop.xlane.xlu0 %7819  ;;  %v7823_v51 = vpop.xlane.xlu1 %7822  ;;  %7888 = vadd.xlane.f32.xlu1 %v7887_v38 }
 0x70f   :  { %13553 = vpow2.f32 %v7868_v4  ;;  %v7846_v31 = vsub.f32 %v15474_v7, %v7820_v20  ;;  %v7847_v63 = vsub.f32 %v15504_v30, %v7823_v51 }
 0x710   :  { %v15602_v58 = vpop.eup %13543  ;;  %13555 = vpow2.f32 %v7870_v60 }
 0x711   :  { %v7872_v27 = vmul.f32 1.442695, %v7846_v31  ;;  %v7874_v16 = vmul.f32 1.442695, %v7847_v63  ;;  %v7893_v43 = vsel %vm2169_vm4, %v15602_v58, 0.0 }
 0x712   :  { %v7826_v23 = vpop.xlane.xlu0 %7825  ;;  %v7829_v8 = vpop.xlane.xlu1 %7828  ;;  %7894 = vadd.xlane.f32.xlu1 %v7893_v43 }
 0x713   :  { %13557 = vpow2.f32 %v7872_v27  ;;  %v7848_v9 = vsub.f32 %v15484_v3, %v7826_v23  ;;  %v7849_v5 = vsub.f32 %v15510_v22, %v7829_v8 }
 0x714   :  { %v15608_v32 = vpop.eup %13545  ;;  %13559 = vpow2.f32 %v7874_v16 }
 0x715   :  { %v15610_v30 = vpop.eup %13547  ;;  %v7876_v7 = vmul.f32 1.442695, %v7848_v9  ;;  %v7878_v13 = vmul.f32 1.442695, %v7849_v5  ;;  %v7896_v47 = vsel %vm2169_vm4, %v15608_v32, 0.0 }
 0x716   :  { %7897 = vadd.xlane.f32.xlu0 %v7896_v47  ;;  %v7832_v35 = vpop.xlane.xlu0 %7831  ;;  %v7899_v19 = vsel %vm2169_vm4, %v15610_v30, 0.0  ;;  %v15657_v47 = vpop.permute.xlu1 %9588 }
 0x717   :  { %13561 = vpow2.f32 %v7876_v7  ;;  %v7850_v3 = vsub.f32 %v15498_v53, %v7832_v35  ;;  %7900 = vadd.xlane.f32.xlu1 %v7899_v19 }
 0x718   :  { %v15617_v22 = vpop.eup %13549  ;;  %13563 = vpow2.f32 %v7878_v13 }
 0x719   :  { %v15619_v52 = vpop.eup %13551  ;;  %v7880_v4 = vmul.f32 1.442695, %v7850_v3  ;;  %v7902_v60 = vsel %vm2169_vm4, %v15617_v22, 0.0 }
 0x71a   :  { %7903 = vadd.xlane.f32.xlu0 %v7902_v60  ;;  %v7905_v38 = vsel %vm2169_vm4, %v15619_v52, 0.0  ;;  %v15661_v35 = vpop.permute.xlu1 %9586  ;;  %v16701_v60 = vld [vmem:[#allocation55_spill] sm:$0xff] }
 0x71b   :  { %13565 = vpow2.f32 %v7880_v4  ;;  %7906 = vadd.xlane.f32.xlu1 %v7905_v38  ;;  %v16700_v4 = vld [vmem:[#allocation4_spill] sm:$0xff] }
 0x71c   :  { %v15625_v20 = vpop.eup %13553 }
 0x71d   :  { %v15627_v51 = vpop.eup %13555  ;;  %v7908_v53 = vsel %vm2169_vm4, %v15625_v20, 0.0 }
 0x71e   :  { %7909 = vadd.xlane.f32.xlu0 %v7908_v53  ;;  %v7911_v31 = vsel %vm2169_vm4, %v15627_v51, 0.0 }
 0x71f   :  { %7912 = vadd.xlane.f32.xlu1 %v7911_v31  ;;  %v16702_v31 = vld [vmem:[#allocation46_spill] sm:$0xff] }
 0x720   :  { %v15633_v63 = vpop.eup %13557 }
 0x721   :  { %v15635_v27 = vpop.eup %13559  ;;  %v7914_v16 = vsel %vm2169_vm4, %v15633_v63, 0.0 }
 0x722   :  { %7915 = vadd.xlane.f32.xlu0 %v7914_v16  ;;  %v7917_v43 = vsel %vm2169_vm4, %v15635_v27, 0.0 }
 0x723   :  { %7918 = vadd.xlane.f32.xlu1 %v7917_v43  ;;  %v16703_v43 = vld [vmem:[#allocation56_spill] sm:$0xff] }
 0x724   :  { %v15641_v23 = vpop.eup %13561 }
 0x725   :  { %v15643_v8 = vpop.eup %13563  ;;  %v7920_v9 = vsel %vm2169_vm4, %v15641_v23, 0.0 }
 0x726   :  { %7921 = vadd.xlane.f32.xlu0 %v7920_v9  ;;  %v7923_v5 = vsel %vm2169_vm4, %v15643_v8, 0.0 }
 0x727   :  { %7924 = vadd.xlane.f32.xlu1 %v7923_v5  ;;  %v16704_v5 = vld [vmem:[#allocation53_spill] sm:$0xff] }
 0x728   :  { %v15649_v7 = vpop.eup %13565 }
 0x729   :  { %v7926_v13 = vsel %vm2169_vm4, %v15649_v7, 0.0 }
 0x72b   :  { %7927 = vadd.xlane.f32.xlu1 %v7926_v13 }
 0x73c   :  { %9742 = vrot.lane.b32.xlu1 %v14408_v34, %s13670_s16 }
 0x740   :  { %9900 = vrot.lane.b32.xlu1 %v14414_v46, %s13670_s16  ;;  %v15670_v46 = vpop.permute.xlu0 %9510 }
 0x744   :  { %9898 = vrot.lane.b32.xlu1 %v14535_v28, %s13670_s16  ;;  %v15676_v28 = vpop.permute.xlu0 %9508 }
 0x748   :  { %10056 = vrot.lane.b32.xlu1 %v14553_v50, %s13670_s16 }
 0x74b   :  { %v7835_v19 = vpop.xlane.xlu1 %7834 }
 0x74c   :  { %10054 = vrot.lane.b32.xlu1 %v14574_v24, %s13670_s16  ;;  %v7851_v3 = vsub.f32 %v15516_v0, %v7835_v19  ;;  %v16705_v19 = vld [vmem:[#allocation57_spill] sm:$0xff] }
 0x74e   :  { %v7882_v34 = vmul.f32 1.442695, %v7851_v3  ;;  %v16706_v3 = vld [vmem:[#allocation6_spill] sm:$0xff] }
 0x750   :  { %13567 = vpow2.f32 %v7882_v34  ;;  %10212 = vrot.lane.b32.xlu1 %v14594_v57, %s13670_s16  ;;  %v15684_v57 = vpop.permute.xlu0 %9666 }
 0x754   :  { %10210 = vrot.lane.b32.xlu1 %v14607_v10, %s13670_s16 }
 0x758   :  { %10368 = vrot.lane.b32.xlu1 %v14615_v48, %s13670_s16 }
 0x75c   :  { %10366 = vrot.lane.b32.xlu1 %v14623_v61, %s13670_s16 }
 0x75d   :  { %v15680_v24 = vpop.eup %13567 }
 0x75e   :  { %v7929_v50 = vsel %vm2169_vm4, %v15680_v24, 0.0 }
 0x75f   :  { %7930 = vadd.xlane.f32.xlu0 %v7929_v50  ;;  %v16707_v50 = vld [vmem:[#allocation7_spill] sm:$0xff] }
 0x760   :  { %10697 = vrot.lane.b32.xlu1 %v14631_v59, %s13670_s16 }
 0x764   :  { %v7886_v10 = vpop.xlane.xlu0 %7885  ;;  %10851 = vrot.lane.b32.xlu1 %v14638_v62, %s13670_s16 }
 0x765   :  { %13569 = vrcp.f32 %v7886_v10  ;;  %v16709_v10 = vld [vmem:[#allocation48_spill] sm:$0xff] }
 0x768   :  { %v7892_v48 = vpop.xlane.xlu0 %7891  ;;  %10928 = vrot.lane.b32.xlu1 %v14648_v25, %s13670_s16 }
 0x769   :  { %13571 = vrcp.f32 %v7892_v48  ;;  %v16710_v48 = vld [vmem:[#allocation49_spill] sm:$0xff] }
 0x76c   :  { %11005 = vrot.lane.b32.xlu1 %v14654_v17, %s13670_s16 }
 0x770   :  { %11159 = vrot.lane.b32.xlu1 %v14661_v55, %s13670_s16 }
 0x772   :  { %v13570_v61 = vpop.eup %13569 }
 0x773   :  { %v7948_v0 = vmul.f32 %v13570_v61, %v15570_v54 }
 0x774   :  { %11313 = vrot.lane.b32.xlu1 %v14671_v2, %s13670_s16  ;;  %v15728_v2 = vpop.permute.xlu1 %9744 }
 0x775   :  { %13163 = vmatmul.mubr.msk.f32.vlgmr.msra.gmra.mxu0 %vm2346_vm5, %v7948_v0  ;;  %9664 = vrot.lane.b32.xlu0 %v14422_v40, %s13670_s16 }
 0x776   :  { %v13572_v59 = vpop.eup %13571  ;;  %13171 = vmatpush3.msk.msra.mxu0 %vm2350_vm3, %v15520_v45  ;;  %13172 = vmatprep.mubr.msk.f32.mxu0 %vm13667_vm1, %v16579_v21 }
 0x777   :  { %13180 = vmatprep.subr.mxu0 %v16579_v21  ;;  %v7950_v62 = vmul.f32 %v13572_v59, %v15574_v44 }
 0x779   :  { %13173 = vmatmul.mubr.msk.f32.vlgmr.msra.gmra.mxu0 %vm2346_vm5, %v7950_v62  ;;  %9822 = vrot.lane.b32.xlu0 %v14428_v37, %s13670_s16 }
 0x77a   :  { %13181 = vmatpush3.msk.msra.mxu0 %vm2350_vm3, %v15548_v26  ;;  %13182 = vmatprep.mubr.msk.f32.mxu0 %vm13667_vm1, %v16579_v21 }
 0x77b   :  { %13190 = vmatprep.subr.mxu0 %v16579_v21 }
 0x77d   :  { %9820 = vrot.lane.b32.xlu0 %v14436_v42, %s13670_s16 }
 0x781   :  { %9978 = vrot.lane.b32.xlu0 %v16629_v29, %s13670_s16 }
 0x785   :  { %9976 = vrot.lane.b32.xlu0 %v16630_v15, %s13670_s16 }
 0x789   :  { %10134 = vrot.lane.b32.xlu0 %v16631_v39, %s13670_s16 }
 0x78d   :  { %10132 = vrot.lane.b32.xlu0 %v16632_v56, %s13670_s16 }
 0x791   :  { %10290 = vrot.lane.b32.xlu0 %v16633_v6, %s13670_s16 }
 0x795   :  { %10288 = vrot.lane.b32.xlu0 %v16634_v33, %s13670_s16 }
 0x797   :  { %v7889_v40 = vpop.xlane.xlu1 %7888 }
 0x798   :  { %13573 = vrcp.f32 %v7889_v40 }
 0x799   :  { %10620 = vrot.lane.b32.xlu0 %v16635_v12, %s13670_s16 }
 0x79b   :  { %v7895_v37 = vpop.xlane.xlu1 %7894 }
 0x79c   :  { %13575 = vrcp.f32 %v7895_v37 }
 0x79d   :  { %10774 = vrot.lane.b32.xlu0 %v16636_v36, %s13670_s16 }
 0x79f   :  { %v7898_v42 = vpop.xlane.xlu0 %7897 }
 0x7a0   :  { %13577 = vrcp.f32 %v7898_v42  ;;  %v7901_v25 = vpop.xlane.xlu1 %7900 }
 0x7a1   :  { %13579 = vrcp.f32 %v7901_v25  ;;  %11082 = vrot.lane.b32.xlu0 %v16637_v41, %s13670_s16 }
 0x7a3   :  { %v7904_v17 = vpop.xlane.xlu0 %7903 }
 0x7a4   :  { %13581 = vrcp.f32 %v7904_v17  ;;  %v7907_v55 = vpop.xlane.xlu1 %7906  ;;  %v16712_v17 = vld [vmem:[#allocation8_spill] sm:$0xff] }
 0x7a5   :  { %v13574_v29 = vpop.eup %13573  ;;  %13583 = vrcp.f32 %v7907_v55  ;;  %11236 = vrot.lane.b32.xlu0 %v16638_v1, %s13670_s16 }
 0x7a6   :  { %v7949_v15 = vmul.f32 %v13574_v29, %v15596_v49  ;;  %v16699_v49 = vld [vmem:[#allocation54_spill] sm:$0xff] }
 0x7a7   :  { %v7910_v39 = vpop.xlane.xlu0 %7909 }
 0x7a8   :  { %13585 = vrcp.f32 %v7910_v39  ;;  %v7913_v56 = vpop.xlane.xlu1 %7912  ;;  %13168 = vmatmul.mubr.msk.f32.vlgmr.msra.gmra.mxu1 %vm2346_vm5, %v7949_v15  ;;  %v16713_v15 = vld [vmem:[#allocation9_spill] sm:$0xff] }
 0x7a9   :  { %v13576_v6 = vpop.eup %13575  ;;  %13587 = vrcp.f32 %v7913_v56  ;;  %13176 = vmatpush3.msk.msra.mxu1 %vm2350_vm3, %v15544_v11  ;;  %13177 = vmatprep.mubr.msk.f32.mxu1 %vm13667_vm1, %v16579_v21 }
 0x7aa   :  { %13185 = vmatprep.subr.mxu1 %v16579_v21  ;;  %v7951_v33 = vmul.f32 %v13576_v6, %v15602_v58  ;;  %v16715_v6 = vld [vmem:[#allocation11_spill] sm:$0xff] }
 0x7ab   :  { %v7916_v12 = vpop.xlane.xlu0 %7915 }
 0x7ac   :  { %13589 = vrcp.f32 %v7916_v12  ;;  %v7919_v36 = vpop.xlane.xlu1 %7918  ;;  %13178 = vmatmul.mubr.msk.f32.vlgmr.msra.gmra.mxu1 %vm2346_vm5, %v7951_v33 }
 0x7ad   :  { %v13578_v41 = vpop.eup %13577  ;;  %13591 = vrcp.f32 %v7919_v36  ;;  %13186 = vmatpush3.msk.msra.mxu1 %vm2350_vm3, %v15552_v14  ;;  %13187 = vmatprep.mubr.msk.f32.mxu1 %vm13667_vm1, %v16579_v21 }
 0x7ae   :  { %v13580_v1 = vpop.eup %13579  ;;  %13195 = vmatprep.subr.mxu1 %v16579_v21  ;;  %v7952_v45 = vmul.f32 %v13578_v41, %v15608_v32 }
 0x7af   :  { %v7922_v26 = vpop.xlane.xlu0 %7921  ;;  %v7953_v54 = vmul.f32 %v13580_v1, %v15610_v30 }
 0x7b0   :  { %13593 = vrcp.f32 %v7922_v26  ;;  %v7925_v11 = vpop.xlane.xlu1 %7924  ;;  %13183 = vmatmul.mubr.msk.f32.vlgmr.msra.gmra.mxu0 %vm2346_vm5, %v7952_v45 }
 0x7b1   :  { %v13582_v44 = vpop.eup %13581  ;;  %13595 = vrcp.f32 %v7925_v11  ;;  %13188 = vmatmul.mubr.msk.f32.vlgmr.msra.gmra.mxu1 %vm2346_vm5, %v7953_v54  ;;  %13191 = vmatpush3.msk.msra.mxu0 %vm2350_vm3, %v15522_v18 }
 0x7b2   :  { %v13584_v14 = vpop.eup %13583  ;;  %13196 = vmatpush3.msk.msra.mxu1 %vm2350_vm3, %v16699_v49  ;;  %13192 = vmatprep.mubr.msk.f32.mxu0 %vm13667_vm1, %v16579_v21  ;;  %v7954_v58 = vmul.f32 %v13582_v44, %v15617_v22 }
 0x7b3   :  { %13197 = vmatprep.mubr.msk.f32.mxu1 %vm13667_vm1, %v16579_v21  ;;  %13200 = vmatprep.subr.mxu0 %v16579_v21  ;;  %v7955_v32 = vmul.f32 %v13584_v14, %v15619_v52 }
 0x7b4   :  { %13205 = vmatprep.subr.mxu1 %v16579_v21  ;;  %v7928_v30 = vpop.xlane.xlu1 %7927  ;;  %13193 = vmatmul.mubr.msk.f32.vlgmr.msra.gmra.mxu0 %vm2346_vm5, %v7954_v58 }
 0x7b5   :  { %v13586_v18 = vpop.eup %13585  ;;  %13597 = vrcp.f32 %v7928_v30  ;;  %13198 = vmatmul.mubr.msk.f32.vlgmr.msra.gmra.mxu1 %vm2346_vm5, %v7955_v32  ;;  %13201 = vmatpush3.msk.msra.mxu0 %vm2350_vm3, %v16700_v4 }
 0x7b6   :  { %v13588_v22 = vpop.eup %13587  ;;  %13206 = vmatpush3.msk.msra.mxu1 %vm2350_vm3, %v16701_v60  ;;  %13202 = vmatprep.mubr.msk.f32.mxu0 %vm13667_vm1, %v16579_v21  ;;  %v7956_v52 = vmul.f32 %v13586_v18, %v15625_v20 }
 0x7b7   :  { %13207 = vmatprep.mubr.msk.f32.mxu1 %vm13667_vm1, %v16579_v21  ;;  %13210 = vmatprep.subr.mxu0 %v16579_v21  ;;  %v7957_v38 = vmul.f32 %v13588_v22, %v15627_v51 }
 0x7b8   :  { %13215 = vmatprep.subr.mxu1 %v16579_v21  ;;  %13203 = vmatmul.mubr.msk.f32.vlgmr.msra.gmra.mxu0 %vm2346_vm5, %v7956_v52  ;;  %v9743_v61 = vpop.permute.xlu1 %9742 }
 0x7b9   :  { %v13590_v53 = vpop.eup %13589  ;;  %13208 = vmatmul.mubr.msk.f32.vlgmr.msra.gmra.mxu1 %vm2346_vm5, %v7957_v38  ;;  %13211 = vmatpush3.msk.msra.mxu0 %vm2350_vm3, %v16702_v31 }
 0x7ba   :  { %v13592_v16 = vpop.eup %13591  ;;  %13216 = vmatpush3.msk.msra.mxu1 %vm2350_vm3, %v16703_v43  ;;  %13212 = vmatprep.mubr.msk.f32.mxu0 %vm13667_vm1, %v16579_v21  ;;  %v7958_v20 = vmul.f32 %v13590_v53, %v15633_v63 }
 0x7bb   :  { %13217 = vmatprep.mubr.msk.f32.mxu1 %vm13667_vm1, %v16579_v21  ;;  %13220 = vmatprep.subr.mxu0 %v16579_v21  ;;  %v7959_v51 = vmul.f32 %v13592_v16, %v15635_v27 }
 0x7bc   :  { %13225 = vmatprep.subr.mxu1 %v16579_v21  ;;  %13213 = vmatmul.mubr.msk.f32.vlgmr.msra.gmra.mxu0 %vm2346_vm5, %v7958_v20  ;;  %v9901_v59 = vpop.permute.xlu1 %9900 }
 0x7bd   :  { %v13594_v9 = vpop.eup %13593  ;;  %13218 = vmatmul.mubr.msk.f32.vlgmr.msra.gmra.mxu1 %vm2346_vm5, %v7959_v51  ;;  %13221 = vmatpush3.msk.msra.mxu0 %vm2350_vm3, %v16704_v5 }
 0x7be   :  { %v13596_v13 = vpop.eup %13595  ;;  %13226 = vmatpush3.msk.msra.mxu1 %vm2350_vm3, %v16705_v19  ;;  %13222 = vmatprep.mubr.msk.f32.mxu0 %vm13667_vm1, %v16579_v21  ;;  %v7960_v63 = vmul.f32 %v13594_v9, %v15641_v23 }
 0x7bf   :  { %13227 = vmatprep.mubr.msk.f32.mxu1 %vm13667_vm1, %v16579_v21  ;;  %13230 = vmatprep.subr.mxu0 %v16579_v21  ;;  %v7961_v27 = vmul.f32 %v13596_v13, %v15643_v8  ;;  %v16708_v8 = vld [vmem:[#allocation47_spill] sm:$0xff] }
 0x7c0   :  { %13235 = vmatprep.subr.mxu1 %v16579_v21  ;;  %13223 = vmatmul.mubr.msk.f32.vlgmr.msra.gmra.mxu0 %vm2346_vm5, %v7960_v63  ;;  %v9899_v62 = vpop.permute.xlu1 %9898 }
 0x7c1   :  { %13228 = vmatmul.mubr.msk.f32.vlgmr.msra.gmra.mxu1 %vm2346_vm5, %v7961_v27  ;;  %13231 = vmatpush3.msk.msra.mxu0 %vm2350_vm3, %v16706_v3 }
 0x7c2   :  { %v13598_v34 = vpop.eup %13597  ;;  %13236 = vmatpush3.msk.msra.mxu1 %vm2350_vm3, %v16707_v50  ;;  %13232 = vmatprep.mubr.msk.f32.mxu0 %vm13667_vm1, %v16579_v21 }
 0x7c3   :  { %13240 = vmatprep.subr.mxu0 %v16579_v21  ;;  %v7962_v23 = vmul.f32 %v13598_v34, %v15649_v7  ;;  %13237 = vmatprep.mubr.msk.f32.mxu1 %vm13667_vm1, %v16579_v21  ;;  %v16711_v7 = vld [vmem:[#allocation50_spill] sm:$0xff] }
 0x7c4   :  { %13245 = vmatprep.subr.mxu1 %v16579_v21  ;;  %v10057_v40 = vpop.permute.xlu1 %10056 }
 0x7c5   :  { %13233 = vmatmul.mubr.msk.f32.vlgmr.msra.gmra.mxu0 %vm2346_vm5, %v7962_v23 }
 0x7c6   :  { %13241 = vmatpush3.xpose.msk.msra.mxu0 %vm968_vm2, %v16708_v8  ;;  %13242 = vmatprep.mubr.msk.f32.mxu0 %vm13667_vm1, %v16579_v21 }
 0x7c7   :  { %13250 = vmatprep.subr.mxu0 %v16579_v21 }
 0x7c8   :  { %v10055_v55 = vpop.permute.xlu1 %10054 }
 0x7c9   :  { %13243 = vmatmul.mubr.msk.f32.vlgmr.msra.gmra.mxu0 %vm968_vm2, %v16709_v10 }
 0x7ca   :  { %13251 = vmatpush3.xpose.msk.msra.mxu0 %vm968_vm2, %v16710_v48  ;;  %13252 = vmatprep.mubr.msk.f32.mxu0 %vm13667_vm1, %v16579_v21 }
 0x7cb   :  { %13260 = vmatprep.subr.mxu0 %v16579_v21 }
 0x7cc   :  { %v10213_v56 = vpop.permute.xlu1 %10212 }
 0x7cd   :  { %13253 = vmatmul.mubr.msk.f32.vlgmr.msra.gmra.mxu0 %vm968_vm2, %v16711_v7 }
 0x7ce   :  { %13261 = vmatpush3.xpose.msk.msra.mxu0 %vm968_vm2, %v15670_v46  ;;  %13262 = vmatprep.mubr.msk.f32.mxu0 %vm13667_vm1, %v16579_v21 }
 0x7cf   :  { %13270 = vmatprep.subr.mxu0 %v16579_v21 }
 0x7d1   :  { %13263 = vmatmul.mubr.msk.f32.vlgmr.msra.gmra.mxu0 %vm968_vm2, %v15676_v28 }
 0x7d2   :  { %13271 = vmatpush3.xpose.msk.msra.mxu0 %vm968_vm2, %v15684_v57  ;;  %13272 = vmatprep.mubr.msk.f32.mxu0 %vm13667_vm1, %v16579_v21 }
 0x7d3   :  { %13280 = vmatprep.subr.mxu0 %v16579_v21 }
 0x7e8   :  { %v7931_v0 = vpop.xlane.xlu0 %7930 }
 0x7e9   :  { %13599 = vrcp.f32 %v7931_v0 }
 0x7ec   :  { %v9665_v46 = vpop.permute.xlu0 %9664 }
 0x7ed   :  { %13273 = vmatmul.mubr.msk.f32.vlgmr.msra.gmra.mxu0 %vm968_vm2, %v9665_v46 }
 0x7ee   :  { %13282 = vmatprep.mubr.msk.f32.mxu0 %vm13667_vm1, %v16579_v21 }
 0x7f0   :  { %v9823_v28 = vpop.permute.xlu0 %9822 }
 0x7f1   :  { %13281 = vmatpush3.xpose.msk.msra.mxu0 %vm968_vm2, %v9823_v28 }
 0x7f2   :  { %13290 = vmatprep.subr.mxu0 %v16579_v21 }
 0x7f4   :  { %v9821_v57 = vpop.permute.xlu0 %9820 }
 0x7f5   :  { %13283 = vmatmul.mubr.msk.f32.vlgmr.msra.gmra.mxu0 %vm968_vm2, %v9821_v57 }
 0x7f6   :  { %v13600_v37 = vpop.eup %13599  ;;  %13292 = vmatprep.mubr.msk.f32.mxu0 %vm13667_vm1, %v16579_v21 }
 0x7f7   :  { %v7963_v42 = vmul.f32 %v13600_v37, %v15680_v24  ;;  %v16714_v24 = vld [vmem:[#allocation10_spill] sm:$0xff] }
 0x7f8   :  { %v9979_v25 = vpop.permute.xlu0 %9978 }
 0x7f9   :  { %13238 = vmatmul.mubr.msk.f32.vlgmr.msra.gmra.mxu1 %vm2346_vm5, %v7963_v42  ;;  %13291 = vmatpush3.xpose.msk.msra.mxu0 %vm968_vm2, %v9979_v25 }
 0x7fa   :  { %13246 = vmatpush3.xpose.msk.msra.mxu1 %vm968_vm2, %v16712_v17  ;;  %13247 = vmatprep.mubr.msk.f32.mxu1 %vm13667_vm1, %v16579_v21 }
 0x7fb   :  { %13255 = vmatprep.subr.mxu1 %v16579_v21  ;;  %13300 = vmatprep.subr.mxu0 %v16579_v21 }
 0x7fc   :  { %v9977_v29 = vpop.permute.xlu0 %9976 }
 0x7fd   :  { %13248 = vmatmul.mubr.msk.f32.vlgmr.msra.gmra.mxu1 %vm968_vm2, %v16713_v15  ;;  %13293 = vmatmul.mubr.msk.f32.vlgmr.msra.gmra.mxu0 %vm968_vm2, %v9977_v29 }
 0x7fe   :  { %13256 = vmatpush3.xpose.msk.msra.mxu1 %vm968_vm2, %v16714_v24  ;;  %13257 = vmatprep.mubr.msk.f32.mxu1 %vm13667_vm1, %v16579_v21 }
 0x7ff   :  { %13265 = vmatprep.subr.mxu1 %v16579_v21  ;;  %13302 = vmatprep.mubr.msk.f32.mxu0 %vm13667_vm1, %v16579_v21 }
 0x800   :  { %v10135_v39 = vpop.permute.xlu0 %10134 }
 0x801   :  { %13258 = vmatmul.mubr.msk.f32.vlgmr.msra.gmra.mxu1 %vm968_vm2, %v16715_v6  ;;  %13301 = vmatpush3.xpose.msk.msra.mxu0 %vm968_vm2, %v10135_v39 }
 0x802   :  { %13266 = vmatpush3.xpose.msk.msra.mxu1 %vm968_vm2, %v15657_v47  ;;  %13267 = vmatprep.mubr.msk.f32.mxu1 %vm13667_vm1, %v16579_v21  ;;  %v10211_v47 = vpop.permute.xlu1 %10210 }
 0x803   :  { %13275 = vmatprep.subr.mxu1 %v16579_v21  ;;  %13310 = vmatprep.subr.mxu0 %v16579_v21 }
 0x804   :  { %v10133_v33 = vpop.permute.xlu0 %10132 }
 0x805   :  { %13268 = vmatmul.mubr.msk.f32.vlgmr.msra.gmra.mxu1 %vm968_vm2, %v15661_v35  ;;  %13303 = vmatmul.mubr.msk.f32.vlgmr.msra.gmra.mxu0 %vm968_vm2, %v10133_v33 }
 0x806   :  { %13276 = vmatpush3.xpose.msk.msra.mxu1 %vm968_vm2, %v15728_v2  ;;  %13277 = vmatprep.mubr.msk.f32.mxu1 %vm13667_vm1, %v16579_v21  ;;  %v10369_v2 = vpop.permute.xlu1 %10368 }
 0x807   :  { %13285 = vmatprep.subr.mxu1 %v16579_v21  ;;  %13312 = vmatprep.mubr.msk.f32.mxu0 %vm13667_vm1, %v16579_v21 }
 0x808   :  { %v10291_v12 = vpop.permute.xlu0 %10290 }
 0x809   :  { %13278 = vmatmul.mubr.msk.f32.vlgmr.msra.gmra.mxu1 %vm968_vm2, %v9743_v61  ;;  %13311 = vmatpush3.xpose.msk.msra.mxu0 %vm968_vm2, %v10291_v12 }
 0x80a   :  { %13286 = vmatpush3.xpose.msk.msra.mxu1 %vm968_vm2, %v9901_v59  ;;  %13287 = vmatprep.mubr.msk.f32.mxu1 %vm13667_vm1, %v16579_v21  ;;  %v10367_v41 = vpop.permute.xlu1 %10366 }
 0x80b   :  { %13295 = vmatprep.subr.mxu1 %v16579_v21  ;;  %13320 = vmatprep.subr.mxu0 %v16579_v21 }
 0x80c   :  { %v10289_v35 = vpop.permute.xlu0 %10288 }
 0x80d   :  { %13288 = vmatmul.mubr.msk.f32.vlgmr.msra.gmra.mxu1 %vm968_vm2, %v9899_v62  ;;  %13313 = vmatmul.mubr.msk.f32.vlgmr.msra.gmra.mxu0 %vm968_vm2, %v10289_v35 }
 0x80e   :  { %13296 = vmatpush3.xpose.msk.msra.mxu1 %vm968_vm2, %v10057_v40  ;;  %13297 = vmatprep.mubr.msk.f32.mxu1 %vm13667_vm1, %v16579_v21  ;;  %v10698_v1 = vpop.permute.xlu1 %10697 }
 0x80f   :  { %13305 = vmatprep.subr.mxu1 %v16579_v21  ;;  %13322 = vmatprep.mubr.msk.f32.mxu0 %vm13667_vm1, %v16579_v21 }
 0x810   :  { %v10621_v36 = vpop.permute.xlu0 %10620 }
 0x811   :  { %13298 = vmatmul.mubr.msk.f32.vlgmr.msra.gmra.mxu1 %vm968_vm2, %v10055_v55  ;;  %13321 = vmatpush3.msk.msra.mxu0 %vm2350_vm3, %v10621_v36 }
 0x812   :  { %13306 = vmatpush3.xpose.msk.msra.mxu1 %vm968_vm2, %v10213_v56  ;;  %13307 = vmatprep.mubr.msk.f32.mxu1 %vm13667_vm1, %v16579_v21 }
 0x813   :  { %13315 = vmatprep.subr.mxu1 %v16579_v21  ;;  %13330 = vmatprep.subr.mxu0 %v16579_v21 }
 0x815   :  { %13308 = vmatmul.mubr.msk.f32.vlgmr.msra.gmra.mxu1 %vm968_vm2, %v10211_v47 }
 0x816   :  { %13316 = vmatpush3.xpose.msk.msra.mxu1 %vm968_vm2, %v10369_v2  ;;  %13317 = vmatprep.mubr.msk.f32.mxu1 %vm13667_vm1, %v16579_v21 }
 0x817   :  { %13325 = vmatprep.subr.mxu1 %v16579_v21 }
 0x819   :  { %13318 = vmatmul.mubr.msk.f32.vlgmr.msra.gmra.mxu1 %vm968_vm2, %v10367_v41 }
 0x81a   :  { %13326 = vmatpush3.msk.msra.mxu1 %vm2350_vm3, %v10698_v1  ;;  %13327 = vmatprep.mubr.msk.f32.mxu1 %vm13667_vm1, %v16579_v21 }
 0x81b   :  { %13335 = vmatprep.subr.mxu1 %v16579_v21 }
 0x835   :  { %v15930_v45 = vpop.f32.mrf.mxu0 }
 0x837   :  { %v13164_v26 = vpop.f32.mrf.mxu0 }
 0x839   :  { %v15932_v54 = vpop.f32.mrf.mxu0 }
 0x83b   :  { %v13174_v11 = vpop.f32.mrf.mxu0 }
 0x868   :  { %v15934_v44 = vpop.f32.mrf.mxu1 }
 0x86a   :  { %v13169_v14 = vpop.f32.mrf.mxu1 }
 0x86c   :  { %v15936_v49 = vpop.f32.mrf.mxu1 }
 0x86e   :  { %v13179_v58 = vpop.f32.mrf.mxu1 }
 0x870   :  { %v15938_v32 = vpop.f32.mrf.mxu0 }
 0x871   :  { %v15940_v30 = vpop.f32.mrf.mxu1 }
 0x872   :  { %v13184_v18 = vpop.f32.mrf.mxu0 }
 0x873   :  { %v13189_v4 = vpop.f32.mrf.mxu1 }
 0x874   :  { %v15942_v22 = vpop.f32.mrf.mxu0 }
 0x875   :  { %v15944_v60 = vpop.f32.mrf.mxu1 }
 0x876   :  { %v13194_v52 = vpop.f32.mrf.mxu0 }
 0x877   :  { %v13199_v38 = vpop.f32.mrf.mxu1 }
 0x878   :  { %v15946_v53 = vpop.f32.mrf.mxu0 }
 0x879   :  { %v15948_v31 = vpop.f32.mrf.mxu1 }
 0x87a   :  { %v13204_v16 = vpop.f32.mrf.mxu0 }
 0x87b   :  { %v13209_v43 = vpop.f32.mrf.mxu1 }
 0x87c   :  { %v15950_v20 = vpop.f32.mrf.mxu0 }
 0x87d   :  { %v15952_v51 = vpop.f32.mrf.mxu1 }
 0x87e   :  { %v13214_v9 = vpop.f32.mrf.mxu0 }
 0x87f   :  { %v13219_v5 = vpop.f32.mrf.mxu1 }
 0x880   :  { %v15954_v13 = vpop.f32.mrf.mxu0 }
 0x881   :  { %v15956_v19 = vpop.f32.mrf.mxu1 }
 0x882   :  { %v13224_v63 = vpop.f32.mrf.mxu0 }
 0x883   :  { %v13229_v27 = vpop.f32.mrf.mxu1 }
 0x885   :  { %v15958_v3 = vpop.f32.mrf.mxu0 }
 0x887   :  { %v13234_v34 = vpop.f32.mrf.mxu0 }
 0x889   :  { %v15960_v50 = vpop.f32.mrf.mxu0 }
 0x88a   :  { %v10444_v23 = vsel %vm2169_vm4, %v15960_v50, -inf }
 0x88b   :  { %10445 = vmax.xlane.f32.xlu0 %v10444_v23  ;;  %v13244_v8 = vpop.f32.mrf.mxu0 }
 0x88c   :  { %v16716_v8 = vld [vmem:[#allocation34_spill] sm:$0xff] }
 0x88d   :  { %v15964_v10 = vpop.f32.mrf.mxu0 }
 0x88e   :  { %v10450_v48 = vsel %vm2169_vm4, %v15964_v10, -inf }
 0x88f   :  { %10451 = vmax.xlane.f32.xlu0 %v10450_v48  ;;  %v13254_v7 = vpop.f32.mrf.mxu0  ;;  %v16717_v48 = vld [vmem:[#allocation31_spill] sm:$0xff] }
 0x890   :  { %v16718_v7 = vld [vmem:[#allocation32_spill] sm:$0xff] }
 0x891   :  { %v15968_v61 = vpop.f32.mrf.mxu0 }
 0x892   :  { %v10456_v6 = vsel %vm2169_vm4, %v15968_v61, -inf }
 0x893   :  { %v13264_v0 = vpop.f32.mrf.mxu0 }
 0x894   :  { %v16030_v0 = vpop.permute.xlu0 %10774 }
 0x8ad   :  { %v15970_v59 = vpop.f32.mrf.mxu0 }
 0x8ae   :  { %v10462_v2 = vsel %vm2169_vm4, %v15970_v59, -inf }
 0x8af   :  { %v13274_v46 = vpop.f32.mrf.mxu0 }
 0x8b0   :  { %v16032_v46 = vpop.permute.xlu0 %11082 }
 0x8b5   :  { %v15972_v62 = vpop.f32.mrf.mxu0 }
 0x8b6   :  { %v10468_v11 = vsel %vm2169_vm4, %v15972_v62, -inf }
 0x8b7   :  { %v13284_v28 = vpop.f32.mrf.mxu0 }
 0x8b9   :  { %v15974_v57 = vpop.f32.mrf.mxu1 }
 0x8bb   :  { %v13239_v40 = vpop.f32.mrf.mxu1 }
 0x8bc   :  { %v16036_v40 = vpop.permute.xlu0 %11236 }
 0x8bd   :  { %v15976_v37 = vpop.f32.mrf.mxu1  ;;  %v15978_v42 = vpop.f32.mrf.mxu0 }
 0x8be   :  { %v10447_v25 = vsel %vm2169_vm4, %v15976_v37, -inf  ;;  %v10474_v52 = vsel %vm2169_vm4, %v15978_v42, -inf }
 0x8bf   :  { %v13294_v17 = vpop.f32.mrf.mxu0  ;;  %10448 = vmax.xlane.f32.xlu1 %v10447_v25  ;;  %v13249_v55 = vpop.f32.mrf.mxu1 }
 0x8c1   :  { %v15982_v29 = vpop.f32.mrf.mxu1 }
 0x8c2   :  { %v10453_v15 = vsel %vm2169_vm4, %v15982_v29, -inf }
 0x8c3   :  { %10454 = vmax.xlane.f32.xlu0 %v10453_v15  ;;  %v13259_v24 = vpop.f32.mrf.mxu1 }
 0x8c5   :  { %v15986_v39 = vpop.f32.mrf.mxu1  ;;  %v15988_v56 = vpop.f32.mrf.mxu0 }
 0x8c6   :  { %v10459_v33 = vsel %vm2169_vm4, %v15986_v39, -inf  ;;  %v10480_v9 = vsel %vm2169_vm4, %v15988_v56, -inf }
 0x8c7   :  { %v13304_v47 = vpop.f32.mrf.mxu0  ;;  %10457 = vmax.xlane.f32.xlu0 %v10456_v6  ;;  %10460 = vmax.xlane.f32.xlu1 %v10459_v33  ;;  %v13269_v12 = vpop.f32.mrf.mxu1  ;;  %v16719_v33 = vld [vmem:[#allocation35_spill] sm:$0xff] }
 0x8c9   :  { %v15994_v35 = vpop.f32.mrf.mxu1 }
 0x8ca   :  { %v10465_v36 = vsel %vm2169_vm4, %v15994_v35, -inf }
 0x8cb   :  { %10463 = vmax.xlane.f32.xlu0 %v10462_v2  ;;  %10466 = vmax.xlane.f32.xlu1 %v10465_v36  ;;  %v13279_v41 = vpop.f32.mrf.mxu1  ;;  %v16050_v36 = vpop.permute.xlu1 %10851 }
 0x8cd   :  { %v16000_v1 = vpop.f32.mrf.mxu1  ;;  %v16002_v26 = vpop.f32.mrf.mxu0 }
 0x8ce   :  { %v10471_v14 = vsel %vm2169_vm4, %v16000_v1, -inf  ;;  %v10486_v34 = vsel %vm2169_vm4, %v16002_v26, -inf }
 0x8cf   :  { %v13314_v58 = vpop.f32.mrf.mxu0  ;;  %10469 = vmax.xlane.f32.xlu0 %v10468_v11  ;;  %10472 = vmax.xlane.f32.xlu1 %v10471_v14  ;;  %v13289_v18 = vpop.f32.mrf.mxu1 }
 0x8d1   :  { %v16008_v4 = vpop.f32.mrf.mxu1 }
 0x8d2   :  { %v10477_v38 = vsel %vm2169_vm4, %v16008_v4, -inf }
 0x8d3   :  { %10475 = vmax.xlane.f32.xlu0 %v10474_v52  ;;  %10478 = vmax.xlane.f32.xlu1 %v10477_v38  ;;  %v13299_v16 = vpop.f32.mrf.mxu1 }
 0x8d5   :  { %v16014_v43 = vpop.f32.mrf.mxu1 }
 0x8d6   :  { %v10483_v5 = vsel %vm2169_vm4, %v16014_v43, -inf }
 0x8d7   :  { %10481 = vmax.xlane.f32.xlu0 %v10480_v9  ;;  %10484 = vmax.xlane.f32.xlu1 %v10483_v5  ;;  %v13309_v63 = vpop.f32.mrf.mxu1 }
 0x8d9   :  { %v16020_v27 = vpop.f32.mrf.mxu1 }
 0x8da   :  { %v10489_v28 = vsel %vm2169_vm4, %v16020_v27, -inf }
 0x8db   :  { %10487 = vmax.xlane.f32.xlu0 %v10486_v34  ;;  %v13319_v23 = vpop.f32.mrf.mxu1 }
 0x8e8   :  { %11467 = vrot.lane.b32.xlu1 %v16716_v8, %s13670_s16 }
 0x8f1   :  { %11390 = vrot.lane.b32.xlu0 %v16717_v48, %s13670_s16 }
 0x8f5   :  { %11544 = vrot.lane.b32.xlu0 %v16718_v7, %s13670_s16 }
 0x90c   :  { %10490 = vmax.xlane.f32.xlu1 %v10489_v28 }
 0x914   :  { %v10446_v25 = vpop.xlane.xlu0 %10445 }
 0x915   :  { %v10492_v17 = vsub.f32 %v15960_v50, %v10446_v25 }
 0x917   :  { %v10508_v55 = vmul.f32 1.442695, %v10492_v17 }
 0x918   :  { %v10452_v15 = vpop.xlane.xlu0 %10451 }
 0x919   :  { %13601 = vpow2.f32 %v10508_v55  ;;  %v10494_v24 = vsub.f32 %v15964_v10, %v10452_v15  ;;  %v16052_v10 = vpop.permute.xlu1 %10928 }
 0x91b   :  { %v10512_v6 = vmul.f32 1.442695, %v10494_v24 }
 0x91d   :  { %13603 = vpow2.f32 %v10512_v6  ;;  %11621 = vrot.lane.b32.xlu1 %v16719_v33, %s13670_s16  ;;  %v16054_v41 = vpop.permute.xlu1 %11005 }
 0x921   :  { %v16056_v11 = vpop.permute.xlu1 %11159 }
 0x925   :  { %v16058_v14 = vpop.permute.xlu1 %11313 }
 0x926   :  { %v16042_v47 = vpop.eup %13601 }
 0x927   :  { %v10540_v12 = vsel %vm2169_vm4, %v16042_v47, 0.0 }
 0x928   :  { %10541 = vadd.xlane.f32.xlu0 %v10540_v12 }
 0x92a   :  { %v16046_v2 = vpop.eup %13603 }
 0x92b   :  { %v10546_v50 = vsel %vm2169_vm4, %v16046_v2, 0.0 }
 0x92c   :  { %10547 = vadd.xlane.f32.xlu0 %v10546_v50 }
 0x948   :  { %v10449_v58 = vpop.xlane.xlu1 %10448 }
 0x949   :  { %v10493_v18 = vsub.f32 %v15976_v37, %v10449_v58 }
 0x94b   :  { %v10510_v52 = vmul.f32 1.442695, %v10493_v18 }
 0x94c   :  { %v10455_v38 = vpop.xlane.xlu0 %10454 }
 0x94d   :  { %13605 = vpow2.f32 %v10510_v52  ;;  %v10495_v16 = vsub.f32 %v15982_v29, %v10455_v38 }
 0x94f   :  { %v10514_v9 = vmul.f32 1.442695, %v10495_v16 }
 0x950   :  { %v10458_v5 = vpop.xlane.xlu0 %10457  ;;  %v10461_v63 = vpop.xlane.xlu1 %10460 }
 0x951   :  { %13607 = vpow2.f32 %v10514_v9  ;;  %v10496_v34 = vsub.f32 %v15968_v61, %v10458_v5  ;;  %v10497_v23 = vsub.f32 %v15986_v39, %v10461_v63 }
 0x953   :  { %v10516_v8 = vmul.f32 1.442695, %v10496_v34  ;;  %v10518_v48 = vmul.f32 1.442695, %v10497_v23 }
 0x954   :  { %v10464_v7 = vpop.xlane.xlu0 %10463  ;;  %v10467_v28 = vpop.xlane.xlu1 %10466 }
 0x955   :  { %13609 = vpow2.f32 %v10516_v8  ;;  %v10498_v37 = vsub.f32 %v15970_v59, %v10464_v7  ;;  %v10499_v25 = vsub.f32 %v15994_v35, %v10467_v28 }
 0x956   :  { %13611 = vpow2.f32 %v10518_v48 }
 0x957   :  { %v10520_v17 = vmul.f32 1.442695, %v10498_v37  ;;  %v10522_v29 = vmul.f32 1.442695, %v10499_v25 }
 0x958   :  { %v10470_v55 = vpop.xlane.xlu0 %10469  ;;  %v10473_v15 = vpop.xlane.xlu1 %10472 }
 0x959   :  { %13613 = vpow2.f32 %v10520_v17  ;;  %v10500_v24 = vsub.f32 %v15972_v62, %v10470_v55  ;;  %v10501_v61 = vsub.f32 %v16000_v1, %v10473_v15 }
 0x95a   :  { %v16068_v39 = vpop.eup %13605  ;;  %13615 = vpow2.f32 %v10522_v29 }
 0x95b   :  { %v10524_v6 = vmul.f32 1.442695, %v10500_v24  ;;  %v10526_v33 = vmul.f32 1.442695, %v10501_v61  ;;  %v10543_v59 = vsel %vm2169_vm4, %v16068_v39, 0.0 }
 0x95c   :  { %v10476_v12 = vpop.xlane.xlu0 %10475  ;;  %v10479_v35 = vpop.xlane.xlu1 %10478  ;;  %10544 = vadd.xlane.f32.xlu1 %v10543_v59 }
 0x95d   :  { %13617 = vpow2.f32 %v10524_v6  ;;  %v10502_v50 = vsub.f32 %v15978_v42, %v10476_v12  ;;  %v10503_v58 = vsub.f32 %v16008_v4, %v10479_v35 }
 0x95e   :  { %v16074_v18 = vpop.eup %13607  ;;  %13619 = vpow2.f32 %v10526_v33 }
 0x95f   :  { %v10528_v62 = vmul.f32 1.442695, %v10502_v50  ;;  %v10530_v1 = vmul.f32 1.442695, %v10503_v58  ;;  %v10549_v52 = vsel %vm2169_vm4, %v16074_v18, 0.0 }
 0x960   :  { %v10482_v38 = vpop.xlane.xlu0 %10481  ;;  %v10485_v16 = vpop.xlane.xlu1 %10484  ;;  %10550 = vadd.xlane.f32.xlu1 %v10549_v52 }
 0x961   :  { %13621 = vpow2.f32 %v10528_v62  ;;  %v10504_v9 = vsub.f32 %v15988_v56, %v10482_v38  ;;  %v10505_v5 = vsub.f32 %v16014_v43, %v10485_v16  ;;  %v16720_v62 = vld [vmem:[#allocation36_spill] sm:$0xff] }
 0x962   :  { %v16080_v63 = vpop.eup %13609  ;;  %13623 = vpow2.f32 %v10530_v1  ;;  %v16721_v1 = vld [vmem:[#allocation23_spill] sm:$0xff]  ;;  %v16722_v38 = vld [vmem:[#allocation24_spill] sm:$0xff] }
 0x963   :  { %v16082_v42 = vpop.eup %13611  ;;  %v10532_v4 = vmul.f32 1.442695, %v10504_v9  ;;  %v10534_v34 = vmul.f32 1.442695, %v10505_v5  ;;  %v10552_v23 = vsel %vm2169_vm4, %v16080_v63, 0.0  ;;  %v16723_v9 = vld [vmem:[#allocation26_spill] sm:$0xff] }
 0x964   :  { %10553 = vadd.xlane.f32.xlu0 %v10552_v23  ;;  %v10488_v8 = vpop.xlane.xlu0 %10487  ;;  %v10555_v48 = vsel %vm2169_vm4, %v16082_v42, 0.0  ;;  %v16129_v52 = vpop.permute.xlu1 %11467  ;;  %v16725_v23 = vld [vmem:[#allocation30_spill] sm:$0xff] }
 0x965   :  { %13625 = vpow2.f32 %v10532_v4  ;;  %v10506_v56 = vsub.f32 %v16002_v26, %v10488_v8  ;;  %10556 = vadd.xlane.f32.xlu1 %v10555_v48  ;;  %v16726_v8 = vld [vmem:[#allocation44_spill] sm:$0xff]  ;;  %v16727_v48 = vld [vmem:[#allocation2_spill] sm:$0xff] }
 0x966   :  { %v16089_v43 = vpop.eup %13613  ;;  %13627 = vpow2.f32 %v10534_v34  ;;  %v16724_v34 = vld [vmem:[#allocation28_spill] sm:$0xff] }
 0x967   :  { %v16091_v7 = vpop.eup %13615  ;;  %v10536_v28 = vmul.f32 1.442695, %v10506_v56  ;;  %v10558_v37 = vsel %vm2169_vm4, %v16089_v43, 0.0 }
 0x968   :  { %10559 = vadd.xlane.f32.xlu0 %v10558_v37  ;;  %v10561_v25 = vsel %vm2169_vm4, %v16091_v7, 0.0  ;;  %v16728_v37 = vld [vmem:[#allocation52_spill] sm:$0xff] }
 0x969   :  { %13629 = vpow2.f32 %v10536_v28  ;;  %10562 = vadd.xlane.f32.xlu1 %v10561_v25  ;;  %v16146_v28 = vpop.permute.xlu0 %11390 }
 0x96a   :  { %v16097_v17 = vpop.eup %13617 }
 0x96b   :  { %v16099_v29 = vpop.eup %13619  ;;  %v10564_v26 = vsel %vm2169_vm4, %v16097_v17, 0.0 }
 0x96c   :  { %10565 = vadd.xlane.f32.xlu0 %v10564_v26  ;;  %v10567_v55 = vsel %vm2169_vm4, %v16099_v29, 0.0 }
 0x96d   :  { %10568 = vadd.xlane.f32.xlu1 %v10567_v55  ;;  %v16152_v25 = vpop.permute.xlu0 %11544 }
 0x96e   :  { %v16105_v15 = vpop.eup %13621 }
 0x96f   :  { %v16107_v24 = vpop.eup %13623  ;;  %v10570_v61 = vsel %vm2169_vm4, %v16105_v15, 0.0 }
 0x970   :  { %10571 = vadd.xlane.f32.xlu0 %v10570_v61  ;;  %v10573_v6 = vsel %vm2169_vm4, %v16107_v24, 0.0 }
 0x971   :  { %10574 = vadd.xlane.f32.xlu1 %v10573_v6  ;;  %v16729_v6 = vld [vmem:[#allocation33_spill] sm:$0xff] }
 0x972   :  { %v16113_v33 = vpop.eup %13625 }
 0x973   :  { %v16115_v59 = vpop.eup %13627  ;;  %v10576_v12 = vsel %vm2169_vm4, %v16113_v33, 0.0 }
 0x974   :  { %10577 = vadd.xlane.f32.xlu0 %v10576_v12  ;;  %v10579_v35 = vsel %vm2169_vm4, %v16115_v59, 0.0 }
 0x975   :  { %10580 = vadd.xlane.f32.xlu1 %v10579_v35 }
 0x976   :  { %v16121_v50 = vpop.eup %13629 }
 0x977   :  { %v10582_v58 = vsel %vm2169_vm4, %v16121_v50, 0.0 }
 0x979   :  { %10583 = vadd.xlane.f32.xlu1 %v10582_v58 }
 0x98a   :  { %11775 = vrot.lane.b32.xlu1 %v16720_v62, %s13670_s16 }
 0x98e   :  { %11870 = vrot.lane.b32.xlu1 %v16721_v1, %s13671_s17 }
 0x992   :  { %11874 = vrot.lane.b32.xlu1 %v16722_v38, %s13671_s17 }
 0x995   :  { %v10491_v16 = vpop.xlane.xlu1 %10490 }
 0x996   :  { %11878 = vrot.lane.b32.xlu1 %v16723_v9, %s13671_s17  ;;  %v10507_v5 = vsub.f32 %v16020_v27, %v10491_v16 }
 0x998   :  { %v10538_v4 = vmul.f32 1.442695, %v10507_v5 }
 0x999   :  { %v16202_v12 = vpop.permute.xlu1 %11621 }
 0x99a   :  { %13631 = vpow2.f32 %v10538_v4  ;;  %11882 = vrot.lane.b32.xlu1 %v16724_v34, %s13671_s17 }
 0x99e   :  { %11886 = vrot.lane.b32.xlu1 %v16725_v23, %s13671_s17 }
 0x9a2   :  { %11890 = vrot.lane.b32.xlu1 %v16726_v8, %s13671_s17 }
 0x9a6   :  { %11894 = vrot.lane.b32.xlu1 %v16727_v48, %s13671_s17 }
 0x9a7   :  { %v16144_v56 = vpop.eup %13631 }
 0x9a8   :  { %v10585_v27 = vsel %vm2169_vm4, %v16144_v56, 0.0 }
 0x9a9   :  { %10586 = vadd.xlane.f32.xlu0 %v10585_v27 }
 0x9aa   :  { %11898 = vrot.lane.b32.xlu1 %v16728_v37, %s13671_s17 }
 0x9ae   :  { %11934 = vrot.lane.b32.xlu1 %v15934_v44, %s13672_s18 }
 0x9b1   :  { %v10542_v26 = vpop.xlane.xlu0 %10541 }
 0x9b2   :  { %13633 = vrcp.f32 %v10542_v26  ;;  %11938 = vrot.lane.b32.xlu1 %v15936_v49, %s13672_s18 }
 0x9b5   :  { %v10548_v55 = vpop.xlane.xlu0 %10547 }
 0x9b6   :  { %13635 = vrcp.f32 %v10548_v55  ;;  %11942 = vrot.lane.b32.xlu1 %v15940_v30, %s13672_s18  ;;  %v16730_v30 = vld [vmem:[#allocation21_spill] sm:$0xff] }
 0x9ba   :  { %11946 = vrot.lane.b32.xlu1 %v15944_v60, %s13672_s18 }
 0x9be   :  { %11950 = vrot.lane.b32.xlu1 %v15948_v31, %s13672_s18  ;;  %v16731_v31 = vld [vmem:[#allocation22_spill] sm:$0xff] }
 0x9bf   :  { %v13634_v61 = vpop.eup %13633  ;;  %11698 = vrot.lane.b32.xlu0 %v16729_v6, %s13670_s16 }
 0x9c0   :  { %v10604_v44 = vmul.f32 %v13634_v61, %v16042_v47  ;;  %v16735_v47 = vld [vmem:[#allocation3_spill] sm:$0xff] }
 0x9c2   :  { %13323 = vmatmul.mubr.msk.f32.vlgmr.msra.gmra.mxu0 %vm2346_vm5, %v10604_v44  ;;  %11954 = vrot.lane.b32.xlu1 %v15952_v51, %s13672_s18  ;;  %v16732_v51 = vld [vmem:[#allocation25_spill] sm:$0xff] }
 0x9c3   :  { %v13636_v49 = vpop.eup %13635  ;;  %13331 = vmatpush3.msk.msra.mxu0 %vm2350_vm3, %v16030_v0  ;;  %11868 = vrot.lane.b32.xlu0 %v16730_v30, %s13671_s17  ;;  %v16733_v0 = vld [vmem:[#allocation27_spill] sm:$0xff] }
 0x9c4   :  { %v10606_v60 = vmul.f32 %v13636_v49, %v16046_v2  ;;  %13332 = vmatprep.mubr.msk.f32.mxu0 %vm13667_vm1, %v16579_v21  ;;  %13340 = vmatprep.subr.mxu0 %v16579_v21  ;;  %v16736_v2 = vld [vmem:[#allocation51_spill] sm:$0xff] }
 0x9c6   :  { %13333 = vmatmul.mubr.msk.f32.vlgmr.msra.gmra.mxu0 %vm2346_vm5, %v10606_v60  ;;  %11958 = vrot.lane.b32.xlu1 %v15956_v19, %s13672_s18  ;;  %v16734_v19 = vld [vmem:[#allocation29_spill] sm:$0xff]  ;;  %v16738_v60 = vld [vmem:[#allocation20_spill] sm:$0xff] }
 0x9c7   :  { %13341 = vmatpush3.msk.msra.mxu0 %vm2350_vm3, %v16052_v10  ;;  %11872 = vrot.lane.b32.xlu0 %v16731_v31, %s13671_s17  ;;  %v16737_v10 = vld [vmem:[#allocation45_spill] sm:$0xff] }
 0x9c8   :  { %13342 = vmatprep.mubr.msk.f32.mxu0 %vm13667_vm1, %v16579_v21  ;;  %13350 = vmatprep.subr.mxu0 %v16579_v21 }
 0x9ca   :  { %11962 = vrot.lane.b32.xlu1 %v15974_v57, %s13672_s18 }
 0x9cb   :  { %11876 = vrot.lane.b32.xlu0 %v16732_v51, %s13671_s17 }
 0x9cf   :  { %11880 = vrot.lane.b32.xlu0 %v16733_v0, %s13671_s17  ;;  %v16739_v0 = vld [vmem:[#allocation13_spill] sm:$0xff] }
 0x9d3   :  { %11884 = vrot.lane.b32.xlu0 %v16734_v19, %s13671_s17 }
 0x9d7   :  { %11888 = vrot.lane.b32.xlu0 %v16735_v47, %s13671_s17 }
 0x9db   :  { %11892 = vrot.lane.b32.xlu0 %v16736_v2, %s13671_s17 }
 0x9df   :  { %11896 = vrot.lane.b32.xlu0 %v16737_v10, %s13671_s17  ;;  %v16740_v10 = vld [vmem:[#allocation19_spill] sm:$0xff] }
 0x9e3   :  { %11932 = vrot.lane.b32.xlu0 %v15930_v45, %s13672_s18 }
 0x9e5   :  { %v10545_v57 = vpop.xlane.xlu1 %10544 }
 0x9e6   :  { %13637 = vrcp.f32 %v10545_v57 }
 0x9e7   :  { %11936 = vrot.lane.b32.xlu0 %v15932_v54, %s13672_s18 }
 0x9e9   :  { %v10551_v35 = vpop.xlane.xlu1 %10550 }
 0x9ea   :  { %13639 = vrcp.f32 %v10551_v35 }
 0x9eb   :  { %11940 = vrot.lane.b32.xlu0 %v15938_v32, %s13672_s18 }
 0x9ed   :  { %v10554_v58 = vpop.xlane.xlu0 %10553 }
 0x9ee   :  { %13641 = vrcp.f32 %v10554_v58  ;;  %v10557_v62 = vpop.xlane.xlu1 %10556  ;;  %v16741_v58 = vld [vmem:[#allocation38_spill] sm:$0xff] }
 0x9ef   :  { %13643 = vrcp.f32 %v10557_v62  ;;  %11944 = vrot.lane.b32.xlu0 %v15942_v22, %s13672_s18 }
 0x9f1   :  { %v10560_v1 = vpop.xlane.xlu0 %10559 }
 0x9f2   :  { %13645 = vrcp.f32 %v10560_v1  ;;  %v10563_v45 = vpop.xlane.xlu1 %10562 }
 0x9f3   :  { %v13638_v38 = vpop.eup %13637  ;;  %13647 = vrcp.f32 %v10563_v45  ;;  %11948 = vrot.lane.b32.xlu0 %v15946_v53, %s13672_s18 }
 0x9f4   :  { %v10605_v54 = vmul.f32 %v13638_v38, %v16068_v39  ;;  %v16742_v38 = vld [vmem:[#allocation40_spill] sm:$0xff] }
 0x9f5   :  { %v10566_v16 = vpop.xlane.xlu0 %10565 }
 0x9f6   :  { %13649 = vrcp.f32 %v10566_v16  ;;  %v10569_v32 = vpop.xlane.xlu1 %10568  ;;  %13328 = vmatmul.mubr.msk.f32.vlgmr.msra.gmra.mxu1 %vm2346_vm5, %v10605_v54 }
 0x9f7   :  { %v13640_v9 = vpop.eup %13639  ;;  %13651 = vrcp.f32 %v10569_v32  ;;  %13336 = vmatpush3.msk.msra.mxu1 %vm2350_vm3, %v16050_v36  ;;  %11952 = vrot.lane.b32.xlu0 %v15950_v20, %s13672_s18 }
 0x9f8   :  { %v10607_v22 = vmul.f32 %v13640_v9, %v16074_v18  ;;  %13337 = vmatprep.mubr.msk.f32.mxu1 %vm13667_vm1, %v16579_v21  ;;  %13345 = vmatprep.subr.mxu1 %v16579_v21 }
 0x9f9   :  { %v10572_v53 = vpop.xlane.xlu0 %10571 }
 0x9fa   :  { %13653 = vrcp.f32 %v10572_v53  ;;  %v10575_v39 = vpop.xlane.xlu1 %10574  ;;  %13338 = vmatmul.mubr.msk.f32.vlgmr.msra.gmra.mxu1 %vm2346_vm5, %v10607_v22 }
 0x9fb   :  { %v13642_v5 = vpop.eup %13641  ;;  %13655 = vrcp.f32 %v10575_v39  ;;  %13346 = vmatpush3.msk.msra.mxu1 %vm2350_vm3, %v16054_v41  ;;  %11956 = vrot.lane.b32.xlu0 %v15954_v13, %s13672_s18 }
 0x9fc   :  { %v13644_v20 = vpop.eup %13643  ;;  %v10608_v36 = vmul.f32 %v13642_v5, %v16080_v63  ;;  %13347 = vmatprep.mubr.msk.f32.mxu1 %vm13667_vm1, %v16579_v21  ;;  %13355 = vmatprep.subr.mxu1 %v16579_v21 }
 0x9fd   :  { %v10609_v18 = vmul.f32 %v13644_v20, %v16082_v42  ;;  %v10578_v4 = vpop.xlane.xlu0 %10577 }
 0x9fe   :  { %13657 = vrcp.f32 %v10578_v4  ;;  %v10581_v34 = vpop.xlane.xlu1 %10580  ;;  %13343 = vmatmul.mubr.msk.f32.vlgmr.msra.gmra.mxu0 %vm2346_vm5, %v10608_v36 }
 0x9ff   :  { %v13646_v23 = vpop.eup %13645  ;;  %13659 = vrcp.f32 %v10581_v34  ;;  %13348 = vmatmul.mubr.msk.f32.vlgmr.msra.gmra.mxu1 %vm2346_vm5, %v10609_v18  ;;  %13351 = vmatpush3.msk.msra.mxu0 %vm2350_vm3, %v16032_v46 }
 0xa00   :  { %v13648_v13 = vpop.eup %13647  ;;  %v10610_v41 = vmul.f32 %v13646_v23, %v16089_v43  ;;  %13356 = vmatpush3.msk.msra.mxu1 %vm2350_vm3, %v16056_v11  ;;  %11960 = vrot.lane.b32.xlu0 %v15958_v3, %s13672_s18 }
 0xa01   :  { %v10611_v63 = vmul.f32 %v13648_v13, %v16091_v7  ;;  %13352 = vmatprep.mubr.msk.f32.mxu0 %vm13667_vm1, %v16579_v21  ;;  %13357 = vmatprep.mubr.msk.f32.mxu1 %vm13667_vm1, %v16579_v21 }
 0xa02   :  { %13360 = vmatprep.subr.mxu0 %v16579_v21  ;;  %13365 = vmatprep.subr.mxu1 %v16579_v21 }
 0xa03   :  { %v13650_v46 = vpop.eup %13649  ;;  %13353 = vmatmul.mubr.msk.f32.vlgmr.msra.gmra.mxu0 %vm2346_vm5, %v10610_v41  ;;  %13358 = vmatmul.mubr.msk.f32.vlgmr.msra.gmra.mxu1 %vm2346_vm5, %v10611_v63 }
 0xa04   :  { %v13652_v11 = vpop.eup %13651  ;;  %v10612_v3 = vmul.f32 %v13650_v46, %v16097_v17  ;;  %13361 = vmatpush3.msk.msra.mxu0 %vm2350_vm3, %v16036_v40  ;;  %13366 = vmatpush3.msk.msra.mxu1 %vm2350_vm3, %v16058_v14  ;;  %v10584_v17 = vpop.xlane.xlu1 %10583 }
 0xa05   :  { %v10613_v42 = vmul.f32 %v13652_v11, %v16099_v29  ;;  %13362 = vmatprep.mubr.msk.f32.mxu0 %vm13667_vm1, %v16579_v21  ;;  %13367 = vmatprep.mubr.msk.f32.mxu1 %vm13667_vm1, %v16579_v21  ;;  %13661 = vrcp.f32 %v10584_v17 }
 0xa06   :  { %13370 = vmatprep.subr.mxu0 %v16579_v21  ;;  %13375 = vmatprep.subr.mxu1 %v16579_v21 }
 0xa07   :  { %v13654_v43 = vpop.eup %13653  ;;  %13363 = vmatmul.mubr.msk.f32.vlgmr.msra.gmra.mxu0 %vm2346_vm5, %v10612_v3  ;;  %13368 = vmatmul.mubr.msk.f32.vlgmr.msra.gmra.mxu1 %vm2346_vm5, %v10613_v42 }
 0xa08   :  { %v13656_v40 = vpop.eup %13655  ;;  %v10614_v14 = vmul.f32 %v13654_v43, %v16105_v15  ;;  %13371 = vmatpush3.msk.msra.mxu0 %vm2350_vm3, %v16146_v28  ;;  %13376 = vmatpush3.msk.msra.mxu1 %vm2350_vm3, %v16129_v52  ;;  %v11776_v8 = vpop.permute.xlu1 %11775 }
 0xa09   :  { %v10615_v7 = vmul.f32 %v13656_v40, %v16107_v24  ;;  %13372 = vmatprep.mubr.msk.f32.mxu0 %vm13667_vm1, %v16579_v21  ;;  %13377 = vmatprep.mubr.msk.f32.mxu1 %vm13667_vm1, %v16579_v21 }
 0xa0a   :  { %13380 = vmatprep.subr.mxu0 %v16579_v21  ;;  %13385 = vmatprep.subr.mxu1 %v16579_v21 }
 0xa0b   :  { %v13658_v29 = vpop.eup %13657  ;;  %13373 = vmatmul.mubr.msk.f32.vlgmr.msra.gmra.mxu0 %vm2346_vm5, %v10614_v14  ;;  %13378 = vmatmul.mubr.msk.f32.vlgmr.msra.gmra.mxu1 %vm2346_vm5, %v10615_v7 }
 0xa0c   :  { %v13660_v15 = vpop.eup %13659  ;;  %v10616_v52 = vmul.f32 %v13658_v29, %v16113_v33  ;;  %13381 = vmatpush3.msk.msra.mxu0 %vm2350_vm3, %v16152_v25  ;;  %13386 = vmatpush3.msk.msra.mxu1 %vm2350_vm3, %v16202_v12  ;;  %v11871_v14 = vpop.permute.xlu1 %11870 }
 0xa0d   :  { %v10617_v24 = vmul.f32 %v13660_v15, %v16115_v59  ;;  %13382 = vmatprep.mubr.msk.f32.mxu0 %vm13667_vm1, %v16579_v21  ;;  %13387 = vmatprep.mubr.msk.f32.mxu1 %vm13667_vm1, %v16579_v21 }
 0xa0e   :  { %13395 = vmatprep.subr.mxu1 %v16579_v21  ;;  %13390 = vmatprep.subr.mxu0 %v16579_v21 }
 0xa0f   :  { %13383 = vmatmul.mubr.msk.f32.vlgmr.msra.gmra.mxu0 %vm2346_vm5, %v10616_v52  ;;  %13388 = vmatmul.mubr.msk.f32.vlgmr.msra.gmra.mxu1 %vm2346_vm5, %v10617_v24 }
 0xa10   :  { %13396 = vmatpush3.msk.msra.mxu1 %vm2350_vm3, %v11776_v8  ;;  %13392 = vmatprep.mubr.msk.f32.mxu0 %vm13667_vm1, %v16579_v21  ;;  %v11875_v8 = vpop.permute.xlu1 %11874 }
 0xa11   :  { %13397 = vmatprep.mubr.msk.f32.mxu1 %vm13667_vm1, %v16579_v21 }
 0xa12   :  { %v13662_v59 = vpop.eup %13661 }
 0xa13   :  { %v10618_v48 = vmul.f32 %v13662_v59, %v16121_v50 }
 0xa32   :  { %v10587_v33 = vpop.xlane.xlu0 %10586 }
 0xa33   :  { %13663 = vrcp.f32 %v10587_v33 }
 0xa36   :  { %v11699_v28 = vpop.permute.xlu0 %11698 }
 0xa37   :  { %13391 = vmatpush3.msk.msra.mxu0 %vm2350_vm3, %v11699_v28 }
 0xa38   :  { %13393 = vmatmul.mubr.msk.f32.vlgmr.msra.gmra.mxu0 %vm2346_vm5, %v10618_v48  ;;  %v11879_v48 = vpop.permute.xlu1 %11878 }
 0xa3a   :  { %v16302_v27 = vpop.permute.xlu0 %11868 }
 0xa3c   :  { %v11883_v28 = vpop.permute.xlu1 %11882 }
 0xa3e   :  { %v16304_v37 = vpop.permute.xlu0 %11872 }
 0xa40   :  { %v13664_v25 = vpop.eup %13663 }
 0xa41   :  { %v10619_v26 = vmul.f32 %v13664_v25, %v16144_v56  ;;  %v11887_v25 = vpop.permute.xlu1 %11886 }
 0xa42   :  { %v11877_v55 = vpop.permute.xlu0 %11876 }
 0xa43   :  { %13398 = vmatmul.mubr.msk.f32.vlgmr.msra.gmra.mxu1 %vm2346_vm5, %v10619_v26  ;;  %v12048_v31 = vsel %vm968_vm2, %v16738_v60, %v11877_v55 }
 0xa45   :  { %v16353_v26 = vpop.permute.xlu1 %11890 }
 0xa46   :  { %v11881_v21 = vpop.permute.xlu0 %11880 }
 0xa47   :  { %v12050_v19 = vsel %vm968_vm2, %v16739_v0, %v11881_v21  ;;  %v16744_v0 = vld [vmem:[#allocation14_spill] sm:$0xff] }
 0xa49   :  { %v16355_v55 = vpop.permute.xlu1 %11894 }
 0xa4a   :  { %v11885_v61 = vpop.permute.xlu0 %11884 }
 0xa4b   :  { %v12052_v12 = vsel %vm968_vm2, %v16740_v10, %v11885_v61  ;;  %v16743_v61 = vld [vmem:[#allocation5_spill] sm:$0xff] }
 0xa4e   :  { %v11889_v6 = vpop.permute.xlu0 %11888 }
 0xa4f   :  { %v12054_v62 = vsel %vm968_vm2, %v16741_v58, %v11889_v6  ;;  %v12044_v6 = vsel %vm968_vm2, %v16743_v61, %v16302_v27 }
 0xa52   :  { %v11893_v44 = vpop.permute.xlu0 %11892 }
 0xa53   :  { %v12056_v54 = vsel %vm968_vm2, %v16742_v38, %v11893_v44  ;;  %v16362_v44 = vpop.permute.xlu1 %11898 }
 0xa56   :  { %v16308_v50 = vpop.permute.xlu0 %11896 }
 0xa5a   :  { %v16310_v49 = vpop.permute.xlu0 %11932 }
 0xa5b   :  { %v12061_v60 = vsel %vm12060_vm6, %v12044_v6, %v16310_v49 }
 0xa5e   :  { %v16312_v30 = vpop.permute.xlu0 %11936 }
 0xa62   :  { %v11941_v51 = vpop.permute.xlu0 %11940 }
 0xa63   :  { %v16317_v56 = vsel %vm12060_vm6, %v12048_v31, %v11941_v51 }
 0xa66   :  { %v11945_v47 = vpop.permute.xlu0 %11944 }
 0xa67   :  { %v16322_v2 = vsel %vm12060_vm6, %v12050_v19, %v11945_v47  ;;  %v12046_v19 = vsel %vm968_vm2, %v16744_v0, %v16304_v37 }
 0xa68   :  { %v12063_v27 = vsel %vm12060_vm6, %v12046_v19, %v16312_v30 }
 0xa6a   :  { %v11949_v57 = vpop.permute.xlu0 %11948 }
 0xa6b   :  { %v16327_v35 = vsel %vm12060_vm6, %v12052_v12, %v11949_v57  ;;  %v11935_v57 = vpop.permute.xlu1 %11934 }
 0xa6e   :  { %v11953_v1 = vpop.permute.xlu0 %11952 }
 0xa6f   :  { %v16332_v45 = vsel %vm12060_vm6, %v12054_v62, %v11953_v1  ;;  %v11939_v58 = vpop.permute.xlu1 %11938 }
 0xa72   :  { %v11957_v16 = vpop.permute.xlu0 %11956 }
 0xa73   :  { %v16337_v32 = vsel %vm12060_vm6, %v12056_v54, %v11957_v16  ;;  %v11943_v1 = vpop.permute.xlu1 %11942 }
 0xa76   :  { %v16357_v21 = vpop.permute.xlu0 %11960 }
 0xa77   :  { %v11947_v38 = vpop.permute.xlu1 %11946 }
 0xa7b   :  { %v11951_v30 = vpop.permute.xlu1 %11950 }
 0xa7f   :  { %v11955_v54 = vpop.permute.xlu1 %11954 }
 0xa82   :  { %v10693_v9 = vpop.f32.mrf.mxu0 }
 0xa83   :  { %11996 = vrot.lane.b32.xlu0 %v10693_v9, %s13673_s19  ;;  %v11959_v16 = vpop.permute.xlu1 %11958 }
 0xa84   :  { %v13324_v22 = vpop.f32.mrf.mxu0 }
 0xa85   :  { %v16745_v22 = vld [vmem:[#allocation12_spill] sm:$0xff] }
 0xa86   :  { %v10847_v53 = vpop.f32.mrf.mxu0 }
 0xa87   :  { %12000 = vrot.lane.b32.xlu0 %v10847_v53, %s13673_s19  ;;  %v11963_v9 = vpop.permute.xlu1 %11962  ;;  %v12045_v53 = vsel %vm968_vm2, %v16745_v22, %v11871_v14 }
 0xa88   :  { %v13334_v39 = vpop.f32.mrf.mxu0 }
 0xa89   :  { %v12062_v39 = vsel %vm12060_vm6, %v12045_v53, %v11935_v57 }
 0xab6   :  { %v10770_v5 = vpop.f32.mrf.mxu1 }
 0xab7   :  { %11998 = vrot.lane.b32.xlu1 %v10770_v5, %s13673_s19 }
 0xab8   :  { %v13329_v20 = vpop.f32.mrf.mxu1 }
 0xaba   :  { %v10924_v36 = vpop.f32.mrf.mxu1 }
 0xabb   :  { %12002 = vrot.lane.b32.xlu1 %v10924_v36, %s13673_s19  ;;  %v16746_v36 = vld [vmem:[#allocation16_spill] sm:$0xff] }
 0xabc   :  { %v13339_v18 = vpop.f32.mrf.mxu1 }
 0xabd   :  { %v12047_v18 = vsel %vm968_vm2, %v16746_v36, %v11875_v8 }
 0xabe   :  { %v11001_v4 = vpop.f32.mrf.mxu0 }
 0xabf   :  { %v11078_v34 = vpop.f32.mrf.mxu1  ;;  %12004 = vrot.lane.b32.xlu0 %v11001_v4, %s13673_s19  ;;  %v12064_v4 = vsel %vm12060_vm6, %v12047_v18, %v11939_v58 }
 0xac0   :  { %12006 = vrot.lane.b32.xlu1 %v11078_v34, %s13673_s19  ;;  %v13344_v23 = vpop.f32.mrf.mxu0 }
 0xac1   :  { %v13349_v13 = vpop.f32.mrf.mxu1 }
 0xac2   :  { %v16747_v13 = vld [vmem:[#allocation15_spill] sm:$0xff] }
 0xac3   :  { %v11155_v41 = vpop.f32.mrf.mxu0  ;;  %v11232_v63 = vpop.f32.mrf.mxu1 }
 0xac4   :  { %12008 = vrot.lane.b32.xlu0 %v11155_v41, %s13673_s19  ;;  %12010 = vrot.lane.b32.xlu1 %v11232_v63, %s13673_s19  ;;  %v12049_v41 = vsel %vm968_vm2, %v16747_v13, %v11879_v48  ;;  %v16750_v48 = vld [vmem:[#allocation39_spill] sm:$0xff] }
 0xac5   :  { %v13354_v46 = vpop.f32.mrf.mxu0  ;;  %v13359_v11 = vpop.f32.mrf.mxu1 }
 0xac6   :  { %v12066_v46 = vsel %vm12060_vm6, %v12049_v41, %v11943_v1 }
 0xac7   :  { %v11309_v3 = vpop.f32.mrf.mxu0  ;;  %v11386_v42 = vpop.f32.mrf.mxu1 }
 0xac8   :  { %12012 = vrot.lane.b32.xlu0 %v11309_v3, %s13673_s19  ;;  %12014 = vrot.lane.b32.xlu1 %v11386_v42, %s13673_s19 }
 0xac9   :  { %v13364_v43 = vpop.f32.mrf.mxu0  ;;  %v13369_v40 = vpop.f32.mrf.mxu1 }
 0xaca   :  { %v16748_v43 = vld [vmem:[#allocation17_spill] sm:$0xff] }
 0xacb   :  { %v11463_v7 = vpop.f32.mrf.mxu0  ;;  %v11540_v17 = vpop.f32.mrf.mxu1  ;;  %v12051_v40 = vsel %vm968_vm2, %v16748_v43, %v11883_v28  ;;  %v12055_v28 = vsel %vm968_vm2, %v16750_v48, %v16353_v26  ;;  %v16751_v26 = vld [vmem:[#allocation42_spill] sm:$0xff] }
 0xacc   :  { %12016 = vrot.lane.b32.xlu0 %v11463_v7, %s13673_s19  ;;  %12018 = vrot.lane.b32.xlu1 %v11540_v17, %s13673_s19  ;;  %v12068_v14 = vsel %vm12060_vm6, %v12051_v40, %v11947_v38 }
 0xacd   :  { %v13374_v29 = vpop.f32.mrf.mxu0  ;;  %v13379_v15 = vpop.f32.mrf.mxu1 }
 0xace   :  { %v16749_v15 = vld [vmem:[#allocation37_spill] sm:$0xff] }
 0xacf   :  { %v11617_v52 = vpop.f32.mrf.mxu0  ;;  %v11694_v24 = vpop.f32.mrf.mxu1 }
 0xad0   :  { %12020 = vrot.lane.b32.xlu0 %v11617_v52, %s13673_s19  ;;  %12022 = vrot.lane.b32.xlu1 %v11694_v24, %s13673_s19  ;;  %v12053_v52 = vsel %vm968_vm2, %v16749_v15, %v11887_v25  ;;  %v12072_v25 = vsel %vm12060_vm6, %v12055_v28, %v11955_v54 }
 0xad1   :  { %v13384_v33 = vpop.f32.mrf.mxu0  ;;  %v13389_v59 = vpop.f32.mrf.mxu1  ;;  %v12070_v24 = vsel %vm12060_vm6, %v12053_v52, %v11951_v30 }
 0xaf5   :  { %v11997_v31 = vpop.permute.xlu0 %11996 }
 0xaf6   :  { %v12078_v51 = vsel %vm12077_vm7, %v12061_v60, %v11997_v31  ;;  %v12057_v31 = vsel %vm968_vm2, %v16751_v26, %v16355_v55  ;;  %v16752_v55 = vld [vmem:[#allocation41_spill] sm:$0xff] }
 0xaf7   :  { %12095 = vst.msk [vmem:[%s16498_s8] sm:$0x3] %vm12094_vm8, %v12078_v51  ;;  %v12074_v51 = vsel %vm12060_vm6, %v12057_v31, %v11959_v16 }
 0xaf8   :  { %v11771_v47 = vpop.f32.mrf.mxu0 }
 0xaf9   :  { %v12001_v10 = vpop.permute.xlu0 %12000  ;;  %12024 = vrot.lane.b32.xlu0 %v11771_v47, %s13673_s19 }
 0xafa   :  { %v12080_v49 = vsel %vm12077_vm7, %v12063_v27, %v12001_v10  ;;  %v13394_v12 = vpop.f32.mrf.mxu0  ;;  %v12058_v27 = vsel %vm968_vm2, %v16752_v55, %v16308_v50 }
 0xafb   :  { %12097 = vst.msk [vmem:[%s16498_s8 + $0x4] sm:$0x3] %vm12094_vm8, %v12080_v49  ;;  %v12075_v10 = vsel %vm12060_vm6, %v12058_v27, %v16357_v21  ;;  %v16753_v12 = vld [vmem:[#allocation43_spill] sm:$0xff] }
 0xafc   :  { %v12059_v57 = vsel %vm968_vm2, %v16753_v12, %v16362_v44 }
 0xafd   :  { %v12076_v58 = vsel %vm12060_vm6, %v12059_v57, %v11963_v9 }
 0xb03   :  { %v11848_v62 = vpop.f32.mrf.mxu1 }
 0xb04   :  { %12026 = vrot.lane.b32.xlu1 %v11848_v62, %s13673_s19 }
 0xb05   :  { %v13399_v37 = vpop.f32.mrf.mxu1 }
 0xb29   :  { %v11999_v5 = vpop.permute.xlu1 %11998 }
 0xb2a   :  { %v12079_v20 = vsel %vm12077_vm7, %v12062_v39, %v11999_v5 }
 0xb2b   :  { %12096 = vst.msk [vmem:[%s16498_s8 + $0x2] sm:$0x3] %vm12094_vm8, %v12079_v20 }
 0xb2d   :  { %v12003_v34 = vpop.permute.xlu1 %12002 }
 0xb2e   :  { %v12081_v23 = vsel %vm12077_vm7, %v12064_v4, %v12003_v34 }
 0xb2f   :  { %12098 = vst.msk [vmem:[%s16498_s8 + $0x6] sm:$0x3] %vm12094_vm8, %v12081_v23 }
 0xb31   :  { %v12005_v63 = vpop.permute.xlu0 %12004 }
 0xb32   :  { %v12082_v11 = vsel %vm12077_vm7, %v16317_v56, %v12005_v63  ;;  %v12007_v3 = vpop.permute.xlu1 %12006 }
 0xb33   :  { %12099 = vst.msk [vmem:[%s16498_s8 + $0x8] sm:$0x3] %vm12094_vm8, %v12082_v11  ;;  %v12083_v42 = vsel %vm12077_vm7, %v12066_v46, %v12007_v3 }
 0xb34   :  { %12100 = vst.msk [vmem:[%s16498_s8 + $0xa] sm:$0x3] %vm12094_vm8, %v12083_v42 }
 0xb36   :  { %v12009_v7 = vpop.permute.xlu0 %12008  ;;  %v12011_v56 = vpop.permute.xlu1 %12010 }
 0xb37   :  { %v12084_v17 = vsel %vm12077_vm7, %v16322_v2, %v12009_v7  ;;  %v12085_v29 = vsel %vm12077_vm7, %v12068_v14, %v12011_v56 }
 0xb38   :  { %12101 = vst.msk [vmem:[%s16498_s8 + $0xc] sm:$0x3] %vm12094_vm8, %v12084_v17  ;;  %12102 = vst.msk [vmem:[%s16498_s8 + $0xe] sm:$0x3] %vm12094_vm8, %v12085_v29 }
 0xb3a   :  { %v12013_v8 = vpop.permute.xlu0 %12012  ;;  %v12015_v33 = vpop.permute.xlu1 %12014 }
 0xb3b   :  { %v12086_v2 = vsel %vm12077_vm7, %v16327_v35, %v12013_v8  ;;  %v12087_v59 = vsel %vm12077_vm7, %v12070_v24, %v12015_v33 }
 0xb3c   :  { %12103 = vst.msk [vmem:[%s16498_s8 + $0x10] sm:$0x3] %vm12094_vm8, %v12086_v2  ;;  %12104 = vst.msk [vmem:[%s16498_s8 + $0x12] sm:$0x3] %vm12094_vm8, %v12087_v59 }
 0xb3e   :  { %v12017_v61 = vpop.permute.xlu0 %12016  ;;  %v12019_v35 = vpop.permute.xlu1 %12018 }
 0xb3f   :  { %v12088_v6 = vsel %vm12077_vm7, %v16332_v45, %v12017_v61  ;;  %v12089_v60 = vsel %vm12077_vm7, %v12072_v25, %v12019_v35 }
 0xb40   :  { %12105 = vst.msk [vmem:[%s16498_s8 + $0x14] sm:$0x3] %vm12094_vm8, %v12088_v6  ;;  %12106 = vst.msk [vmem:[%s16498_s8 + $0x16] sm:$0x3] %vm12094_vm8, %v12089_v60 }
 0xb42   :  { %v12021_v0 = vpop.permute.xlu0 %12020  ;;  %v12023_v45 = vpop.permute.xlu1 %12022 }
 0xb43   :  { %v12090_v19 = vsel %vm12077_vm7, %v16337_v32, %v12021_v0  ;;  %v12091_v47 = vsel %vm12077_vm7, %v12074_v51, %v12023_v45 }
 0xb44   :  { %12107 = vst.msk [vmem:[%s16498_s8 + $0x18] sm:$0x3] %vm12094_vm8, %v12090_v19  ;;  %12108 = vst.msk [vmem:[%s16498_s8 + $0x1a] sm:$0x3] %vm12094_vm8, %v12091_v47 }
 0xb6b   :  { %v12025_v32 = vpop.permute.xlu0 %12024 }
 0xb6c   :  { %v12092_v49 = vsel %vm12077_vm7, %v12075_v10, %v12025_v32 }
 0xb6d   :  { %12109 = vst.msk [vmem:[%s16498_s8 + $0x1c] sm:$0x3] %vm12094_vm8, %v12092_v49 }
 0xb76   :  { %v12027_v62 = vpop.permute.xlu1 %12026 }
 0xb77   :  { %v12093_v50 = vsel %vm12077_vm7, %v12076_v58, %v12027_v62 }
 0xb78   :  { %12110 = vst.msk [vmem:[%s16498_s8 + $0x1e] sm:$0x3] %vm12094_vm8, %v12093_v50 }

</bundles_post_ra>
